<compile_context>
chip_gen: v7x
topology: tpu7x:2x2x1
jax: 0.10.0
libtpu: 0.0.40
codegen_flags: <defaults>
</compile_context>

<pallas_src>
import functools

import jax
import jax.numpy as jnp
from jax.experimental import pallas as pl
from jax.experimental.pallas import tpu as pltpu


# ----------------------------------------------------------------------------
# Fused 3x3x3 conv + folded BN + optional ReLU (tap-accumulating kernel)
# ----------------------------------------------------------------------------
def _conv3x3_kernel(*refs, n_in, stride, Ho, Wo, relu):
    """refs = x_refs[0..n_in-1], w_refs[0..n_in-1], scale, shift, o_ref, acc_ref.

    Grid: (batch, out_depth, depth_tap).  Each step accumulates the 9 in-plane
    taps of one depth tap (for every input tensor) into acc_ref (f32, VMEM).
    """
    x_refs = refs[:n_in]
    w_refs = refs[n_in:2 * n_in]
    scale_ref = refs[2 * n_in]
    shift_ref = refs[2 * n_in + 1]
    o_ref = refs[2 * n_in + 2]
    acc_ref = refs[2 * n_in + 3]

    a = pl.program_id(2)                      # depth tap index (0, 1, 2)

    @pl.when(a == 0)
    def _init():
        acc_ref[...] = jnp.zeros_like(acc_ref)

    s = stride
    part = jnp.zeros(acc_ref.shape, jnp.float32)
    for idx in range(n_in):                   # split-K over multiple inputs
        x_ref = x_refs[idx]
        w_ref = w_refs[idx]
        cin = x_ref.shape[-1]
        for b in range(3):
            for c in range(3):
                # For stride 2 the wrapper pre-splits H/W by parity, so every
                # tap is a plain unit-stride static slice of the VMEM block.
                phase = (b % s) * s + (c % s)
                slab = x_ref[0, phase,
                             b // s: b // s + Ho,
                             c // s: c // s + Wo, :]          # (Ho, Wo, cin) bf16
                slab = slab.reshape(Ho * Wo, cin)
                tap = b * 3 + c
                wt = w_ref[0, tap * cin:(tap + 1) * cin, :]   # (cin, cout) bf16
                part = part + jnp.dot(slab, wt,
                                      preferred_element_type=jnp.float32)
    acc_ref[...] += part

    @pl.when(a == pl.num_programs(2) - 1)
    def _finalize():
        out = acc_ref[...] * scale_ref[...] + shift_ref[...]   # f32 epilogue
        if relu:
            out = jnp.maximum(out, 0.0)
        o_ref[...] = out.reshape(o_ref.shape).astype(o_ref.dtype)


def conv3x3_bn_act(xs, ws, scale, shift, *, stride=1, relu=True,
                   out_dtype=jnp.bfloat16):
    """Fused 3x3x3 conv (pad=1, stride 1 or 2) + per-channel scale/shift + ReLU.

    xs: list of NDHWC inputs sharing spatial shape (channel-split K reduction,
        used to implement the skip-connection concat without materializing it).
    ws: matching list of weights, each (3, 3, 3, cin_i, cout).
    """
    n, D, H, W, _ = xs[0].shape
    cout = ws[0].shape[-1]
    s = stride
    Do = (D - 1) // s + 1
    Ho = (H - 1) // s + 1
    Wo = (W - 1) // s + 1
    Dp = D + 2

    xqs, wqs, x_specs, w_specs = [], [], [], []
    for x, w in zip(xs, ws):
        assert x.shape[:4] == (n, D, H, W)
        cin = x.shape[-1]
        xp = jnp.pad(x.astype(jnp.bfloat16),
                     ((0, 0), (1, 1), (1, 1), (1, 1), (0, 0)))
        Hp, Wp = H + 2, W + 2
        if s == 1:
            Hps, Wps = Hp, Wp
            xq = xp.reshape(n * Dp, 1, Hps, Wps, cin)
        else:
            # Parity rearrangement so the kernel only needs unit-stride slices.
            assert s == 2 and H % 2 == 0 and W % 2 == 0, "stride-2 needs even H,W"
            Hps, Wps = Hp // 2, Wp // 2
            xq = xp.reshape(n, Dp, Hps, 2, Wps, 2, cin)
            xq = xq.transpose(0, 1, 3, 5, 2, 4, 6)
            xq = xq.reshape(n * Dp, s * s, Hps, Wps, cin)
        xqs.append(xq)
        # Block = one padded depth plane (all parities); depth tap via index_map.
        x_specs.append(pl.BlockSpec(
            (1, s * s, Hps, Wps, cin),
            lambda i, d, a, s=s, Dp=Dp: (i * Dp + s * d + a, 0, 0, 0, 0)))
        # Weight laid out (depth_tap, (b, c, cin), cout); one tap slab per step.
        wq = w.reshape(3, 9 * cin, cout).astype(jnp.bfloat16)
        wqs.append(wq)
        w_specs.append(pl.BlockSpec((1, 9 * cin, cout),
                                    lambda i, d, a: (a, 0, 0)))

    scale_spec = pl.BlockSpec((1, cout), lambda i, d, a: (0, 0))
    shift_spec = pl.BlockSpec((1, cout), lambda i, d, a: (0, 0))

    kernel = functools.partial(_conv3x3_kernel, n_in=len(xs), stride=s,
                               Ho=Ho, Wo=Wo, relu=relu)
    out = pl.pallas_call(
        kernel,
        out_shape=jax.ShapeDtypeStruct((n * Do, Ho, Wo, cout), out_dtype),
        grid=(n, Do, 3),
        in_specs=x_specs + w_specs + [scale_spec, shift_spec],
        out_specs=pl.BlockSpec((1, Ho, Wo, cout),
                               lambda i, d, a, Do=Do: (i * Do + d, 0, 0, 0)),
        scratch_shapes=[pltpu.VMEM((Ho * Wo, cout), jnp.float32)],
        compiler_params=pltpu.CompilerParams(
            dimension_semantics=("parallel", "parallel", "arbitrary")),
    )(*xqs, *wqs,
      scale.reshape(1, cout).astype(jnp.float32),
      shift.reshape(1, cout).astype(jnp.float32))
    return out.reshape(n, Do, Ho, Wo, cout)


# ----------------------------------------------------------------------------
# Per-voxel channel matmul kernel (ConvTranspose3d k=2,s=2 and 1x1x1 outconv)
# ----------------------------------------------------------------------------
def _rowmm_kernel(x_ref, w_ref, b_ref, o_ref):
    M = x_ref.shape[1] * x_ref.shape[2]
    cin = x_ref.shape[3]
    x = x_ref[...].reshape(M, cin)
    y = jnp.dot(x, w_ref[...], preferred_element_type=jnp.float32) + b_ref[...]
    o_ref[...] = y.reshape(o_ref.shape).astype(o_ref.dtype)


def rowwise_matmul(x, w, b, *, out_dtype):
    """out[n,d,h,w,:] = x[n,d,h,w,:] @ w + b  (x: NDHWC, w: (Cin, Nout))."""
    n, D, H, W, cin = x.shape
    nout = w.shape[-1]
    xf = x.reshape(n * D, H, W, cin).astype(jnp.bfloat16)
    out = pl.pallas_call(
        _rowmm_kernel,
        out_shape=jax.ShapeDtypeStruct((n * D, H, W, nout), out_dtype),
        grid=(n * D,),
        in_specs=[pl.BlockSpec((1, H, W, cin), lambda i: (i, 0, 0, 0)),
                  pl.BlockSpec((cin, nout), lambda i: (0, 0)),
                  pl.BlockSpec((1, nout), lambda i: (0, 0))],
        out_specs=pl.BlockSpec((1, H, W, nout), lambda i: (i, 0, 0, 0)),
        compiler_params=pltpu.CompilerParams(dimension_semantics=("parallel",)),
    )(xf, w.astype(jnp.bfloat16), b.reshape(1, nout).astype(jnp.float32))
    return out.reshape(n, D, H, W, nout)


def conv_transpose3d_x2(x, w, b):
    """ConvTranspose3d, kernel_size=2, stride=2 (pure x2 upsampling case).

    x: (N, D, H, W, Cin)   w: (Cin, 2, 2, 2, Cout)   b: (Cout,)
    NOTE: weight layout is channels-last style, NOT PyTorch's (Cin,Cout,kd,kh,kw).
    """
    n, D, H, W, cin = x.shape
    cout = w.shape[-1]
    wm = w.reshape(cin, 8 * cout)                 # columns ordered (pa,pb,pc,cout)
    y = rowwise_matmul(x, wm, jnp.tile(b, 8), out_dtype=jnp.bfloat16)
    # Interleave the 2x2x2 phase factors into the spatial dims.  Pure glue;
    # XLA fuses this with the zero-pad done by the consuming conv, so the
    # upsampled volume is materialized only once in HBM.
    y = y.reshape(n, D, H, W, 2, 2, 2, cout)
    y = y.transpose(0, 1, 4, 2, 5, 3, 6, 7)
    return y.reshape(n, 2 * D, 2 * H, 2 * W, cout)


def conv3d_1x1(x, w, b):
    """outconv: 1x1x1 conv, no BN, no activation, f32 output."""
    return rowwise_matmul(x, w, b, out_dtype=jnp.float32)


# ----------------------------------------------------------------------------
# Deterministic parameter initialization (synthetic; no checkpoint loading)
# ----------------------------------------------------------------------------
_BN_EPS = 1e-5


def _fold_bn(bias, cout):
    gamma = jnp.ones((cout,), jnp.float32)
    beta = jnp.zeros((cout,), jnp.float32)
    mean = jnp.zeros((cout,), jnp.float32)
    var = jnp.ones((cout,), jnp.float32)
    scale = gamma / jnp.sqrt(var + _BN_EPS)
    shift = (bias - mean) * scale + beta
    return scale, shift


def _conv_block_params(key, cins, cout):
    """Conv3d(sum(cins)->cout, 3, pad=1) + eval-BN + ReLU, weight split per input.

    For the decoder ("up") blocks the split (upsampled, skip) corresponds to
    cat([upsampled, skip], dim=1) followed by a single conv in the reference.
    """
    n_in = len(cins)
    keys = jax.random.split(key, n_in + 1)
    fan_in = sum(cins) * 27
    bound = float(1.0 / (fan_in ** 0.5))
    ws = [jax.random.uniform(keys[i], (3, 3, 3, cins[i], cout), jnp.float32,
                             -bound, bound) for i in range(n_in)]
    bias = jax.random.uniform(keys[-1], (cout,), jnp.float32, -bound, bound)
    scale, shift = _fold_bn(bias, cout)
    return dict(ws=ws, scale=scale, shift=shift)


def _tconv_params(key, cin, cout):
    kw_, kb_ = jax.random.split(key)
    fan_in = cin * 8
    bound = float(1.0 / (fan_in ** 0.5))
    w = jax.random.uniform(kw_, (cin, 2, 2, 2, cout), jnp.float32, -bound, bound)
    b = jax.random.uniform(kb_, (cout,), jnp.float32, -bound, bound)
    return dict(w=w, b=b)


def _outconv_params(key, cin, cout):
    kw_, kb_ = jax.random.split(key)
    bound = float(1.0 / (cin ** 0.5))
    w = jax.random.uniform(kw_, (cin, cout), jnp.float32, -bound, bound)
    b = jax.random.uniform(kb_, (cout,), jnp.float32, -bound, bound)
    return dict(w=w, b=b)


def init_unet3d_params(key, n_channels, n_classes):
    ks = jax.random.split(key, 9)
    return {
        "inc":   _conv_block_params(ks[0], (n_channels,), 32),
        "down0": _conv_block_params(ks[1], (32,), 32),
        "down1": _conv_block_params(ks[2], (32,), 64),
        "down2": _conv_block_params(ks[3], (64,), 128),
        "up0_t": _tconv_params(ks[4], 128, 64),
        "up0_c": _conv_block_params(ks[5], (64, 64), 64),    # [upsampled, skip]
        "up1_t": _tconv_params(ks[6], 64, 32),
        "up1_c": _conv_block_params(ks[7], (32, 32), 32),    # [upsampled, skip]
        "outc":  _outconv_params(ks[8], 32, n_classes),
    }


# ----------------------------------------------------------------------------
# UNet3D forward
# ----------------------------------------------------------------------------
def unet3d_forward(params, x_ncdhw):
    # PyTorch NCDHW -> NDHWC; activations travel between kernels in bf16.
    x = jnp.transpose(x_ncdhw, (0, 2, 3, 4, 1)).astype(jnp.bfloat16)
    p = params

    x0 = conv3x3_bn_act([x],  p["inc"]["ws"],   p["inc"]["scale"],
                        p["inc"]["shift"],   stride=1)                 # inc
    x1 = conv3x3_bn_act([x0], p["down0"]["ws"], p["down0"]["scale"],
                        p["down0"]["shift"], stride=1)                 # down0
    x2 = conv3x3_bn_act([x1], p["down1"]["ws"], p["down1"]["scale"],
                        p["down1"]["shift"], stride=2)                 # down1
    x3 = conv3x3_bn_act([x2], p["down2"]["ws"], p["down2"]["scale"],
                        p["down2"]["shift"], stride=2)                 # down2

    u0 = conv_transpose3d_x2(x3, p["up0_t"]["w"], p["up0_t"]["b"])
    # Skip connection as a split-K reduction inside the conv kernel — no HBM
    # concatenate.  Channel order matches cat([upsampled, skip], dim=1).
    x4 = conv3x3_bn_act([u0, x2], p["up0_c"]["ws"], p["up0_c"]["scale"],
                        p["up0_c"]["shift"], stride=1)                 # up0

    u1 = conv_transpose3d_x2(x4, p["up1_t"]["w"], p["up1_t"]["b"])
    x5 = conv3x3_bn_act([u1, x1], p["up1_c"]["ws"], p["up1_c"]["scale"],
                        p["up1_c"]["shift"], stride=1)                 # up1

    x6 = conv3d_1x1(x5, p["outc"]["w"], p["outc"]["b"])                # outc

    # NDHWC -> NCDHW to match the PyTorch output convention
    return jnp.transpose(x6, (0, 4, 1, 2, 3))


if __name__ == "__main__":
    key = jax.random.PRNGKey(0)
    pkey, xkey = jax.random.split(key)

    n_channels, n_classes = 2, 3
    N, D, H, W = 1, 8, 8, 8

    params = init_unet3d_params(pkey, n_channels, n_classes)
    x = jax.random.normal(xkey, (N, n_channels, D, H, W), jnp.float32)

    fwd = jax.jit(unet3d_forward)
    out = jax.block_until_ready(fwd(params, x))

    assert out.shape == (N, n_classes, D, H, W), out.shape
    assert out.dtype == jnp.float32
    assert bool(jnp.all(jnp.isfinite(out)))
    print("KERNEL_OK")
</pallas_src>

<mosaic_0001>
module attributes {stable_mosaic.version = 11 : i64} {
  func.func @_conv3x3_kernel(%arg0: i32, %arg1: i32, %arg2: i32, %arg3: memref<1x1x10x10x2xbf16, #tpu.memory_space<vmem>>, %arg4: memref<1x18x32xbf16, #tpu.memory_space<vmem>>, %arg5: memref<1x32xf32, #tpu.memory_space<vmem>>, %arg6: memref<1x32xf32, #tpu.memory_space<vmem>>, %arg7: memref<1x8x8x32xbf16, #tpu.memory_space<vmem>>, %arg8: memref<64x32xf32, #tpu.memory_space<vmem>>) attributes {dimension_semantics = [#tpu.dimension_semantics<parallel>, #tpu.dimension_semantics<parallel>, #tpu.dimension_semantics<arbitrary>], iteration_bounds = array<i64: 1, 8, 3>, scalar_prefetch = 0 : i64, scratch_operands = 1 : i64, tpu.core_type = #tpu.core_type<tc>, window_params = [{transform_indices = @transform_0, window_bounds = array<i64: 1, 1, 10, 10, 2>}, {transform_indices = @transform_1, window_bounds = array<i64: 1, 18, 32>}, {pipeline_mode = #tpu.pipeline_mode<synchronous>, transform_indices = @transform_2, window_bounds = array<i64: 1, 32>}, {pipeline_mode = #tpu.pipeline_mode<synchronous>, transform_indices = @transform_3, window_bounds = array<i64: 1, 32>}, {transform_indices = @transform_4, window_bounds = array<i64: 1, 8, 8, 32>}]} {
    %c0_i32 = arith.constant 0 : i32
    %0 = arith.cmpi eq, %arg2, %c0_i32 : i32
    %1 = arith.extui %0 : i1 to i32
    %c0_i32_0 = arith.constant 0 : i32
    %2 = arith.cmpi ne, %1, %c0_i32_0 : i32
    scf.if %2 {
      %cst_77 = arith.constant 0.000000e+00 : f32
      %73 = vector.broadcast %cst_77 : f32 to vector<64x32xf32>
      %c0_78 = arith.constant 0 : index
      %c0_79 = arith.constant 0 : index
      %74 = vector.load %arg8[%c0_78, %c0_79] : memref<64x32xf32, #tpu.memory_space<vmem>>, vector<64x32xf32>
      tpu.vector_store %arg8[%c0_78, %c0_79], %73 {strides = array<i32>} : memref<64x32xf32, #tpu.memory_space<vmem>>, vector<64x32xf32>,
    } else {
    }
    %cst = arith.constant 0.000000e+00 : f32
    %3 = vector.broadcast %cst : f32 to vector<64x32xf32>
    %c0 = arith.constant 0 : index
    %c0_1 = arith.constant 0 : index
    %c0_2 = arith.constant 0 : index
    %c0_3 = arith.constant 0 : index
    %c0_4 = arith.constant 0 : index
    %4 = vector.load %arg3[%c0, %c0_1, %c0_2, %c0_3, %c0_4] : memref<1x1x10x10x2xbf16, #tpu.memory_space<vmem>>, vector<1x1x8x8x2xbf16>
    %5 = vector.shape_cast %4 : vector<1x1x8x8x2xbf16> to vector<8x8x2xbf16>
    %6 = vector.shape_cast %5 : vector<8x8x2xbf16> to vector<64x2xbf16>
    %c0_5 = arith.constant 0 : index
    %c0_6 = arith.constant 0 : index
    %c0_7 = arith.constant 0 : index
    %7 = vector.load %arg4[%c0_5, %c0_6, %c0_7] : memref<1x18x32xbf16, #tpu.memory_space<vmem>>, vector<1x2x32xbf16>
    %8 = vector.shape_cast %7 : vector<1x2x32xbf16> to vector<2x32xbf16>
    %cst_8 = arith.constant dense<0.000000e+00> : vector<64x32xf32>
    %9 = tpu.matmul %6, %8, %cst_8 {dimension_numbers = #tpu.dot_dimension_numbers<[1], [0], [0], [1], [0, 0, 1, 1], [], []>} : vector<64x2xbf16>, vector<2x32xbf16>, vector<64x32xf32> -> vector<64x32xf32>
    %10 = arith.addf %3, %9 : vector<64x32xf32>
    %c0_9 = arith.constant 0 : index
    %c0_10 = arith.constant 0 : index
    %c0_11 = arith.constant 0 : index
    %c1 = arith.constant 1 : index
    %c0_12 = arith.constant 0 : index
    %11 = vector.load %arg3[%c0_9, %c0_10, %c0_11, %c1, %c0_12] : memref<1x1x10x10x2xbf16, #tpu.memory_space<vmem>>, vector<1x1x8x8x2xbf16>
    %12 = vector.shape_cast %11 : vector<1x1x8x8x2xbf16> to vector<8x8x2xbf16>
    %13 = vector.shape_cast %12 : vector<8x8x2xbf16> to vector<64x2xbf16>
    %c0_13 = arith.constant 0 : index
    %c2 = arith.constant 2 : index
    %c0_14 = arith.constant 0 : index
    %14 = vector.load %arg4[%c0_13, %c2, %c0_14] : memref<1x18x32xbf16, #tpu.memory_space<vmem>>, vector<1x2x32xbf16>
    %15 = vector.shape_cast %14 : vector<1x2x32xbf16> to vector<2x32xbf16>
    %cst_15 = arith.constant dense<0.000000e+00> : vector<64x32xf32>
    %16 = tpu.matmul %13, %15, %cst_15 {dimension_numbers = #tpu.dot_dimension_numbers<[1], [0], [0], [1], [0, 0, 1, 1], [], []>} : vector<64x2xbf16>, vector<2x32xbf16>, vector<64x32xf32> -> vector<64x32xf32>
    %17 = arith.addf %10, %16 : vector<64x32xf32>
    %c0_16 = arith.constant 0 : index
    %c0_17 = arith.constant 0 : index
    %c0_18 = arith.constant 0 : index
    %c2_19 = arith.constant 2 : index
    %c0_20 = arith.constant 0 : index
    %18 = vector.load %arg3[%c0_16, %c0_17, %c0_18, %c2_19, %c0_20] : memref<1x1x10x10x2xbf16, #tpu.memory_space<vmem>>, vector<1x1x8x8x2xbf16>
    %19 = vector.shape_cast %18 : vector<1x1x8x8x2xbf16> to vector<8x8x2xbf16>
    %20 = vector.shape_cast %19 : vector<8x8x2xbf16> to vector<64x2xbf16>
    %c0_21 = arith.constant 0 : index
    %c4 = arith.constant 4 : index
    %c0_22 = arith.constant 0 : index
    %21 = vector.load %arg4[%c0_21, %c4, %c0_22] : memref<1x18x32xbf16, #tpu.memory_space<vmem>>, vector<1x2x32xbf16>
    %22 = vector.shape_cast %21 : vector<1x2x32xbf16> to vector<2x32xbf16>
    %cst_23 = arith.constant dense<0.000000e+00> : vector<64x32xf32>
    %23 = tpu.matmul %20, %22, %cst_23 {dimension_numbers = #tpu.dot_dimension_numbers<[1], [0], [0], [1], [0, 0, 1, 1], [], []>} : vector<64x2xbf16>, vector<2x32xbf16>, vector<64x32xf32> -> vector<64x32xf32>
    %24 = arith.addf %17, %23 : vector<64x32xf32>
    %c0_24 = arith.constant 0 : index
    %c0_25 = arith.constant 0 : index
    %c1_26 = arith.constant 1 : index
    %c0_27 = arith.constant 0 : index
    %c0_28 = arith.constant 0 : index
    %25 = vector.load %arg3[%c0_24, %c0_25, %c1_26, %c0_27, %c0_28] : memref<1x1x10x10x2xbf16, #tpu.memory_space<vmem>>, vector<1x1x8x8x2xbf16>
    %26 = vector.shape_cast %25 : vector<1x1x8x8x2xbf16> to vector<8x8x2xbf16>
    %27 = vector.shape_cast %26 : vector<8x8x2xbf16> to vector<64x2xbf16>
    %c0_29 = arith.constant 0 : index
    %c6 = arith.constant 6 : index
    %c0_30 = arith.constant 0 : index
    %28 = vector.load %arg4[%c0_29, %c6, %c0_30] : memref<1x18x32xbf16, #tpu.memory_space<vmem>>, vector<1x2x32xbf16>
    %29 = vector.shape_cast %28 : vector<1x2x32xbf16> to vector<2x32xbf16>
    %cst_31 = arith.constant dense<0.000000e+00> : vector<64x32xf32>
    %30 = tpu.matmul %27, %29, %cst_31 {dimension_numbers = #tpu.dot_dimension_numbers<[1], [0], [0], [1], [0, 0, 1, 1], [], []>} : vector<64x2xbf16>, vector<2x32xbf16>, vector<64x32xf32> -> vector<64x32xf32>
    %31 = arith.addf %24, %30 : vector<64x32xf32>
    %c0_32 = arith.constant 0 : index
    %c0_33 = arith.constant 0 : index
    %c1_34 = arith.constant 1 : index
    %c1_35 = arith.constant 1 : index
    %c0_36 = arith.constant 0 : index
    %32 = vector.load %arg3[%c0_32, %c0_33, %c1_34, %c1_35, %c0_36] : memref<1x1x10x10x2xbf16, #tpu.memory_space<vmem>>, vector<1x1x8x8x2xbf16>
    %33 = vector.shape_cast %32 : vector<1x1x8x8x2xbf16> to vector<8x8x2xbf16>
    %34 = vector.shape_cast %33 : vector<8x8x2xbf16> to vector<64x2xbf16>
    %c0_37 = arith.constant 0 : index
    %c8 = arith.constant 8 : index
    %c0_38 = arith.constant 0 : index
    %35 = vector.load %arg4[%c0_37, %c8, %c0_38] : memref<1x18x32xbf16, #tpu.memory_space<vmem>>, vector<1x2x32xbf16>
    %36 = vector.shape_cast %35 : vector<1x2x32xbf16> to vector<2x32xbf16>
    %cst_39 = arith.constant dense<0.000000e+00> : vector<64x32xf32>
    %37 = tpu.matmul %34, %36, %cst_39 {dimension_numbers = #tpu.dot_dimension_numbers<[1], [0], [0], [1], [0, 0, 1, 1], [], []>} : vector<64x2xbf16>, vector<2x32xbf16>, vector<64x32xf32> -> vector<64x32xf32>
    %38 = arith.addf %31, %37 : vector<64x32xf32>
    %c0_40 = arith.constant 0 : index
    %c0_41 = arith.constant 0 : index
    %c1_42 = arith.constant 1 : index
    %c2_43 = arith.constant 2 : index
    %c0_44 = arith.constant 0 : index
    %39 = vector.load %arg3[%c0_40, %c0_41, %c1_42, %c2_43, %c0_44] : memref<1x1x10x10x2xbf16, #tpu.memory_space<vmem>>, vector<1x1x8x8x2xbf16>
    %40 = vector.shape_cast %39 : vector<1x1x8x8x2xbf16> to vector<8x8x2xbf16>
    %41 = vector.shape_cast %40 : vector<8x8x2xbf16> to vector<64x2xbf16>
    %c0_45 = arith.constant 0 : index
    %c10 = arith.constant 10 : index
    %c0_46 = arith.constant 0 : index
    %42 = vector.load %arg4[%c0_45, %c10, %c0_46] : memref<1x18x32xbf16, #tpu.memory_space<vmem>>, vector<1x2x32xbf16>
    %43 = vector.shape_cast %42 : vector<1x2x32xbf16> to vector<2x32xbf16>
    %cst_47 = arith.constant dense<0.000000e+00> : vector<64x32xf32>
    %44 = tpu.matmul %41, %43, %cst_47 {dimension_numbers = #tpu.dot_dimension_numbers<[1], [0], [0], [1], [0, 0, 1, 1], [], []>} : vector<64x2xbf16>, vector<2x32xbf16>, vector<64x32xf32> -> vector<64x32xf32>
    %45 = arith.addf %38, %44 : vector<64x32xf32>
    %c0_48 = arith.constant 0 : index
    %c0_49 = arith.constant 0 : index
    %c2_50 = arith.constant 2 : index
    %c0_51 = arith.constant 0 : index
    %c0_52 = arith.constant 0 : index
    %46 = vector.load %arg3[%c0_48, %c0_49, %c2_50, %c0_51, %c0_52] : memref<1x1x10x10x2xbf16, #tpu.memory_space<vmem>>, vector<1x1x8x8x2xbf16>
    %47 = vector.shape_cast %46 : vector<1x1x8x8x2xbf16> to vector<8x8x2xbf16>
    %48 = vector.shape_cast %47 : vector<8x8x2xbf16> to vector<64x2xbf16>
    %c0_53 = arith.constant 0 : index
    %c12 = arith.constant 12 : index
    %c0_54 = arith.constant 0 : index
    %49 = vector.load %arg4[%c0_53, %c12, %c0_54] : memref<1x18x32xbf16, #tpu.memory_space<vmem>>, vector<1x2x32xbf16>
    %50 = vector.shape_cast %49 : vector<1x2x32xbf16> to vector<2x32xbf16>
    %cst_55 = arith.constant dense<0.000000e+00> : vector<64x32xf32>
    %51 = tpu.matmul %48, %50, %cst_55 {dimension_numbers = #tpu.dot_dimension_numbers<[1], [0], [0], [1], [0, 0, 1, 1], [], []>} : vector<64x2xbf16>, vector<2x32xbf16>, vector<64x32xf32> -> vector<64x32xf32>
    %52 = arith.addf %45, %51 : vector<64x32xf32>
    %c0_56 = arith.constant 0 : index
    %c0_57 = arith.constant 0 : index
    %c2_58 = arith.constant 2 : index
    %c1_59 = arith.constant 1 : index
    %c0_60 = arith.constant 0 : index
    %53 = vector.load %arg3[%c0_56, %c0_57, %c2_58, %c1_59, %c0_60] : memref<1x1x10x10x2xbf16, #tpu.memory_space<vmem>>, vector<1x1x8x8x2xbf16>
    %54 = vector.shape_cast %53 : vector<1x1x8x8x2xbf16> to vector<8x8x2xbf16>
    %55 = vector.shape_cast %54 : vector<8x8x2xbf16> to vector<64x2xbf16>
    %c0_61 = arith.constant 0 : index
    %c14 = arith.constant 14 : index
    %c0_62 = arith.constant 0 : index
    %56 = vector.load %arg4[%c0_61, %c14, %c0_62] : memref<1x18x32xbf16, #tpu.memory_space<vmem>>, vector<1x2x32xbf16>
    %57 = vector.shape_cast %56 : vector<1x2x32xbf16> to vector<2x32xbf16>
    %cst_63 = arith.constant dense<0.000000e+00> : vector<64x32xf32>
    %58 = tpu.matmul %55, %57, %cst_63 {dimension_numbers = #tpu.dot_dimension_numbers<[1], [0], [0], [1], [0, 0, 1, 1], [], []>} : vector<64x2xbf16>, vector<2x32xbf16>, vector<64x32xf32> -> vector<64x32xf32>
    %59 = arith.addf %52, %58 : vector<64x32xf32>
    %c0_64 = arith.constant 0 : index
    %c0_65 = arith.constant 0 : index
    %c2_66 = arith.constant 2 : index
    %c2_67 = arith.constant 2 : index
    %c0_68 = arith.constant 0 : index
    %60 = vector.load %arg3[%c0_64, %c0_65, %c2_66, %c2_67, %c0_68] : memref<1x1x10x10x2xbf16, #tpu.memory_space<vmem>>, vector<1x1x8x8x2xbf16>
    %61 = vector.shape_cast %60 : vector<1x1x8x8x2xbf16> to vector<8x8x2xbf16>
    %62 = vector.shape_cast %61 : vector<8x8x2xbf16> to vector<64x2xbf16>
    %c0_69 = arith.constant 0 : index
    %c16 = arith.constant 16 : index
    %c0_70 = arith.constant 0 : index
    %63 = vector.load %arg4[%c0_69, %c16, %c0_70] : memref<1x18x32xbf16, #tpu.memory_space<vmem>>, vector<1x2x32xbf16>
    %64 = vector.shape_cast %63 : vector<1x2x32xbf16> to vector<2x32xbf16>
    %cst_71 = arith.constant dense<0.000000e+00> : vector<64x32xf32>
    %65 = tpu.matmul %62, %64, %cst_71 {dimension_numbers = #tpu.dot_dimension_numbers<[1], [0], [0], [1], [0, 0, 1, 1], [], []>} : vector<64x2xbf16>, vector<2x32xbf16>, vector<64x32xf32> -> vector<64x32xf32>
    %66 = arith.addf %59, %65 : vector<64x32xf32>
    %c0_72 = arith.constant 0 : index
    %c0_73 = arith.constant 0 : index
    %67 = vector.load %arg8[%c0_72, %c0_73] : memref<64x32xf32, #tpu.memory_space<vmem>>, vector<64x32xf32>
    %68 = arith.addf %67, %66 : vector<64x32xf32>
    %c0_74 = arith.constant 0 : index
    %c0_75 = arith.constant 0 : index
    %69 = vector.load %arg8[%c0_74, %c0_75] : memref<64x32xf32, #tpu.memory_space<vmem>>, vector<64x32xf32>
    tpu.vector_store %arg8[%c0_74, %c0_75], %68 {strides = array<i32>} : memref<64x32xf32, #tpu.memory_space<vmem>>, vector<64x32xf32>,
    %c2_i32 = arith.constant 2 : i32
    %70 = arith.cmpi eq, %arg2, %c2_i32 : i32
    %71 = arith.extui %70 : i1 to i32
    %c0_i32_76 = arith.constant 0 : i32
    %72 = arith.cmpi ne, %71, %c0_i32_76 : i32
    scf.if %72 {
      %c0_77 = arith.constant 0 : index
      %c0_78 = arith.constant 0 : index
      %73 = vector.load %arg8[%c0_77, %c0_78] : memref<64x32xf32, #tpu.memory_space<vmem>>, vector<64x32xf32>
      %c0_79 = arith.constant 0 : index
      %c0_80 = arith.constant 0 : index
      %74 = vector.load %arg5[%c0_79, %c0_80] : memref<1x32xf32, #tpu.memory_space<vmem>>, vector<1x32xf32>
      %75 = vector.broadcast %74 : vector<1x32xf32> to vector<64x32xf32>
      %76 = arith.mulf %73, %75 : vector<64x32xf32>
      %c0_81 = arith.constant 0 : index
      %c0_82 = arith.constant 0 : index
      %77 = vector.load %arg6[%c0_81, %c0_82] : memref<1x32xf32, #tpu.memory_space<vmem>>, vector<1x32xf32>
      %78 = vector.broadcast %77 : vector<1x32xf32> to vector<64x32xf32>
      %79 = arith.addf %76, %78 : vector<64x32xf32>
      %cst_83 = arith.constant 0.000000e+00 : f32
      %80 = vector.broadcast %cst_83 : f32 to vector<64x32xf32>
      %81 = arith.maximumf %79, %80 : vector<64x32xf32>
      %82 = vector.shape_cast %81 : vector<64x32xf32> to vector<1x8x8x32xf32>
      %83 = arith.truncf %82 : vector<1x8x8x32xf32> to vector<1x8x8x32xbf16>
      %c0_84 = arith.constant 0 : index
      %c0_85 = arith.constant 0 : index
      %c0_86 = arith.constant 0 : index
      %c0_87 = arith.constant 0 : index
      %84 = vector.load %arg7[%c0_84, %c0_85, %c0_86, %c0_87] : memref<1x8x8x32xbf16, #tpu.memory_space<vmem>>, vector<1x8x8x32xbf16>
      tpu.vector_store %arg7[%c0_84, %c0_85, %c0_86, %c0_87], %83 {strides = array<i32>} : memref<1x8x8x32xbf16, #tpu.memory_space<vmem>>, vector<1x8x8x32xbf16>,
    } else {
    }
    return
  }
  func.func @transform_0(%arg0: i32, %arg1: i32, %arg2: i32) -> (i32, i32, i32, i32, i32) {
    %c10_i32 = arith.constant 10 : i32
    %0 = arith.muli %arg0, %c10_i32 : i32
    %c1_i32 = arith.constant 1 : i32
    %1 = arith.muli %c1_i32, %arg1 : i32
    %2 = arith.addi %0, %1 : i32
    %3 = arith.addi %2, %arg2 : i32
    %c0_i32 = arith.constant 0 : i32
    %c0_i32_0 = arith.constant 0 : i32
    %c0_i32_1 = arith.constant 0 : i32
    %c0_i32_2 = arith.constant 0 : i32
    %c0_i32_3 = arith.constant 0 : i32
    return %3, %c0_i32, %c0_i32_0, %c0_i32_1, %c0_i32_2 : i32, i32, i32, i32, i32
  }
  func.func @transform_1(%arg0: i32, %arg1: i32, %arg2: i32) -> (i32, i32, i32) {
    %c0_i32 = arith.constant 0 : i32
    %c0_i32_0 = arith.constant 0 : i32
    %c0_i32_1 = arith.constant 0 : i32
    return %arg2, %c0_i32, %c0_i32_0 : i32, i32, i32
  }
  func.func @transform_2(%arg0: i32, %arg1: i32, %arg2: i32) -> (i32, i32) {
    %c0_i32 = arith.constant 0 : i32
    %c0_i32_0 = arith.constant 0 : i32
    %c0_i32_1 = arith.constant 0 : i32
    return %c0_i32, %c0_i32_0 : i32, i32
  }
  func.func @transform_3(%arg0: i32, %arg1: i32, %arg2: i32) -> (i32, i32) {
    %c0_i32 = arith.constant 0 : i32
    %c0_i32_0 = arith.constant 0 : i32
    %c0_i32_1 = arith.constant 0 : i32
    return %c0_i32, %c0_i32_0 : i32, i32
  }
  func.func @transform_4(%arg0: i32, %arg1: i32, %arg2: i32) -> (i32, i32, i32, i32) {
    %c8_i32 = arith.constant 8 : i32
    %0 = arith.muli %arg0, %c8_i32 : i32
    %1 = arith.addi %0, %arg1 : i32
    %c0_i32 = arith.constant 0 : i32
    %c0_i32_0 = arith.constant 0 : i32
    %c0_i32_1 = arith.constant 0 : i32
    %c0_i32_2 = arith.constant 0 : i32
    return %1, %c0_i32, %c0_i32_0, %c0_i32_1 : i32, i32, i32, i32
  }
}

module attributes {stable_mosaic.version = 11 : i64} {
  func.func @_conv3x3_kernel(%arg0: i32, %arg1: i32, %arg2: i32, %arg3: memref<1x1x10x10x32xbf16, #tpu.memory_space<vmem>>, %arg4: memref<1x288x32xbf16, #tpu.memory_space<vmem>>, %arg5: memref<1x32xf32, #tpu.memory_space<vmem>>, %arg6: memref<1x32xf32, #tpu.memory_space<vmem>>, %arg7: memref<1x8x8x32xbf16, #tpu.memory_space<vmem>>, %arg8: memref<64x32xf32, #tpu.memory_space<vmem>>) attributes {dimension_semantics = [#tpu.dimension_semantics<parallel>, #tpu.dimension_semantics<parallel>, #tpu.dimension_semantics<arbitrary>], iteration_bounds = array<i64: 1, 8, 3>, scalar_prefetch = 0 : i64, scratch_operands = 1 : i64, tpu.core_type = #tpu.core_type<tc>, window_params = [{transform_indices = @transform_0, window_bounds = array<i64: 1, 1, 10, 10, 32>}, {transform_indices = @transform_1, window_bounds = array<i64: 1, 288, 32>}, {pipeline_mode = #tpu.pipeline_mode<synchronous>, transform_indices = @transform_2, window_bounds = array<i64: 1, 32>}, {pipeline_mode = #tpu.pipeline_mode<synchronous>, transform_indices = @transform_3, window_bounds = array<i64: 1, 32>}, {transform_indices = @transform_4, window_bounds = array<i64: 1, 8, 8, 32>}]} {
    %c0_i32 = arith.constant 0 : i32
    %0 = arith.cmpi eq, %arg2, %c0_i32 : i32
    %1 = arith.extui %0 : i1 to i32
    %c0_i32_0 = arith.constant 0 : i32
    %2 = arith.cmpi ne, %1, %c0_i32_0 : i32
    scf.if %2 {
      %cst_76 = arith.constant 0.000000e+00 : f32
      %73 = vector.broadcast %cst_76 : f32 to vector<64x32xf32>
      %c0_77 = arith.constant 0 : index
      %c0_78 = arith.constant 0 : index
      %74 = vector.load %arg8[%c0_77, %c0_78] : memref<64x32xf32, #tpu.memory_space<vmem>>, vector<64x32xf32>
      tpu.vector_store %arg8[%c0_77, %c0_78], %73 {strides = array<i32>} : memref<64x32xf32, #tpu.memory_space<vmem>>, vector<64x32xf32>,
    } else {
    }
    %cst = arith.constant 0.000000e+00 : f32
    %3 = vector.broadcast %cst : f32 to vector<64x32xf32>
    %c0 = arith.constant 0 : index
    %c0_1 = arith.constant 0 : index
    %c0_2 = arith.constant 0 : index
    %c0_3 = arith.constant 0 : index
    %c0_4 = arith.constant 0 : index
    %4 = vector.load %arg3[%c0, %c0_1, %c0_2, %c0_3, %c0_4] : memref<1x1x10x10x32xbf16, #tpu.memory_space<vmem>>, vector<1x1x8x8x32xbf16>
    %5 = vector.shape_cast %4 : vector<1x1x8x8x32xbf16> to vector<8x8x32xbf16>
    %6 = vector.shape_cast %5 : vector<8x8x32xbf16> to vector<64x32xbf16>
    %c0_5 = arith.constant 0 : index
    %c0_6 = arith.constant 0 : index
    %c0_7 = arith.constant 0 : index
    %7 = vector.load %arg4[%c0_5, %c0_6, %c0_7] : memref<1x288x32xbf16, #tpu.memory_space<vmem>>, vector<1x32x32xbf16>
    %8 = vector.shape_cast %7 : vector<1x32x32xbf16> to vector<32x32xbf16>
    %cst_8 = arith.constant dense<0.000000e+00> : vector<64x32xf32>
    %9 = tpu.matmul %6, %8, %cst_8 {dimension_numbers = #tpu.dot_dimension_numbers<[1], [0], [0], [1], [0, 0, 1, 1], [], []>} : vector<64x32xbf16>, vector<32x32xbf16>, vector<64x32xf32> -> vector<64x32xf32>
    %10 = arith.addf %3, %9 : vector<64x32xf32>
    %c0_9 = arith.constant 0 : index
    %c0_10 = arith.constant 0 : index
    %c0_11 = arith.constant 0 : index
    %c1 = arith.constant 1 : index
    %c0_12 = arith.constant 0 : index
    %11 = vector.load %arg3[%c0_9, %c0_10, %c0_11, %c1, %c0_12] : memref<1x1x10x10x32xbf16, #tpu.memory_space<vmem>>, vector<1x1x8x8x32xbf16>
    %12 = vector.shape_cast %11 : vector<1x1x8x8x32xbf16> to vector<8x8x32xbf16>
    %13 = vector.shape_cast %12 : vector<8x8x32xbf16> to vector<64x32xbf16>
    %c0_13 = arith.constant 0 : index
    %c32 = arith.constant 32 : index
    %c0_14 = arith.constant 0 : index
    %14 = vector.load %arg4[%c0_13, %c32, %c0_14] : memref<1x288x32xbf16, #tpu.memory_space<vmem>>, vector<1x32x32xbf16>
    %15 = vector.shape_cast %14 : vector<1x32x32xbf16> to vector<32x32xbf16>
    %cst_15 = arith.constant dense<0.000000e+00> : vector<64x32xf32>
    %16 = tpu.matmul %13, %15, %cst_15 {dimension_numbers = #tpu.dot_dimension_numbers<[1], [0], [0], [1], [0, 0, 1, 1], [], []>} : vector<64x32xbf16>, vector<32x32xbf16>, vector<64x32xf32> -> vector<64x32xf32>
    %17 = arith.addf %10, %16 : vector<64x32xf32>
    %c0_16 = arith.constant 0 : index
    %c0_17 = arith.constant 0 : index
    %c0_18 = arith.constant 0 : index
    %c2 = arith.constant 2 : index
    %c0_19 = arith.constant 0 : index
    %18 = vector.load %arg3[%c0_16, %c0_17, %c0_18, %c2, %c0_19] : memref<1x1x10x10x32xbf16, #tpu.memory_space<vmem>>, vector<1x1x8x8x32xbf16>
    %19 = vector.shape_cast %18 : vector<1x1x8x8x32xbf16> to vector<8x8x32xbf16>
    %20 = vector.shape_cast %19 : vector<8x8x32xbf16> to vector<64x32xbf16>
    %c0_20 = arith.constant 0 : index
    %c64 = arith.constant 64 : index
    %c0_21 = arith.constant 0 : index
    %21 = vector.load %arg4[%c0_20, %c64, %c0_21] : memref<1x288x32xbf16, #tpu.memory_space<vmem>>, vector<1x32x32xbf16>
    %22 = vector.shape_cast %21 : vector<1x32x32xbf16> to vector<32x32xbf16>
    %cst_22 = arith.constant dense<0.000000e+00> : vector<64x32xf32>
    %23 = tpu.matmul %20, %22, %cst_22 {dimension_numbers = #tpu.dot_dimension_numbers<[1], [0], [0], [1], [0, 0, 1, 1], [], []>} : vector<64x32xbf16>, vector<32x32xbf16>, vector<64x32xf32> -> vector<64x32xf32>
    %24 = arith.addf %17, %23 : vector<64x32xf32>
    %c0_23 = arith.constant 0 : index
    %c0_24 = arith.constant 0 : index
    %c1_25 = arith.constant 1 : index
    %c0_26 = arith.constant 0 : index
    %c0_27 = arith.constant 0 : index
    %25 = vector.load %arg3[%c0_23, %c0_24, %c1_25, %c0_26, %c0_27] : memref<1x1x10x10x32xbf16, #tpu.memory_space<vmem>>, vector<1x1x8x8x32xbf16>
    %26 = vector.shape_cast %25 : vector<1x1x8x8x32xbf16> to vector<8x8x32xbf16>
    %27 = vector.shape_cast %26 : vector<8x8x32xbf16> to vector<64x32xbf16>
    %c0_28 = arith.constant 0 : index
    %c96 = arith.constant 96 : index
    %c0_29 = arith.constant 0 : index
    %28 = vector.load %arg4[%c0_28, %c96, %c0_29] : memref<1x288x32xbf16, #tpu.memory_space<vmem>>, vector<1x32x32xbf16>
    %29 = vector.shape_cast %28 : vector<1x32x32xbf16> to vector<32x32xbf16>
    %cst_30 = arith.constant dense<0.000000e+00> : vector<64x32xf32>
    %30 = tpu.matmul %27, %29, %cst_30 {dimension_numbers = #tpu.dot_dimension_numbers<[1], [0], [0], [1], [0, 0, 1, 1], [], []>} : vector<64x32xbf16>, vector<32x32xbf16>, vector<64x32xf32> -> vector<64x32xf32>
    %31 = arith.addf %24, %30 : vector<64x32xf32>
    %c0_31 = arith.constant 0 : index
    %c0_32 = arith.constant 0 : index
    %c1_33 = arith.constant 1 : index
    %c1_34 = arith.constant 1 : index
    %c0_35 = arith.constant 0 : index
    %32 = vector.load %arg3[%c0_31, %c0_32, %c1_33, %c1_34, %c0_35] : memref<1x1x10x10x32xbf16, #tpu.memory_space<vmem>>, vector<1x1x8x8x32xbf16>
    %33 = vector.shape_cast %32 : vector<1x1x8x8x32xbf16> to vector<8x8x32xbf16>
    %34 = vector.shape_cast %33 : vector<8x8x32xbf16> to vector<64x32xbf16>
    %c0_36 = arith.constant 0 : index
    %c128 = arith.constant 128 : index
    %c0_37 = arith.constant 0 : index
    %35 = vector.load %arg4[%c0_36, %c128, %c0_37] : memref<1x288x32xbf16, #tpu.memory_space<vmem>>, vector<1x32x32xbf16>
    %36 = vector.shape_cast %35 : vector<1x32x32xbf16> to vector<32x32xbf16>
    %cst_38 = arith.constant dense<0.000000e+00> : vector<64x32xf32>
    %37 = tpu.matmul %34, %36, %cst_38 {dimension_numbers = #tpu.dot_dimension_numbers<[1], [0], [0], [1], [0, 0, 1, 1], [], []>} : vector<64x32xbf16>, vector<32x32xbf16>, vector<64x32xf32> -> vector<64x32xf32>
    %38 = arith.addf %31, %37 : vector<64x32xf32>
    %c0_39 = arith.constant 0 : index
    %c0_40 = arith.constant 0 : index
    %c1_41 = arith.constant 1 : index
    %c2_42 = arith.constant 2 : index
    %c0_43 = arith.constant 0 : index
    %39 = vector.load %arg3[%c0_39, %c0_40, %c1_41, %c2_42, %c0_43] : memref<1x1x10x10x32xbf16, #tpu.memory_space<vmem>>, vector<1x1x8x8x32xbf16>
    %40 = vector.shape_cast %39 : vector<1x1x8x8x32xbf16> to vector<8x8x32xbf16>
    %41 = vector.shape_cast %40 : vector<8x8x32xbf16> to vector<64x32xbf16>
    %c0_44 = arith.constant 0 : index
    %c160 = arith.constant 160 : index
    %c0_45 = arith.constant 0 : index
    %42 = vector.load %arg4[%c0_44, %c160, %c0_45] : memref<1x288x32xbf16, #tpu.memory_space<vmem>>, vector<1x32x32xbf16>
    %43 = vector.shape_cast %42 : vector<1x32x32xbf16> to vector<32x32xbf16>
    %cst_46 = arith.constant dense<0.000000e+00> : vector<64x32xf32>
    %44 = tpu.matmul %41, %43, %cst_46 {dimension_numbers = #tpu.dot_dimension_numbers<[1], [0], [0], [1], [0, 0, 1, 1], [], []>} : vector<64x32xbf16>, vector<32x32xbf16>, vector<64x32xf32> -> vector<64x32xf32>
    %45 = arith.addf %38, %44 : vector<64x32xf32>
    %c0_47 = arith.constant 0 : index
    %c0_48 = arith.constant 0 : index
    %c2_49 = arith.constant 2 : index
    %c0_50 = arith.constant 0 : index
    %c0_51 = arith.constant 0 : index
    %46 = vector.load %arg3[%c0_47, %c0_48, %c2_49, %c0_50, %c0_51] : memref<1x1x10x10x32xbf16, #tpu.memory_space<vmem>>, vector<1x1x8x8x32xbf16>
    %47 = vector.shape_cast %46 : vector<1x1x8x8x32xbf16> to vector<8x8x32xbf16>
    %48 = vector.shape_cast %47 : vector<8x8x32xbf16> to vector<64x32xbf16>
    %c0_52 = arith.constant 0 : index
    %c192 = arith.constant 192 : index
    %c0_53 = arith.constant 0 : index
    %49 = vector.load %arg4[%c0_52, %c192, %c0_53] : memref<1x288x32xbf16, #tpu.memory_space<vmem>>, vector<1x32x32xbf16>
    %50 = vector.shape_cast %49 : vector<1x32x32xbf16> to vector<32x32xbf16>
    %cst_54 = arith.constant dense<0.000000e+00> : vector<64x32xf32>
    %51 = tpu.matmul %48, %50, %cst_54 {dimension_numbers = #tpu.dot_dimension_numbers<[1], [0], [0], [1], [0, 0, 1, 1], [], []>} : vector<64x32xbf16>, vector<32x32xbf16>, vector<64x32xf32> -> vector<64x32xf32>
    %52 = arith.addf %45, %51 : vector<64x32xf32>
    %c0_55 = arith.constant 0 : index
    %c0_56 = arith.constant 0 : index
    %c2_57 = arith.constant 2 : index
    %c1_58 = arith.constant 1 : index
    %c0_59 = arith.constant 0 : index
    %53 = vector.load %arg3[%c0_55, %c0_56, %c2_57, %c1_58, %c0_59] : memref<1x1x10x10x32xbf16, #tpu.memory_space<vmem>>, vector<1x1x8x8x32xbf16>
    %54 = vector.shape_cast %53 : vector<1x1x8x8x32xbf16> to vector<8x8x32xbf16>
    %55 = vector.shape_cast %54 : vector<8x8x32xbf16> to vector<64x32xbf16>
    %c0_60 = arith.constant 0 : index
    %c224 = arith.constant 224 : index
    %c0_61 = arith.constant 0 : index
    %56 = vector.load %arg4[%c0_60, %c224, %c0_61] : memref<1x288x32xbf16, #tpu.memory_space<vmem>>, vector<1x32x32xbf16>
    %57 = vector.shape_cast %56 : vector<1x32x32xbf16> to vector<32x32xbf16>
    %cst_62 = arith.constant dense<0.000000e+00> : vector<64x32xf32>
    %58 = tpu.matmul %55, %57, %cst_62 {dimension_numbers = #tpu.dot_dimension_numbers<[1], [0], [0], [1], [0, 0, 1, 1], [], []>} : vector<64x32xbf16>, vector<32x32xbf16>, vector<64x32xf32> -> vector<64x32xf32>
    %59 = arith.addf %52, %58 : vector<64x32xf32>
    %c0_63 = arith.constant 0 : index
    %c0_64 = arith.constant 0 : index
    %c2_65 = arith.constant 2 : index
    %c2_66 = arith.constant 2 : index
    %c0_67 = arith.constant 0 : index
    %60 = vector.load %arg3[%c0_63, %c0_64, %c2_65, %c2_66, %c0_67] : memref<1x1x10x10x32xbf16, #tpu.memory_space<vmem>>, vector<1x1x8x8x32xbf16>
    %61 = vector.shape_cast %60 : vector<1x1x8x8x32xbf16> to vector<8x8x32xbf16>
    %62 = vector.shape_cast %61 : vector<8x8x32xbf16> to vector<64x32xbf16>
    %c0_68 = arith.constant 0 : index
    %c256 = arith.constant 256 : index
    %c0_69 = arith.constant 0 : index
    %63 = vector.load %arg4[%c0_68, %c256, %c0_69] : memref<1x288x32xbf16, #tpu.memory_space<vmem>>, vector<1x32x32xbf16>
    %64 = vector.shape_cast %63 : vector<1x32x32xbf16> to vector<32x32xbf16>
    %cst_70 = arith.constant dense<0.000000e+00> : vector<64x32xf32>
    %65 = tpu.matmul %62, %64, %cst_70 {dimension_numbers = #tpu.dot_dimension_numbers<[1], [0], [0], [1], [0, 0, 1, 1], [], []>} : vector<64x32xbf16>, vector<32x32xbf16>, vector<64x32xf32> -> vector<64x32xf32>
    %66 = arith.addf %59, %65 : vector<64x32xf32>
    %c0_71 = arith.constant 0 : index
    %c0_72 = arith.constant 0 : index
    %67 = vector.load %arg8[%c0_71, %c0_72] : memref<64x32xf32, #tpu.memory_space<vmem>>, vector<64x32xf32>
    %68 = arith.addf %67, %66 : vector<64x32xf32>
    %c0_73 = arith.constant 0 : index
    %c0_74 = arith.constant 0 : index
    %69 = vector.load %arg8[%c0_73, %c0_74] : memref<64x32xf32, #tpu.memory_space<vmem>>, vector<64x32xf32>
    tpu.vector_store %arg8[%c0_73, %c0_74], %68 {strides = array<i32>} : memref<64x32xf32, #tpu.memory_space<vmem>>, vector<64x32xf32>,
    %c2_i32 = arith.constant 2 : i32
    %70 = arith.cmpi eq, %arg2, %c2_i32 : i32
    %71 = arith.extui %70 : i1 to i32
    %c0_i32_75 = arith.constant 0 : i32
    %72 = arith.cmpi ne, %71, %c0_i32_75 : i32
    scf.if %72 {
      %c0_76 = arith.constant 0 : index
      %c0_77 = arith.constant 0 : index
      %73 = vector.load %arg8[%c0_76, %c0_77] : memref<64x32xf32, #tpu.memory_space<vmem>>, vector<64x32xf32>
      %c0_78 = arith.constant 0 : index
      %c0_79 = arith.constant 0 : index
      %74 = vector.load %arg5[%c0_78, %c0_79] : memref<1x32xf32, #tpu.memory_space<vmem>>, vector<1x32xf32>
      %75 = vector.broadcast %74 : vector<1x32xf32> to vector<64x32xf32>
      %76 = arith.mulf %73, %75 : vector<64x32xf32>
      %c0_80 = arith.constant 0 : index
      %c0_81 = arith.constant 0 : index
      %77 = vector.load %arg6[%c0_80, %c0_81] : memref<1x32xf32, #tpu.memory_space<vmem>>, vector<1x32xf32>
      %78 = vector.broadcast %77 : vector<1x32xf32> to vector<64x32xf32>
      %79 = arith.addf %76, %78 : vector<64x32xf32>
      %cst_82 = arith.constant 0.000000e+00 : f32
      %80 = vector.broadcast %cst_82 : f32 to vector<64x32xf32>
      %81 = arith.maximumf %79, %80 : vector<64x32xf32>
      %82 = vector.shape_cast %81 : vector<64x32xf32> to vector<1x8x8x32xf32>
      %83 = arith.truncf %82 : vector<1x8x8x32xf32> to vector<1x8x8x32xbf16>
      %c0_83 = arith.constant 0 : index
      %c0_84 = arith.constant 0 : index
      %c0_85 = arith.constant 0 : index
      %c0_86 = arith.constant 0 : index
      %84 = vector.load %arg7[%c0_83, %c0_84, %c0_85, %c0_86] : memref<1x8x8x32xbf16, #tpu.memory_space<vmem>>, vector<1x8x8x32xbf16>
      tpu.vector_store %arg7[%c0_83, %c0_84, %c0_85, %c0_86], %83 {strides = array<i32>} : memref<1x8x8x32xbf16, #tpu.memory_space<vmem>>, vector<1x8x8x32xbf16>,
    } else {
    }
    return
  }
  func.func @transform_0(%arg0: i32, %arg1: i32, %arg2: i32) -> (i32, i32, i32, i32, i32) {
    %c10_i32 = arith.constant 10 : i32
    %0 = arith.muli %arg0, %c10_i32 : i32
    %c1_i32 = arith.constant 1 : i32
    %1 = arith.muli %c1_i32, %arg1 : i32
    %2 = arith.addi %0, %1 : i32
    %3 = arith.addi %2, %arg2 : i32
    %c0_i32 = arith.constant 0 : i32
    %c0_i32_0 = arith.constant 0 : i32
    %c0_i32_1 = arith.constant 0 : i32
    %c0_i32_2 = arith.constant 0 : i32
    %c0_i32_3 = arith.constant 0 : i32
    return %3, %c0_i32, %c0_i32_0, %c0_i32_1, %c0_i32_2 : i32, i32, i32, i32, i32
  }
  func.func @transform_1(%arg0: i32, %arg1: i32, %arg2: i32) -> (i32, i32, i32) {
    %c0_i32 = arith.constant 0 : i32
    %c0_i32_0 = arith.constant 0 : i32
    %c0_i32_1 = arith.constant 0 : i32
    return %arg2, %c0_i32, %c0_i32_0 : i32, i32, i32
  }
  func.func @transform_2(%arg0: i32, %arg1: i32, %arg2: i32) -> (i32, i32) {
    %c0_i32 = arith.constant 0 : i32
    %c0_i32_0 = arith.constant 0 : i32
    %c0_i32_1 = arith.constant 0 : i32
    return %c0_i32, %c0_i32_0 : i32, i32
  }
  func.func @transform_3(%arg0: i32, %arg1: i32, %arg2: i32) -> (i32, i32) {
    %c0_i32 = arith.constant 0 : i32
    %c0_i32_0 = arith.constant 0 : i32
    %c0_i32_1 = arith.constant 0 : i32
    return %c0_i32, %c0_i32_0 : i32, i32
  }
  func.func @transform_4(%arg0: i32, %arg1: i32, %arg2: i32) -> (i32, i32, i32, i32) {
    %c8_i32 = arith.constant 8 : i32
    %0 = arith.muli %arg0, %c8_i32 : i32
    %1 = arith.addi %0, %arg1 : i32
    %c0_i32 = arith.constant 0 : i32
    %c0_i32_0 = arith.constant 0 : i32
    %c0_i32_1 = arith.constant 0 : i32
    %c0_i32_2 = arith.constant 0 : i32
    return %1, %c0_i32, %c0_i32_0, %c0_i32_1 : i32, i32, i32, i32
  }
}

module attributes {stable_mosaic.version = 11 : i64} {
  func.func @_conv3x3_kernel(%arg0: i32, %arg1: i32, %arg2: i32, %arg3: memref<1x4x5x5x32xbf16, #tpu.memory_space<vmem>>, %arg4: memref<1x288x64xbf16, #tpu.memory_space<vmem>>, %arg5: memref<1x64xf32, #tpu.memory_space<vmem>>, %arg6: memref<1x64xf32, #tpu.memory_space<vmem>>, %arg7: memref<1x4x4x64xbf16, #tpu.memory_space<vmem>>, %arg8: memref<16x64xf32, #tpu.memory_space<vmem>>) attributes {dimension_semantics = [#tpu.dimension_semantics<parallel>, #tpu.dimension_semantics<parallel>, #tpu.dimension_semantics<arbitrary>], iteration_bounds = array<i64: 1, 4, 3>, scalar_prefetch = 0 : i64, scratch_operands = 1 : i64, tpu.core_type = #tpu.core_type<tc>, window_params = [{transform_indices = @transform_0, window_bounds = array<i64: 1, 4, 5, 5, 32>}, {transform_indices = @transform_1, window_bounds = array<i64: 1, 288, 64>}, {pipeline_mode = #tpu.pipeline_mode<synchronous>, transform_indices = @transform_2, window_bounds = array<i64: 1, 64>}, {pipeline_mode = #tpu.pipeline_mode<synchronous>, transform_indices = @transform_3, window_bounds = array<i64: 1, 64>}, {transform_indices = @transform_4, window_bounds = array<i64: 1, 4, 4, 64>}]} {
    %c0_i32 = arith.constant 0 : i32
    %0 = arith.cmpi eq, %arg2, %c0_i32 : i32
    %1 = arith.extui %0 : i1 to i32
    %c0_i32_0 = arith.constant 0 : i32
    %2 = arith.cmpi ne, %1, %c0_i32_0 : i32
    scf.if %2 {
      %cst_75 = arith.constant 0.000000e+00 : f32
      %73 = vector.broadcast %cst_75 : f32 to vector<16x64xf32>
      %c0_76 = arith.constant 0 : index
      %c0_77 = arith.constant 0 : index
      %74 = vector.load %arg8[%c0_76, %c0_77] : memref<16x64xf32, #tpu.memory_space<vmem>>, vector<16x64xf32>
      tpu.vector_store %arg8[%c0_76, %c0_77], %73 {strides = array<i32>} : memref<16x64xf32, #tpu.memory_space<vmem>>, vector<16x64xf32>,
    } else {
    }
    %cst = arith.constant 0.000000e+00 : f32
    %3 = vector.broadcast %cst : f32 to vector<16x64xf32>
    %c0 = arith.constant 0 : index
    %c0_1 = arith.constant 0 : index
    %c0_2 = arith.constant 0 : index
    %c0_3 = arith.constant 0 : index
    %c0_4 = arith.constant 0 : index
    %4 = vector.load %arg3[%c0, %c0_1, %c0_2, %c0_3, %c0_4] : memref<1x4x5x5x32xbf16, #tpu.memory_space<vmem>>, vector<1x1x4x4x32xbf16>
    %5 = vector.shape_cast %4 : vector<1x1x4x4x32xbf16> to vector<4x4x32xbf16>
    %6 = vector.shape_cast %5 : vector<4x4x32xbf16> to vector<16x32xbf16>
    %c0_5 = arith.constant 0 : index
    %c0_6 = arith.constant 0 : index
    %c0_7 = arith.constant 0 : index
    %7 = vector.load %arg4[%c0_5, %c0_6, %c0_7] : memref<1x288x64xbf16, #tpu.memory_space<vmem>>, vector<1x32x64xbf16>
    %8 = vector.shape_cast %7 : vector<1x32x64xbf16> to vector<32x64xbf16>
    %cst_8 = arith.constant dense<0.000000e+00> : vector<16x64xf32>
    %9 = tpu.matmul %6, %8, %cst_8 {dimension_numbers = #tpu.dot_dimension_numbers<[1], [0], [0], [1], [0, 0, 1, 1], [], []>} : vector<16x32xbf16>, vector<32x64xbf16>, vector<16x64xf32> -> vector<16x64xf32>
    %10 = arith.addf %3, %9 : vector<16x64xf32>
    %c0_9 = arith.constant 0 : index
    %c1 = arith.constant 1 : index
    %c0_10 = arith.constant 0 : index
    %c0_11 = arith.constant 0 : index
    %c0_12 = arith.constant 0 : index
    %11 = vector.load %arg3[%c0_9, %c1, %c0_10, %c0_11, %c0_12] : memref<1x4x5x5x32xbf16, #tpu.memory_space<vmem>>, vector<1x1x4x4x32xbf16>
    %12 = vector.shape_cast %11 : vector<1x1x4x4x32xbf16> to vector<4x4x32xbf16>
    %13 = vector.shape_cast %12 : vector<4x4x32xbf16> to vector<16x32xbf16>
    %c0_13 = arith.constant 0 : index
    %c32 = arith.constant 32 : index
    %c0_14 = arith.constant 0 : index
    %14 = vector.load %arg4[%c0_13, %c32, %c0_14] : memref<1x288x64xbf16, #tpu.memory_space<vmem>>, vector<1x32x64xbf16>
    %15 = vector.shape_cast %14 : vector<1x32x64xbf16> to vector<32x64xbf16>
    %cst_15 = arith.constant dense<0.000000e+00> : vector<16x64xf32>
    %16 = tpu.matmul %13, %15, %cst_15 {dimension_numbers = #tpu.dot_dimension_numbers<[1], [0], [0], [1], [0, 0, 1, 1], [], []>} : vector<16x32xbf16>, vector<32x64xbf16>, vector<16x64xf32> -> vector<16x64xf32>
    %17 = arith.addf %10, %16 : vector<16x64xf32>
    %c0_16 = arith.constant 0 : index
    %c0_17 = arith.constant 0 : index
    %c0_18 = arith.constant 0 : index
    %c1_19 = arith.constant 1 : index
    %c0_20 = arith.constant 0 : index
    %18 = vector.load %arg3[%c0_16, %c0_17, %c0_18, %c1_19, %c0_20] : memref<1x4x5x5x32xbf16, #tpu.memory_space<vmem>>, vector<1x1x4x4x32xbf16>
    %19 = vector.shape_cast %18 : vector<1x1x4x4x32xbf16> to vector<4x4x32xbf16>
    %20 = vector.shape_cast %19 : vector<4x4x32xbf16> to vector<16x32xbf16>
    %c0_21 = arith.constant 0 : index
    %c64 = arith.constant 64 : index
    %c0_22 = arith.constant 0 : index
    %21 = vector.load %arg4[%c0_21, %c64, %c0_22] : memref<1x288x64xbf16, #tpu.memory_space<vmem>>, vector<1x32x64xbf16>
    %22 = vector.shape_cast %21 : vector<1x32x64xbf16> to vector<32x64xbf16>
    %cst_23 = arith.constant dense<0.000000e+00> : vector<16x64xf32>
    %23 = tpu.matmul %20, %22, %cst_23 {dimension_numbers = #tpu.dot_dimension_numbers<[1], [0], [0], [1], [0, 0, 1, 1], [], []>} : vector<16x32xbf16>, vector<32x64xbf16>, vector<16x64xf32> -> vector<16x64xf32>
    %24 = arith.addf %17, %23 : vector<16x64xf32>
    %c0_24 = arith.constant 0 : index
    %c2 = arith.constant 2 : index
    %c0_25 = arith.constant 0 : index
    %c0_26 = arith.constant 0 : index
    %c0_27 = arith.constant 0 : index
    %25 = vector.load %arg3[%c0_24, %c2, %c0_25, %c0_26, %c0_27] : memref<1x4x5x5x32xbf16, #tpu.memory_space<vmem>>, vector<1x1x4x4x32xbf16>
    %26 = vector.shape_cast %25 : vector<1x1x4x4x32xbf16> to vector<4x4x32xbf16>
    %27 = vector.shape_cast %26 : vector<4x4x32xbf16> to vector<16x32xbf16>
    %c0_28 = arith.constant 0 : index
    %c96 = arith.constant 96 : index
    %c0_29 = arith.constant 0 : index
    %28 = vector.load %arg4[%c0_28, %c96, %c0_29] : memref<1x288x64xbf16, #tpu.memory_space<vmem>>, vector<1x32x64xbf16>
    %29 = vector.shape_cast %28 : vector<1x32x64xbf16> to vector<32x64xbf16>
    %cst_30 = arith.constant dense<0.000000e+00> : vector<16x64xf32>
    %30 = tpu.matmul %27, %29, %cst_30 {dimension_numbers = #tpu.dot_dimension_numbers<[1], [0], [0], [1], [0, 0, 1, 1], [], []>} : vector<16x32xbf16>, vector<32x64xbf16>, vector<16x64xf32> -> vector<16x64xf32>
    %31 = arith.addf %24, %30 : vector<16x64xf32>
    %c0_31 = arith.constant 0 : index
    %c3 = arith.constant 3 : index
    %c0_32 = arith.constant 0 : index
    %c0_33 = arith.constant 0 : index
    %c0_34 = arith.constant 0 : index
    %32 = vector.load %arg3[%c0_31, %c3, %c0_32, %c0_33, %c0_34] : memref<1x4x5x5x32xbf16, #tpu.memory_space<vmem>>, vector<1x1x4x4x32xbf16>
    %33 = vector.shape_cast %32 : vector<1x1x4x4x32xbf16> to vector<4x4x32xbf16>
    %34 = vector.shape_cast %33 : vector<4x4x32xbf16> to vector<16x32xbf16>
    %c0_35 = arith.constant 0 : index
    %c128 = arith.constant 128 : index
    %c0_36 = arith.constant 0 : index
    %35 = vector.load %arg4[%c0_35, %c128, %c0_36] : memref<1x288x64xbf16, #tpu.memory_space<vmem>>, vector<1x32x64xbf16>
    %36 = vector.shape_cast %35 : vector<1x32x64xbf16> to vector<32x64xbf16>
    %cst_37 = arith.constant dense<0.000000e+00> : vector<16x64xf32>
    %37 = tpu.matmul %34, %36, %cst_37 {dimension_numbers = #tpu.dot_dimension_numbers<[1], [0], [0], [1], [0, 0, 1, 1], [], []>} : vector<16x32xbf16>, vector<32x64xbf16>, vector<16x64xf32> -> vector<16x64xf32>
    %38 = arith.addf %31, %37 : vector<16x64xf32>
    %c0_38 = arith.constant 0 : index
    %c2_39 = arith.constant 2 : index
    %c0_40 = arith.constant 0 : index
    %c1_41 = arith.constant 1 : index
    %c0_42 = arith.constant 0 : index
    %39 = vector.load %arg3[%c0_38, %c2_39, %c0_40, %c1_41, %c0_42] : memref<1x4x5x5x32xbf16, #tpu.memory_space<vmem>>, vector<1x1x4x4x32xbf16>
    %40 = vector.shape_cast %39 : vector<1x1x4x4x32xbf16> to vector<4x4x32xbf16>
    %41 = vector.shape_cast %40 : vector<4x4x32xbf16> to vector<16x32xbf16>
    %c0_43 = arith.constant 0 : index
    %c160 = arith.constant 160 : index
    %c0_44 = arith.constant 0 : index
    %42 = vector.load %arg4[%c0_43, %c160, %c0_44] : memref<1x288x64xbf16, #tpu.memory_space<vmem>>, vector<1x32x64xbf16>
    %43 = vector.shape_cast %42 : vector<1x32x64xbf16> to vector<32x64xbf16>
    %cst_45 = arith.constant dense<0.000000e+00> : vector<16x64xf32>
    %44 = tpu.matmul %41, %43, %cst_45 {dimension_numbers = #tpu.dot_dimension_numbers<[1], [0], [0], [1], [0, 0, 1, 1], [], []>} : vector<16x32xbf16>, vector<32x64xbf16>, vector<16x64xf32> -> vector<16x64xf32>
    %45 = arith.addf %38, %44 : vector<16x64xf32>
    %c0_46 = arith.constant 0 : index
    %c0_47 = arith.constant 0 : index
    %c1_48 = arith.constant 1 : index
    %c0_49 = arith.constant 0 : index
    %c0_50 = arith.constant 0 : index
    %46 = vector.load %arg3[%c0_46, %c0_47, %c1_48, %c0_49, %c0_50] : memref<1x4x5x5x32xbf16, #tpu.memory_space<vmem>>, vector<1x1x4x4x32xbf16>
    %47 = vector.shape_cast %46 : vector<1x1x4x4x32xbf16> to vector<4x4x32xbf16>
    %48 = vector.shape_cast %47 : vector<4x4x32xbf16> to vector<16x32xbf16>
    %c0_51 = arith.constant 0 : index
    %c192 = arith.constant 192 : index
    %c0_52 = arith.constant 0 : index
    %49 = vector.load %arg4[%c0_51, %c192, %c0_52] : memref<1x288x64xbf16, #tpu.memory_space<vmem>>, vector<1x32x64xbf16>
    %50 = vector.shape_cast %49 : vector<1x32x64xbf16> to vector<32x64xbf16>
    %cst_53 = arith.constant dense<0.000000e+00> : vector<16x64xf32>
    %51 = tpu.matmul %48, %50, %cst_53 {dimension_numbers = #tpu.dot_dimension_numbers<[1], [0], [0], [1], [0, 0, 1, 1], [], []>} : vector<16x32xbf16>, vector<32x64xbf16>, vector<16x64xf32> -> vector<16x64xf32>
    %52 = arith.addf %45, %51 : vector<16x64xf32>
    %c0_54 = arith.constant 0 : index
    %c1_55 = arith.constant 1 : index
    %c1_56 = arith.constant 1 : index
    %c0_57 = arith.constant 0 : index
    %c0_58 = arith.constant 0 : index
    %53 = vector.load %arg3[%c0_54, %c1_55, %c1_56, %c0_57, %c0_58] : memref<1x4x5x5x32xbf16, #tpu.memory_space<vmem>>, vector<1x1x4x4x32xbf16>
    %54 = vector.shape_cast %53 : vector<1x1x4x4x32xbf16> to vector<4x4x32xbf16>
    %55 = vector.shape_cast %54 : vector<4x4x32xbf16> to vector<16x32xbf16>
    %c0_59 = arith.constant 0 : index
    %c224 = arith.constant 224 : index
    %c0_60 = arith.constant 0 : index
    %56 = vector.load %arg4[%c0_59, %c224, %c0_60] : memref<1x288x64xbf16, #tpu.memory_space<vmem>>, vector<1x32x64xbf16>
    %57 = vector.shape_cast %56 : vector<1x32x64xbf16> to vector<32x64xbf16>
    %cst_61 = arith.constant dense<0.000000e+00> : vector<16x64xf32>
    %58 = tpu.matmul %55, %57, %cst_61 {dimension_numbers = #tpu.dot_dimension_numbers<[1], [0], [0], [1], [0, 0, 1, 1], [], []>} : vector<16x32xbf16>, vector<32x64xbf16>, vector<16x64xf32> -> vector<16x64xf32>
    %59 = arith.addf %52, %58 : vector<16x64xf32>
    %c0_62 = arith.constant 0 : index
    %c0_63 = arith.constant 0 : index
    %c1_64 = arith.constant 1 : index
    %c1_65 = arith.constant 1 : index
    %c0_66 = arith.constant 0 : index
    %60 = vector.load %arg3[%c0_62, %c0_63, %c1_64, %c1_65, %c0_66] : memref<1x4x5x5x32xbf16, #tpu.memory_space<vmem>>, vector<1x1x4x4x32xbf16>
    %61 = vector.shape_cast %60 : vector<1x1x4x4x32xbf16> to vector<4x4x32xbf16>
    %62 = vector.shape_cast %61 : vector<4x4x32xbf16> to vector<16x32xbf16>
    %c0_67 = arith.constant 0 : index
    %c256 = arith.constant 256 : index
    %c0_68 = arith.constant 0 : index
    %63 = vector.load %arg4[%c0_67, %c256, %c0_68] : memref<1x288x64xbf16, #tpu.memory_space<vmem>>, vector<1x32x64xbf16>
    %64 = vector.shape_cast %63 : vector<1x32x64xbf16> to vector<32x64xbf16>
    %cst_69 = arith.constant dense<0.000000e+00> : vector<16x64xf32>
    %65 = tpu.matmul %62, %64, %cst_69 {dimension_numbers = #tpu.dot_dimension_numbers<[1], [0], [0], [1], [0, 0, 1, 1], [], []>} : vector<16x32xbf16>, vector<32x64xbf16>, vector<16x64xf32> -> vector<16x64xf32>
    %66 = arith.addf %59, %65 : vector<16x64xf32>
    %c0_70 = arith.constant 0 : index
    %c0_71 = arith.constant 0 : index
    %67 = vector.load %arg8[%c0_70, %c0_71] : memref<16x64xf32, #tpu.memory_space<vmem>>, vector<16x64xf32>
    %68 = arith.addf %67, %66 : vector<16x64xf32>
    %c0_72 = arith.constant 0 : index
    %c0_73 = arith.constant 0 : index
    %69 = vector.load %arg8[%c0_72, %c0_73] : memref<16x64xf32, #tpu.memory_space<vmem>>, vector<16x64xf32>
    tpu.vector_store %arg8[%c0_72, %c0_73], %68 {strides = array<i32>} : memref<16x64xf32, #tpu.memory_space<vmem>>, vector<16x64xf32>,
    %c2_i32 = arith.constant 2 : i32
    %70 = arith.cmpi eq, %arg2, %c2_i32 : i32
    %71 = arith.extui %70 : i1 to i32
    %c0_i32_74 = arith.constant 0 : i32
    %72 = arith.cmpi ne, %71, %c0_i32_74 : i32
    scf.if %72 {
      %c0_75 = arith.constant 0 : index
      %c0_76 = arith.constant 0 : index
      %73 = vector.load %arg8[%c0_75, %c0_76] : memref<16x64xf32, #tpu.memory_space<vmem>>, vector<16x64xf32>
      %c0_77 = arith.constant 0 : index
      %c0_78 = arith.constant 0 : index
      %74 = vector.load %arg5[%c0_77, %c0_78] : memref<1x64xf32, #tpu.memory_space<vmem>>, vector<1x64xf32>
      %75 = vector.broadcast %74 : vector<1x64xf32> to vector<16x64xf32>
      %76 = arith.mulf %73, %75 : vector<16x64xf32>
      %c0_79 = arith.constant 0 : index
      %c0_80 = arith.constant 0 : index
      %77 = vector.load %arg6[%c0_79, %c0_80] : memref<1x64xf32, #tpu.memory_space<vmem>>, vector<1x64xf32>
      %78 = vector.broadcast %77 : vector<1x64xf32> to vector<16x64xf32>
      %79 = arith.addf %76, %78 : vector<16x64xf32>
      %cst_81 = arith.constant 0.000000e+00 : f32
      %80 = vector.broadcast %cst_81 : f32 to vector<16x64xf32>
      %81 = arith.maximumf %79, %80 : vector<16x64xf32>
      %82 = vector.shape_cast %81 : vector<16x64xf32> to vector<1x4x4x64xf32>
      %83 = arith.truncf %82 : vector<1x4x4x64xf32> to vector<1x4x4x64xbf16>
      %c0_82 = arith.constant 0 : index
      %c0_83 = arith.constant 0 : index
      %c0_84 = arith.constant 0 : index
      %c0_85 = arith.constant 0 : index
      %84 = vector.load %arg7[%c0_82, %c0_83, %c0_84, %c0_85] : memref<1x4x4x64xbf16, #tpu.memory_space<vmem>>, vector<1x4x4x64xbf16>
      tpu.vector_store %arg7[%c0_82, %c0_83, %c0_84, %c0_85], %83 {strides = array<i32>} : memref<1x4x4x64xbf16, #tpu.memory_space<vmem>>, vector<1x4x4x64xbf16>,
    } else {
    }
    return
  }
  func.func @transform_0(%arg0: i32, %arg1: i32, %arg2: i32) -> (i32, i32, i32, i32, i32) {
    %c10_i32 = arith.constant 10 : i32
    %0 = arith.muli %arg0, %c10_i32 : i32
    %c2_i32 = arith.constant 2 : i32
    %1 = arith.muli %c2_i32, %arg1 : i32
    %2 = arith.addi %0, %1 : i32
    %3 = arith.addi %2, %arg2 : i32
    %c0_i32 = arith.constant 0 : i32
    %c0_i32_0 = arith.constant 0 : i32
    %c0_i32_1 = arith.constant 0 : i32
    %c0_i32_2 = arith.constant 0 : i32
    %c0_i32_3 = arith.constant 0 : i32
    return %3, %c0_i32, %c0_i32_0, %c0_i32_1, %c0_i32_2 : i32, i32, i32, i32, i32
  }
  func.func @transform_1(%arg0: i32, %arg1: i32, %arg2: i32) -> (i32, i32, i32) {
    %c0_i32 = arith.constant 0 : i32
    %c0_i32_0 = arith.constant 0 : i32
    %c0_i32_1 = arith.constant 0 : i32
    return %arg2, %c0_i32, %c0_i32_0 : i32, i32, i32
  }
  func.func @transform_2(%arg0: i32, %arg1: i32, %arg2: i32) -> (i32, i32) {
    %c0_i32 = arith.constant 0 : i32
    %c0_i32_0 = arith.constant 0 : i32
    %c0_i32_1 = arith.constant 0 : i32
    return %c0_i32, %c0_i32_0 : i32, i32
  }
  func.func @transform_3(%arg0: i32, %arg1: i32, %arg2: i32) -> (i32, i32) {
    %c0_i32 = arith.constant 0 : i32
    %c0_i32_0 = arith.constant 0 : i32
    %c0_i32_1 = arith.constant 0 : i32
    return %c0_i32, %c0_i32_0 : i32, i32
  }
  func.func @transform_4(%arg0: i32, %arg1: i32, %arg2: i32) -> (i32, i32, i32, i32) {
    %c4_i32 = arith.constant 4 : i32
    %0 = arith.muli %arg0, %c4_i32 : i32
    %1 = arith.addi %0, %arg1 : i32
    %c0_i32 = arith.constant 0 : i32
    %c0_i32_0 = arith.constant 0 : i32
    %c0_i32_1 = arith.constant 0 : i32
    %c0_i32_2 = arith.constant 0 : i32
    return %1, %c0_i32, %c0_i32_0, %c0_i32_1 : i32, i32, i32, i32
  }
}

module attributes {stable_mosaic.version = 11 : i64} {
  func.func @_conv3x3_kernel(%arg0: i32, %arg1: i32, %arg2: i32, %arg3: memref<1x4x3x3x64xbf16, #tpu.memory_space<vmem>>, %arg4: memref<1x576x128xbf16, #tpu.memory_space<vmem>>, %arg5: memref<1x128xf32, #tpu.memory_space<vmem>>, %arg6: memref<1x128xf32, #tpu.memory_space<vmem>>, %arg7: memref<1x2x2x128xbf16, #tpu.memory_space<vmem>>, %arg8: memref<4x128xf32, #tpu.memory_space<vmem>>) attributes {dimension_semantics = [#tpu.dimension_semantics<parallel>, #tpu.dimension_semantics<parallel>, #tpu.dimension_semantics<arbitrary>], iteration_bounds = array<i64: 1, 2, 3>, scalar_prefetch = 0 : i64, scratch_operands = 1 : i64, tpu.core_type = #tpu.core_type<tc>, window_params = [{transform_indices = @transform_0, window_bounds = array<i64: 1, 4, 3, 3, 64>}, {transform_indices = @transform_1, window_bounds = array<i64: 1, 576, 128>}, {pipeline_mode = #tpu.pipeline_mode<synchronous>, transform_indices = @transform_2, window_bounds = array<i64: 1, 128>}, {pipeline_mode = #tpu.pipeline_mode<synchronous>, transform_indices = @transform_3, window_bounds = array<i64: 1, 128>}, {transform_indices = @transform_4, window_bounds = array<i64: 1, 2, 2, 128>}]} {
    %c0_i32 = arith.constant 0 : i32
    %0 = arith.cmpi eq, %arg2, %c0_i32 : i32
    %1 = arith.extui %0 : i1 to i32
    %c0_i32_0 = arith.constant 0 : i32
    %2 = arith.cmpi ne, %1, %c0_i32_0 : i32
    scf.if %2 {
      %cst_75 = arith.constant 0.000000e+00 : f32
      %73 = vector.broadcast %cst_75 : f32 to vector<4x128xf32>
      %c0_76 = arith.constant 0 : index
      %c0_77 = arith.constant 0 : index
      %74 = vector.load %arg8[%c0_76, %c0_77] : memref<4x128xf32, #tpu.memory_space<vmem>>, vector<4x128xf32>
      tpu.vector_store %arg8[%c0_76, %c0_77], %73 {strides = array<i32>} : memref<4x128xf32, #tpu.memory_space<vmem>>, vector<4x128xf32>,
    } else {
    }
    %cst = arith.constant 0.000000e+00 : f32
    %3 = vector.broadcast %cst : f32 to vector<4x128xf32>
    %c0 = arith.constant 0 : index
    %c0_1 = arith.constant 0 : index
    %c0_2 = arith.constant 0 : index
    %c0_3 = arith.constant 0 : index
    %c0_4 = arith.constant 0 : index
    %4 = vector.load %arg3[%c0, %c0_1, %c0_2, %c0_3, %c0_4] : memref<1x4x3x3x64xbf16, #tpu.memory_space<vmem>>, vector<1x1x2x2x64xbf16>
    %5 = vector.shape_cast %4 : vector<1x1x2x2x64xbf16> to vector<2x2x64xbf16>
    %6 = vector.shape_cast %5 : vector<2x2x64xbf16> to vector<4x64xbf16>
    %c0_5 = arith.constant 0 : index
    %c0_6 = arith.constant 0 : index
    %c0_7 = arith.constant 0 : index
    %7 = vector.load %arg4[%c0_5, %c0_6, %c0_7] : memref<1x576x128xbf16, #tpu.memory_space<vmem>>, vector<1x64x128xbf16>
    %8 = vector.shape_cast %7 : vector<1x64x128xbf16> to vector<64x128xbf16>
    %cst_8 = arith.constant dense<0.000000e+00> : vector<4x128xf32>
    %9 = tpu.matmul %6, %8, %cst_8 {dimension_numbers = #tpu.dot_dimension_numbers<[1], [0], [0], [1], [0, 0, 1, 1], [], []>} : vector<4x64xbf16>, vector<64x128xbf16>, vector<4x128xf32> -> vector<4x128xf32>
    %10 = arith.addf %3, %9 : vector<4x128xf32>
    %c0_9 = arith.constant 0 : index
    %c1 = arith.constant 1 : index
    %c0_10 = arith.constant 0 : index
    %c0_11 = arith.constant 0 : index
    %c0_12 = arith.constant 0 : index
    %11 = vector.load %arg3[%c0_9, %c1, %c0_10, %c0_11, %c0_12] : memref<1x4x3x3x64xbf16, #tpu.memory_space<vmem>>, vector<1x1x2x2x64xbf16>
    %12 = vector.shape_cast %11 : vector<1x1x2x2x64xbf16> to vector<2x2x64xbf16>
    %13 = vector.shape_cast %12 : vector<2x2x64xbf16> to vector<4x64xbf16>
    %c0_13 = arith.constant 0 : index
    %c64 = arith.constant 64 : index
    %c0_14 = arith.constant 0 : index
    %14 = vector.load %arg4[%c0_13, %c64, %c0_14] : memref<1x576x128xbf16, #tpu.memory_space<vmem>>, vector<1x64x128xbf16>
    %15 = vector.shape_cast %14 : vector<1x64x128xbf16> to vector<64x128xbf16>
    %cst_15 = arith.constant dense<0.000000e+00> : vector<4x128xf32>
    %16 = tpu.matmul %13, %15, %cst_15 {dimension_numbers = #tpu.dot_dimension_numbers<[1], [0], [0], [1], [0, 0, 1, 1], [], []>} : vector<4x64xbf16>, vector<64x128xbf16>, vector<4x128xf32> -> vector<4x128xf32>
    %17 = arith.addf %10, %16 : vector<4x128xf32>
    %c0_16 = arith.constant 0 : index
    %c0_17 = arith.constant 0 : index
    %c0_18 = arith.constant 0 : index
    %c1_19 = arith.constant 1 : index
    %c0_20 = arith.constant 0 : index
    %18 = vector.load %arg3[%c0_16, %c0_17, %c0_18, %c1_19, %c0_20] : memref<1x4x3x3x64xbf16, #tpu.memory_space<vmem>>, vector<1x1x2x2x64xbf16>
    %19 = vector.shape_cast %18 : vector<1x1x2x2x64xbf16> to vector<2x2x64xbf16>
    %20 = vector.shape_cast %19 : vector<2x2x64xbf16> to vector<4x64xbf16>
    %c0_21 = arith.constant 0 : index
    %c128 = arith.constant 128 : index
    %c0_22 = arith.constant 0 : index
    %21 = vector.load %arg4[%c0_21, %c128, %c0_22] : memref<1x576x128xbf16, #tpu.memory_space<vmem>>, vector<1x64x128xbf16>
    %22 = vector.shape_cast %21 : vector<1x64x128xbf16> to vector<64x128xbf16>
    %cst_23 = arith.constant dense<0.000000e+00> : vector<4x128xf32>
    %23 = tpu.matmul %20, %22, %cst_23 {dimension_numbers = #tpu.dot_dimension_numbers<[1], [0], [0], [1], [0, 0, 1, 1], [], []>} : vector<4x64xbf16>, vector<64x128xbf16>, vector<4x128xf32> -> vector<4x128xf32>
    %24 = arith.addf %17, %23 : vector<4x128xf32>
    %c0_24 = arith.constant 0 : index
    %c2 = arith.constant 2 : index
    %c0_25 = arith.constant 0 : index
    %c0_26 = arith.constant 0 : index
    %c0_27 = arith.constant 0 : index
    %25 = vector.load %arg3[%c0_24, %c2, %c0_25, %c0_26, %c0_27] : memref<1x4x3x3x64xbf16, #tpu.memory_space<vmem>>, vector<1x1x2x2x64xbf16>
    %26 = vector.shape_cast %25 : vector<1x1x2x2x64xbf16> to vector<2x2x64xbf16>
    %27 = vector.shape_cast %26 : vector<2x2x64xbf16> to vector<4x64xbf16>
    %c0_28 = arith.constant 0 : index
    %c192 = arith.constant 192 : index
    %c0_29 = arith.constant 0 : index
    %28 = vector.load %arg4[%c0_28, %c192, %c0_29] : memref<1x576x128xbf16, #tpu.memory_space<vmem>>, vector<1x64x128xbf16>
    %29 = vector.shape_cast %28 : vector<1x64x128xbf16> to vector<64x128xbf16>
    %cst_30 = arith.constant dense<0.000000e+00> : vector<4x128xf32>
    %30 = tpu.matmul %27, %29, %cst_30 {dimension_numbers = #tpu.dot_dimension_numbers<[1], [0], [0], [1], [0, 0, 1, 1], [], []>} : vector<4x64xbf16>, vector<64x128xbf16>, vector<4x128xf32> -> vector<4x128xf32>
    %31 = arith.addf %24, %30 : vector<4x128xf32>
    %c0_31 = arith.constant 0 : index
    %c3 = arith.constant 3 : index
    %c0_32 = arith.constant 0 : index
    %c0_33 = arith.constant 0 : index
    %c0_34 = arith.constant 0 : index
    %32 = vector.load %arg3[%c0_31, %c3, %c0_32, %c0_33, %c0_34] : memref<1x4x3x3x64xbf16, #tpu.memory_space<vmem>>, vector<1x1x2x2x64xbf16>
    %33 = vector.shape_cast %32 : vector<1x1x2x2x64xbf16> to vector<2x2x64xbf16>
    %34 = vector.shape_cast %33 : vector<2x2x64xbf16> to vector<4x64xbf16>
    %c0_35 = arith.constant 0 : index
    %c256 = arith.constant 256 : index
    %c0_36 = arith.constant 0 : index
    %35 = vector.load %arg4[%c0_35, %c256, %c0_36] : memref<1x576x128xbf16, #tpu.memory_space<vmem>>, vector<1x64x128xbf16>
    %36 = vector.shape_cast %35 : vector<1x64x128xbf16> to vector<64x128xbf16>
    %cst_37 = arith.constant dense<0.000000e+00> : vector<4x128xf32>
    %37 = tpu.matmul %34, %36, %cst_37 {dimension_numbers = #tpu.dot_dimension_numbers<[1], [0], [0], [1], [0, 0, 1, 1], [], []>} : vector<4x64xbf16>, vector<64x128xbf16>, vector<4x128xf32> -> vector<4x128xf32>
    %38 = arith.addf %31, %37 : vector<4x128xf32>
    %c0_38 = arith.constant 0 : index
    %c2_39 = arith.constant 2 : index
    %c0_40 = arith.constant 0 : index
    %c1_41 = arith.constant 1 : index
    %c0_42 = arith.constant 0 : index
    %39 = vector.load %arg3[%c0_38, %c2_39, %c0_40, %c1_41, %c0_42] : memref<1x4x3x3x64xbf16, #tpu.memory_space<vmem>>, vector<1x1x2x2x64xbf16>
    %40 = vector.shape_cast %39 : vector<1x1x2x2x64xbf16> to vector<2x2x64xbf16>
    %41 = vector.shape_cast %40 : vector<2x2x64xbf16> to vector<4x64xbf16>
    %c0_43 = arith.constant 0 : index
    %c320 = arith.constant 320 : index
    %c0_44 = arith.constant 0 : index
    %42 = vector.load %arg4[%c0_43, %c320, %c0_44] : memref<1x576x128xbf16, #tpu.memory_space<vmem>>, vector<1x64x128xbf16>
    %43 = vector.shape_cast %42 : vector<1x64x128xbf16> to vector<64x128xbf16>
    %cst_45 = arith.constant dense<0.000000e+00> : vector<4x128xf32>
    %44 = tpu.matmul %41, %43, %cst_45 {dimension_numbers = #tpu.dot_dimension_numbers<[1], [0], [0], [1], [0, 0, 1, 1], [], []>} : vector<4x64xbf16>, vector<64x128xbf16>, vector<4x128xf32> -> vector<4x128xf32>
    %45 = arith.addf %38, %44 : vector<4x128xf32>
    %c0_46 = arith.constant 0 : index
    %c0_47 = arith.constant 0 : index
    %c1_48 = arith.constant 1 : index
    %c0_49 = arith.constant 0 : index
    %c0_50 = arith.constant 0 : index
    %46 = vector.load %arg3[%c0_46, %c0_47, %c1_48, %c0_49, %c0_50] : memref<1x4x3x3x64xbf16, #tpu.memory_space<vmem>>, vector<1x1x2x2x64xbf16>
    %47 = vector.shape_cast %46 : vector<1x1x2x2x64xbf16> to vector<2x2x64xbf16>
    %48 = vector.shape_cast %47 : vector<2x2x64xbf16> to vector<4x64xbf16>
    %c0_51 = arith.constant 0 : index
    %c384 = arith.constant 384 : index
    %c0_52 = arith.constant 0 : index
    %49 = vector.load %arg4[%c0_51, %c384, %c0_52] : memref<1x576x128xbf16, #tpu.memory_space<vmem>>, vector<1x64x128xbf16>
    %50 = vector.shape_cast %49 : vector<1x64x128xbf16> to vector<64x128xbf16>
    %cst_53 = arith.constant dense<0.000000e+00> : vector<4x128xf32>
    %51 = tpu.matmul %48, %50, %cst_53 {dimension_numbers = #tpu.dot_dimension_numbers<[1], [0], [0], [1], [0, 0, 1, 1], [], []>} : vector<4x64xbf16>, vector<64x128xbf16>, vector<4x128xf32> -> vector<4x128xf32>
    %52 = arith.addf %45, %51 : vector<4x128xf32>
    %c0_54 = arith.constant 0 : index
    %c1_55 = arith.constant 1 : index
    %c1_56 = arith.constant 1 : index
    %c0_57 = arith.constant 0 : index
    %c0_58 = arith.constant 0 : index
    %53 = vector.load %arg3[%c0_54, %c1_55, %c1_56, %c0_57, %c0_58] : memref<1x4x3x3x64xbf16, #tpu.memory_space<vmem>>, vector<1x1x2x2x64xbf16>
    %54 = vector.shape_cast %53 : vector<1x1x2x2x64xbf16> to vector<2x2x64xbf16>
    %55 = vector.shape_cast %54 : vector<2x2x64xbf16> to vector<4x64xbf16>
    %c0_59 = arith.constant 0 : index
    %c448 = arith.constant 448 : index
    %c0_60 = arith.constant 0 : index
    %56 = vector.load %arg4[%c0_59, %c448, %c0_60] : memref<1x576x128xbf16, #tpu.memory_space<vmem>>, vector<1x64x128xbf16>
    %57 = vector.shape_cast %56 : vector<1x64x128xbf16> to vector<64x128xbf16>
    %cst_61 = arith.constant dense<0.000000e+00> : vector<4x128xf32>
    %58 = tpu.matmul %55, %57, %cst_61 {dimension_numbers = #tpu.dot_dimension_numbers<[1], [0], [0], [1], [0, 0, 1, 1], [], []>} : vector<4x64xbf16>, vector<64x128xbf16>, vector<4x128xf32> -> vector<4x128xf32>
    %59 = arith.addf %52, %58 : vector<4x128xf32>
    %c0_62 = arith.constant 0 : index
    %c0_63 = arith.constant 0 : index
    %c1_64 = arith.constant 1 : index
    %c1_65 = arith.constant 1 : index
    %c0_66 = arith.constant 0 : index
    %60 = vector.load %arg3[%c0_62, %c0_63, %c1_64, %c1_65, %c0_66] : memref<1x4x3x3x64xbf16, #tpu.memory_space<vmem>>, vector<1x1x2x2x64xbf16>
    %61 = vector.shape_cast %60 : vector<1x1x2x2x64xbf16> to vector<2x2x64xbf16>
    %62 = vector.shape_cast %61 : vector<2x2x64xbf16> to vector<4x64xbf16>
    %c0_67 = arith.constant 0 : index
    %c512 = arith.constant 512 : index
    %c0_68 = arith.constant 0 : index
    %63 = vector.load %arg4[%c0_67, %c512, %c0_68] : memref<1x576x128xbf16, #tpu.memory_space<vmem>>, vector<1x64x128xbf16>
    %64 = vector.shape_cast %63 : vector<1x64x128xbf16> to vector<64x128xbf16>
    %cst_69 = arith.constant dense<0.000000e+00> : vector<4x128xf32>
    %65 = tpu.matmul %62, %64, %cst_69 {dimension_numbers = #tpu.dot_dimension_numbers<[1], [0], [0], [1], [0, 0, 1, 1], [], []>} : vector<4x64xbf16>, vector<64x128xbf16>, vector<4x128xf32> -> vector<4x128xf32>
    %66 = arith.addf %59, %65 : vector<4x128xf32>
    %c0_70 = arith.constant 0 : index
    %c0_71 = arith.constant 0 : index
    %67 = vector.load %arg8[%c0_70, %c0_71] : memref<4x128xf32, #tpu.memory_space<vmem>>, vector<4x128xf32>
    %68 = arith.addf %67, %66 : vector<4x128xf32>
    %c0_72 = arith.constant 0 : index
    %c0_73 = arith.constant 0 : index
    %69 = vector.load %arg8[%c0_72, %c0_73] : memref<4x128xf32, #tpu.memory_space<vmem>>, vector<4x128xf32>
    tpu.vector_store %arg8[%c0_72, %c0_73], %68 {strides = array<i32>} : memref<4x128xf32, #tpu.memory_space<vmem>>, vector<4x128xf32>,
    %c2_i32 = arith.constant 2 : i32
    %70 = arith.cmpi eq, %arg2, %c2_i32 : i32
    %71 = arith.extui %70 : i1 to i32
    %c0_i32_74 = arith.constant 0 : i32
    %72 = arith.cmpi ne, %71, %c0_i32_74 : i32
    scf.if %72 {
      %c0_75 = arith.constant 0 : index
      %c0_76 = arith.constant 0 : index
      %73 = vector.load %arg8[%c0_75, %c0_76] : memref<4x128xf32, #tpu.memory_space<vmem>>, vector<4x128xf32>
      %c0_77 = arith.constant 0 : index
      %c0_78 = arith.constant 0 : index
      %74 = vector.load %arg5[%c0_77, %c0_78] : memref<1x128xf32, #tpu.memory_space<vmem>>, vector<1x128xf32>
      %75 = vector.broadcast %74 : vector<1x128xf32> to vector<4x128xf32>
      %76 = arith.mulf %73, %75 : vector<4x128xf32>
      %c0_79 = arith.constant 0 : index
      %c0_80 = arith.constant 0 : index
      %77 = vector.load %arg6[%c0_79, %c0_80] : memref<1x128xf32, #tpu.memory_space<vmem>>, vector<1x128xf32>
      %78 = vector.broadcast %77 : vector<1x128xf32> to vector<4x128xf32>
      %79 = arith.addf %76, %78 : vector<4x128xf32>
      %cst_81 = arith.constant 0.000000e+00 : f32
      %80 = vector.broadcast %cst_81 : f32 to vector<4x128xf32>
      %81 = arith.maximumf %79, %80 : vector<4x128xf32>
      %82 = vector.shape_cast %81 : vector<4x128xf32> to vector<1x2x2x128xf32>
      %83 = arith.truncf %82 : vector<1x2x2x128xf32> to vector<1x2x2x128xbf16>
      %c0_82 = arith.constant 0 : index
      %c0_83 = arith.constant 0 : index
      %c0_84 = arith.constant 0 : index
      %c0_85 = arith.constant 0 : index
      %84 = vector.load %arg7[%c0_82, %c0_83, %c0_84, %c0_85] : memref<1x2x2x128xbf16, #tpu.memory_space<vmem>>, vector<1x2x2x128xbf16>
      tpu.vector_store %arg7[%c0_82, %c0_83, %c0_84, %c0_85], %83 {strides = array<i32>} : memref<1x2x2x128xbf16, #tpu.memory_space<vmem>>, vector<1x2x2x128xbf16>,
    } else {
    }
    return
  }
  func.func @transform_0(%arg0: i32, %arg1: i32, %arg2: i32) -> (i32, i32, i32, i32, i32) {
    %c6_i32 = arith.constant 6 : i32
    %0 = arith.muli %arg0, %c6_i32 : i32
    %c2_i32 = arith.constant 2 : i32
    %1 = arith.muli %c2_i32, %arg1 : i32
    %2 = arith.addi %0, %1 : i32
    %3 = arith.addi %2, %arg2 : i32
    %c0_i32 = arith.constant 0 : i32
    %c0_i32_0 = arith.constant 0 : i32
    %c0_i32_1 = arith.constant 0 : i32
    %c0_i32_2 = arith.constant 0 : i32
    %c0_i32_3 = arith.constant 0 : i32
    return %3, %c0_i32, %c0_i32_0, %c0_i32_1, %c0_i32_2 : i32, i32, i32, i32, i32
  }
  func.func @transform_1(%arg0: i32, %arg1: i32, %arg2: i32) -> (i32, i32, i32) {
    %c0_i32 = arith.constant 0 : i32
    %c0_i32_0 = arith.constant 0 : i32
    %c0_i32_1 = arith.constant 0 : i32
    return %arg2, %c0_i32, %c0_i32_0 : i32, i32, i32
  }
  func.func @transform_2(%arg0: i32, %arg1: i32, %arg2: i32) -> (i32, i32) {
    %c0_i32 = arith.constant 0 : i32
    %c0_i32_0 = arith.constant 0 : i32
    %c0_i32_1 = arith.constant 0 : i32
    return %c0_i32, %c0_i32_0 : i32, i32
  }
  func.func @transform_3(%arg0: i32, %arg1: i32, %arg2: i32) -> (i32, i32) {
    %c0_i32 = arith.constant 0 : i32
    %c0_i32_0 = arith.constant 0 : i32
    %c0_i32_1 = arith.constant 0 : i32
    return %c0_i32, %c0_i32_0 : i32, i32
  }
  func.func @transform_4(%arg0: i32, %arg1: i32, %arg2: i32) -> (i32, i32, i32, i32) {
    %c2_i32 = arith.constant 2 : i32
    %0 = arith.muli %arg0, %c2_i32 : i32
    %1 = arith.addi %0, %arg1 : i32
    %c0_i32 = arith.constant 0 : i32
    %c0_i32_0 = arith.constant 0 : i32
    %c0_i32_1 = arith.constant 0 : i32
    %c0_i32_2 = arith.constant 0 : i32
    return %1, %c0_i32, %c0_i32_0, %c0_i32_1 : i32, i32, i32, i32
  }
}

module attributes {stable_mosaic.version = 11 : i64} {
  func.func @_rowmm_kernel(%arg0: i32, %arg1: memref<1x2x2x128xbf16, #tpu.memory_space<vmem>>, %arg2: memref<128x512xbf16, #tpu.memory_space<vmem>>, %arg3: memref<1x512xf32, #tpu.memory_space<vmem>>, %arg4: memref<1x2x2x512xbf16, #tpu.memory_space<vmem>>) attributes {dimension_semantics = [#tpu.dimension_semantics<parallel>], iteration_bounds = array<i64: 2>, scalar_prefetch = 0 : i64, scratch_operands = 0 : i64, tpu.core_type = #tpu.core_type<tc>, window_params = [{transform_indices = @transform_0, window_bounds = array<i64: 1, 2, 2, 128>}, {pipeline_mode = #tpu.pipeline_mode<synchronous>, transform_indices = @transform_1, window_bounds = array<i64: 128, 512>}, {pipeline_mode = #tpu.pipeline_mode<synchronous>, transform_indices = @transform_2, window_bounds = array<i64: 1, 512>}, {transform_indices = @transform_3, window_bounds = array<i64: 1, 2, 2, 512>}]} {
    %c0 = arith.constant 0 : index
    %c0_0 = arith.constant 0 : index
    %c0_1 = arith.constant 0 : index
    %c0_2 = arith.constant 0 : index
    %0 = vector.load %arg1[%c0, %c0_0, %c0_1, %c0_2] : memref<1x2x2x128xbf16, #tpu.memory_space<vmem>>, vector<1x2x2x128xbf16>
    %1 = vector.shape_cast %0 : vector<1x2x2x128xbf16> to vector<4x128xbf16>
    %c0_3 = arith.constant 0 : index
    %c0_4 = arith.constant 0 : index
    %2 = vector.load %arg2[%c0_3, %c0_4] : memref<128x512xbf16, #tpu.memory_space<vmem>>, vector<128x512xbf16>
    %cst = arith.constant dense<0.000000e+00> : vector<4x512xf32>
    %3 = tpu.matmul %1, %2, %cst {dimension_numbers = #tpu.dot_dimension_numbers<[1], [0], [0], [1], [0, 0, 1, 1], [], []>} : vector<4x128xbf16>, vector<128x512xbf16>, vector<4x512xf32> -> vector<4x512xf32>
    %c0_5 = arith.constant 0 : index
    %c0_6 = arith.constant 0 : index
    %4 = vector.load %arg3[%c0_5, %c0_6] : memref<1x512xf32, #tpu.memory_space<vmem>>, vector<1x512xf32>
    %5 = vector.broadcast %4 : vector<1x512xf32> to vector<4x512xf32>
    %6 = arith.addf %3, %5 : vector<4x512xf32>
    %7 = vector.shape_cast %6 : vector<4x512xf32> to vector<1x2x2x512xf32>
    %8 = arith.truncf %7 : vector<1x2x2x512xf32> to vector<1x2x2x512xbf16>
    %c0_7 = arith.constant 0 : index
    %c0_8 = arith.constant 0 : index
    %c0_9 = arith.constant 0 : index
    %c0_10 = arith.constant 0 : index
    %9 = vector.load %arg4[%c0_7, %c0_8, %c0_9, %c0_10] : memref<1x2x2x512xbf16, #tpu.memory_space<vmem>>, vector<1x2x2x512xbf16>
    tpu.vector_store %arg4[%c0_7, %c0_8, %c0_9, %c0_10], %8 {strides = array<i32>} : memref<1x2x2x512xbf16, #tpu.memory_space<vmem>>, vector<1x2x2x512xbf16>,
    return
  }
  func.func @transform_0(%arg0: i32) -> (i32, i32, i32, i32) {
    %c0_i32 = arith.constant 0 : i32
    %c0_i32_0 = arith.constant 0 : i32
    %c0_i32_1 = arith.constant 0 : i32
    %c0_i32_2 = arith.constant 0 : i32
    return %arg0, %c0_i32, %c0_i32_0, %c0_i32_1 : i32, i32, i32, i32
  }
  func.func @transform_1(%arg0: i32) -> (i32, i32) {
    %c0_i32 = arith.constant 0 : i32
    %c0_i32_0 = arith.constant 0 : i32
    %c0_i32_1 = arith.constant 0 : i32
    return %c0_i32, %c0_i32_0 : i32, i32
  }
  func.func @transform_2(%arg0: i32) -> (i32, i32) {
    %c0_i32 = arith.constant 0 : i32
    %c0_i32_0 = arith.constant 0 : i32
    %c0_i32_1 = arith.constant 0 : i32
    return %c0_i32, %c0_i32_0 : i32, i32
  }
  func.func @transform_3(%arg0: i32) -> (i32, i32, i32, i32) {
    %c0_i32 = arith.constant 0 : i32
    %c0_i32_0 = arith.constant 0 : i32
    %c0_i32_1 = arith.constant 0 : i32
    %c0_i32_2 = arith.constant 0 : i32
    return %arg0, %c0_i32, %c0_i32_0, %c0_i32_1 : i32, i32, i32, i32
  }
}

module attributes {stable_mosaic.version = 11 : i64} {
  func.func @_conv3x3_kernel(%arg0: i32, %arg1: i32, %arg2: i32, %arg3: memref<1x1x6x6x64xbf16, #tpu.memory_space<vmem>>, %arg4: memref<1x1x6x6x64xbf16, #tpu.memory_space<vmem>>, %arg5: memref<1x576x64xbf16, #tpu.memory_space<vmem>>, %arg6: memref<1x576x64xbf16, #tpu.memory_space<vmem>>, %arg7: memref<1x64xf32, #tpu.memory_space<vmem>>, %arg8: memref<1x64xf32, #tpu.memory_space<vmem>>, %arg9: memref<1x4x4x64xbf16, #tpu.memory_space<vmem>>, %arg10: memref<16x64xf32, #tpu.memory_space<vmem>>) attributes {dimension_semantics = [#tpu.dimension_semantics<parallel>, #tpu.dimension_semantics<parallel>, #tpu.dimension_semantics<arbitrary>], iteration_bounds = array<i64: 1, 4, 3>, scalar_prefetch = 0 : i64, scratch_operands = 1 : i64, tpu.core_type = #tpu.core_type<tc>, window_params = [{transform_indices = @transform_0, window_bounds = array<i64: 1, 1, 6, 6, 64>}, {transform_indices = @transform_1, window_bounds = array<i64: 1, 1, 6, 6, 64>}, {transform_indices = @transform_2, window_bounds = array<i64: 1, 576, 64>}, {transform_indices = @transform_3, window_bounds = array<i64: 1, 576, 64>}, {pipeline_mode = #tpu.pipeline_mode<synchronous>, transform_indices = @transform_4, window_bounds = array<i64: 1, 64>}, {pipeline_mode = #tpu.pipeline_mode<synchronous>, transform_indices = @transform_5, window_bounds = array<i64: 1, 64>}, {transform_indices = @transform_6, window_bounds = array<i64: 1, 4, 4, 64>}]} {
    %c0_i32 = arith.constant 0 : i32
    %0 = arith.cmpi eq, %arg2, %c0_i32 : i32
    %1 = arith.extui %0 : i1 to i32
    %c0_i32_0 = arith.constant 0 : i32
    %2 = arith.cmpi ne, %1, %c0_i32_0 : i32
    scf.if %2 {
      %cst_157 = arith.constant 0.000000e+00 : f32
      %136 = vector.broadcast %cst_157 : f32 to vector<16x64xf32>
      %c0_158 = arith.constant 0 : index
      %c0_159 = arith.constant 0 : index
      %137 = vector.load %arg10[%c0_158, %c0_159] : memref<16x64xf32, #tpu.memory_space<vmem>>, vector<16x64xf32>
      tpu.vector_store %arg10[%c0_158, %c0_159], %136 {strides = array<i32>} : memref<16x64xf32, #tpu.memory_space<vmem>>, vector<16x64xf32>,
    } else {
    }
    %cst = arith.constant 0.000000e+00 : f32
    %3 = vector.broadcast %cst : f32 to vector<16x64xf32>
    %c0 = arith.constant 0 : index
    %c0_1 = arith.constant 0 : index
    %c0_2 = arith.constant 0 : index
    %c0_3 = arith.constant 0 : index
    %c0_4 = arith.constant 0 : index
    %4 = vector.load %arg3[%c0, %c0_1, %c0_2, %c0_3, %c0_4] : memref<1x1x6x6x64xbf16, #tpu.memory_space<vmem>>, vector<1x1x4x4x64xbf16>
    %5 = vector.shape_cast %4 : vector<1x1x4x4x64xbf16> to vector<4x4x64xbf16>
    %6 = vector.shape_cast %5 : vector<4x4x64xbf16> to vector<16x64xbf16>
    %c0_5 = arith.constant 0 : index
    %c0_6 = arith.constant 0 : index
    %c0_7 = arith.constant 0 : index
    %7 = vector.load %arg5[%c0_5, %c0_6, %c0_7] : memref<1x576x64xbf16, #tpu.memory_space<vmem>>, vector<1x64x64xbf16>
    %8 = vector.shape_cast %7 : vector<1x64x64xbf16> to vector<64x64xbf16>
    %cst_8 = arith.constant dense<0.000000e+00> : vector<16x64xf32>
    %9 = tpu.matmul %6, %8, %cst_8 {dimension_numbers = #tpu.dot_dimension_numbers<[1], [0], [0], [1], [0, 0, 1, 1], [], []>} : vector<16x64xbf16>, vector<64x64xbf16>, vector<16x64xf32> -> vector<16x64xf32>
    %10 = arith.addf %3, %9 : vector<16x64xf32>
    %c0_9 = arith.constant 0 : index
    %c0_10 = arith.constant 0 : index
    %c0_11 = arith.constant 0 : index
    %c1 = arith.constant 1 : index
    %c0_12 = arith.constant 0 : index
    %11 = vector.load %arg3[%c0_9, %c0_10, %c0_11, %c1, %c0_12] : memref<1x1x6x6x64xbf16, #tpu.memory_space<vmem>>, vector<1x1x4x4x64xbf16>
    %12 = vector.shape_cast %11 : vector<1x1x4x4x64xbf16> to vector<4x4x64xbf16>
    %13 = vector.shape_cast %12 : vector<4x4x64xbf16> to vector<16x64xbf16>
    %c0_13 = arith.constant 0 : index
    %c64 = arith.constant 64 : index
    %c0_14 = arith.constant 0 : index
    %14 = vector.load %arg5[%c0_13, %c64, %c0_14] : memref<1x576x64xbf16, #tpu.memory_space<vmem>>, vector<1x64x64xbf16>
    %15 = vector.shape_cast %14 : vector<1x64x64xbf16> to vector<64x64xbf16>
    %cst_15 = arith.constant dense<0.000000e+00> : vector<16x64xf32>
    %16 = tpu.matmul %13, %15, %cst_15 {dimension_numbers = #tpu.dot_dimension_numbers<[1], [0], [0], [1], [0, 0, 1, 1], [], []>} : vector<16x64xbf16>, vector<64x64xbf16>, vector<16x64xf32> -> vector<16x64xf32>
    %17 = arith.addf %10, %16 : vector<16x64xf32>
    %c0_16 = arith.constant 0 : index
    %c0_17 = arith.constant 0 : index
    %c0_18 = arith.constant 0 : index
    %c2 = arith.constant 2 : index
    %c0_19 = arith.constant 0 : index
    %18 = vector.load %arg3[%c0_16, %c0_17, %c0_18, %c2, %c0_19] : memref<1x1x6x6x64xbf16, #tpu.memory_space<vmem>>, vector<1x1x4x4x64xbf16>
    %19 = vector.shape_cast %18 : vector<1x1x4x4x64xbf16> to vector<4x4x64xbf16>
    %20 = vector.shape_cast %19 : vector<4x4x64xbf16> to vector<16x64xbf16>
    %c0_20 = arith.constant 0 : index
    %c128 = arith.constant 128 : index
    %c0_21 = arith.constant 0 : index
    %21 = vector.load %arg5[%c0_20, %c128, %c0_21] : memref<1x576x64xbf16, #tpu.memory_space<vmem>>, vector<1x64x64xbf16>
    %22 = vector.shape_cast %21 : vector<1x64x64xbf16> to vector<64x64xbf16>
    %cst_22 = arith.constant dense<0.000000e+00> : vector<16x64xf32>
    %23 = tpu.matmul %20, %22, %cst_22 {dimension_numbers = #tpu.dot_dimension_numbers<[1], [0], [0], [1], [0, 0, 1, 1], [], []>} : vector<16x64xbf16>, vector<64x64xbf16>, vector<16x64xf32> -> vector<16x64xf32>
    %24 = arith.addf %17, %23 : vector<16x64xf32>
    %c0_23 = arith.constant 0 : index
    %c0_24 = arith.constant 0 : index
    %c1_25 = arith.constant 1 : index
    %c0_26 = arith.constant 0 : index
    %c0_27 = arith.constant 0 : index
    %25 = vector.load %arg3[%c0_23, %c0_24, %c1_25, %c0_26, %c0_27] : memref<1x1x6x6x64xbf16, #tpu.memory_space<vmem>>, vector<1x1x4x4x64xbf16>
    %26 = vector.shape_cast %25 : vector<1x1x4x4x64xbf16> to vector<4x4x64xbf16>
    %27 = vector.shape_cast %26 : vector<4x4x64xbf16> to vector<16x64xbf16>
    %c0_28 = arith.constant 0 : index
    %c192 = arith.constant 192 : index
    %c0_29 = arith.constant 0 : index
    %28 = vector.load %arg5[%c0_28, %c192, %c0_29] : memref<1x576x64xbf16, #tpu.memory_space<vmem>>, vector<1x64x64xbf16>
    %29 = vector.shape_cast %28 : vector<1x64x64xbf16> to vector<64x64xbf16>
    %cst_30 = arith.constant dense<0.000000e+00> : vector<16x64xf32>
    %30 = tpu.matmul %27, %29, %cst_30 {dimension_numbers = #tpu.dot_dimension_numbers<[1], [0], [0], [1], [0, 0, 1, 1], [], []>} : vector<16x64xbf16>, vector<64x64xbf16>, vector<16x64xf32> -> vector<16x64xf32>
    %31 = arith.addf %24, %30 : vector<16x64xf32>
    %c0_31 = arith.constant 0 : index
    %c0_32 = arith.constant 0 : index
    %c1_33 = arith.constant 1 : index
    %c1_34 = arith.constant 1 : index
    %c0_35 = arith.constant 0 : index
    %32 = vector.load %arg3[%c0_31, %c0_32, %c1_33, %c1_34, %c0_35] : memref<1x1x6x6x64xbf16, #tpu.memory_space<vmem>>, vector<1x1x4x4x64xbf16>
    %33 = vector.shape_cast %32 : vector<1x1x4x4x64xbf16> to vector<4x4x64xbf16>
    %34 = vector.shape_cast %33 : vector<4x4x64xbf16> to vector<16x64xbf16>
    %c0_36 = arith.constant 0 : index
    %c256 = arith.constant 256 : index
    %c0_37 = arith.constant 0 : index
    %35 = vector.load %arg5[%c0_36, %c256, %c0_37] : memref<1x576x64xbf16, #tpu.memory_space<vmem>>, vector<1x64x64xbf16>
    %36 = vector.shape_cast %35 : vector<1x64x64xbf16> to vector<64x64xbf16>
    %cst_38 = arith.constant dense<0.000000e+00> : vector<16x64xf32>
    %37 = tpu.matmul %34, %36, %cst_38 {dimension_numbers = #tpu.dot_dimension_numbers<[1], [0], [0], [1], [0, 0, 1, 1], [], []>} : vector<16x64xbf16>, vector<64x64xbf16>, vector<16x64xf32> -> vector<16x64xf32>
    %38 = arith.addf %31, %37 : vector<16x64xf32>
    %c0_39 = arith.constant 0 : index
    %c0_40 = arith.constant 0 : index
    %c1_41 = arith.constant 1 : index
    %c2_42 = arith.constant 2 : index
    %c0_43 = arith.constant 0 : index
    %39 = vector.load %arg3[%c0_39, %c0_40, %c1_41, %c2_42, %c0_43] : memref<1x1x6x6x64xbf16, #tpu.memory_space<vmem>>, vector<1x1x4x4x64xbf16>
    %40 = vector.shape_cast %39 : vector<1x1x4x4x64xbf16> to vector<4x4x64xbf16>
    %41 = vector.shape_cast %40 : vector<4x4x64xbf16> to vector<16x64xbf16>
    %c0_44 = arith.constant 0 : index
    %c320 = arith.constant 320 : index
    %c0_45 = arith.constant 0 : index
    %42 = vector.load %arg5[%c0_44, %c320, %c0_45] : memref<1x576x64xbf16, #tpu.memory_space<vmem>>, vector<1x64x64xbf16>
    %43 = vector.shape_cast %42 : vector<1x64x64xbf16> to vector<64x64xbf16>
    %cst_46 = arith.constant dense<0.000000e+00> : vector<16x64xf32>
    %44 = tpu.matmul %41, %43, %cst_46 {dimension_numbers = #tpu.dot_dimension_numbers<[1], [0], [0], [1], [0, 0, 1, 1], [], []>} : vector<16x64xbf16>, vector<64x64xbf16>, vector<16x64xf32> -> vector<16x64xf32>
    %45 = arith.addf %38, %44 : vector<16x64xf32>
    %c0_47 = arith.constant 0 : index
    %c0_48 = arith.constant 0 : index
    %c2_49 = arith.constant 2 : index
    %c0_50 = arith.constant 0 : index
    %c0_51 = arith.constant 0 : index
    %46 = vector.load %arg3[%c0_47, %c0_48, %c2_49, %c0_50, %c0_51] : memref<1x1x6x6x64xbf16, #tpu.memory_space<vmem>>, vector<1x1x4x4x64xbf16>
    %47 = vector.shape_cast %46 : vector<1x1x4x4x64xbf16> to vector<4x4x64xbf16>
    %48 = vector.shape_cast %47 : vector<4x4x64xbf16> to vector<16x64xbf16>
    %c0_52 = arith.constant 0 : index
    %c384 = arith.constant 384 : index
    %c0_53 = arith.constant 0 : index
    %49 = vector.load %arg5[%c0_52, %c384, %c0_53] : memref<1x576x64xbf16, #tpu.memory_space<vmem>>, vector<1x64x64xbf16>
    %50 = vector.shape_cast %49 : vector<1x64x64xbf16> to vector<64x64xbf16>
    %cst_54 = arith.constant dense<0.000000e+00> : vector<16x64xf32>
    %51 = tpu.matmul %48, %50, %cst_54 {dimension_numbers = #tpu.dot_dimension_numbers<[1], [0], [0], [1], [0, 0, 1, 1], [], []>} : vector<16x64xbf16>, vector<64x64xbf16>, vector<16x64xf32> -> vector<16x64xf32>
    %52 = arith.addf %45, %51 : vector<16x64xf32>
    %c0_55 = arith.constant 0 : index
    %c0_56 = arith.constant 0 : index
    %c2_57 = arith.constant 2 : index
    %c1_58 = arith.constant 1 : index
    %c0_59 = arith.constant 0 : index
    %53 = vector.load %arg3[%c0_55, %c0_56, %c2_57, %c1_58, %c0_59] : memref<1x1x6x6x64xbf16, #tpu.memory_space<vmem>>, vector<1x1x4x4x64xbf16>
    %54 = vector.shape_cast %53 : vector<1x1x4x4x64xbf16> to vector<4x4x64xbf16>
    %55 = vector.shape_cast %54 : vector<4x4x64xbf16> to vector<16x64xbf16>
    %c0_60 = arith.constant 0 : index
    %c448 = arith.constant 448 : index
    %c0_61 = arith.constant 0 : index
    %56 = vector.load %arg5[%c0_60, %c448, %c0_61] : memref<1x576x64xbf16, #tpu.memory_space<vmem>>, vector<1x64x64xbf16>
    %57 = vector.shape_cast %56 : vector<1x64x64xbf16> to vector<64x64xbf16>
    %cst_62 = arith.constant dense<0.000000e+00> : vector<16x64xf32>
    %58 = tpu.matmul %55, %57, %cst_62 {dimension_numbers = #tpu.dot_dimension_numbers<[1], [0], [0], [1], [0, 0, 1, 1], [], []>} : vector<16x64xbf16>, vector<64x64xbf16>, vector<16x64xf32> -> vector<16x64xf32>
    %59 = arith.addf %52, %58 : vector<16x64xf32>
    %c0_63 = arith.constant 0 : index
    %c0_64 = arith.constant 0 : index
    %c2_65 = arith.constant 2 : index
    %c2_66 = arith.constant 2 : index
    %c0_67 = arith.constant 0 : index
    %60 = vector.load %arg3[%c0_63, %c0_64, %c2_65, %c2_66, %c0_67] : memref<1x1x6x6x64xbf16, #tpu.memory_space<vmem>>, vector<1x1x4x4x64xbf16>
    %61 = vector.shape_cast %60 : vector<1x1x4x4x64xbf16> to vector<4x4x64xbf16>
    %62 = vector.shape_cast %61 : vector<4x4x64xbf16> to vector<16x64xbf16>
    %c0_68 = arith.constant 0 : index
    %c512 = arith.constant 512 : index
    %c0_69 = arith.constant 0 : index
    %63 = vector.load %arg5[%c0_68, %c512, %c0_69] : memref<1x576x64xbf16, #tpu.memory_space<vmem>>, vector<1x64x64xbf16>
    %64 = vector.shape_cast %63 : vector<1x64x64xbf16> to vector<64x64xbf16>
    %cst_70 = arith.constant dense<0.000000e+00> : vector<16x64xf32>
    %65 = tpu.matmul %62, %64, %cst_70 {dimension_numbers = #tpu.dot_dimension_numbers<[1], [0], [0], [1], [0, 0, 1, 1], [], []>} : vector<16x64xbf16>, vector<64x64xbf16>, vector<16x64xf32> -> vector<16x64xf32>
    %66 = arith.addf %59, %65 : vector<16x64xf32>
    %c0_71 = arith.constant 0 : index
    %c0_72 = arith.constant 0 : index
    %c0_73 = arith.constant 0 : index
    %c0_74 = arith.constant 0 : index
    %c0_75 = arith.constant 0 : index
    %67 = vector.load %arg4[%c0_71, %c0_72, %c0_73, %c0_74, %c0_75] : memref<1x1x6x6x64xbf16, #tpu.memory_space<vmem>>, vector<1x1x4x4x64xbf16>
    %68 = vector.shape_cast %67 : vector<1x1x4x4x64xbf16> to vector<4x4x64xbf16>
    %69 = vector.shape_cast %68 : vector<4x4x64xbf16> to vector<16x64xbf16>
    %c0_76 = arith.constant 0 : index
    %c0_77 = arith.constant 0 : index
    %c0_78 = arith.constant 0 : index
    %70 = vector.load %arg6[%c0_76, %c0_77, %c0_78] : memref<1x576x64xbf16, #tpu.memory_space<vmem>>, vector<1x64x64xbf16>
    %71 = vector.shape_cast %70 : vector<1x64x64xbf16> to vector<64x64xbf16>
    %cst_79 = arith.constant dense<0.000000e+00> : vector<16x64xf32>
    %72 = tpu.matmul %69, %71, %cst_79 {dimension_numbers = #tpu.dot_dimension_numbers<[1], [0], [0], [1], [0, 0, 1, 1], [], []>} : vector<16x64xbf16>, vector<64x64xbf16>, vector<16x64xf32> -> vector<16x64xf32>
    %73 = arith.addf %66, %72 : vector<16x64xf32>
    %c0_80 = arith.constant 0 : index
    %c0_81 = arith.constant 0 : index
    %c0_82 = arith.constant 0 : index
    %c1_83 = arith.constant 1 : index
    %c0_84 = arith.constant 0 : index
    %74 = vector.load %arg4[%c0_80, %c0_81, %c0_82, %c1_83, %c0_84] : memref<1x1x6x6x64xbf16, #tpu.memory_space<vmem>>, vector<1x1x4x4x64xbf16>
    %75 = vector.shape_cast %74 : vector<1x1x4x4x64xbf16> to vector<4x4x64xbf16>
    %76 = vector.shape_cast %75 : vector<4x4x64xbf16> to vector<16x64xbf16>
    %c0_85 = arith.constant 0 : index
    %c64_86 = arith.constant 64 : index
    %c0_87 = arith.constant 0 : index
    %77 = vector.load %arg6[%c0_85, %c64_86, %c0_87] : memref<1x576x64xbf16, #tpu.memory_space<vmem>>, vector<1x64x64xbf16>
    %78 = vector.shape_cast %77 : vector<1x64x64xbf16> to vector<64x64xbf16>
    %cst_88 = arith.constant dense<0.000000e+00> : vector<16x64xf32>
    %79 = tpu.matmul %76, %78, %cst_88 {dimension_numbers = #tpu.dot_dimension_numbers<[1], [0], [0], [1], [0, 0, 1, 1], [], []>} : vector<16x64xbf16>, vector<64x64xbf16>, vector<16x64xf32> -> vector<16x64xf32>
    %80 = arith.addf %73, %79 : vector<16x64xf32>
    %c0_89 = arith.constant 0 : index
    %c0_90 = arith.constant 0 : index
    %c0_91 = arith.constant 0 : index
    %c2_92 = arith.constant 2 : index
    %c0_93 = arith.constant 0 : index
    %81 = vector.load %arg4[%c0_89, %c0_90, %c0_91, %c2_92, %c0_93] : memref<1x1x6x6x64xbf16, #tpu.memory_space<vmem>>, vector<1x1x4x4x64xbf16>
    %82 = vector.shape_cast %81 : vector<1x1x4x4x64xbf16> to vector<4x4x64xbf16>
    %83 = vector.shape_cast %82 : vector<4x4x64xbf16> to vector<16x64xbf16>
    %c0_94 = arith.constant 0 : index
    %c128_95 = arith.constant 128 : index
    %c0_96 = arith.constant 0 : index
    %84 = vector.load %arg6[%c0_94, %c128_95, %c0_96] : memref<1x576x64xbf16, #tpu.memory_space<vmem>>, vector<1x64x64xbf16>
    %85 = vector.shape_cast %84 : vector<1x64x64xbf16> to vector<64x64xbf16>
    %cst_97 = arith.constant dense<0.000000e+00> : vector<16x64xf32>
    %86 = tpu.matmul %83, %85, %cst_97 {dimension_numbers = #tpu.dot_dimension_numbers<[1], [0], [0], [1], [0, 0, 1, 1], [], []>} : vector<16x64xbf16>, vector<64x64xbf16>, vector<16x64xf32> -> vector<16x64xf32>
    %87 = arith.addf %80, %86 : vector<16x64xf32>
    %c0_98 = arith.constant 0 : index
    %c0_99 = arith.constant 0 : index
    %c1_100 = arith.constant 1 : index
    %c0_101 = arith.constant 0 : index
    %c0_102 = arith.constant 0 : index
    %88 = vector.load %arg4[%c0_98, %c0_99, %c1_100, %c0_101, %c0_102] : memref<1x1x6x6x64xbf16, #tpu.memory_space<vmem>>, vector<1x1x4x4x64xbf16>
    %89 = vector.shape_cast %88 : vector<1x1x4x4x64xbf16> to vector<4x4x64xbf16>
    %90 = vector.shape_cast %89 : vector<4x4x64xbf16> to vector<16x64xbf16>
    %c0_103 = arith.constant 0 : index
    %c192_104 = arith.constant 192 : index
    %c0_105 = arith.constant 0 : index
    %91 = vector.load %arg6[%c0_103, %c192_104, %c0_105] : memref<1x576x64xbf16, #tpu.memory_space<vmem>>, vector<1x64x64xbf16>
    %92 = vector.shape_cast %91 : vector<1x64x64xbf16> to vector<64x64xbf16>
    %cst_106 = arith.constant dense<0.000000e+00> : vector<16x64xf32>
    %93 = tpu.matmul %90, %92, %cst_106 {dimension_numbers = #tpu.dot_dimension_numbers<[1], [0], [0], [1], [0, 0, 1, 1], [], []>} : vector<16x64xbf16>, vector<64x64xbf16>, vector<16x64xf32> -> vector<16x64xf32>
    %94 = arith.addf %87, %93 : vector<16x64xf32>
    %c0_107 = arith.constant 0 : index
    %c0_108 = arith.constant 0 : index
    %c1_109 = arith.constant 1 : index
    %c1_110 = arith.constant 1 : index
    %c0_111 = arith.constant 0 : index
    %95 = vector.load %arg4[%c0_107, %c0_108, %c1_109, %c1_110, %c0_111] : memref<1x1x6x6x64xbf16, #tpu.memory_space<vmem>>, vector<1x1x4x4x64xbf16>
    %96 = vector.shape_cast %95 : vector<1x1x4x4x64xbf16> to vector<4x4x64xbf16>
    %97 = vector.shape_cast %96 : vector<4x4x64xbf16> to vector<16x64xbf16>
    %c0_112 = arith.constant 0 : index
    %c256_113 = arith.constant 256 : index
    %c0_114 = arith.constant 0 : index
    %98 = vector.load %arg6[%c0_112, %c256_113, %c0_114] : memref<1x576x64xbf16, #tpu.memory_space<vmem>>, vector<1x64x64xbf16>
    %99 = vector.shape_cast %98 : vector<1x64x64xbf16> to vector<64x64xbf16>
    %cst_115 = arith.constant dense<0.000000e+00> : vector<16x64xf32>
    %100 = tpu.matmul %97, %99, %cst_115 {dimension_numbers = #tpu.dot_dimension_numbers<[1], [0], [0], [1], [0, 0, 1, 1], [], []>} : vector<16x64xbf16>, vector<64x64xbf16>, vector<16x64xf32> -> vector<16x64xf32>
    %101 = arith.addf %94, %100 : vector<16x64xf32>
    %c0_116 = arith.constant 0 : index
    %c0_117 = arith.constant 0 : index
    %c1_118 = arith.constant 1 : index
    %c2_119 = arith.constant 2 : index
    %c0_120 = arith.constant 0 : index
    %102 = vector.load %arg4[%c0_116, %c0_117, %c1_118, %c2_119, %c0_120] : memref<1x1x6x6x64xbf16, #tpu.memory_space<vmem>>, vector<1x1x4x4x64xbf16>
    %103 = vector.shape_cast %102 : vector<1x1x4x4x64xbf16> to vector<4x4x64xbf16>
    %104 = vector.shape_cast %103 : vector<4x4x64xbf16> to vector<16x64xbf16>
    %c0_121 = arith.constant 0 : index
    %c320_122 = arith.constant 320 : index
    %c0_123 = arith.constant 0 : index
    %105 = vector.load %arg6[%c0_121, %c320_122, %c0_123] : memref<1x576x64xbf16, #tpu.memory_space<vmem>>, vector<1x64x64xbf16>
    %106 = vector.shape_cast %105 : vector<1x64x64xbf16> to vector<64x64xbf16>
    %cst_124 = arith.constant dense<0.000000e+00> : vector<16x64xf32>
    %107 = tpu.matmul %104, %106, %cst_124 {dimension_numbers = #tpu.dot_dimension_numbers<[1], [0], [0], [1], [0, 0, 1, 1], [], []>} : vector<16x64xbf16>, vector<64x64xbf16>, vector<16x64xf32> -> vector<16x64xf32>
    %108 = arith.addf %101, %107 : vector<16x64xf32>
    %c0_125 = arith.constant 0 : index
    %c0_126 = arith.constant 0 : index
    %c2_127 = arith.constant 2 : index
    %c0_128 = arith.constant 0 : index
    %c0_129 = arith.constant 0 : index
    %109 = vector.load %arg4[%c0_125, %c0_126, %c2_127, %c0_128, %c0_129] : memref<1x1x6x6x64xbf16, #tpu.memory_space<vmem>>, vector<1x1x4x4x64xbf16>
    %110 = vector.shape_cast %109 : vector<1x1x4x4x64xbf16> to vector<4x4x64xbf16>
    %111 = vector.shape_cast %110 : vector<4x4x64xbf16> to vector<16x64xbf16>
    %c0_130 = arith.constant 0 : index
    %c384_131 = arith.constant 384 : index
    %c0_132 = arith.constant 0 : index
    %112 = vector.load %arg6[%c0_130, %c384_131, %c0_132] : memref<1x576x64xbf16, #tpu.memory_space<vmem>>, vector<1x64x64xbf16>
    %113 = vector.shape_cast %112 : vector<1x64x64xbf16> to vector<64x64xbf16>
    %cst_133 = arith.constant dense<0.000000e+00> : vector<16x64xf32>
    %114 = tpu.matmul %111, %113, %cst_133 {dimension_numbers = #tpu.dot_dimension_numbers<[1], [0], [0], [1], [0, 0, 1, 1], [], []>} : vector<16x64xbf16>, vector<64x64xbf16>, vector<16x64xf32> -> vector<16x64xf32>
    %115 = arith.addf %108, %114 : vector<16x64xf32>
    %c0_134 = arith.constant 0 : index
    %c0_135 = arith.constant 0 : index
    %c2_136 = arith.constant 2 : index
    %c1_137 = arith.constant 1 : index
    %c0_138 = arith.constant 0 : index
    %116 = vector.load %arg4[%c0_134, %c0_135, %c2_136, %c1_137, %c0_138] : memref<1x1x6x6x64xbf16, #tpu.memory_space<vmem>>, vector<1x1x4x4x64xbf16>
    %117 = vector.shape_cast %116 : vector<1x1x4x4x64xbf16> to vector<4x4x64xbf16>
    %118 = vector.shape_cast %117 : vector<4x4x64xbf16> to vector<16x64xbf16>
    %c0_139 = arith.constant 0 : index
    %c448_140 = arith.constant 448 : index
    %c0_141 = arith.constant 0 : index
    %119 = vector.load %arg6[%c0_139, %c448_140, %c0_141] : memref<1x576x64xbf16, #tpu.memory_space<vmem>>, vector<1x64x64xbf16>
    %120 = vector.shape_cast %119 : vector<1x64x64xbf16> to vector<64x64xbf16>
    %cst_142 = arith.constant dense<0.000000e+00> : vector<16x64xf32>
    %121 = tpu.matmul %118, %120, %cst_142 {dimension_numbers = #tpu.dot_dimension_numbers<[1], [0], [0], [1], [0, 0, 1, 1], [], []>} : vector<16x64xbf16>, vector<64x64xbf16>, vector<16x64xf32> -> vector<16x64xf32>
    %122 = arith.addf %115, %121 : vector<16x64xf32>
    %c0_143 = arith.constant 0 : index
    %c0_144 = arith.constant 0 : index
    %c2_145 = arith.constant 2 : index
    %c2_146 = arith.constant 2 : index
    %c0_147 = arith.constant 0 : index
    %123 = vector.load %arg4[%c0_143, %c0_144, %c2_145, %c2_146, %c0_147] : memref<1x1x6x6x64xbf16, #tpu.memory_space<vmem>>, vector<1x1x4x4x64xbf16>
    %124 = vector.shape_cast %123 : vector<1x1x4x4x64xbf16> to vector<4x4x64xbf16>
    %125 = vector.shape_cast %124 : vector<4x4x64xbf16> to vector<16x64xbf16>
    %c0_148 = arith.constant 0 : index
    %c512_149 = arith.constant 512 : index
    %c0_150 = arith.constant 0 : index
    %126 = vector.load %arg6[%c0_148, %c512_149, %c0_150] : memref<1x576x64xbf16, #tpu.memory_space<vmem>>, vector<1x64x64xbf16>
    %127 = vector.shape_cast %126 : vector<1x64x64xbf16> to vector<64x64xbf16>
    %cst_151 = arith.constant dense<0.000000e+00> : vector<16x64xf32>
    %128 = tpu.matmul %125, %127, %cst_151 {dimension_numbers = #tpu.dot_dimension_numbers<[1], [0], [0], [1], [0, 0, 1, 1], [], []>} : vector<16x64xbf16>, vector<64x64xbf16>, vector<16x64xf32> -> vector<16x64xf32>
    %129 = arith.addf %122, %128 : vector<16x64xf32>
    %c0_152 = arith.constant 0 : index
    %c0_153 = arith.constant 0 : index
    %130 = vector.load %arg10[%c0_152, %c0_153] : memref<16x64xf32, #tpu.memory_space<vmem>>, vector<16x64xf32>
    %131 = arith.addf %130, %129 : vector<16x64xf32>
    %c0_154 = arith.constant 0 : index
    %c0_155 = arith.constant 0 : index
    %132 = vector.load %arg10[%c0_154, %c0_155] : memref<16x64xf32, #tpu.memory_space<vmem>>, vector<16x64xf32>
    tpu.vector_store %arg10[%c0_154, %c0_155], %131 {strides = array<i32>} : memref<16x64xf32, #tpu.memory_space<vmem>>, vector<16x64xf32>,
    %c2_i32 = arith.constant 2 : i32
    %133 = arith.cmpi eq, %arg2, %c2_i32 : i32
    %134 = arith.extui %133 : i1 to i32
    %c0_i32_156 = arith.constant 0 : i32
    %135 = arith.cmpi ne, %134, %c0_i32_156 : i32
    scf.if %135 {
      %c0_157 = arith.constant 0 : index
      %c0_158 = arith.constant 0 : index
      %136 = vector.load %arg10[%c0_157, %c0_158] : memref<16x64xf32, #tpu.memory_space<vmem>>, vector<16x64xf32>
      %c0_159 = arith.constant 0 : index
      %c0_160 = arith.constant 0 : index
      %137 = vector.load %arg7[%c0_159, %c0_160] : memref<1x64xf32, #tpu.memory_space<vmem>>, vector<1x64xf32>
      %138 = vector.broadcast %137 : vector<1x64xf32> to vector<16x64xf32>
      %139 = arith.mulf %136, %138 : vector<16x64xf32>
      %c0_161 = arith.constant 0 : index
      %c0_162 = arith.constant 0 : index
      %140 = vector.load %arg8[%c0_161, %c0_162] : memref<1x64xf32, #tpu.memory_space<vmem>>, vector<1x64xf32>
      %141 = vector.broadcast %140 : vector<1x64xf32> to vector<16x64xf32>
      %142 = arith.addf %139, %141 : vector<16x64xf32>
      %cst_163 = arith.constant 0.000000e+00 : f32
      %143 = vector.broadcast %cst_163 : f32 to vector<16x64xf32>
      %144 = arith.maximumf %142, %143 : vector<16x64xf32>
      %145 = vector.shape_cast %144 : vector<16x64xf32> to vector<1x4x4x64xf32>
      %146 = arith.truncf %145 : vector<1x4x4x64xf32> to vector<1x4x4x64xbf16>
      %c0_164 = arith.constant 0 : index
      %c0_165 = arith.constant 0 : index
      %c0_166 = arith.constant 0 : index
      %c0_167 = arith.constant 0 : index
      %147 = vector.load %arg9[%c0_164, %c0_165, %c0_166, %c0_167] : memref<1x4x4x64xbf16, #tpu.memory_space<vmem>>, vector<1x4x4x64xbf16>
      tpu.vector_store %arg9[%c0_164, %c0_165, %c0_166, %c0_167], %146 {strides = array<i32>} : memref<1x4x4x64xbf16, #tpu.memory_space<vmem>>, vector<1x4x4x64xbf16>,
    } else {
    }
    return
  }
  func.func @transform_0(%arg0: i32, %arg1: i32, %arg2: i32) -> (i32, i32, i32, i32, i32) {
    %c6_i32 = arith.constant 6 : i32
    %0 = arith.muli %arg0, %c6_i32 : i32
    %c1_i32 = arith.constant 1 : i32
    %1 = arith.muli %c1_i32, %arg1 : i32
    %2 = arith.addi %0, %1 : i32
    %3 = arith.addi %2, %arg2 : i32
    %c0_i32 = arith.constant 0 : i32
    %c0_i32_0 = arith.constant 0 : i32
    %c0_i32_1 = arith.constant 0 : i32
    %c0_i32_2 = arith.constant 0 : i32
    %c0_i32_3 = arith.constant 0 : i32
    return %3, %c0_i32, %c0_i32_0, %c0_i32_1, %c0_i32_2 : i32, i32, i32, i32, i32
  }
  func.func @transform_1(%arg0: i32, %arg1: i32, %arg2: i32) -> (i32, i32, i32, i32, i32) {
    %c6_i32 = arith.constant 6 : i32
    %0 = arith.muli %arg0, %c6_i32 : i32
    %c1_i32 = arith.constant 1 : i32
    %1 = arith.muli %c1_i32, %arg1 : i32
    %2 = arith.addi %0, %1 : i32
    %3 = arith.addi %2, %arg2 : i32
    %c0_i32 = arith.constant 0 : i32
    %c0_i32_0 = arith.constant 0 : i32
    %c0_i32_1 = arith.constant 0 : i32
    %c0_i32_2 = arith.constant 0 : i32
    %c0_i32_3 = arith.constant 0 : i32
    return %3, %c0_i32, %c0_i32_0, %c0_i32_1, %c0_i32_2 : i32, i32, i32, i32, i32
  }
  func.func @transform_2(%arg0: i32, %arg1: i32, %arg2: i32) -> (i32, i32, i32) {
    %c0_i32 = arith.constant 0 : i32
    %c0_i32_0 = arith.constant 0 : i32
    %c0_i32_1 = arith.constant 0 : i32
    return %arg2, %c0_i32, %c0_i32_0 : i32, i32, i32
  }
  func.func @transform_3(%arg0: i32, %arg1: i32, %arg2: i32) -> (i32, i32, i32) {
    %c0_i32 = arith.constant 0 : i32
    %c0_i32_0 = arith.constant 0 : i32
    %c0_i32_1 = arith.constant 0 : i32
    return %arg2, %c0_i32, %c0_i32_0 : i32, i32, i32
  }
  func.func @transform_4(%arg0: i32, %arg1: i32, %arg2: i32) -> (i32, i32) {
    %c0_i32 = arith.constant 0 : i32
    %c0_i32_0 = arith.constant 0 : i32
    %c0_i32_1 = arith.constant 0 : i32
    return %c0_i32, %c0_i32_0 : i32, i32
  }
  func.func @transform_5(%arg0: i32, %arg1: i32, %arg2: i32) -> (i32, i32) {
    %c0_i32 = arith.constant 0 : i32
    %c0_i32_0 = arith.constant 0 : i32
    %c0_i32_1 = arith.constant 0 : i32
    return %c0_i32, %c0_i32_0 : i32, i32
  }
  func.func @transform_6(%arg0: i32, %arg1: i32, %arg2: i32) -> (i32, i32, i32, i32) {
    %c4_i32 = arith.constant 4 : i32
    %0 = arith.muli %arg0, %c4_i32 : i32
    %1 = arith.addi %0, %arg1 : i32
    %c0_i32 = arith.constant 0 : i32
    %c0_i32_0 = arith.constant 0 : i32
    %c0_i32_1 = arith.constant 0 : i32
    %c0_i32_2 = arith.constant 0 : i32
    return %1, %c0_i32, %c0_i32_0, %c0_i32_1 : i32, i32, i32, i32
  }
}

module attributes {stable_mosaic.version = 11 : i64} {
  func.func @_rowmm_kernel(%arg0: i32, %arg1: memref<1x4x4x64xbf16, #tpu.memory_space<vmem>>, %arg2: memref<64x256xbf16, #tpu.memory_space<vmem>>, %arg3: memref<1x256xf32, #tpu.memory_space<vmem>>, %arg4: memref<1x4x4x256xbf16, #tpu.memory_space<vmem>>) attributes {dimension_semantics = [#tpu.dimension_semantics<parallel>], iteration_bounds = array<i64: 4>, scalar_prefetch = 0 : i64, scratch_operands = 0 : i64, tpu.core_type = #tpu.core_type<tc>, window_params = [{transform_indices = @transform_0, window_bounds = array<i64: 1, 4, 4, 64>}, {pipeline_mode = #tpu.pipeline_mode<synchronous>, transform_indices = @transform_1, window_bounds = array<i64: 64, 256>}, {pipeline_mode = #tpu.pipeline_mode<synchronous>, transform_indices = @transform_2, window_bounds = array<i64: 1, 256>}, {transform_indices = @transform_3, window_bounds = array<i64: 1, 4, 4, 256>}]} {
    %c0 = arith.constant 0 : index
    %c0_0 = arith.constant 0 : index
    %c0_1 = arith.constant 0 : index
    %c0_2 = arith.constant 0 : index
    %0 = vector.load %arg1[%c0, %c0_0, %c0_1, %c0_2] : memref<1x4x4x64xbf16, #tpu.memory_space<vmem>>, vector<1x4x4x64xbf16>
    %1 = vector.shape_cast %0 : vector<1x4x4x64xbf16> to vector<16x64xbf16>
    %c0_3 = arith.constant 0 : index
    %c0_4 = arith.constant 0 : index
    %2 = vector.load %arg2[%c0_3, %c0_4] : memref<64x256xbf16, #tpu.memory_space<vmem>>, vector<64x256xbf16>
    %cst = arith.constant dense<0.000000e+00> : vector<16x256xf32>
    %3 = tpu.matmul %1, %2, %cst {dimension_numbers = #tpu.dot_dimension_numbers<[1], [0], [0], [1], [0, 0, 1, 1], [], []>} : vector<16x64xbf16>, vector<64x256xbf16>, vector<16x256xf32> -> vector<16x256xf32>
    %c0_5 = arith.constant 0 : index
    %c0_6 = arith.constant 0 : index
    %4 = vector.load %arg3[%c0_5, %c0_6] : memref<1x256xf32, #tpu.memory_space<vmem>>, vector<1x256xf32>
    %5 = vector.broadcast %4 : vector<1x256xf32> to vector<16x256xf32>
    %6 = arith.addf %3, %5 : vector<16x256xf32>
    %7 = vector.shape_cast %6 : vector<16x256xf32> to vector<1x4x4x256xf32>
    %8 = arith.truncf %7 : vector<1x4x4x256xf32> to vector<1x4x4x256xbf16>
    %c0_7 = arith.constant 0 : index
    %c0_8 = arith.constant 0 : index
    %c0_9 = arith.constant 0 : index
    %c0_10 = arith.constant 0 : index
    %9 = vector.load %arg4[%c0_7, %c0_8, %c0_9, %c0_10] : memref<1x4x4x256xbf16, #tpu.memory_space<vmem>>, vector<1x4x4x256xbf16>
    tpu.vector_store %arg4[%c0_7, %c0_8, %c0_9, %c0_10], %8 {strides = array<i32>} : memref<1x4x4x256xbf16, #tpu.memory_space<vmem>>, vector<1x4x4x256xbf16>,
    return
  }
  func.func @transform_0(%arg0: i32) -> (i32, i32, i32, i32) {
    %c0_i32 = arith.constant 0 : i32
    %c0_i32_0 = arith.constant 0 : i32
    %c0_i32_1 = arith.constant 0 : i32
    %c0_i32_2 = arith.constant 0 : i32
    return %arg0, %c0_i32, %c0_i32_0, %c0_i32_1 : i32, i32, i32, i32
  }
  func.func @transform_1(%arg0: i32) -> (i32, i32) {
    %c0_i32 = arith.constant 0 : i32
    %c0_i32_0 = arith.constant 0 : i32
    %c0_i32_1 = arith.constant 0 : i32
    return %c0_i32, %c0_i32_0 : i32, i32
  }
  func.func @transform_2(%arg0: i32) -> (i32, i32) {
    %c0_i32 = arith.constant 0 : i32
    %c0_i32_0 = arith.constant 0 : i32
    %c0_i32_1 = arith.constant 0 : i32
    return %c0_i32, %c0_i32_0 : i32, i32
  }
  func.func @transform_3(%arg0: i32) -> (i32, i32, i32, i32) {
    %c0_i32 = arith.constant 0 : i32
    %c0_i32_0 = arith.constant 0 : i32
    %c0_i32_1 = arith.constant 0 : i32
    %c0_i32_2 = arith.constant 0 : i32
    return %arg0, %c0_i32, %c0_i32_0, %c0_i32_1 : i32, i32, i32, i32
  }
}

module attributes {stable_mosaic.version = 11 : i64} {
  func.func @_conv3x3_kernel(%arg0: i32, %arg1: i32, %arg2: i32, %arg3: memref<1x1x10x10x32xbf16, #tpu.memory_space<vmem>>, %arg4: memref<1x1x10x10x32xbf16, #tpu.memory_space<vmem>>, %arg5: memref<1x288x32xbf16, #tpu.memory_space<vmem>>, %arg6: memref<1x288x32xbf16, #tpu.memory_space<vmem>>, %arg7: memref<1x32xf32, #tpu.memory_space<vmem>>, %arg8: memref<1x32xf32, #tpu.memory_space<vmem>>, %arg9: memref<1x8x8x32xbf16, #tpu.memory_space<vmem>>, %arg10: memref<64x32xf32, #tpu.memory_space<vmem>>) attributes {dimension_semantics = [#tpu.dimension_semantics<parallel>, #tpu.dimension_semantics<parallel>, #tpu.dimension_semantics<arbitrary>], iteration_bounds = array<i64: 1, 8, 3>, scalar_prefetch = 0 : i64, scratch_operands = 1 : i64, tpu.core_type = #tpu.core_type<tc>, window_params = [{transform_indices = @transform_0, window_bounds = array<i64: 1, 1, 10, 10, 32>}, {transform_indices = @transform_1, window_bounds = array<i64: 1, 1, 10, 10, 32>}, {transform_indices = @transform_2, window_bounds = array<i64: 1, 288, 32>}, {transform_indices = @transform_3, window_bounds = array<i64: 1, 288, 32>}, {pipeline_mode = #tpu.pipeline_mode<synchronous>, transform_indices = @transform_4, window_bounds = array<i64: 1, 32>}, {pipeline_mode = #tpu.pipeline_mode<synchronous>, transform_indices = @transform_5, window_bounds = array<i64: 1, 32>}, {transform_indices = @transform_6, window_bounds = array<i64: 1, 8, 8, 32>}]} {
    %c0_i32 = arith.constant 0 : i32
    %0 = arith.cmpi eq, %arg2, %c0_i32 : i32
    %1 = arith.extui %0 : i1 to i32
    %c0_i32_0 = arith.constant 0 : i32
    %2 = arith.cmpi ne, %1, %c0_i32_0 : i32
    scf.if %2 {
      %cst_157 = arith.constant 0.000000e+00 : f32
      %136 = vector.broadcast %cst_157 : f32 to vector<64x32xf32>
      %c0_158 = arith.constant 0 : index
      %c0_159 = arith.constant 0 : index
      %137 = vector.load %arg10[%c0_158, %c0_159] : memref<64x32xf32, #tpu.memory_space<vmem>>, vector<64x32xf32>
      tpu.vector_store %arg10[%c0_158, %c0_159], %136 {strides = array<i32>} : memref<64x32xf32, #tpu.memory_space<vmem>>, vector<64x32xf32>,
    } else {
    }
    %cst = arith.constant 0.000000e+00 : f32
    %3 = vector.broadcast %cst : f32 to vector<64x32xf32>
    %c0 = arith.constant 0 : index
    %c0_1 = arith.constant 0 : index
    %c0_2 = arith.constant 0 : index
    %c0_3 = arith.constant 0 : index
    %c0_4 = arith.constant 0 : index
    %4 = vector.load %arg3[%c0, %c0_1, %c0_2, %c0_3, %c0_4] : memref<1x1x10x10x32xbf16, #tpu.memory_space<vmem>>, vector<1x1x8x8x32xbf16>
    %5 = vector.shape_cast %4 : vector<1x1x8x8x32xbf16> to vector<8x8x32xbf16>
    %6 = vector.shape_cast %5 : vector<8x8x32xbf16> to vector<64x32xbf16>
    %c0_5 = arith.constant 0 : index
    %c0_6 = arith.constant 0 : index
    %c0_7 = arith.constant 0 : index
    %7 = vector.load %arg5[%c0_5, %c0_6, %c0_7] : memref<1x288x32xbf16, #tpu.memory_space<vmem>>, vector<1x32x32xbf16>
    %8 = vector.shape_cast %7 : vector<1x32x32xbf16> to vector<32x32xbf16>
    %cst_8 = arith.constant dense<0.000000e+00> : vector<64x32xf32>
    %9 = tpu.matmul %6, %8, %cst_8 {dimension_numbers = #tpu.dot_dimension_numbers<[1], [0], [0], [1], [0, 0, 1, 1], [], []>} : vector<64x32xbf16>, vector<32x32xbf16>, vector<64x32xf32> -> vector<64x32xf32>
    %10 = arith.addf %3, %9 : vector<64x32xf32>
    %c0_9 = arith.constant 0 : index
    %c0_10 = arith.constant 0 : index
    %c0_11 = arith.constant 0 : index
    %c1 = arith.constant 1 : index
    %c0_12 = arith.constant 0 : index
    %11 = vector.load %arg3[%c0_9, %c0_10, %c0_11, %c1, %c0_12] : memref<1x1x10x10x32xbf16, #tpu.memory_space<vmem>>, vector<1x1x8x8x32xbf16>
    %12 = vector.shape_cast %11 : vector<1x1x8x8x32xbf16> to vector<8x8x32xbf16>
    %13 = vector.shape_cast %12 : vector<8x8x32xbf16> to vector<64x32xbf16>
    %c0_13 = arith.constant 0 : index
    %c32 = arith.constant 32 : index
    %c0_14 = arith.constant 0 : index
    %14 = vector.load %arg5[%c0_13, %c32, %c0_14] : memref<1x288x32xbf16, #tpu.memory_space<vmem>>, vector<1x32x32xbf16>
    %15 = vector.shape_cast %14 : vector<1x32x32xbf16> to vector<32x32xbf16>
    %cst_15 = arith.constant dense<0.000000e+00> : vector<64x32xf32>
    %16 = tpu.matmul %13, %15, %cst_15 {dimension_numbers = #tpu.dot_dimension_numbers<[1], [0], [0], [1], [0, 0, 1, 1], [], []>} : vector<64x32xbf16>, vector<32x32xbf16>, vector<64x32xf32> -> vector<64x32xf32>
    %17 = arith.addf %10, %16 : vector<64x32xf32>
    %c0_16 = arith.constant 0 : index
    %c0_17 = arith.constant 0 : index
    %c0_18 = arith.constant 0 : index
    %c2 = arith.constant 2 : index
    %c0_19 = arith.constant 0 : index
    %18 = vector.load %arg3[%c0_16, %c0_17, %c0_18, %c2, %c0_19] : memref<1x1x10x10x32xbf16, #tpu.memory_space<vmem>>, vector<1x1x8x8x32xbf16>
    %19 = vector.shape_cast %18 : vector<1x1x8x8x32xbf16> to vector<8x8x32xbf16>
    %20 = vector.shape_cast %19 : vector<8x8x32xbf16> to vector<64x32xbf16>
    %c0_20 = arith.constant 0 : index
    %c64 = arith.constant 64 : index
    %c0_21 = arith.constant 0 : index
    %21 = vector.load %arg5[%c0_20, %c64, %c0_21] : memref<1x288x32xbf16, #tpu.memory_space<vmem>>, vector<1x32x32xbf16>
    %22 = vector.shape_cast %21 : vector<1x32x32xbf16> to vector<32x32xbf16>
    %cst_22 = arith.constant dense<0.000000e+00> : vector<64x32xf32>
    %23 = tpu.matmul %20, %22, %cst_22 {dimension_numbers = #tpu.dot_dimension_numbers<[1], [0], [0], [1], [0, 0, 1, 1], [], []>} : vector<64x32xbf16>, vector<32x32xbf16>, vector<64x32xf32> -> vector<64x32xf32>
    %24 = arith.addf %17, %23 : vector<64x32xf32>
    %c0_23 = arith.constant 0 : index
    %c0_24 = arith.constant 0 : index
    %c1_25 = arith.constant 1 : index
    %c0_26 = arith.constant 0 : index
    %c0_27 = arith.constant 0 : index
    %25 = vector.load %arg3[%c0_23, %c0_24, %c1_25, %c0_26, %c0_27] : memref<1x1x10x10x32xbf16, #tpu.memory_space<vmem>>, vector<1x1x8x8x32xbf16>
    %26 = vector.shape_cast %25 : vector<1x1x8x8x32xbf16> to vector<8x8x32xbf16>
    %27 = vector.shape_cast %26 : vector<8x8x32xbf16> to vector<64x32xbf16>
    %c0_28 = arith.constant 0 : index
    %c96 = arith.constant 96 : index
    %c0_29 = arith.constant 0 : index
    %28 = vector.load %arg5[%c0_28, %c96, %c0_29] : memref<1x288x32xbf16, #tpu.memory_space<vmem>>, vector<1x32x32xbf16>
    %29 = vector.shape_cast %28 : vector<1x32x32xbf16> to vector<32x32xbf16>
    %cst_30 = arith.constant dense<0.000000e+00> : vector<64x32xf32>
    %30 = tpu.matmul %27, %29, %cst_30 {dimension_numbers = #tpu.dot_dimension_numbers<[1], [0], [0], [1], [0, 0, 1, 1], [], []>} : vector<64x32xbf16>, vector<32x32xbf16>, vector<64x32xf32> -> vector<64x32xf32>
    %31 = arith.addf %24, %30 : vector<64x32xf32>
    %c0_31 = arith.constant 0 : index
    %c0_32 = arith.constant 0 : index
    %c1_33 = arith.constant 1 : index
    %c1_34 = arith.constant 1 : index
    %c0_35 = arith.constant 0 : index
    %32 = vector.load %arg3[%c0_31, %c0_32, %c1_33, %c1_34, %c0_35] : memref<1x1x10x10x32xbf16, #tpu.memory_space<vmem>>, vector<1x1x8x8x32xbf16>
    %33 = vector.shape_cast %32 : vector<1x1x8x8x32xbf16> to vector<8x8x32xbf16>
    %34 = vector.shape_cast %33 : vector<8x8x32xbf16> to vector<64x32xbf16>
    %c0_36 = arith.constant 0 : index
    %c128 = arith.constant 128 : index
    %c0_37 = arith.constant 0 : index
    %35 = vector.load %arg5[%c0_36, %c128, %c0_37] : memref<1x288x32xbf16, #tpu.memory_space<vmem>>, vector<1x32x32xbf16>
    %36 = vector.shape_cast %35 : vector<1x32x32xbf16> to vector<32x32xbf16>
    %cst_38 = arith.constant dense<0.000000e+00> : vector<64x32xf32>
    %37 = tpu.matmul %34, %36, %cst_38 {dimension_numbers = #tpu.dot_dimension_numbers<[1], [0], [0], [1], [0, 0, 1, 1], [], []>} : vector<64x32xbf16>, vector<32x32xbf16>, vector<64x32xf32> -> vector<64x32xf32>
    %38 = arith.addf %31, %37 : vector<64x32xf32>
    %c0_39 = arith.constant 0 : index
    %c0_40 = arith.constant 0 : index
    %c1_41 = arith.constant 1 : index
    %c2_42 = arith.constant 2 : index
    %c0_43 = arith.constant 0 : index
    %39 = vector.load %arg3[%c0_39, %c0_40, %c1_41, %c2_42, %c0_43] : memref<1x1x10x10x32xbf16, #tpu.memory_space<vmem>>, vector<1x1x8x8x32xbf16>
    %40 = vector.shape_cast %39 : vector<1x1x8x8x32xbf16> to vector<8x8x32xbf16>
    %41 = vector.shape_cast %40 : vector<8x8x32xbf16> to vector<64x32xbf16>
    %c0_44 = arith.constant 0 : index
    %c160 = arith.constant 160 : index
    %c0_45 = arith.constant 0 : index
    %42 = vector.load %arg5[%c0_44, %c160, %c0_45] : memref<1x288x32xbf16, #tpu.memory_space<vmem>>, vector<1x32x32xbf16>
    %43 = vector.shape_cast %42 : vector<1x32x32xbf16> to vector<32x32xbf16>
    %cst_46 = arith.constant dense<0.000000e+00> : vector<64x32xf32>
    %44 = tpu.matmul %41, %43, %cst_46 {dimension_numbers = #tpu.dot_dimension_numbers<[1], [0], [0], [1], [0, 0, 1, 1], [], []>} : vector<64x32xbf16>, vector<32x32xbf16>, vector<64x32xf32> -> vector<64x32xf32>
    %45 = arith.addf %38, %44 : vector<64x32xf32>
    %c0_47 = arith.constant 0 : index
    %c0_48 = arith.constant 0 : index
    %c2_49 = arith.constant 2 : index
    %c0_50 = arith.constant 0 : index
    %c0_51 = arith.constant 0 : index
    %46 = vector.load %arg3[%c0_47, %c0_48, %c2_49, %c0_50, %c0_51] : memref<1x1x10x10x32xbf16, #tpu.memory_space<vmem>>, vector<1x1x8x8x32xbf16>
    %47 = vector.shape_cast %46 : vector<1x1x8x8x32xbf16> to vector<8x8x32xbf16>
    %48 = vector.shape_cast %47 : vector<8x8x32xbf16> to vector<64x32xbf16>
    %c0_52 = arith.constant 0 : index
    %c192 = arith.constant 192 : index
    %c0_53 = arith.constant 0 : index
    %49 = vector.load %arg5[%c0_52, %c192, %c0_53] : memref<1x288x32xbf16, #tpu.memory_space<vmem>>, vector<1x32x32xbf16>
    %50 = vector.shape_cast %49 : vector<1x32x32xbf16> to vector<32x32xbf16>
    %cst_54 = arith.constant dense<0.000000e+00> : vector<64x32xf32>
    %51 = tpu.matmul %48, %50, %cst_54 {dimension_numbers = #tpu.dot_dimension_numbers<[1], [0], [0], [1], [0, 0, 1, 1], [], []>} : vector<64x32xbf16>, vector<32x32xbf16>, vector<64x32xf32> -> vector<64x32xf32>
    %52 = arith.addf %45, %51 : vector<64x32xf32>
    %c0_55 = arith.constant 0 : index
    %c0_56 = arith.constant 0 : index
    %c2_57 = arith.constant 2 : index
    %c1_58 = arith.constant 1 : index
    %c0_59 = arith.constant 0 : index
    %53 = vector.load %arg3[%c0_55, %c0_56, %c2_57, %c1_58, %c0_59] : memref<1x1x10x10x32xbf16, #tpu.memory_space<vmem>>, vector<1x1x8x8x32xbf16>
    %54 = vector.shape_cast %53 : vector<1x1x8x8x32xbf16> to vector<8x8x32xbf16>
    %55 = vector.shape_cast %54 : vector<8x8x32xbf16> to vector<64x32xbf16>
    %c0_60 = arith.constant 0 : index
    %c224 = arith.constant 224 : index
    %c0_61 = arith.constant 0 : index
    %56 = vector.load %arg5[%c0_60, %c224, %c0_61] : memref<1x288x32xbf16, #tpu.memory_space<vmem>>, vector<1x32x32xbf16>
    %57 = vector.shape_cast %56 : vector<1x32x32xbf16> to vector<32x32xbf16>
    %cst_62 = arith.constant dense<0.000000e+00> : vector<64x32xf32>
    %58 = tpu.matmul %55, %57, %cst_62 {dimension_numbers = #tpu.dot_dimension_numbers<[1], [0], [0], [1], [0, 0, 1, 1], [], []>} : vector<64x32xbf16>, vector<32x32xbf16>, vector<64x32xf32> -> vector<64x32xf32>
    %59 = arith.addf %52, %58 : vector<64x32xf32>
    %c0_63 = arith.constant 0 : index
    %c0_64 = arith.constant 0 : index
    %c2_65 = arith.constant 2 : index
    %c2_66 = arith.constant 2 : index
    %c0_67 = arith.constant 0 : index
    %60 = vector.load %arg3[%c0_63, %c0_64, %c2_65, %c2_66, %c0_67] : memref<1x1x10x10x32xbf16, #tpu.memory_space<vmem>>, vector<1x1x8x8x32xbf16>
    %61 = vector.shape_cast %60 : vector<1x1x8x8x32xbf16> to vector<8x8x32xbf16>
    %62 = vector.shape_cast %61 : vector<8x8x32xbf16> to vector<64x32xbf16>
    %c0_68 = arith.constant 0 : index
    %c256 = arith.constant 256 : index
    %c0_69 = arith.constant 0 : index
    %63 = vector.load %arg5[%c0_68, %c256, %c0_69] : memref<1x288x32xbf16, #tpu.memory_space<vmem>>, vector<1x32x32xbf16>
    %64 = vector.shape_cast %63 : vector<1x32x32xbf16> to vector<32x32xbf16>
    %cst_70 = arith.constant dense<0.000000e+00> : vector<64x32xf32>
    %65 = tpu.matmul %62, %64, %cst_70 {dimension_numbers = #tpu.dot_dimension_numbers<[1], [0], [0], [1], [0, 0, 1, 1], [], []>} : vector<64x32xbf16>, vector<32x32xbf16>, vector<64x32xf32> -> vector<64x32xf32>
    %66 = arith.addf %59, %65 : vector<64x32xf32>
    %c0_71 = arith.constant 0 : index
    %c0_72 = arith.constant 0 : index
    %c0_73 = arith.constant 0 : index
    %c0_74 = arith.constant 0 : index
    %c0_75 = arith.constant 0 : index
    %67 = vector.load %arg4[%c0_71, %c0_72, %c0_73, %c0_74, %c0_75] : memref<1x1x10x10x32xbf16, #tpu.memory_space<vmem>>, vector<1x1x8x8x32xbf16>
    %68 = vector.shape_cast %67 : vector<1x1x8x8x32xbf16> to vector<8x8x32xbf16>
    %69 = vector.shape_cast %68 : vector<8x8x32xbf16> to vector<64x32xbf16>
    %c0_76 = arith.constant 0 : index
    %c0_77 = arith.constant 0 : index
    %c0_78 = arith.constant 0 : index
    %70 = vector.load %arg6[%c0_76, %c0_77, %c0_78] : memref<1x288x32xbf16, #tpu.memory_space<vmem>>, vector<1x32x32xbf16>
    %71 = vector.shape_cast %70 : vector<1x32x32xbf16> to vector<32x32xbf16>
    %cst_79 = arith.constant dense<0.000000e+00> : vector<64x32xf32>
    %72 = tpu.matmul %69, %71, %cst_79 {dimension_numbers = #tpu.dot_dimension_numbers<[1], [0], [0], [1], [0, 0, 1, 1], [], []>} : vector<64x32xbf16>, vector<32x32xbf16>, vector<64x32xf32> -> vector<64x32xf32>
    %73 = arith.addf %66, %72 : vector<64x32xf32>
    %c0_80 = arith.constant 0 : index
    %c0_81 = arith.constant 0 : index
    %c0_82 = arith.constant 0 : index
    %c1_83 = arith.constant 1 : index
    %c0_84 = arith.constant 0 : index
    %74 = vector.load %arg4[%c0_80, %c0_81, %c0_82, %c1_83, %c0_84] : memref<1x1x10x10x32xbf16, #tpu.memory_space<vmem>>, vector<1x1x8x8x32xbf16>
    %75 = vector.shape_cast %74 : vector<1x1x8x8x32xbf16> to vector<8x8x32xbf16>
    %76 = vector.shape_cast %75 : vector<8x8x32xbf16> to vector<64x32xbf16>
    %c0_85 = arith.constant 0 : index
    %c32_86 = arith.constant 32 : index
    %c0_87 = arith.constant 0 : index
    %77 = vector.load %arg6[%c0_85, %c32_86, %c0_87] : memref<1x288x32xbf16, #tpu.memory_space<vmem>>, vector<1x32x32xbf16>
    %78 = vector.shape_cast %77 : vector<1x32x32xbf16> to vector<32x32xbf16>
    %cst_88 = arith.constant dense<0.000000e+00> : vector<64x32xf32>
    %79 = tpu.matmul %76, %78, %cst_88 {dimension_numbers = #tpu.dot_dimension_numbers<[1], [0], [0], [1], [0, 0, 1, 1], [], []>} : vector<64x32xbf16>, vector<32x32xbf16>, vector<64x32xf32> -> vector<64x32xf32>
    %80 = arith.addf %73, %79 : vector<64x32xf32>
    %c0_89 = arith.constant 0 : index
    %c0_90 = arith.constant 0 : index
    %c0_91 = arith.constant 0 : index
    %c2_92 = arith.constant 2 : index
    %c0_93 = arith.constant 0 : index
    %81 = vector.load %arg4[%c0_89, %c0_90, %c0_91, %c2_92, %c0_93] : memref<1x1x10x10x32xbf16, #tpu.memory_space<vmem>>, vector<1x1x8x8x32xbf16>
    %82 = vector.shape_cast %81 : vector<1x1x8x8x32xbf16> to vector<8x8x32xbf16>
    %83 = vector.shape_cast %82 : vector<8x8x32xbf16> to vector<64x32xbf16>
    %c0_94 = arith.constant 0 : index
    %c64_95 = arith.constant 64 : index
    %c0_96 = arith.constant 0 : index
    %84 = vector.load %arg6[%c0_94, %c64_95, %c0_96] : memref<1x288x32xbf16, #tpu.memory_space<vmem>>, vector<1x32x32xbf16>
    %85 = vector.shape_cast %84 : vector<1x32x32xbf16> to vector<32x32xbf16>
    %cst_97 = arith.constant dense<0.000000e+00> : vector<64x32xf32>
    %86 = tpu.matmul %83, %85, %cst_97 {dimension_numbers = #tpu.dot_dimension_numbers<[1], [0], [0], [1], [0, 0, 1, 1], [], []>} : vector<64x32xbf16>, vector<32x32xbf16>, vector<64x32xf32> -> vector<64x32xf32>
    %87 = arith.addf %80, %86 : vector<64x32xf32>
    %c0_98 = arith.constant 0 : index
    %c0_99 = arith.constant 0 : index
    %c1_100 = arith.constant 1 : index
    %c0_101 = arith.constant 0 : index
    %c0_102 = arith.constant 0 : index
    %88 = vector.load %arg4[%c0_98, %c0_99, %c1_100, %c0_101, %c0_102] : memref<1x1x10x10x32xbf16, #tpu.memory_space<vmem>>, vector<1x1x8x8x32xbf16>
    %89 = vector.shape_cast %88 : vector<1x1x8x8x32xbf16> to vector<8x8x32xbf16>
    %90 = vector.shape_cast %89 : vector<8x8x32xbf16> to vector<64x32xbf16>
    %c0_103 = arith.constant 0 : index
    %c96_104 = arith.constant 96 : index
    %c0_105 = arith.constant 0 : index
    %91 = vector.load %arg6[%c0_103, %c96_104, %c0_105] : memref<1x288x32xbf16, #tpu.memory_space<vmem>>, vector<1x32x32xbf16>
    %92 = vector.shape_cast %91 : vector<1x32x32xbf16> to vector<32x32xbf16>
    %cst_106 = arith.constant dense<0.000000e+00> : vector<64x32xf32>
    %93 = tpu.matmul %90, %92, %cst_106 {dimension_numbers = #tpu.dot_dimension_numbers<[1], [0], [0], [1], [0, 0, 1, 1], [], []>} : vector<64x32xbf16>, vector<32x32xbf16>, vector<64x32xf32> -> vector<64x32xf32>
    %94 = arith.addf %87, %93 : vector<64x32xf32>
    %c0_107 = arith.constant 0 : index
    %c0_108 = arith.constant 0 : index
    %c1_109 = arith.constant 1 : index
    %c1_110 = arith.constant 1 : index
    %c0_111 = arith.constant 0 : index
    %95 = vector.load %arg4[%c0_107, %c0_108, %c1_109, %c1_110, %c0_111] : memref<1x1x10x10x32xbf16, #tpu.memory_space<vmem>>, vector<1x1x8x8x32xbf16>
    %96 = vector.shape_cast %95 : vector<1x1x8x8x32xbf16> to vector<8x8x32xbf16>
    %97 = vector.shape_cast %96 : vector<8x8x32xbf16> to vector<64x32xbf16>
    %c0_112 = arith.constant 0 : index
    %c128_113 = arith.constant 128 : index
    %c0_114 = arith.constant 0 : index
    %98 = vector.load %arg6[%c0_112, %c128_113, %c0_114] : memref<1x288x32xbf16, #tpu.memory_space<vmem>>, vector<1x32x32xbf16>
    %99 = vector.shape_cast %98 : vector<1x32x32xbf16> to vector<32x32xbf16>
    %cst_115 = arith.constant dense<0.000000e+00> : vector<64x32xf32>
    %100 = tpu.matmul %97, %99, %cst_115 {dimension_numbers = #tpu.dot_dimension_numbers<[1], [0], [0], [1], [0, 0, 1, 1], [], []>} : vector<64x32xbf16>, vector<32x32xbf16>, vector<64x32xf32> -> vector<64x32xf32>
    %101 = arith.addf %94, %100 : vector<64x32xf32>
    %c0_116 = arith.constant 0 : index
    %c0_117 = arith.constant 0 : index
    %c1_118 = arith.constant 1 : index
    %c2_119 = arith.constant 2 : index
    %c0_120 = arith.constant 0 : index
    %102 = vector.load %arg4[%c0_116, %c0_117, %c1_118, %c2_119, %c0_120] : memref<1x1x10x10x32xbf16, #tpu.memory_space<vmem>>, vector<1x1x8x8x32xbf16>
    %103 = vector.shape_cast %102 : vector<1x1x8x8x32xbf16> to vector<8x8x32xbf16>
    %104 = vector.shape_cast %103 : vector<8x8x32xbf16> to vector<64x32xbf16>
    %c0_121 = arith.constant 0 : index
    %c160_122 = arith.constant 160 : index
    %c0_123 = arith.constant 0 : index
    %105 = vector.load %arg6[%c0_121, %c160_122, %c0_123] : memref<1x288x32xbf16, #tpu.memory_space<vmem>>, vector<1x32x32xbf16>
    %106 = vector.shape_cast %105 : vector<1x32x32xbf16> to vector<32x32xbf16>
    %cst_124 = arith.constant dense<0.000000e+00> : vector<64x32xf32>
    %107 = tpu.matmul %104, %106, %cst_124 {dimension_numbers = #tpu.dot_dimension_numbers<[1], [0], [0], [1], [0, 0, 1, 1], [], []>} : vector<64x32xbf16>, vector<32x32xbf16>, vector<64x32xf32> -> vector<64x32xf32>
    %108 = arith.addf %101, %107 : vector<64x32xf32>
    %c0_125 = arith.constant 0 : index
    %c0_126 = arith.constant 0 : index
    %c2_127 = arith.constant 2 : index
    %c0_128 = arith.constant 0 : index
    %c0_129 = arith.constant 0 : index
    %109 = vector.load %arg4[%c0_125, %c0_126, %c2_127, %c0_128, %c0_129] : memref<1x1x10x10x32xbf16, #tpu.memory_space<vmem>>, vector<1x1x8x8x32xbf16>
    %110 = vector.shape_cast %109 : vector<1x1x8x8x32xbf16> to vector<8x8x32xbf16>
    %111 = vector.shape_cast %110 : vector<8x8x32xbf16> to vector<64x32xbf16>
    %c0_130 = arith.constant 0 : index
    %c192_131 = arith.constant 192 : index
    %c0_132 = arith.constant 0 : index
    %112 = vector.load %arg6[%c0_130, %c192_131, %c0_132] : memref<1x288x32xbf16, #tpu.memory_space<vmem>>, vector<1x32x32xbf16>
    %113 = vector.shape_cast %112 : vector<1x32x32xbf16> to vector<32x32xbf16>
    %cst_133 = arith.constant dense<0.000000e+00> : vector<64x32xf32>
    %114 = tpu.matmul %111, %113, %cst_133 {dimension_numbers = #tpu.dot_dimension_numbers<[1], [0], [0], [1], [0, 0, 1, 1], [], []>} : vector<64x32xbf16>, vector<32x32xbf16>, vector<64x32xf32> -> vector<64x32xf32>
    %115 = arith.addf %108, %114 : vector<64x32xf32>
    %c0_134 = arith.constant 0 : index
    %c0_135 = arith.constant 0 : index
    %c2_136 = arith.constant 2 : index
    %c1_137 = arith.constant 1 : index
    %c0_138 = arith.constant 0 : index
    %116 = vector.load %arg4[%c0_134, %c0_135, %c2_136, %c1_137, %c0_138] : memref<1x1x10x10x32xbf16, #tpu.memory_space<vmem>>, vector<1x1x8x8x32xbf16>
    %117 = vector.shape_cast %116 : vector<1x1x8x8x32xbf16> to vector<8x8x32xbf16>
    %118 = vector.shape_cast %117 : vector<8x8x32xbf16> to vector<64x32xbf16>
    %c0_139 = arith.constant 0 : index
    %c224_140 = arith.constant 224 : index
    %c0_141 = arith.constant 0 : index
    %119 = vector.load %arg6[%c0_139, %c224_140, %c0_141] : memref<1x288x32xbf16, #tpu.memory_space<vmem>>, vector<1x32x32xbf16>
    %120 = vector.shape_cast %119 : vector<1x32x32xbf16> to vector<32x32xbf16>
    %cst_142 = arith.constant dense<0.000000e+00> : vector<64x32xf32>
    %121 = tpu.matmul %118, %120, %cst_142 {dimension_numbers = #tpu.dot_dimension_numbers<[1], [0], [0], [1], [0, 0, 1, 1], [], []>} : vector<64x32xbf16>, vector<32x32xbf16>, vector<64x32xf32> -> vector<64x32xf32>
    %122 = arith.addf %115, %121 : vector<64x32xf32>
    %c0_143 = arith.constant 0 : index
    %c0_144 = arith.constant 0 : index
    %c2_145 = arith.constant 2 : index
    %c2_146 = arith.constant 2 : index
    %c0_147 = arith.constant 0 : index
    %123 = vector.load %arg4[%c0_143, %c0_144, %c2_145, %c2_146, %c0_147] : memref<1x1x10x10x32xbf16, #tpu.memory_space<vmem>>, vector<1x1x8x8x32xbf16>
    %124 = vector.shape_cast %123 : vector<1x1x8x8x32xbf16> to vector<8x8x32xbf16>
    %125 = vector.shape_cast %124 : vector<8x8x32xbf16> to vector<64x32xbf16>
    %c0_148 = arith.constant 0 : index
    %c256_149 = arith.constant 256 : index
    %c0_150 = arith.constant 0 : index
    %126 = vector.load %arg6[%c0_148, %c256_149, %c0_150] : memref<1x288x32xbf16, #tpu.memory_space<vmem>>, vector<1x32x32xbf16>
    %127 = vector.shape_cast %126 : vector<1x32x32xbf16> to vector<32x32xbf16>
    %cst_151 = arith.constant dense<0.000000e+00> : vector<64x32xf32>
    %128 = tpu.matmul %125, %127, %cst_151 {dimension_numbers = #tpu.dot_dimension_numbers<[1], [0], [0], [1], [0, 0, 1, 1], [], []>} : vector<64x32xbf16>, vector<32x32xbf16>, vector<64x32xf32> -> vector<64x32xf32>
    %129 = arith.addf %122, %128 : vector<64x32xf32>
    %c0_152 = arith.constant 0 : index
    %c0_153 = arith.constant 0 : index
    %130 = vector.load %arg10[%c0_152, %c0_153] : memref<64x32xf32, #tpu.memory_space<vmem>>, vector<64x32xf32>
    %131 = arith.addf %130, %129 : vector<64x32xf32>
    %c0_154 = arith.constant 0 : index
    %c0_155 = arith.constant 0 : index
    %132 = vector.load %arg10[%c0_154, %c0_155] : memref<64x32xf32, #tpu.memory_space<vmem>>, vector<64x32xf32>
    tpu.vector_store %arg10[%c0_154, %c0_155], %131 {strides = array<i32>} : memref<64x32xf32, #tpu.memory_space<vmem>>, vector<64x32xf32>,
    %c2_i32 = arith.constant 2 : i32
    %133 = arith.cmpi eq, %arg2, %c2_i32 : i32
    %134 = arith.extui %133 : i1 to i32
    %c0_i32_156 = arith.constant 0 : i32
    %135 = arith.cmpi ne, %134, %c0_i32_156 : i32
    scf.if %135 {
      %c0_157 = arith.constant 0 : index
      %c0_158 = arith.constant 0 : index
      %136 = vector.load %arg10[%c0_157, %c0_158] : memref<64x32xf32, #tpu.memory_space<vmem>>, vector<64x32xf32>
      %c0_159 = arith.constant 0 : index
      %c0_160 = arith.constant 0 : index
      %137 = vector.load %arg7[%c0_159, %c0_160] : memref<1x32xf32, #tpu.memory_space<vmem>>, vector<1x32xf32>
      %138 = vector.broadcast %137 : vector<1x32xf32> to vector<64x32xf32>
      %139 = arith.mulf %136, %138 : vector<64x32xf32>
      %c0_161 = arith.constant 0 : index
      %c0_162 = arith.constant 0 : index
      %140 = vector.load %arg8[%c0_161, %c0_162] : memref<1x32xf32, #tpu.memory_space<vmem>>, vector<1x32xf32>
      %141 = vector.broadcast %140 : vector<1x32xf32> to vector<64x32xf32>
      %142 = arith.addf %139, %141 : vector<64x32xf32>
      %cst_163 = arith.constant 0.000000e+00 : f32
      %143 = vector.broadcast %cst_163 : f32 to vector<64x32xf32>
      %144 = arith.maximumf %142, %143 : vector<64x32xf32>
      %145 = vector.shape_cast %144 : vector<64x32xf32> to vector<1x8x8x32xf32>
      %146 = arith.truncf %145 : vector<1x8x8x32xf32> to vector<1x8x8x32xbf16>
      %c0_164 = arith.constant 0 : index
      %c0_165 = arith.constant 0 : index
      %c0_166 = arith.constant 0 : index
      %c0_167 = arith.constant 0 : index
      %147 = vector.load %arg9[%c0_164, %c0_165, %c0_166, %c0_167] : memref<1x8x8x32xbf16, #tpu.memory_space<vmem>>, vector<1x8x8x32xbf16>
      tpu.vector_store %arg9[%c0_164, %c0_165, %c0_166, %c0_167], %146 {strides = array<i32>} : memref<1x8x8x32xbf16, #tpu.memory_space<vmem>>, vector<1x8x8x32xbf16>,
    } else {
    }
    return
  }
  func.func @transform_0(%arg0: i32, %arg1: i32, %arg2: i32) -> (i32, i32, i32, i32, i32) {
    %c10_i32 = arith.constant 10 : i32
    %0 = arith.muli %arg0, %c10_i32 : i32
    %c1_i32 = arith.constant 1 : i32
    %1 = arith.muli %c1_i32, %arg1 : i32
    %2 = arith.addi %0, %1 : i32
    %3 = arith.addi %2, %arg2 : i32
    %c0_i32 = arith.constant 0 : i32
    %c0_i32_0 = arith.constant 0 : i32
    %c0_i32_1 = arith.constant 0 : i32
    %c0_i32_2 = arith.constant 0 : i32
    %c0_i32_3 = arith.constant 0 : i32
    return %3, %c0_i32, %c0_i32_0, %c0_i32_1, %c0_i32_2 : i32, i32, i32, i32, i32
  }
  func.func @transform_1(%arg0: i32, %arg1: i32, %arg2: i32) -> (i32, i32, i32, i32, i32) {
    %c10_i32 = arith.constant 10 : i32
    %0 = arith.muli %arg0, %c10_i32 : i32
    %c1_i32 = arith.constant 1 : i32
    %1 = arith.muli %c1_i32, %arg1 : i32
    %2 = arith.addi %0, %1 : i32
    %3 = arith.addi %2, %arg2 : i32
    %c0_i32 = arith.constant 0 : i32
    %c0_i32_0 = arith.constant 0 : i32
    %c0_i32_1 = arith.constant 0 : i32
    %c0_i32_2 = arith.constant 0 : i32
    %c0_i32_3 = arith.constant 0 : i32
    return %3, %c0_i32, %c0_i32_0, %c0_i32_1, %c0_i32_2 : i32, i32, i32, i32, i32
  }
  func.func @transform_2(%arg0: i32, %arg1: i32, %arg2: i32) -> (i32, i32, i32) {
    %c0_i32 = arith.constant 0 : i32
    %c0_i32_0 = arith.constant 0 : i32
    %c0_i32_1 = arith.constant 0 : i32
    return %arg2, %c0_i32, %c0_i32_0 : i32, i32, i32
  }
  func.func @transform_3(%arg0: i32, %arg1: i32, %arg2: i32) -> (i32, i32, i32) {
    %c0_i32 = arith.constant 0 : i32
    %c0_i32_0 = arith.constant 0 : i32
    %c0_i32_1 = arith.constant 0 : i32
    return %arg2, %c0_i32, %c0_i32_0 : i32, i32, i32
  }
  func.func @transform_4(%arg0: i32, %arg1: i32, %arg2: i32) -> (i32, i32) {
    %c0_i32 = arith.constant 0 : i32
    %c0_i32_0 = arith.constant 0 : i32
    %c0_i32_1 = arith.constant 0 : i32
    return %c0_i32, %c0_i32_0 : i32, i32
  }
  func.func @transform_5(%arg0: i32, %arg1: i32, %arg2: i32) -> (i32, i32) {
    %c0_i32 = arith.constant 0 : i32
    %c0_i32_0 = arith.constant 0 : i32
    %c0_i32_1 = arith.constant 0 : i32
    return %c0_i32, %c0_i32_0 : i32, i32
  }
  func.func @transform_6(%arg0: i32, %arg1: i32, %arg2: i32) -> (i32, i32, i32, i32) {
    %c8_i32 = arith.constant 8 : i32
    %0 = arith.muli %arg0, %c8_i32 : i32
    %1 = arith.addi %0, %arg1 : i32
    %c0_i32 = arith.constant 0 : i32
    %c0_i32_0 = arith.constant 0 : i32
    %c0_i32_1 = arith.constant 0 : i32
    %c0_i32_2 = arith.constant 0 : i32
    return %1, %c0_i32, %c0_i32_0, %c0_i32_1 : i32, i32, i32, i32
  }
}

module attributes {stable_mosaic.version = 11 : i64} {
  func.func @_rowmm_kernel(%arg0: i32, %arg1: memref<1x8x8x32xbf16, #tpu.memory_space<vmem>>, %arg2: memref<32x3xbf16, #tpu.memory_space<vmem>>, %arg3: memref<1x3xf32, #tpu.memory_space<vmem>>, %arg4: memref<1x8x8x3xf32, #tpu.memory_space<vmem>>) attributes {dimension_semantics = [#tpu.dimension_semantics<parallel>], iteration_bounds = array<i64: 8>, scalar_prefetch = 0 : i64, scratch_operands = 0 : i64, tpu.core_type = #tpu.core_type<tc>, window_params = [{transform_indices = @transform_0, window_bounds = array<i64: 1, 8, 8, 32>}, {pipeline_mode = #tpu.pipeline_mode<synchronous>, transform_indices = @transform_1, window_bounds = array<i64: 32, 3>}, {pipeline_mode = #tpu.pipeline_mode<synchronous>, transform_indices = @transform_2, window_bounds = array<i64: 1, 3>}, {transform_indices = @transform_3, window_bounds = array<i64: 1, 8, 8, 3>}]} {
    %c0 = arith.constant 0 : index
    %c0_0 = arith.constant 0 : index
    %c0_1 = arith.constant 0 : index
    %c0_2 = arith.constant 0 : index
    %0 = vector.load %arg1[%c0, %c0_0, %c0_1, %c0_2] : memref<1x8x8x32xbf16, #tpu.memory_space<vmem>>, vector<1x8x8x32xbf16>
    %1 = vector.shape_cast %0 : vector<1x8x8x32xbf16> to vector<64x32xbf16>
    %c0_3 = arith.constant 0 : index
    %c0_4 = arith.constant 0 : index
    %2 = vector.load %arg2[%c0_3, %c0_4] : memref<32x3xbf16, #tpu.memory_space<vmem>>, vector<32x3xbf16>
    %cst = arith.constant dense<0.000000e+00> : vector<64x3xf32>
    %3 = tpu.matmul %1, %2, %cst {dimension_numbers = #tpu.dot_dimension_numbers<[1], [0], [0], [1], [0, 0, 1, 1], [], []>} : vector<64x32xbf16>, vector<32x3xbf16>, vector<64x3xf32> -> vector<64x3xf32>
    %c0_5 = arith.constant 0 : index
    %c0_6 = arith.constant 0 : index
    %4 = vector.load %arg3[%c0_5, %c0_6] : memref<1x3xf32, #tpu.memory_space<vmem>>, vector<1x3xf32>
    %5 = vector.broadcast %4 : vector<1x3xf32> to vector<64x3xf32>
    %6 = arith.addf %3, %5 : vector<64x3xf32>
    %7 = vector.shape_cast %6 : vector<64x3xf32> to vector<1x8x8x3xf32>
    %c0_7 = arith.constant 0 : index
    %c0_8 = arith.constant 0 : index
    %c0_9 = arith.constant 0 : index
    %c0_10 = arith.constant 0 : index
    %8 = vector.load %arg4[%c0_7, %c0_8, %c0_9, %c0_10] : memref<1x8x8x3xf32, #tpu.memory_space<vmem>>, vector<1x8x8x3xf32>
    tpu.vector_store %arg4[%c0_7, %c0_8, %c0_9, %c0_10], %7 {strides = array<i32>} : memref<1x8x8x3xf32, #tpu.memory_space<vmem>>, vector<1x8x8x3xf32>,
    return
  }
  func.func @transform_0(%arg0: i32) -> (i32, i32, i32, i32) {
    %c0_i32 = arith.constant 0 : i32
    %c0_i32_0 = arith.constant 0 : i32
    %c0_i32_1 = arith.constant 0 : i32
    %c0_i32_2 = arith.constant 0 : i32
    return %arg0, %c0_i32, %c0_i32_0, %c0_i32_1 : i32, i32, i32, i32
  }
  func.func @transform_1(%arg0: i32) -> (i32, i32) {
    %c0_i32 = arith.constant 0 : i32
    %c0_i32_0 = arith.constant 0 : i32
    %c0_i32_1 = arith.constant 0 : i32
    return %c0_i32, %c0_i32_0 : i32, i32
  }
  func.func @transform_2(%arg0: i32) -> (i32, i32) {
    %c0_i32 = arith.constant 0 : i32
    %c0_i32_0 = arith.constant 0 : i32
    %c0_i32_1 = arith.constant 0 : i32
    return %c0_i32, %c0_i32_0 : i32, i32
  }
  func.func @transform_3(%arg0: i32) -> (i32, i32, i32, i32) {
    %c0_i32 = arith.constant 0 : i32
    %c0_i32_0 = arith.constant 0 : i32
    %c0_i32_1 = arith.constant 0 : i32
    %c0_i32_2 = arith.constant 0 : i32
    return %arg0, %c0_i32, %c0_i32_0, %c0_i32_1 : i32, i32, i32, i32
  }
}

</mosaic_0001>

<bundles_post_ra>
// kernel: unet3d_forward.9
= control target key start
LH: loop header
LB: loop body
LE: loop exit
PB: predicated region body
PF: predicated region fallthrough
CT: control target
= control target key end

     0   :  { %s2501_s15 = smov 0   ;;  %s2503_s16 = smov 0   ;;  %s3044_s0 = inlined_call_operand.vmem [shape: bf16[10,1,10,10,2], index: 0, kind: input, shape index: {}]   ;;  %s3045_s1 = inlined_call_operand.vmem [shape: bf16[3,18,32], index: 1, kind: input, shape index: {}]   ;;  %s3046_s2 = inlined_call_operand.vmem [shape: f32[1,32], index: 2, kind: input, shape index: {}]   ;;  %s3047_s3 = inlined_call_operand.vmem [shape: f32[1,32], index: 3, kind: input, shape index: {}]   ;;  %s3048_s4 = inlined_call_operand.vmem [shape: bf16[8,8,8,32], index: 4, kind: output, shape index: {}]  }
   0x1   :  { %s2505_s17 = smov 0   ;;  %s2507_s18 = smov 0  }
   0x2   :  { %s2509_s19 = smov 0  }
   0x3 LB: > { %s26_s20 = sadd.s32 1, %s2465_s17  ;;  %s29_s21 = sadd.s32 1, %s2469_s18  ;;  %s2473_s19 = sphi %s2509_s19, %s14_s19   ;;  %s2469_s18 = sphi %s2507_s18, %s3056_s18   ;;  %s2465_s17 = sphi %s2505_s17, %s3055_s17   ;;  %s2461_s16 = sphi %s2503_s16, %s3054_s16   ;;  %s2457_s15 = sphi %s2501_s15, %s3053_s15  }
   0x4   : > { %p27_p0 = scmp.ge.s32.totalorder %s26_s20, 3  ;;  %p1985_p1 = scmp.ge.s32.totalorder %s2473_s19, 1 }
   0x5   : > { %p207_p2 = scmp.lt.s32.totalorder %s2473_s19, 25 }
   0x6   : > { %s3058_s20 = smov (%p27_p0, %s26_s20), 0  ;;  %s3060_s21 = smov (!%p27_p0, %s29_s21), %s2469_s18 }
   0x7   : > { %p208_p3 = pnand %p1985_p1, %p207_p2  ;;  %p31_p4 = scmp.ge.s32.totalorder %s3060_s21, 8 }
   0x8   : > { %s245_s22 = sadd.s32 (!%p208_p3), %s2457_s15, %s2461_s16  ;;  %p254_p5 = scmp.lt.s32.totalorder (!%p208_p3), %s2457_s15, 2 }
   0x9   : > { %s3062_s21 = smov (%p31_p4, %s3060_s21), 0  ;;  %211 = sbr.rel (%p208_p3) target bundleno = 363 (0x16b), region = 36 }
   0xa   : > { %p246_p6 = scmp.lt.s32.totalorder (!%p208_p3), %s245_s22, 9  ;;  %p261_p7 = scmp.lt.s32.totalorder (!%p208_p3), %s2461_s16, 7 }
   0xb   : > { %p1990_p8 = scmp.ne.s32.totalorder (!%p208_p3), %s2457_s15, 0 }
  0x10   : > { %s255_s23 = scalar_select %p254_p5, %s2457_s15, 2 }
  0x11   : > { %s3064_s22 = smov (!%p246_p6, %s245_s22), 9  ;;  %s3066_s16 = smov (!%p261_p7, %s2461_s16), 7 }
  0x12   : > { %s2375_s24 = smul.u32 12, %s255_s23  ;;  %s2162_s6 = sshll.u32 %s3066_s16, 5  ;;  %vm273_vm0 = vcmask (!%p1990_p8), 261120   ;;  %v2475_v0 = vmov (!%p1990_p8), 0.0  }
  0x13   : > { %s2374_s25 = smul.u32 80, %s3064_s22  ;;  %s2549_s9 = scalar_lea.vmem %s3048_s4, %s2162_s6  ;;  %274 = vst.msk [vmem:[#allocation2] sm:$0xff] (!%p1990_p8), %vm273_vm0, %v2475_v0  ;;  %275 = vst.msk [vmem:[#allocation2 + $0x8] sm:$0xff] (!%p1990_p8), %vm273_vm0, %v2475_v0 }
  0x14   : > { %s2539_s28 = scalar_lea.vmem %s3045_s1, %s2375_s24  ;;  %272 = sbr.rel (%p1990_p8) target bundleno = 27 (0x1b), region = 40  ;;  %276 = vst.msk [vmem:[#allocation2 + $0x10] sm:$0xff] (!%p1990_p8), %vm273_vm0, %v2475_v0  ;;  %277 = vst.msk [vmem:[#allocation2 + $0x18] sm:$0xff] (!%p1990_p8), %vm273_vm0, %v2475_v0 }
  0x15   : > { %s2544_s5 = scalar_lea.vmem %s3044_s0, %s2374_s25  ;;  %278 = vst.msk [vmem:[#allocation2 + $0x20] sm:$0xff] (!%p1990_p8), %vm273_vm0, %v2475_v0  ;;  %279 = vst.msk [vmem:[#allocation2 + $0x28] sm:$0xff] (!%p1990_p8), %vm273_vm0, %v2475_v0 }
  0x16   : > { %280 = vst.msk [vmem:[#allocation2 + $0x30] sm:$0xff] (!%p1990_p8), %vm273_vm0, %v2475_v0  ;;  %281 = vst.msk [vmem:[#allocation2 + $0x38] sm:$0xff] (!%p1990_p8), %vm273_vm0, %v2475_v0 }
  0x1b PF: > { %v2417_v1 = vld [vmem:[%s2539_s28] ss:$0 sps:$4 sm:$0x22]   ;;  %vm444_vm1 = vcmask 1040384   ;;  %v2554_v2 = vld [vmem:[%s2539_s28 + $0x4] sm:$0x1] }
  0x1c   : > { %v2557_v3 = vld [vmem:[%s2544_s5] sm:$0xf]  ;;  %v2560_v4 = vld [vmem:[%s2544_s5 + $0x8] sm:$0xf]  ;;  %v430_v5 = vrot.slane %v2417_v1, 1  ;;  %2368 = vmatprep.subr.msk.bf16.mxu0 %vm444_vm1, %v2554_v2  ;;  %v2566_v6 = vsel %vm444_vm1, %v2554_v2, 0 }
  0x1d   : > { %v2569_v7 = vld [vmem:[%s2544_s5 + $0x4] sm:$0x1]  ;;  %v2572_v8 = vld [vmem:[%s2544_s5 + $0xc] sm:$0x1]  ;;  %2249 = vmatpush3.bf16.msra.mxu0 %v2566_v6  ;;  %vm299_vm2 = vsmask.f32 3328 }
  0x1e   : > { %vm300_vm3 = vsmask.f32 7440  ;;  %v303_v9 = vshrl.u32 %v2557_v3, 16  ;;  %v306_v10 = vshll.u32 %v2557_v3, 16  ;;  %2364 = vmatprep.subr.msk.bf16.mxu1 %vm444_vm1, %v430_v5  ;;  %v446_v11 = vsel %vm444_vm1, %v430_v5, 0  ;;  %v1804_v28 = vld [vmem:[#allocation2 + $0x18] sm:$0xff] }
  0x1f   : > { %v312_v12 = vshll.u32 %v2569_v7, 16  ;;  %v317_v13 = vshrl.u32 %v2560_v4, 16  ;;  %v320_v14 = vshll.u32 %v2560_v4, 16  ;;  %v2583_v15 = vld [vmem:[%s2539_s28] sm:$0x1]  ;;  %2209 = vmatpush3.bf16.msra.mxu1 %v446_v11  ;;  %v326_v18 = vshll.u32 %v2572_v8, 16  ;;  %vm2598_vm5 = vmor %vm299_vm2, %vm300_vm3 }
  0x20   : > { %v305_v16 = vrot.slane %v303_v9, 4  ;;  %v308_v17 = vrot.slane %v306_v10, 5  ;;  %v2042_v19 = vld [vmem:[%s2544_s5 + $0x8] sm:$0xf]  ;;  %vm431_vm4 = vcmask 15360   ;;  %2365 = vmatprep.subr.msk.bf16.mxu1 %vm444_vm1, %v2583_v15  ;;  %vm637_vm6 = vcmask 1042432  }
  0x21   : > { %v319_v20 = vrot.slane %v317_v13, 4  ;;  %v322_v21 = vrot.slane %v320_v14, 5  ;;  %v2590_v22 = vld [vmem:[%s2544_s5 + $0xc] sm:$0x1]  ;;  %v314_v24 = vrot.slane %v312_v12, 5  ;;  %v328_v25 = vrot.slane %v326_v18, 5 }
  0x22   : > { %v309_v23 = vor.u32 %v308_v17, %v305_v16  ;;  %v2044_v26 = vld [vmem:[%s2544_s5 + $0x10] sm:$0xf]  ;;  %v2594_v27 = vld [vmem:[%s2544_s5 + $0x14] sm:$0x1]  ;;  %v916_v30 = vshrl.u32 %v2042_v19, 16  ;;  %v919_v31 = vshll.u32 %v2042_v19, 16 }
  0x23   : > { %v323_v29 = vor.u32 %v322_v21, %v319_v20  ;;  %v925_v32 = vshll.u32 %v2590_v22, 16  ;;  %v930_v34 = vshrl.u32 %v2044_v26, 16  ;;  %v933_v35 = vshll.u32 %v2044_v26, 16  ;;  %v2605_v37 = vld [vmem:[%s2544_s5 + $0x10] sm:$0xf]  ;;  %p2157_p9 = scmp.ne.s32.totalorder %s2457_s15, 2 }
  0x24   : > { %v310_v33 = vrot.slane %v309_v23, 4  ;;  %v939_v36 = vshll.u32 %v2594_v27, 16  ;;  %v918_v39 = vrot.slane %v916_v30, 4  ;;  %v921_v40 = vrot.slane %v919_v31, 5  ;;  %v2608_v42 = vld [vmem:[%s2544_s5 + $0x18] sm:$0xf] }
  0x25   : > { %v324_v38 = vrot.slane %v323_v29, 4  ;;  %v927_v41 = vrot.slane %v925_v32, 5  ;;  %v932_v44 = vrot.slane %v930_v34, 4  ;;  %v935_v45 = vrot.slane %v933_v35, 5  ;;  %v2620_v52 = vld [vmem:[%s2544_s5 + $0x14] sm:$0x1] }
  0x26   : > { %v315_v43 = vsel %vm2598_vm5, %v310_v33, %v314_v24  ;;  %v941_v46 = vrot.slane %v939_v36, 5  ;;  %v2613_v47 = vld [vmem:[%s2539_s28 + $0x4] ss:$0 sps:$4 sm:$0x22]   ;;  %v922_v49 = vor.u32 %v921_v40, %v918_v39  ;;  %v1154_v50 = vrot.slane %v2590_v22, 5 }
  0x27   : > { %v329_v48 = vsel %vm2598_vm5, %v324_v38, %v328_v25  ;;  %v1158_v51 = vrot.slane %v2594_v27, 5  ;;  %v2623_v53 = vld [vmem:[%s2544_s5 + $0x1c] sm:$0x1]  ;;  %v936_v55 = vor.u32 %v935_v45, %v932_v44  ;;  %v1200_v56 = vrot.slane %v2613_v47, 1  ;;  %v2046_v11 = vld [vmem:[%s2544_s5 + $0x18] sm:$0xf] }
  0x28   : > { %v1991_v54 = vcombine.low %v315_v43, %v329_v48  ;;  %v331_v57 = vshrl.u32 %v2605_v37, 16  ;;  %v923_v58 = vrot.slane %v922_v49, 4  ;;  %v334_v59 = vshll.u32 %v2605_v37, 16  ;;  %v2638_v12 = vld [vmem:[%s2544_s5 + $0x1c] sm:$0x1] }
  0x29   : > { %v340_v60 = vshll.u32 %v2620_v52, 16  ;;  %v345_v61 = vshrl.u32 %v2608_v42, 16  ;;  %v937_v62 = vrot.slane %v936_v55, 4  ;;  %2370 = vmatprep.subr.msk.bf16.mxu0 %vm444_vm1, %v1200_v56  ;;  %v348_v0 = vshll.u32 %v2608_v42, 16  ;;  %v2048_v17 = vld [vmem:[%s2544_s5 + $0x20] sm:$0xf] }
  0x2a   : > { %2210 = vmatprep.mubr.msk.bf16.mxu1 %vm431_vm4, %v1991_v54  ;;  %v333_v63 = vrot.slane %v331_v57, 4  ;;  %v354_v1 = vshll.u32 %v2623_v53, 16  ;;  %v928_v5 = vsel %vm2598_vm5, %v923_v58, %v927_v41  ;;  %v336_v9 = vrot.slane %v334_v59, 5  ;;  %v2644_v18 = vld [vmem:[%s2544_s5 + $0x24] sm:$0x1] }
  0x2b   : > { %v347_v10 = vrot.slane %v345_v61, 4  ;;  %v942_v13 = vsel %vm2598_vm5, %v937_v62, %v941_v46  ;;  %v342_v14 = vrot.slane %v340_v60, 5  ;;  %v350_v16 = vrot.slane %v348_v0, 5  ;;  %v2652_v34 = vld [vmem:[%s2544_s5 + $0x20] sm:$0xf] }
  0x2c   : > { %v2058_v19 = vcombine.low %v928_v5, %v942_v13  ;;  %v337_v20 = vor.u32 %v336_v9, %v333_v63  ;;  %v356_v21 = vrot.slane %v354_v1, 5  ;;  %v546_v23 = vsel %vm444_vm1, %v2583_v15, 0  ;;  %v2655_v39 = vld [vmem:[%s2544_s5 + $0x28] sm:$0xf]  ;;  %v2660_v45 = vld [vmem:[%s2544_s5 + $0x24] sm:$0x1] }
  0x2d   : > { %v351_v24 = vor.u32 %v350_v16, %v347_v10  ;;  %v944_v25 = vshrl.u32 %v2046_v11, 16  ;;  %v947_v26 = vshll.u32 %v2046_v11, 16  ;;  %v953_v29 = vshll.u32 %v2638_v12, 16  ;;  %v2667_v54 = vld [vmem:[%s2544_s5 + $0x2c] sm:$0x1] }
  0x2e   : > { %2250 = vmatprep.mubr.msk.bf16.mxu0 %vm431_vm4, %v2058_v19  ;;  %v338_v30 = vrot.slane %v337_v20, 4  ;;  %v958_v31 = vshrl.u32 %v2048_v17, 16  ;;  %v961_v32 = vshll.u32 %v2048_v17, 16  ;;  %v967_v33 = vshll.u32 %v2644_v18, 16  ;;  %v2672_v60 = vld [vmem:[%s2544_s5 + $0x30] sm:$0xf] }
  0x2f   : > { %v352_v35 = vrot.slane %v351_v24, 4  ;;  %v946_v36 = vrot.slane %v944_v25, 4  ;;  %v949_v38 = vrot.slane %v947_v26, 5  ;;  %v955_v15 = vrot.slane %v953_v29, 5  ;;  %v2678_v1 = vld [vmem:[%s2544_s5 + $0x34] sm:$0x1] }
  0x30   : > { %v343_v40 = vsel %vm2598_vm5, %v338_v30, %v342_v14  ;;  %v960_v41 = vrot.slane %v958_v31, 4  ;;  %v963_v43 = vrot.slane %v961_v32, 5  ;;  %v969_v44 = vrot.slane %v967_v33, 5  ;;  %v2686_v17 = vld [vmem:[%s2544_s5 + $0x38] sm:$0xf] }
  0x31   : > { %v357_v46 = vsel %vm2598_vm5, %v352_v35, %v356_v21  ;;  %v950_v47 = vor.u32 %v949_v38, %v946_v36  ;;  %v1162_v48 = vrot.slane %v2638_v12, 5  ;;  %v1166_v49 = vrot.slane %v2644_v18, 5  ;;  %v2691_v24 = vld [vmem:[%s2544_s5 + $0x3c] sm:$0x1]  ;;  %v2066_v31 = vld [vmem:[%s2544_s5 + $0x8] sm:$0xe] }
  0x32   : > { %v1992_v55 = vcombine.low %v343_v40, %v357_v46  ;;  %v964_v57 = vor.u32 %v963_v43, %v960_v41  ;;  %v1214_v58 = vsel %vm444_vm1, %v1200_v56, 0  ;;  %v359_v59 = vshrl.u32 %v2652_v34, 16  ;;  %v2067_v32 = vld [vmem:[%s2544_s5 + $0x10] sm:$0xe]  ;;  %v2068_v46 = vld [vmem:[%s2544_s5 + $0x18] sm:$0xe] }
  0x33   : > { %v951_v61 = vrot.slane %v950_v47, 4  ;;  %v362_v62 = vshll.u32 %v2652_v34, 16  ;;  %v368_v63 = vshll.u32 %v2660_v45, 16  ;;  %v373_v0 = vshrl.u32 %v2655_v39, 16  ;;  %v2744_v27 = vld [vmem:[%s2544_s5 + $0x44] sm:$0x1] }
  0x34   : > { %2211 = vmatmul.mubr.msk.bf16.vlgmr.msra.gmra.mrb[0].mxu1 %vm431_vm4, %v1992_v55  ;;  %v965_v5 = vrot.slane %v964_v57, 4  ;;  %v361_v9 = vrot.slane %v359_v59, 4  ;;  %v376_v56 = vshll.u32 %v2655_v39, 16  ;;  %v382_v10 = vshll.u32 %v2667_v54, 16  ;;  %v2069_v59 = vld [vmem:[%s2544_s5 + $0x20] sm:$0xe] }
  0x35   : > { %2219 = vmatpush3.bf16.msra.mxu1 %v546_v23  ;;  %v956_v11 = vsel %vm2598_vm5, %v951_v61, %v955_v15  ;;  %v364_v13 = vrot.slane %v362_v62, 5  ;;  %v370_v14 = vrot.slane %v368_v63, 5  ;;  %v375_v16 = vrot.slane %v373_v0, 4  ;;  %v2419_v15 = vld [vmem:[%s2539_s28 + $0x4] ss:$0 sps:$4 sm:$0x44]  }
  0x36   : > { %v970_v19 = vsel %vm2598_vm5, %v965_v5, %v969_v44  ;;  %v378_v20 = vrot.slane %v376_v56, 5  ;;  %v384_v21 = vrot.slane %v382_v10, 5  ;;  %v387_v25 = vshrl.u32 %v2672_v60, 16  ;;  %v2708_v0 = vld [vmem:[%s2539_s28] ss:$0 sps:$4 sm:$0x44]  }
  0x37   : > { %v2059_v23 = vcombine.low %v956_v11, %v970_v19  ;;  %v365_v26 = vor.u32 %v364_v13, %v361_v9  ;;  %v390_v29 = vshll.u32 %v2672_v60, 16  ;;  %v396_v30 = vshll.u32 %v2678_v1, 16  ;;  %v2717_v11 = vld [vmem:[%s2544_s5 + $0x2c] sm:$0x1]  ;;  %v2070_v13 = vld [vmem:[%s2544_s5 + $0x28] sm:$0xe] }
  0x38   : > { %v379_v33 = vor.u32 %v378_v20, %v375_v16  ;;  %v389_v35 = vrot.slane %v387_v25, 4  ;;  %v401_v36 = vshrl.u32 %v2686_v17, 16  ;;  %v404_v38 = vshll.u32 %v2686_v17, 16  ;;  %v2721_v25 = vld [vmem:[%s2544_s5 + $0x34] sm:$0x1] }
  0x39   : > { %2251 = vmatmul.mubr.msk.bf16.vlgmr.msra.gmra.mrb[0].mxu0 %vm431_vm4, %v2059_v23  ;;  %v366_v40 = vrot.slane %v365_v26, 4  ;;  %v392_v41 = vrot.slane %v390_v29, 5  ;;  %v398_v43 = vrot.slane %v396_v30, 5  ;;  %v410_v44 = vshll.u32 %v2691_v24, 16 }
  0x3a   : > { %2259 = vmatpush3.bf16.msra.mxu0 %v1214_v58  ;;  %v380_v47 = vrot.slane %v379_v33, 4  ;;  %v403_v55 = vrot.slane %v401_v36, 4  ;;  %v406_v57 = vrot.slane %v404_v38, 5  ;;  %vm638_vm7 = vcmask 1046532   ;;  %v2073_v38 = vld [vmem:[%s2544_s5 + $0x40] sm:$0xe] }
  0x3b   : > { %v371_v61 = vsel %vm2598_vm5, %v366_v40, %v370_v14  ;;  %v393_v62 = vor.u32 %v392_v41, %v389_v35  ;;  %v412_v63 = vrot.slane %v410_v44, 5  ;;  %vm2712_vm8 = vmor %vm637_vm6, %vm638_vm7  ;;  %v2074_v56 = vrot.slane %v2066_v31, 9  ;;  %v2733_v31 = vld [vmem:[%s2544_s5 + $0x3c] sm:$0x1]  ;;  %v613_v44 = vld [vmem:[%s2544_s5] sm:$0xe] }
  0x3c   : > { %v385_v58 = vsel %vm2598_vm5, %v380_v47, %v384_v21  ;;  %v407_v5 = vor.u32 %v406_v57, %v403_v55  ;;  %v2075_v10 = vrot.slane %v2067_v32, 9  ;;  %v1322_v19 = vrot.slane %v2419_v15, 2  ;;  %v2071_v21 = vld [vmem:[%s2544_s5 + $0x30] sm:$0xe] }
  0x3d   : > { %v1993_v14 = vcombine.low %v371_v61, %v385_v58  ;;  %v394_v16 = vrot.slane %v393_v62, 4  ;;  %v2076_v20 = vrot.slane %v2068_v46, 9  ;;  %v1155_v26 = vsel %vm2712_vm8, %v2074_v56, %v1154_v50  ;;  %v2072_v50 = vld [vmem:[%s2544_s5 + $0x38] sm:$0xe]  ;;  %v614_v62 = vld [vmem:[%s2544_s5 + $0x8] sm:$0xe] }
  0x3e   : > { %v408_v23 = vrot.slane %v407_v5, 4  ;;  %v1159_v29 = vsel %vm2712_vm8, %v2075_v10, %v1158_v51  ;;  %v2077_v30 = vrot.slane %v2069_v59, 9  ;;  %2371 = vmatprep.subr.msk.bf16.mxu0 %vm444_vm1, %v1322_v19  ;;  %v2000_v36 = vcombine.low %v2557_v3, %v2560_v4  ;;  %v2428_v55 = vld [vmem:[%s2539_s28] ss:$0 sps:$4 sm:$0x88]  }
  0x3f   : > { %2214 = vmatprep.mubr.msk.bf16.mxu1 %vm431_vm4, %v1993_v14  ;;  %v399_v32 = vsel %vm2598_vm5, %v394_v16, %v398_v43  ;;  %v2082_v33 = vcombine.low %v1155_v26, %v1159_v29  ;;  %v1163_v22 = vsel %vm2712_vm8, %v2076_v20, %v1162_v48  ;;  %v688_v12 = vrot.slane %v2708_v0, 2  ;;  %v2426_v43 = vld [vmem:[%s2539_s28 + $0x4] ss:$0 sps:$4 sm:$0x88]   ;;  %v615_v5 = vld [vmem:[%s2544_s5 + $0x10] sm:$0xe] }
  0x40   : > { %v413_v51 = vsel %vm2598_vm5, %v408_v23, %v412_v63  ;;  %v1167_v35 = vsel %vm2712_vm8, %v2077_v30, %v1166_v49  ;;  %v2078_v40 = vrot.slane %v2070_v13, 9  ;;  %v1170_v41 = vrot.slane %v2717_v11, 5  ;;  %v2425_v23 = vld [vmem:[%s2544_s5 + $0x10] ss:$8 sps:$4 sm:$0xff]   ;;  %v617_v30 = vld [vmem:[%s2544_s5 + $0x20] sm:$0xe] }
  0x41   : > { %v1994_v48 = vcombine.low %v399_v32, %v413_v51  ;;  %2260 = vmatprep.mubr.msk.bf16.mxu0 %vm431_vm4, %v2082_v33  ;;  %v2083_v15 = vcombine.low %v1163_v22, %v1167_v35  ;;  %2366 = vmatprep.subr.msk.bf16.mxu1 %vm444_vm1, %v688_v12  ;;  %v2079_v18 = vrot.slane %v2071_v21, 9  ;;  %v1174_v49 = vrot.slane %v2721_v25, 5  ;;  %v2795_v32 = vld [vmem:[%s2544_s5 + $0x28] sm:$0xe]  ;;  %v2808_v22 = vld [vmem:[%s2544_s5 + $0x38] sm:$0xe] }
  0x42   : > { %v1336_v3 = vsel %vm444_vm1, %v1322_v19, 0  ;;  %v1171_v4 = vsel %vm2712_vm8, %v2078_v40, %v1170_v41  ;;  %v2080_v46 = vrot.slane %v2072_v50, 9  ;;  %v1178_v47 = vrot.slane %v2733_v31, 5  ;;  %v616_v19 = vld [vmem:[%s2544_s5 + $0x18] sm:$0xe] }
  0x43   : > { %2215 = vmatmul.mubr.msk.bf16.gmra.mrb[4].mxu1 %vm431_vm4, %v1994_v48  ;;  %v1175_v57 = vsel %vm2712_vm8, %v2079_v18, %v1174_v49  ;;  %v2081_v59 = vrot.slane %v2073_v38, 9  ;;  %v1182_v61 = vrot.slane %v2744_v27, 5  ;;  %v642_v63 = vrot.slane %v2569_v7, 5  ;;  %v2110_v41 = vld [vmem:[%s2544_s5 + $0x18] sm:$0xf] }
  0x44   : > { %2220 = vmatprep.mubr.msk.bf16.mxu1 %vm431_vm4, %v2000_v36  ;;  %v646_v0 = vrot.slane %v2572_v8, 5  ;;  %v2084_v58 = vcombine.low %v1171_v4, %v1175_v57  ;;  %v1179_v56 = vsel %vm2712_vm8, %v2080_v46, %v1178_v47  ;;  %v1555_v13 = vrot.slane %v2426_v43, 3  ;;  %v2835_v43 = vld [vmem:[%s2544_s5 + $0x1c] sm:$0x1]  ;;  %v2112_v46 = vld [vmem:[%s2544_s5 + $0x20] sm:$0xf] }
  0x45   : > { %2261 = vmatmul.mubr.msk.bf16.vlgmr.msra.gmra.mrb[0].mxu0 %vm431_vm4, %v2083_v15  ;;  %v1183_v10 = vsel %vm2712_vm8, %v2081_v59, %v1182_v61  ;;  %v2008_v14 = vrot.slane %v613_v44, 9  ;;  %v2001_v7 = vcombine.low %v2605_v37, %v2608_v42  ;;  %v2009_v8 = vrot.slane %v614_v62, 9  ;;  %v2427_v47 = vld [vmem:[%s2544_s5 + $0x20] ss:$8 sps:$4 sm:$0xff]  }
  0x46   : > { %2269 = vmatpush3.bf16.msra.mxu0 %v1336_v3  ;;  %2264 = vmatprep.mubr.msk.bf16.mxu0 %vm431_vm4, %v2084_v58  ;;  %v810_v16 = vrot.slane %v2428_v55, 3  ;;  %v650_v20 = vrot.slane %v2620_v52, 5  ;;  %v2002_v21 = vcombine.low %v2652_v34, %v2655_v39  ;;  %v2010_v26 = vrot.slane %v615_v5, 9  ;;  %v2114_v62 = vld [vmem:[%s2544_s5 + $0x28] sm:$0xf] }
  0x47   : > { %2372 = vmatprep.subr.msk.bf16.mxu0 %vm444_vm1, %v1555_v13  ;;  %v654_v29 = vrot.slane %v2623_v53, 5  ;;  %v702_v37 = vsel %vm444_vm1, %v688_v12, 0  ;;  %v2085_v42 = vcombine.low %v1179_v56, %v1183_v10  ;;  %v2798_v33 = vsel %vm444_vm1, %v1555_v13, 0  ;;  %v2805_v53 = vld [vmem:[%s2544_s5 + $0x30] sm:$0xe] }
  0x48   : > { %v643_v52 = vsel %vm2712_vm8, %v2008_v14, %v642_v63  ;;  %v647_v34 = vsel %vm2712_vm8, %v2009_v8, %v646_v0  ;;  %v2011_v39 = vrot.slane %v616_v19, 9  ;;  %v2812_v50 = vsel %vm444_vm1, %v810_v16, 0  ;;  %v2108_v12 = vld [vmem:[%s2544_s5 + $0x10] sm:$0xf] }
  0x49   : > { %v2012_v51 = vrot.slane %v617_v30, 9  ;;  %v658_v35 = vrot.slane %v2660_v45, 5  ;;  %v2013_v36 = vrot.slane %v2795_v32, 9  ;;  %v2003_v38 = vcombine.low %v2672_v60, %v2686_v17  ;;  %v2827_v45 = vld [vmem:[%s2544_s5 + $0x14] sm:$0x1] }
  0x4a   : > { %v2822_v48 = vsel %vm2712_vm8, %v2010_v26, %v650_v20  ;;  %v662_v15 = vrot.slane %v2667_v54, 5  ;;  %v2014_v40 = vrot.slane %v2805_v53, 9  ;;  %v666_v60 = vrot.slane %v2678_v1, 5  ;;  %v2845_v1 = vld [vmem:[%s2544_s5 + $0x24] sm:$0x1] }
  0x4b   : > { %2221 = vmatmul.mubr.msk.bf16.vlgmr.msra.gmra.mrb[0].mxu1 %vm431_vm4, %v2001_v7  ;;  %v2015_v17 = vrot.slane %v2808_v22, 9  ;;  %v1428_v54 = vshrl.u32 %v2108_v12, 16  ;;  %v1431_v18 = vshll.u32 %v2108_v12, 16  ;;  %v2016_v49 = vcombine.low %v643_v52, %v647_v34  ;;  %v2429_v63 = vld [vmem:[%s2544_s5 + $0x30] ss:$8 sps:$4 sm:$0xff]  }
  0x4c   : > { %2229 = vmatpush3.bf16.msra.mxu1 %v702_v37  ;;  %2224 = vmatprep.mubr.msk.bf16.mxu1 %vm431_vm4, %v2002_v21  ;;  %v2840_v44 = vsel %vm2712_vm8, %v2011_v39, %v654_v29  ;;  %v1437_v3 = vshll.u32 %v2827_v45, 16  ;;  %v1442_v4 = vshrl.u32 %v2110_v41, 16  ;;  %v670_v55 = vrot.slane %v2691_v24, 5  ;;  %v2857_v7 = vld [vmem:[%s2544_s5 + $0x2c] sm:$0x1] }
  0x4d   : > { %2265 = vmatmul.mubr.msk.bf16.gmra.mrb[4].mxu0 %vm431_vm4, %v2085_v42  ;;  %2367 = vmatprep.subr.msk.bf16.mxu1 %vm444_vm1, %v810_v16  ;;  %v1430_v57 = vrot.slane %v1428_v54, 4  ;;  %v1433_v59 = vrot.slane %v1431_v18, 5  ;;  %v1445_v61 = vshll.u32 %v2110_v41, 16  ;;  %v1451_v5 = vshll.u32 %v2835_v43, 16  ;;  %v2862_v29 = vld [vmem:[%s2539_s28 + $0x8] sm:$0x1] }
  0x4e   : > { %2270 = vmatprep.mubr.msk.bf16.mxu0 %vm431_vm4, %v2425_v23  ;;  %v1439_v0 = vrot.slane %v1437_v3, 5  ;;  %v1444_v58 = vrot.slane %v1442_v4, 4  ;;  %v1456_v56 = vshrl.u32 %v2112_v46, 16  ;;  %v2854_v10 = vsel %vm2712_vm8, %v2012_v51, %v658_v35  ;;  %v2118_v54 = vld [vmem:[%s2544_s5 + $0x38] sm:$0xf] }
  0x4f   : > { %v1434_v13 = vor.u32 %v1433_v59, %v1430_v57  ;;  %v1447_v14 = vrot.slane %v1445_v61, 5  ;;  %v1459_v24 = vshll.u32 %v2112_v46, 16  ;;  %v1465_v16 = vshll.u32 %v2845_v1, 16  ;;  %v2891_v18 = vld [vmem:[%s2544_s5 + $0x3c] sm:$0x1] }
  0x50   : > { %v1458_v8 = vrot.slane %v1456_v56, 4  ;;  %v1470_v19 = vshrl.u32 %v2114_v62, 16  ;;  %v1473_v20 = vshll.u32 %v2114_v62, 16  ;;  %v1453_v26 = vrot.slane %v1451_v5, 5 }
  0x51   : > { %v1435_v21 = vrot.slane %v1434_v13, 4  ;;  %v1448_v23 = vor.u32 %v1447_v14, %v1444_v58  ;;  %v1461_v37 = vrot.slane %v1459_v24, 5  ;;  %v663_v42 = vsel %vm2712_vm8, %v2013_v36, %v662_v15  ;;  %v2881_v15 = vld [vmem:[%s2544_s5 + $0x34] sm:$0x1]  ;;  %v2910_v13 = vld [vmem:[%s2544_s5 + $0x4c] sm:$0x1] }
  0x52   : > { %v1472_v30 = vrot.slane %v1470_v19, 4  ;;  %v1475_v32 = vrot.slane %v1473_v20, 5  ;;  %v1479_v52 = vshll.u32 %v2857_v7, 16  ;;  %v2017_v34 = vcombine.low %v2822_v48, %v2840_v44  ;;  %v2116_v48 = vld [vmem:[%s2544_s5 + $0x30] sm:$0xf] }
  0x53   : > { %2225 = vmatmul.mubr.msk.bf16.gmra.mrb[4].mxu1 %vm431_vm4, %v2003_v38  ;;  %v2873_v39 = vsel %vm2712_vm8, %v2014_v40, %v666_v60  ;;  %v1449_v53 = vrot.slane %v1448_v23, 4  ;;  %v1462_v51 = vor.u32 %v1461_v37, %v1458_v8  ;;  %v1440_v35 = vsel %vm2598_vm5, %v1435_v21, %v1439_v0  ;;  %v2430_v40 = vld [vmem:[%s2544_s5 + $0x40] ss:$8 sps:$4 sm:$0xff]  }
  0x54   : > { %2230 = vmatprep.mubr.msk.bf16.mxu1 %vm431_vm4, %v2016_v49  ;;  %v1467_v36 = vrot.slane %v1465_v16, 5  ;;  %v1476_v12 = vor.u32 %v1475_v32, %v1472_v30  ;;  %v1481_v38 = vrot.slane %v1479_v52, 5  ;;  %v2018_v41 = vcombine.low %v2854_v10, %v663_v42 }
  0x55   : > { %2271 = vmatmul.mubr.msk.bf16.vlgmr.msra.gmra.mrb[0].mxu0 %vm431_vm4, %v2427_v47  ;;  %v1454_v60 = vsel %vm2598_vm5, %v1449_v53, %v1453_v26  ;;  %v1484_v49 = vshrl.u32 %v2116_v48, 16  ;;  %v671_v44 = vsel %vm2712_vm8, %v2015_v17, %v670_v55  ;;  %v1487_v4 = vshll.u32 %v2116_v48, 16  ;;  %v2120_v47 = vld [vmem:[%s2544_s5 + $0x40] sm:$0xf]  ;;  %v2122_v55 = vld [vmem:[%s2544_s5 + $0x48] sm:$0xf] }
  0x56   : > { %2279 = vmatpush3.bf16.msra.mxu0 %v2798_v33  ;;  %2274 = vmatprep.mubr.msk.bf16.mxu0 %vm431_vm4, %v2429_v63  ;;  %v1463_v33 = vrot.slane %v1462_v51, 4  ;;  %v1477_v3 = vrot.slane %v1476_v12, 4  ;;  %v1493_v46 = vshll.u32 %v2881_v15, 16  ;;  %v2124_v57 = vcombine.low %v1440_v35, %v1454_v60  ;;  %v2900_v63 = vld [vmem:[%s2544_s5 + $0x44] sm:$0x1] }
  0x57   : > { %2373 = vmatprep.subr.msk.bf16.mxu0 %vm444_vm1, %v2862_v29  ;;  %v1486_v59 = vrot.slane %v1484_v49, 4  ;;  %v1498_v61 = vshrl.u32 %v2118_v54, 16  ;;  %v1501_v62 = vshll.u32 %v2118_v54, 16  ;;  %v1489_v58 = vrot.slane %v1487_v4, 5  ;;  %v2431_v51 = vld [vmem:[%s2544_s5 + $0x8] ss:$8 sps:$4 sm:$0xff]  }
  0x58   : > { %v1468_v0 = vsel %vm2598_vm5, %v1463_v33, %v1467_v36  ;;  %v1482_v22 = vsel %vm2598_vm5, %v1477_v3, %v1481_v38  ;;  %v1507_v17 = vshll.u32 %v2891_v18, 16  ;;  %v1495_v5 = vrot.slane %v1493_v46, 5  ;;  %v2136_v4 = vld [vmem:[%s2544_s5 + $0x28] sm:$0xe] }
  0x59   : > { %v1500_v56 = vrot.slane %v1498_v61, 4  ;;  %v1503_v10 = vrot.slane %v1501_v62, 5  ;;  %v1512_v14 = vshrl.u32 %v2120_v47, 16  ;;  %v1490_v24 = vor.u32 %v1489_v58, %v1486_v59  ;;  %v2050_v46 = vld [vmem:[%s2544_s5 + $0x28] sm:$0xf] }
  0x5a   : > { %v1509_v8 = vrot.slane %v1507_v17, 5  ;;  %v1515_v16 = vshll.u32 %v2120_v47, 16  ;;  %v1521_v19 = vshll.u32 %v2900_v63, 16  ;;  %v1526_v23 = vshrl.u32 %v2122_v55, 16  ;;  %v2052_v59 = vld [vmem:[%s2544_s5 + $0x30] sm:$0xf] }
  0x5b   : > { %2231 = vmatmul.mubr.msk.bf16.vlgmr.msra.gmra.mrb[0].mxu1 %vm431_vm4, %v2017_v34  ;;  %v1504_v20 = vor.u32 %v1503_v10, %v1500_v56  ;;  %v1514_v21 = vrot.slane %v1512_v14, 4  ;;  %v1529_v26 = vshll.u32 %v2122_v55, 16  ;;  %v2019_v37 = vcombine.low %v2873_v39, %v671_v44  ;;  %v2135_v44 = vld [vmem:[%s2544_s5 + $0x20] sm:$0xe]  ;;  %v2137_v55 = vld [vmem:[%s2544_s5 + $0x30] sm:$0xe] }
  0x5c   : > { %2239 = vmatpush3.bf16.msra.mxu1 %v2812_v50  ;;  %2234 = vmatprep.mubr.msk.bf16.mxu1 %vm431_vm4, %v2018_v41  ;;  %v1491_v50 = vrot.slane %v1490_v24, 4  ;;  %v1517_v42 = vrot.slane %v1515_v16, 5  ;;  %v1535_v30 = vshll.u32 %v2910_v13, 16  ;;  %v1528_v52 = vrot.slane %v1526_v23, 4  ;;  %v2133_v41 = vld [vmem:[%s2544_s5 + $0x10] sm:$0xe] }
  0x5d   : > { %2275 = vmatmul.mubr.msk.bf16.gmra.mrb[4].mxu0 %vm431_vm4, %v2430_v40  ;;  %2369 = vmatprep.subr.msk.bf16.mxu1 %vm444_vm1, %v2554_v2  ;;  %v1505_v32 = vrot.slane %v1504_v20, 4  ;;  %v1531_v34 = vrot.slane %v1529_v26, 5  ;;  %v1670_v53 = vrot.slane %v2827_v45, 5  ;;  %v2125_v2 = vcombine.low %v1468_v0, %v1482_v22  ;;  %v2134_v45 = vld [vmem:[%s2544_s5 + $0x18] sm:$0xe] }
  0x5e   : > { %2280 = vmatprep.mubr.msk.bf16.mxu0 %vm431_vm4, %v2124_v57  ;;  %v1496_v35 = vsel %vm2598_vm5, %v1491_v50, %v1495_v5  ;;  %v1518_v39 = vor.u32 %v1517_v42, %v1514_v21  ;;  %v1674_v36 = vrot.slane %v2835_v43, 5  ;;  %v1523_v38 = vrot.slane %v1521_v19, 5  ;;  %v2138_v24 = vld [vmem:[%s2544_s5 + $0x38] sm:$0xe] }
  0x5f   : > { %v1510_v12 = vsel %vm2598_vm5, %v1505_v32, %v1509_v8  ;;  %v1532_v48 = vor.u32 %v1531_v34, %v1528_v52  ;;  %v1537_v40 = vrot.slane %v1535_v30, 5  ;;  %v2141_v54 = vrot.slane %v2133_v41, 9  ;;  %v2054_v21 = vld [vmem:[%s2544_s5 + $0x38] sm:$0xf] }
  0x60   : > { %v2126_v60 = vcombine.low %v1496_v35, %v1510_v12  ;;  %v1519_v33 = vrot.slane %v1518_v39, 4  ;;  %v2142_v49 = vrot.slane %v2134_v45, 9  ;;  %v1726_v43 = vsel %vm444_vm1, %v2862_v29, 0  ;;  %v2432_v29 = vld [vmem:[%s2544_s5 + $0x18] ss:$8 sps:$4 sm:$0xff]  }
  0x61   : > { %v1533_v3 = vrot.slane %v1532_v48, 4  ;;  %v1671_v47 = vsel %vm2712_vm8, %v2141_v54, %v1670_v53  ;;  %v972_v61 = vshrl.u32 %v2050_v46, 16  ;;  %v981_v62 = vshll.u32 %v2717_v11, 16  ;;  %v2433_v11 = vld [vmem:[%s2544_s5 + $0x28] ss:$8 sps:$4 sm:$0xff]  }
  0x62   : > { %v1675_v57 = vsel %vm2712_vm8, %v2142_v49, %v1674_v36  ;;  %v1524_v0 = vsel %vm2598_vm5, %v1519_v33, %v1523_v38  ;;  %v1678_v58 = vrot.slane %v2845_v1, 5  ;;  %v1682_v17 = vrot.slane %v2857_v7, 5  ;;  %v2434_v33 = vld [vmem:[%s2544_s5 + $0x38] ss:$8 sps:$4 sm:$0xff]  }
  0x63   : > { %2235 = vmatmul.mubr.msk.bf16.gmra.mrb[4].mxu1 %vm431_vm4, %v2019_v37  ;;  %v1538_v22 = vsel %vm2598_vm5, %v1533_v3, %v1537_v40  ;;  %v2143_v5 = vrot.slane %v2135_v44, 9  ;;  %v2144_v56 = vrot.slane %v2136_v4, 9  ;;  %v974_v10 = vrot.slane %v972_v61, 4  ;;  %v2056_v37 = vld [vmem:[%s2544_s5 + $0x40] sm:$0xf] }
  0x64   : > { %2240 = vmatprep.mubr.msk.bf16.mxu1 %vm431_vm4, %v2431_v51  ;;  %v975_v14 = vshll.u32 %v2050_v46, 16  ;;  %v2149_v8 = vcombine.low %v1671_v47, %v1675_v57  ;;  %v986_v16 = vshrl.u32 %v2052_v59, 16  ;;  %v989_v19 = vshll.u32 %v2052_v59, 16  ;;  %v2139_v49 = vld [vmem:[%s2544_s5 + $0x40] sm:$0xe] }
  0x65   : > { %2281 = vmatmul.mubr.msk.bf16.vlgmr.msra.gmra.mrb[0].mxu0 %vm431_vm4, %v2125_v2  ;;  %v995_v20 = vshll.u32 %v2721_v25, 16  ;;  %v2127_v1 = vcombine.low %v1524_v0, %v1538_v22  ;;  %v983_v7 = vrot.slane %v981_v62, 5  ;;  %v2145_v26 = vrot.slane %v2137_v55, 9  ;;  %v2140_v44 = vld [vmem:[%s2544_s5 + $0x48] sm:$0xe] }
  0x66   : > { %2289 = vmatpush3.bf16.msra.mxu0 %v1726_v43  ;;  %2284 = vmatprep.mubr.msk.bf16.mxu0 %vm431_vm4, %v2126_v60  ;;  %v977_v23 = vrot.slane %v975_v14, 5  ;;  %v988_v50 = vrot.slane %v986_v16, 4  ;;  %v991_v42 = vrot.slane %v989_v19, 5  ;;  %v1686_v30 = vrot.slane %v2881_v15, 5  ;;  %v1803_v16 = vld [vmem:[#allocation2 + $0x10] sm:$0xff] }
  0x67   : > { %v2146_v32 = vrot.slane %v2138_v24, 9  ;;  %v1690_v34 = vrot.slane %v2891_v18, 5  ;;  %v1000_v53 = vshrl.u32 %v2054_v21, 16  ;;  %v1003_v2 = vshll.u32 %v2054_v21, 16 }
  0x68   : > { %v978_v52 = vor.u32 %v977_v23, %v974_v10  ;;  %v992_v51 = vor.u32 %v991_v42, %v988_v50  ;;  %v997_v25 = vrot.slane %v995_v20, 5  ;;  %v1014_v35 = vshrl.u32 %v2056_v37, 16  ;;  %v1801_v20 = vld [vmem:[#allocation2] sm:$0xff] }
  0x69   : > { %v1017_v39 = vshll.u32 %v2056_v37, 16  ;;  %v1009_v36 = vshll.u32 %v2733_v31, 16  ;;  %v1002_v12 = vrot.slane %v1000_v53, 4  ;;  %v1005_v18 = vrot.slane %v1003_v2, 5  ;;  %v1802_v37 = vld [vmem:[#allocation2 + $0x8] sm:$0xff]  ;;  %v1807_v2 = vld [vmem:[#allocation2 + $0x30] sm:$0xff] }
  0x6a   : > { %v979_v15 = vrot.slane %v978_v52, 4  ;;  %v1679_v38 = vsel %vm2712_vm8, %v2143_v5, %v1678_v58  ;;  %v993_v48 = vrot.slane %v992_v51, 4  ;;  %v1016_v40 = vrot.slane %v1014_v35, 4 }
  0x6b   : > { %2241 = vmatmul.mubr.msk.bf16.vlgmr.msra.gmra.mrb[0].mxu1 %vm431_vm4, %v2432_v29  ;;  %v1019_v41 = vrot.slane %v1017_v39, 5  ;;  %v1687_v45 = vsel %vm2712_vm8, %v2145_v26, %v1686_v30  ;;  %v1691_v60 = vsel %vm2712_vm8, %v2146_v32, %v1690_v34  ;;  %v1023_v43 = vshll.u32 %v2744_v27, 16  ;;  %v1805_v39 = vld [vmem:[#allocation2 + $0x20] sm:$0xff] }
  0x6c   : > { %2299 = vmatpush3.bf16.msra.mxu1 %v2566_v6  ;;  %2244 = vmatprep.mubr.msk.bf16.mxu1 %vm431_vm4, %v2433_v11  ;;  %v1683_v6 = vsel %vm2712_vm8, %v2144_v56, %v1682_v17  ;;  %v984_v31 = vsel %vm2598_vm5, %v979_v15, %v983_v7  ;;  %v998_v54 = vsel %vm2598_vm5, %v993_v48, %v997_v25  ;;  %v2147_v59 = vrot.slane %v2139_v49, 9  ;;  %v2159_v49 = vld [vmem:[%s3047_s3] ss:$0 sm:$0xff] (!%p2157_p9) }
  0x6d   : > { %2285 = vmatmul.mubr.msk.bf16.gmra.mrb[4].mxu0 %vm431_vm4, %v2127_v1  ;;  %v2060_v3 = vcombine.low %v984_v31, %v998_v54  ;;  %v1006_v4 = vor.u32 %v1005_v18, %v1002_v12  ;;  %v1020_v46 = vor.u32 %v1019_v41, %v1016_v40  ;;  %v2150_v47 = vcombine.low %v1679_v38, %v1683_v6  ;;  %v1808_v18 = vld [vmem:[#allocation2 + $0x38] sm:$0xff]  ;;  %v1806_v41 = vld [vmem:[#allocation2 + $0x28] sm:$0xff]  ;;  %v2158_v54 = vld [vmem:[%s3046_s2] ss:$0 sm:$0xff] (!%p2157_p9) }
  0x6e   : > { %2290 = vmatprep.mubr.msk.bf16.mxu0 %vm431_vm4, %v2149_v8  ;;  %v2151_v57 = vcombine.low %v1687_v45, %v1691_v60  ;;  %v1694_v61 = vrot.slane %v2900_v63, 5  ;;  %v2148_v62 = vrot.slane %v2140_v44, 9  ;;  %v1698_v29 = vrot.slane %v2910_v13, 5 }
  0x6f   : > { %v1011_v0 = vrot.slane %v1009_v36, 5  ;;  %v1025_v22 = vrot.slane %v1023_v43, 5  ;;  %v1007_v58 = vrot.slane %v1006_v4, 4  ;;  %v1021_v17 = vrot.slane %v1020_v46, 4 }
  0x70   : > { %v1695_v27 = vsel %vm2712_vm8, %v2147_v59, %v1694_v61  ;;  %v1699_v63 = vsel %vm2712_vm8, %v2148_v62, %v1698_v29  ;;  %vm1817_vm9 = vcmask 261120   ;;  %vm1884_vm10 = vcmask (!%p2157_p9), 257024  }
  0x71   : > { %v1012_v13 = vsel %vm2598_vm5, %v1007_v58, %v1011_v0  ;;  %v1026_v55 = vsel %vm2598_vm5, %v1021_v17, %v1025_v22  ;;  %v2152_v11 = vcombine.low %v1695_v27, %v1699_v63 }
  0x72   : > { %v2061_v5 = vcombine.low %v1012_v13, %v1026_v55 }
  0x73   : > { %2245 = vmatmul.mubr.msk.bf16.gmra.mrb[4].mxu1 %vm431_vm4, %v2434_v33 }
  0x74   : > { %2254 = vmatprep.mubr.msk.bf16.mxu1 %vm431_vm4, %v2060_v3 }
  0x75   : > { %2291 = vmatmul.mubr.msk.bf16.vlgmr.msra.gmra.mrb[0].mxu0 %vm431_vm4, %v2150_v47 }
  0x76   : > { %2294 = vmatprep.mubr.msk.bf16.mxu0 %vm431_vm4, %v2151_v57 }
  0x7d   : > { %2295 = vmatmul.mubr.msk.bf16.gmra.mrb[4].mxu0 %vm431_vm4, %v2152_v11 }
  0x7f   : > { %2255 = vmatmul.mubr.msk.bf16.vlgmr.msra.gmra.mrb[4].mxu1 %vm431_vm4, %v2061_v5 }
 0x13e   : > { %v2242_v56 = vpop.f32.mrb[0].mxu1 }
 0x13f   : > { %v860_v10 = vpop.f32.mrb[1].mxu1 }
 0x140   : > { %v2243_v14 = vpop.f32.mrb[2].mxu1 }
 0x141   : > { %v863_v24 = vpop.f32.mrb[3].mxu1 }
 0x148   : > { %v2292_v8 = vpop.f32.mrb[0].mxu0 }
 0x149   : > { %v2300_v9 = vadd.f32 %v2292_v8, %v2242_v56  ;;  %v1762_v19 = vpop.f32.mrb[1].mxu0 }
 0x14a   : > { %v2301_v21 = vadd.f32 %v1762_v19, %v860_v10  ;;  %v2293_v1 = vpop.f32.mrb[2].mxu0 }
 0x14b   : > { %v1811_v23 = vadd.f32 %v2300_v9, %v1803_v16  ;;  %v2302_v7 = vadd.f32 %v2293_v1, %v2243_v14  ;;  %v1765_v26 = vpop.f32.mrb[3].mxu0 }
 0x14c   : > { %v1809_v50 = vadd.f32 %v2301_v21, %v1801_v20  ;;  %v2303_v42 = vadd.f32 %v1765_v26, %v863_v24 }
 0x14d   : > { %1820 = vst.msk [vmem:[#allocation2 + $0x10] sm:$0xff] %vm1817_vm9, %v1811_v23  ;;  %v1812_v30 = vadd.f32 %v2302_v7, %v1804_v28 }
 0x14e   : > { %1818 = vst.msk [vmem:[#allocation2] sm:$0xff] %vm1817_vm9, %v1809_v50  ;;  %v1810_v32 = vadd.f32 %v2303_v42, %v1802_v37 }
 0x14f   : > { %1821 = vst.msk [vmem:[#allocation2 + $0x18] sm:$0xff] %vm1817_vm9, %v1812_v30 }
 0x150   : > { %1819 = vst.msk [vmem:[#allocation2 + $0x8] sm:$0xff] %vm1817_vm9, %v1810_v32  ;;  %v2296_v52 = vpop.f32.mrb[4].mxu0 }
 0x151   : > { %v1778_v34 = vpop.f32.mrb[5].mxu0 }
 0x152   : > { %v2256_v53 = vpop.f32.mrb[4].mxu1  ;;  %v2297_v51 = vpop.f32.mrb[6].mxu0 }
 0x153   : > { %v2304_v25 = vadd.f32 %v2296_v52, %v2256_v53  ;;  %v1105_v35 = vpop.f32.mrb[5].mxu1  ;;  %v1781_v36 = vpop.f32.mrb[7].mxu0 }
 0x154   : > { %v2305_v15 = vadd.f32 %v1778_v34, %v1105_v35  ;;  %v2257_v12 = vpop.f32.mrb[6].mxu1  ;;  %1829 = sbr.rel (%p2157_p9) target bundleno = 363 (0x16b), region = 44  ;;  %v1832_v3 = vld [vmem:[#allocation2 + $0x10] sm:$0xff] (!%p2157_p9) }
 0x155   : > { %v1815_v38 = vadd.f32 %v2304_v25, %v1807_v2  ;;  %v2306_v48 = vadd.f32 %v2297_v51, %v2257_v12  ;;  %v1108_v40 = vpop.f32.mrb[7].mxu1  ;;  %v1830_v33 = vld [vmem:[#allocation2] sm:$0xff] (!%p2157_p9)  ;;  %v1847_v47 = vmul.f32 (!%p2157_p9), %v2158_v54, %v1832_v3 }
 0x156   : > { %v1813_v6 = vadd.f32 %v2305_v15, %v1805_v39  ;;  %v2307_v31 = vadd.f32 %v1781_v36, %v1108_v40  ;;  %v1845_v44 = vmul.f32 (!%p2157_p9), %v2158_v54, %v1830_v33  ;;  %v1833_v4 = vld [vmem:[#allocation2 + $0x18] sm:$0xff] (!%p2157_p9) }
 0x157   : > { %1824 = vst.msk [vmem:[#allocation2 + $0x30] sm:$0xff] %vm1817_vm9, %v1815_v38  ;;  %v1816_v45 = vadd.f32 %v2306_v48, %v1808_v18  ;;  %v1831_v43 = vld [vmem:[#allocation2 + $0x8] sm:$0xff] (!%p2157_p9)  ;;  %v1848_v57 = vmul.f32 (!%p2157_p9), %v2158_v54, %v1833_v4  ;;  %v1862_v63 = vadd.f32 (!%p2157_p9), %v2159_v49, %v1847_v47 }
 0x158   : > { %1822 = vst.msk [vmem:[#allocation2 + $0x20] sm:$0xff] %vm1817_vm9, %v1813_v6  ;;  %v1814_v60 = vadd.f32 %v2307_v31, %v1806_v41  ;;  %v1846_v46 = vmul.f32 (!%p2157_p9), %v2158_v54, %v1831_v43  ;;  %v1860_v29 = vadd.f32 (!%p2157_p9), %v2159_v49, %v1845_v44 }
 0x159   : > { %1825 = vst.msk [vmem:[#allocation2 + $0x38] sm:$0xff] %vm1817_vm9, %v1816_v45  ;;  %v1863_v13 = vadd.f32 (!%p2157_p9), %v2159_v49, %v1848_v57  ;;  %v1870_v24 = vmax.f32 (!%p2157_p9), %v1862_v63, 0.0 }
 0x15a   : > { %1823 = vst.msk [vmem:[#allocation2 + $0x28] sm:$0xff] %vm1817_vm9, %v1814_v60  ;;  %v1861_v27 = vadd.f32 (!%p2157_p9), %v2159_v49, %v1846_v46  ;;  %v1868_v11 = vmax.f32 (!%p2157_p9), %v1860_v29, 0.0 }
 0x15b   : > { %v1871_v8 = vmax.f32 %v1863_v13, 0.0  ;;  %v1878_v28 = vpack.c.bf16 %v1870_v24, %v1870_v24 }
 0x15c   : > { %v1869_v14 = vmax.f32 %v1861_v27, 0.0  ;;  %v1876_v9 = vpack.c.bf16 %v1868_v11, %v1868_v11 }
 0x15d   : > { %v1879_v23 = vpack.c.bf16 %v1871_v8, %v1871_v8  ;;  %1887 = vst.msk [vmem:[%s2549_s9 + $0x8] sm:$0xf] %vm1884_vm10, %v1878_v28 }
 0x15e   : > { %v1836_v62 = vld [vmem:[#allocation2 + $0x30] sm:$0xff]  ;;  %v1877_v1 = vpack.c.bf16 %v1869_v14, %v1869_v14  ;;  %1885 = vst.msk [vmem:[%s2549_s9] sm:$0xf] %vm1884_vm10, %v1876_v9 }
 0x15f   : > { %v1834_v59 = vld [vmem:[#allocation2 + $0x20] sm:$0xff]  ;;  %v1851_v58 = vmul.f32 %v2158_v54, %v1836_v62  ;;  %1888 = vst.msk [vmem:[%s2549_s9 + $0xc] sm:$0xf] %vm1884_vm10, %v1879_v23 }
 0x160   : > { %v1849_v0 = vmul.f32 %v2158_v54, %v1834_v59  ;;  %v1837_v17 = vld [vmem:[#allocation2 + $0x38] sm:$0xff]  ;;  %1886 = vst.msk [vmem:[%s2549_s9 + $0x4] sm:$0xf] %vm1884_vm10, %v1877_v1 }
 0x161   : > { %v1835_v61 = vld [vmem:[#allocation2 + $0x28] sm:$0xff]  ;;  %v1852_v55 = vmul.f32 %v2158_v54, %v1837_v17  ;;  %v1866_v10 = vadd.f32 %v2159_v49, %v1851_v58 }
 0x162   : > { %v1850_v22 = vmul.f32 %v2158_v54, %v1835_v61  ;;  %v1864_v5 = vadd.f32 %v2159_v49, %v1849_v0 }
 0x163   : > { %v1867_v16 = vadd.f32 %v2159_v49, %v1852_v55  ;;  %v1874_v21 = vmax.f32 %v1866_v10, 0.0 }
 0x164   : > { %v1865_v56 = vadd.f32 %v2159_v49, %v1850_v22  ;;  %v1872_v19 = vmax.f32 %v1864_v5, 0.0 }
 0x165   : > { %v1875_v7 = vmax.f32 %v1867_v16, 0.0  ;;  %v1882_v50 = vpack.c.bf16 %v1874_v21, %v1874_v21 }
 0x166   : > { %v1873_v20 = vmax.f32 %v1865_v56, 0.0  ;;  %v1880_v26 = vpack.c.bf16 %v1872_v19, %v1872_v19 }
 0x167   : > { %v1883_v42 = vpack.c.bf16 %v1875_v7, %v1875_v7  ;;  %1891 = vst.msk [vmem:[%s2549_s9 + $0x18] sm:$0xf] %vm1884_vm10, %v1882_v50 }
 0x168   : > { %v1881_v37 = vpack.c.bf16 %v1873_v20, %v1873_v20  ;;  %1889 = vst.msk [vmem:[%s2549_s9 + $0x10] sm:$0xf] %vm1884_vm10, %v1880_v26 }
 0x169   : > { %1892 = vst.msk [vmem:[%s2549_s9 + $0x1c] sm:$0xf] %vm1884_vm10, %v1883_v42 }
 0x16a   : > { %1890 = vst.msk [vmem:[%s2549_s9 + $0x14] sm:$0xf] %vm1884_vm10, %v1881_v37 }
 0x16b PF: > { %s14_s19 = sadd.s32 1, %s2473_s19   ;;  %s3053_s15 = smov %s2465_s17 }
 0x16c   : > { %p11_p10 = scmp.ge.s32.totalorder %s14_s19, 26   ;;  %s3054_s16 = smov %s2469_s18 }
 0x16d   : > { %s3055_s17 = smov %s3058_s20  ;;  %s3056_s18 = smov %s3062_s21 }
 0x16e   :  { %13 = sbr.rel (!%p11_p10) target bundleno = 3 (0x3), region = 79 }

// kernel: unet3d_forward.10
= control target key start
LH: loop header
LB: loop body
LE: loop exit
PB: predicated region body
PF: predicated region fallthrough
CT: control target
= control target key end

     0   :  { %s2626_s15 = smov 0   ;;  %s2628_s16 = smov 0   ;;  %s3169_s0 = inlined_call_operand.vmem [shape: bf16[10,1,10,10,32], index: 0, kind: input, shape index: {}]   ;;  %s3170_s1 = inlined_call_operand.vmem [shape: bf16[3,288,32], index: 1, kind: input, shape index: {}]   ;;  %s3171_s2 = inlined_call_operand.vmem [shape: f32[1,32], index: 2, kind: input, shape index: {}]   ;;  %s3172_s3 = inlined_call_operand.vmem [shape: f32[1,32], index: 3, kind: input, shape index: {}]   ;;  %s3173_s4 = inlined_call_operand.vmem [shape: bf16[8,8,8,32], index: 4, kind: output, shape index: {}]  }
   0x1   :  { %s2630_s17 = smov 0   ;;  %s2632_s18 = smov 0  }
   0x2   :  { %s2634_s19 = smov 0  }
   0x3 LB: > { %s26_s20 = sadd.s32 1, %s2590_s17  ;;  %s29_s21 = sadd.s32 1, %s2594_s18  ;;  %s2598_s19 = sphi %s2634_s19, %s14_s19   ;;  %s2594_s18 = sphi %s2632_s18, %s3181_s18   ;;  %s2590_s17 = sphi %s2630_s17, %s3180_s17   ;;  %s2586_s16 = sphi %s2628_s16, %s3179_s16   ;;  %s2582_s15 = sphi %s2626_s15, %s3178_s15  }
   0x4   : > { %p27_p0 = scmp.ge.s32.totalorder %s26_s20, 3  ;;  %p2067_p1 = scmp.ge.s32.totalorder %s2598_s19, 1 }
   0x5   : > { %p207_p2 = scmp.lt.s32.totalorder %s2598_s19, 25 }
   0x6   : > { %s3183_s20 = smov (%p27_p0, %s26_s20), 0  ;;  %s3185_s21 = smov (!%p27_p0, %s29_s21), %s2594_s18 }
   0x7   : > { %p208_p3 = pnand %p2067_p1, %p207_p2  ;;  %p31_p4 = scmp.ge.s32.totalorder %s3185_s21, 8 }
   0x8   : > { %s245_s22 = sadd.s32 (!%p208_p3), %s2582_s15, %s2586_s16  ;;  %p254_p5 = scmp.lt.s32.totalorder (!%p208_p3), %s2582_s15, 2 }
   0x9   : > { %s3187_s21 = smov (%p31_p4, %s3185_s21), 0  ;;  %211 = sbr.rel (%p208_p3) target bundleno = 362 (0x16a), region = 36 }
   0xa   : > { %p246_p6 = scmp.lt.s32.totalorder (!%p208_p3), %s245_s22, 9  ;;  %p261_p7 = scmp.lt.s32.totalorder (!%p208_p3), %s2586_s16, 7 }
   0xb   : > { %p2072_p8 = scmp.ne.s32.totalorder (!%p208_p3), %s2582_s15, 0 }
  0x10   : > { %s255_s23 = scalar_select %p254_p5, %s2582_s15, 2 }
  0x11   : > { %s3189_s22 = smov (!%p246_p6, %s245_s22), 9  ;;  %s3191_s16 = smov (!%p261_p7, %s2586_s16), 7 }
  0x12   : > { %s2488_s24 = smul.u32 144, %s255_s23  ;;  %s2256_s6 = sshll.u32 %s3191_s16, 5  ;;  %vm273_vm0 = vcmask (!%p2072_p8), 261120   ;;  %v2600_v0 = vmov (!%p2072_p8), 0.0  }
  0x13   : > { %s2487_s25 = smul.u32 80, %s3189_s22  ;;  %s2674_s9 = scalar_lea.vmem %s3173_s4, %s2256_s6  ;;  %274 = vst.msk [vmem:[#allocation2] sm:$0xff] (!%p2072_p8), %vm273_vm0, %v2600_v0  ;;  %275 = vst.msk [vmem:[#allocation2 + $0x8] sm:$0xff] (!%p2072_p8), %vm273_vm0, %v2600_v0 }
  0x14   : > { %s2664_s28 = scalar_lea.vmem %s3170_s1, %s2488_s24  ;;  %272 = sbr.rel (%p2072_p8) target bundleno = 27 (0x1b), region = 40  ;;  %276 = vst.msk [vmem:[#allocation2 + $0x10] sm:$0xff] (!%p2072_p8), %vm273_vm0, %v2600_v0  ;;  %277 = vst.msk [vmem:[#allocation2 + $0x18] sm:$0xff] (!%p2072_p8), %vm273_vm0, %v2600_v0 }
  0x15   : > { %s2669_s5 = scalar_lea.vmem %s3169_s0, %s2487_s25  ;;  %278 = vst.msk [vmem:[#allocation2 + $0x20] sm:$0xff] (!%p2072_p8), %vm273_vm0, %v2600_v0  ;;  %279 = vst.msk [vmem:[#allocation2 + $0x28] sm:$0xff] (!%p2072_p8), %vm273_vm0, %v2600_v0 }
  0x16   : > { %280 = vst.msk [vmem:[#allocation2 + $0x30] sm:$0xff] (!%p2072_p8), %vm273_vm0, %v2600_v0  ;;  %281 = vst.msk [vmem:[#allocation2 + $0x38] sm:$0xff] (!%p2072_p8), %vm273_vm0, %v2600_v0 }
  0x1b PF: > { %v2530_v1 = vld [vmem:[%s2664_s28 + $0x10] sm:$0xff]   ;;  %v2679_v2 = vld [vmem:[%s2664_s28 + $0x40] sm:$0xff]   ;;  %v2532_v3 = vld [vmem:[%s2664_s28 + $0x18] sm:$0xff]   ;;  %vm302_vm1 = vsmask.f32 3328  ;;  %vm445_vm3 = vcmask 261120  }
  0x1c   : > { %2311 = vmatprep.subr.bf16.mxu1 %v2530_v1  ;;  %2359 = vmatprep.subr.bf16.mxu0 %v2679_v2  ;;  %v2684_v4 = vld [vmem:[%s2664_s28 + $0x48] sm:$0xff]   ;;  %v2688_v5 = vld [vmem:[%s2669_s5] sm:$0xf]  ;;  %v2694_v7 = vld [vmem:[%s2669_s5 + $0x4] sm:$0x1]  ;;  %vm656_vm5 = vcmask 1042432  }
  0x1d   : > { %2312 = vmatpush3.bf16.msra.mxu1 %v2530_v1  ;;  %2360 = vmatpush3.bf16.msra.mxu0 %v2679_v2  ;;  %v2691_v6 = vld [vmem:[%s2669_s5 + $0x8] sm:$0xf]  ;;  %v2698_v8 = vld [vmem:[%s2669_s5 + $0xc] sm:$0x1]  ;;  %v306_v9 = vshrl.u32 %v2688_v5, 16  ;;  %v309_v10 = vshll.u32 %v2688_v5, 16 }
  0x1e   : > { %2313 = vmatprep.subr.bf16.mxu1 %v2532_v3  ;;  %2361 = vmatprep.subr.bf16.mxu0 %v2684_v4  ;;  %v315_v11 = vshll.u32 %v2694_v7, 16  ;;  %v320_v12 = vshrl.u32 %v2691_v6, 16  ;;  %vm303_vm2 = vsmask.f32 7440  ;;  %v323_v13 = vshll.u32 %v2691_v6, 16  ;;  %v2708_v19 = vld [vmem:[%s2664_s28] sm:$0xff]  }
  0x1f   : > { %v329_v14 = vshll.u32 %v2698_v8, 16  ;;  %v308_v15 = vrot.slane %v306_v9, 4  ;;  %v311_v16 = vrot.slane %v309_v10, 5  ;;  %v2711_v20 = vld [vmem:[%s2664_s28 + $0x50] sm:$0xff]   ;;  %v2129_v23 = vld [vmem:[%s2669_s5 + $0x8] sm:$0xf]  ;;  %vm2725_vm4 = vmor %vm302_vm1, %vm303_vm2 }
  0x20   : > { %v317_v17 = vrot.slane %v315_v11, 5  ;;  %v322_v18 = vrot.slane %v320_v12, 4  ;;  %v325_v21 = vrot.slane %v323_v13, 5  ;;  %v2715_v24 = vld [vmem:[%s2669_s5 + $0xc] sm:$0x1]  ;;  %v951_v28 = vshrl.u32 %v2129_v23, 16 }
  0x21   : > { %2314 = vmatpush3.bf16.msra.mxu1 %v2532_v3  ;;  %2362 = vmatpush3.bf16.msra.mxu0 %v2684_v4  ;;  %v331_v22 = vrot.slane %v329_v14, 5  ;;  %v312_v25 = vor.u32 %v311_v16, %v308_v15  ;;  %v2131_v26 = vld [vmem:[%s2669_s5 + $0x10] sm:$0xf]  ;;  %v2720_v27 = vld [vmem:[%s2669_s5 + $0x14] sm:$0x1]  ;;  %v954_v29 = vshll.u32 %v2129_v23, 16 }
  0x22   : > { %2323 = vmatprep.subr.bf16.mxu1 %v2708_v19  ;;  %2371 = vmatprep.subr.bf16.mxu0 %v2711_v20  ;;  %v326_v31 = vor.u32 %v325_v21, %v322_v18  ;;  %v960_v32 = vshll.u32 %v2715_v24, 16  ;;  %v965_v33 = vshrl.u32 %v2131_v26, 16  ;;  %v968_v34 = vshll.u32 %v2131_v26, 16  ;;  %v2732_v43 = vld [vmem:[%s2669_s5 + $0x10] sm:$0xf]  ;;  %p2251_p9 = scmp.ne.s32.totalorder %s2582_s15, 2 }
  0x23   : > { %v313_v35 = vrot.slane %v312_v25, 4  ;;  %v953_v36 = vrot.slane %v951_v28, 4  ;;  %v956_v37 = vrot.slane %v954_v29, 5  ;;  %v974_v38 = vshll.u32 %v2720_v27, 16  ;;  %v2738_v48 = vld [vmem:[%s2669_s5 + $0x18] sm:$0xf] }
  0x24   : > { %v327_v39 = vrot.slane %v326_v31, 4  ;;  %v962_v40 = vrot.slane %v960_v32, 5  ;;  %v967_v41 = vrot.slane %v965_v33, 4  ;;  %v970_v42 = vrot.slane %v968_v34, 5  ;;  %v2741_v49 = vld [vmem:[%s2669_s5 + $0x14] sm:$0x1] }
  0x25   : > { %v318_v44 = vsel %vm2725_vm4, %v313_v35, %v317_v17  ;;  %v957_v45 = vor.u32 %v956_v37, %v953_v36  ;;  %v976_v46 = vrot.slane %v974_v38, 5  ;;  %v1201_v47 = vrot.slane %v2715_v24, 5  ;;  %v2747_v53 = vld [vmem:[%s2669_s5 + $0x1c] sm:$0x1]  ;;  %v2133_v63 = vld [vmem:[%s2669_s5 + $0x18] sm:$0xf] }
  0x26   : > { %v332_v50 = vsel %vm2725_vm4, %v327_v39, %v331_v22  ;;  %v971_v51 = vor.u32 %v970_v42, %v967_v41  ;;  %v1205_v52 = vrot.slane %v2720_v27, 5  ;;  %v334_v54 = vshrl.u32 %v2732_v43, 16  ;;  %v2760_v9 = vld [vmem:[%s2669_s5 + $0x1c] sm:$0x1]  ;;  %v2135_v10 = vld [vmem:[%s2669_s5 + $0x20] sm:$0xf] }
  0x27   : > { %v2073_v55 = vcombine.low %v318_v44, %v332_v50  ;;  %v958_v56 = vrot.slane %v957_v45, 4  ;;  %v337_v57 = vshll.u32 %v2732_v43, 16  ;;  %v343_v58 = vshll.u32 %v2741_v49, 16  ;;  %v2766_v14 = vld [vmem:[%s2669_s5 + $0x24] sm:$0x1] }
  0x28   : > { %v972_v59 = vrot.slane %v971_v51, 4  ;;  %v336_v60 = vrot.slane %v334_v54, 4  ;;  %v348_v61 = vshrl.u32 %v2738_v48, 16  ;;  %v351_v62 = vshll.u32 %v2738_v48, 16  ;;  %v2770_v26 = vld [vmem:[%s2669_s5 + $0x20] sm:$0xf] }
  0x29   : > { %2315 = vmatprep.mubr.msk.bf16.mxu1 %vm445_vm3, %v2073_v55  ;;  %v963_v0 = vsel %vm2725_vm4, %v958_v56, %v962_v40  ;;  %v339_v1 = vrot.slane %v337_v57, 5  ;;  %v357_v3 = vshll.u32 %v2747_v53, 16  ;;  %v345_v17 = vrot.slane %v343_v58, 5  ;;  %v2775_v33 = vld [vmem:[%s2669_s5 + $0x28] sm:$0xf] }
  0x2a   : > { %v977_v11 = vsel %vm2725_vm4, %v972_v59, %v976_v46  ;;  %v350_v12 = vrot.slane %v348_v61, 4  ;;  %v353_v13 = vrot.slane %v351_v62, 5  ;;  %v979_v22 = vshrl.u32 %v2133_v63, 16  ;;  %v2778_v38 = vld [vmem:[%s2669_s5 + $0x24] sm:$0x1]  ;;  %v2537_v58 = vld [vmem:[%s2664_s28 + $0x8] sm:$0xff]  }
  0x2b   : > { %v2145_v15 = vcombine.low %v963_v0, %v977_v11  ;;  %v340_v16 = vor.u32 %v339_v1, %v336_v60  ;;  %v359_v18 = vrot.slane %v357_v3, 5  ;;  %v982_v23 = vshll.u32 %v2133_v63, 16  ;;  %v2787_v51 = vld [vmem:[%s2669_s5 + $0x2c] sm:$0x1]  ;;  %v2793_v59 = vld [vmem:[%s2669_s5 + $0x30] sm:$0xf] }
  0x2c   : > { %v354_v21 = vor.u32 %v353_v13, %v350_v12  ;;  %v988_v25 = vshll.u32 %v2760_v9, 16  ;;  %v993_v29 = vshrl.u32 %v2135_v10, 16  ;;  %v996_v31 = vshll.u32 %v2135_v10, 16  ;;  %v2799_v0 = vld [vmem:[%s2669_s5 + $0x38] sm:$0xf] }
  0x2d   : > { %2363 = vmatprep.mubr.msk.bf16.mxu0 %vm445_vm3, %v2145_v15  ;;  %v341_v28 = vrot.slane %v340_v16, 4  ;;  %v1002_v32 = vshll.u32 %v2766_v14, 16  ;;  %vm657_vm6 = vcmask 1046532   ;;  %v981_v35 = vrot.slane %v979_v22, 4  ;;  %v2802_v1 = vld [vmem:[%s2669_s5 + $0x34] sm:$0x1] }
  0x2e   : > { %v355_v34 = vrot.slane %v354_v21, 4  ;;  %v984_v36 = vrot.slane %v982_v23, 5  ;;  %v990_v37 = vrot.slane %v988_v25, 5  ;;  %v995_v40 = vrot.slane %v993_v29, 4  ;;  %v2807_v13 = vld [vmem:[%s2669_s5 + $0x3c] sm:$0x1]  ;;  %vm2831_vm7 = vmor %vm656_vm5, %vm657_vm6 }
  0x2f   : > { %v346_v39 = vsel %vm2725_vm4, %v341_v28, %v345_v17  ;;  %v998_v41 = vrot.slane %v996_v31, 5  ;;  %v1004_v42 = vrot.slane %v1002_v32, 5  ;;  %v1209_v46 = vrot.slane %v2760_v9, 5  ;;  %v2536_v16 = vld [vmem:[%s2664_s28 + $0x58] sm:$0xff]   ;;  %v2155_v22 = vld [vmem:[%s2669_s5 + $0x8] sm:$0xe] }
  0x30   : > { %v360_v44 = vsel %vm2725_vm4, %v355_v34, %v359_v18  ;;  %v985_v45 = vor.u32 %v984_v36, %v981_v35  ;;  %v1213_v50 = vrot.slane %v2766_v14, 5  ;;  %v362_v56 = vshrl.u32 %v2770_v26, 16  ;;  %v2815_v23 = vld [vmem:[%s2664_s28 + $0x20] sm:$0xff]   ;;  %v2156_v36 = vld [vmem:[%s2669_s5 + $0x10] sm:$0xe] }
  0x31   : > { %v2074_v54 = vcombine.low %v346_v39, %v360_v44  ;;  %v999_v55 = vor.u32 %v998_v41, %v995_v40  ;;  %v365_v57 = vshll.u32 %v2770_v26, 16  ;;  %v371_v61 = vshll.u32 %v2778_v38, 16  ;;  %v2158_v44 = vld [vmem:[%s2669_s5 + $0x20] sm:$0xe]  ;;  %v2161_v27 = vld [vmem:[%s2669_s5 + $0x38] sm:$0xe] }
  0x32   : > { %v986_v60 = vrot.slane %v985_v45, 4  ;;  %v376_v62 = vshrl.u32 %v2775_v33, 16  ;;  %v379_v63 = vshll.u32 %v2775_v33, 16  ;;  %v364_v10 = vrot.slane %v362_v56, 4 }
  0x33   : > { %2316 = vmatmul.mubr.msk.bf16.vlgmr.msra.gmra.mrb[0].mxu1 %vm445_vm3, %v2074_v54  ;;  %v1000_v3 = vrot.slane %v999_v55, 4  ;;  %v367_v11 = vrot.slane %v365_v57, 5  ;;  %v385_v12 = vshll.u32 %v2787_v51, 16  ;;  %v373_v17 = vrot.slane %v371_v61, 5 }
  0x34   : > { %2324 = vmatpush3.bf16.msra.mxu1 %v2708_v19  ;;  %v991_v15 = vsel %vm2725_vm4, %v986_v60, %v990_v37  ;;  %v378_v18 = vrot.slane %v376_v62, 4  ;;  %v381_v21 = vrot.slane %v379_v63, 5  ;;  %v390_v19 = vshrl.u32 %v2793_v59, 16  ;;  %v2157_v37 = vld [vmem:[%s2669_s5 + $0x18] sm:$0xe] }
  0x35   : > { %v1005_v25 = vsel %vm2725_vm4, %v1000_v3, %v1004_v42  ;;  %v368_v28 = vor.u32 %v367_v11, %v364_v10  ;;  %v387_v29 = vrot.slane %v385_v12, 5  ;;  %2325 = vmatprep.subr.bf16.mxu1 %v2537_v58  ;;  %v393_v34 = vshll.u32 %v2793_v59, 16  ;;  %v2538_v3 = vld [vmem:[%s2664_s28 + $0x60] sm:$0xff]  }
  0x36   : > { %v2146_v31 = vcombine.low %v991_v15, %v1005_v25  ;;  %v382_v32 = vor.u32 %v381_v21, %v378_v18  ;;  %v399_v35 = vshll.u32 %v2802_v1, 16  ;;  %v392_v40 = vrot.slane %v390_v19, 4  ;;  %v2846_v15 = vld [vmem:[%s2669_s5 + $0x34] sm:$0x1] }
  0x37   : > { %v369_v39 = vrot.slane %v368_v28, 4  ;;  %v404_v41 = vshrl.u32 %v2799_v0, 16  ;;  %v407_v42 = vshll.u32 %v2799_v0, 16  ;;  %v395_v54 = vrot.slane %v393_v34, 5  ;;  %v2160_v28 = vld [vmem:[%s2669_s5 + $0x30] sm:$0xe] }
  0x38   : > { %2364 = vmatmul.mubr.msk.bf16.vlgmr.msra.gmra.mrb[0].mxu0 %vm445_vm3, %v2146_v31  ;;  %v383_v45 = vrot.slane %v382_v32, 4  ;;  %v401_v55 = vrot.slane %v399_v35, 5  ;;  %v413_v56 = vshll.u32 %v2807_v13, 16  ;;  %2326 = vmatpush3.bf16.msra.mxu1 %v2537_v58  ;;  %v2163_v63 = vrot.slane %v2155_v22, 9  ;;  %v2841_v58 = vld [vmem:[%s2669_s5 + $0x2c] sm:$0x1] }
  0x39   : > { %2372 = vmatpush3.bf16.msra.mxu0 %v2711_v20  ;;  %v374_v60 = vsel %vm2725_vm4, %v369_v39, %v373_v17  ;;  %v406_v61 = vrot.slane %v404_v41, 4  ;;  %v409_v62 = vrot.slane %v407_v42, 5  ;;  %2335 = vmatprep.subr.bf16.mxu1 %v2815_v23  ;;  %v396_v11 = vor.u32 %v395_v54, %v392_v40  ;;  %v2159_v17 = vld [vmem:[%s2669_s5 + $0x28] sm:$0xe]  ;;  %v2859_v32 = vld [vmem:[%s2669_s5 + $0x3c] sm:$0x1] }
  0x3a   : > { %2373 = vmatprep.subr.bf16.mxu0 %v2536_v16  ;;  %v388_v10 = vsel %vm2725_vm4, %v383_v45, %v387_v29  ;;  %v415_v12 = vrot.slane %v413_v56, 5  ;;  %v2164_v20 = vrot.slane %v2156_v36, 9  ;;  %v1202_v22 = vsel %vm2831_vm7, %v2163_v63, %v1201_v47  ;;  %v2867_v36 = vld [vmem:[%s2669_s5 + $0x44] sm:$0x1]  ;;  %v2162_v39 = vld [vmem:[%s2669_s5 + $0x40] sm:$0xe] }
  0x3b   : > { %v2075_v18 = vcombine.low %v374_v60, %v388_v10  ;;  %v410_v21 = vor.u32 %v409_v62, %v406_v61  ;;  %v2165_v25 = vrot.slane %v2157_v37, 9  ;;  %v397_v19 = vrot.slane %v396_v11, 4  ;;  %v632_v60 = vld [vmem:[%s2669_s5] sm:$0xe]  ;;  %v633_v62 = vld [vmem:[%s2669_s5 + $0x8] sm:$0xe] }
  0x3c   : > { %v1206_v29 = vsel %vm2831_vm7, %v2164_v20, %v1205_v52  ;;  %v2166_v31 = vrot.slane %v2158_v44, 9  ;;  %v2167_v35 = vrot.slane %v2159_v17, 9  ;;  %v1217_v37 = vrot.slane %v2841_v58, 5  ;;  %v2544_v20 = vld [vmem:[%s2664_s28 + $0x28] sm:$0xff]   ;;  %v2908_v17 = vld [vmem:[%s2664_s28 + $0x70] sm:$0xff]  }
  0x3d   : > { %2374 = vmatpush3.bf16.msra.mxu0 %v2536_v16  ;;  %2319 = vmatprep.mubr.msk.bf16.mxu1 %vm445_vm3, %v2075_v18  ;;  %v411_v34 = vrot.slane %v410_v21, 4  ;;  %v2171_v24 = vcombine.low %v1202_v22, %v1206_v29  ;;  %v1210_v47 = vsel %vm2831_vm7, %v2165_v25, %v1209_v46  ;;  %v402_v52 = vsel %vm2725_vm4, %v397_v19, %v401_v55  ;;  %v2546_v18 = vld [vmem:[%s2669_s5 + $0x10] ss:$8 sps:$4 sm:$0xff]   ;;  %v636_v19 = vld [vmem:[%s2669_s5 + $0x20] sm:$0xe] }
  0x3e   : > { %2383 = vmatprep.subr.bf16.mxu0 %v2538_v3  ;;  %v1214_v16 = vsel %vm2831_vm7, %v2166_v31, %v1213_v50  ;;  %v2168_v9 = vrot.slane %v2160_v28, 9  ;;  %v2083_v40 = vcombine.low %v2688_v5, %v2691_v6  ;;  %v1221_v41 = vrot.slane %v2846_v15, 5  ;;  %v2542_v5 = vld [vmem:[%s2664_s28 + $0x68] sm:$0xff]   ;;  %v634_v21 = vld [vmem:[%s2669_s5 + $0x10] sm:$0xe] }
  0x3f   : > { %v416_v46 = vsel %vm2725_vm4, %v411_v34, %v415_v12  ;;  %2375 = vmatprep.mubr.msk.bf16.mxu0 %vm445_vm3, %v2171_v24  ;;  %v2172_v42 = vcombine.low %v1210_v47, %v1214_v16  ;;  %v1218_v50 = vsel %vm2831_vm7, %v2167_v35, %v1217_v37  ;;  %v2169_v45 = vrot.slane %v2161_v27, 9  ;;  %v635_v22 = vld [vmem:[%s2669_s5 + $0x18] sm:$0xe]  ;;  %v637_v31 = vld [vmem:[%s2669_s5 + $0x28] sm:$0xe] }
  0x40   : > { %v2076_v14 = vcombine.low %v402_v52, %v416_v46  ;;  %v1222_v44 = vsel %vm2831_vm7, %v2168_v9, %v1221_v41  ;;  %v1225_v54 = vrot.slane %v2859_v32, 5  ;;  %v2170_v55 = vrot.slane %v2162_v39, 9  ;;  %v2935_v35 = vld [vmem:[%s2669_s5 + $0x30] sm:$0xe]  ;;  %v2938_v27 = vld [vmem:[%s2669_s5 + $0x38] sm:$0xe] }
  0x41   : > { %v2173_v56 = vcombine.low %v1218_v50, %v1222_v44  ;;  %v1229_v6 = vrot.slane %v2867_v36, 5  ;;  %v661_v61 = vrot.slane %v2694_v7, 5  ;;  %v665_v63 = vrot.slane %v2698_v8, 5  ;;  %v2945_v37 = vld [vmem:[%s2669_s5 + $0x14] sm:$0x1] }
  0x42   : > { %2320 = vmatmul.mubr.msk.bf16.gmra.mrb[4].mxu1 %vm445_vm3, %v2076_v14  ;;  %v669_v10 = vrot.slane %v2741_v49, 5  ;;  %v1226_v11 = vsel %vm2831_vm7, %v2169_v45, %v1225_v54  ;;  %v2084_v12 = vcombine.low %v2732_v43, %v2738_v48  ;;  %v2093_v8 = vrot.slane %v632_v60, 9  ;;  %v2201_v9 = vld [vmem:[%s2669_s5 + $0x18] sm:$0xf]  ;;  %v2548_v46 = vld [vmem:[%s2669_s5 + $0x20] ss:$8 sps:$4 sm:$0xff]  }
  0x43   : > { %2327 = vmatprep.mubr.msk.bf16.mxu1 %vm445_vm3, %v2083_v40  ;;  %v1230_v7 = vsel %vm2831_vm7, %v2170_v55, %v1229_v6  ;;  %v2094_v49 = vrot.slane %v633_v62, 9  ;;  %v673_v28 = vrot.slane %v2747_v53, 5  ;;  %v677_v43 = vrot.slane %v2778_v38, 5  ;;  %v2958_v14 = vld [vmem:[%s2669_s5 + $0x1c] sm:$0x1] }
  0x44   : > { %2376 = vmatmul.mubr.msk.bf16.vlgmr.msra.gmra.mrb[0].mxu0 %vm445_vm3, %v2172_v42  ;;  %v2174_v25 = vcombine.low %v1226_v11, %v1230_v7  ;;  %v662_v48 = vsel %vm2831_vm7, %v2093_v8, %v661_v61  ;;  %v2095_v53 = vrot.slane %v634_v21, 9  ;;  %v2096_v29 = vrot.slane %v635_v22, 9  ;;  %v2550_v42 = vld [vmem:[%s2669_s5 + $0x30] ss:$8 sps:$4 sm:$0xff]   ;;  %v2203_v60 = vld [vmem:[%s2669_s5 + $0x20] sm:$0xf] }
  0x45   : > { %2384 = vmatpush3.bf16.msra.mxu0 %v2538_v3  ;;  %2379 = vmatprep.mubr.msk.bf16.mxu0 %vm445_vm3, %v2173_v56  ;;  %v2085_v3 = vcombine.low %v2770_v26, %v2775_v33  ;;  %v666_v26 = vsel %vm2831_vm7, %v2094_v49, %v665_v63  ;;  %v2925_v33 = vld [vmem:[%s2664_s28 + $0x30] sm:$0xff]   ;;  %v2097_v38 = vrot.slane %v636_v19, 9  ;;  %v681_v34 = vrot.slane %v2787_v51, 5  ;;  %v2972_v11 = vld [vmem:[%s2669_s5 + $0x24] sm:$0x1] }
  0x46   : > { %2385 = vmatprep.subr.bf16.mxu0 %v2542_v5  ;;  %v685_v24 = vrot.slane %v2802_v1, 5  ;;  %v689_v47 = vrot.slane %v2807_v13, 5  ;;  %v2086_v52 = vcombine.low %v2793_v59, %v2799_v0  ;;  %v2101_v51 = vcombine.low %v662_v48, %v666_v26  ;;  %v2205_v7 = vld [vmem:[%s2669_s5 + $0x28] sm:$0xf]  ;;  %v2978_v49 = vld [vmem:[%s2669_s5 + $0x2c] sm:$0x1] }
  0x47   : > { %v2098_v16 = vrot.slane %v637_v31, 9  ;;  %v2951_v40 = vsel %vm2831_vm7, %v2095_v53, %v669_v10  ;;  %v2955_v41 = vsel %vm2831_vm7, %v2096_v29, %v673_v28  ;;  %v1500_v0 = vshll.u32 %v2945_v37, 16 }
  0x48   : > { %v2099_v50 = vrot.slane %v2935_v35, 9  ;;  %v1505_v45 = vshrl.u32 %v2201_v9, 16  ;;  %v1508_v54 = vshll.u32 %v2201_v9, 16  ;;  %v2100_v55 = vrot.slane %v2938_v27, 9  ;;  %v2553_v27 = vld [vmem:[%s2664_s28 + $0x38] sm:$0xff]  }
  0x49   : > { %2386 = vmatpush3.bf16.msra.mxu0 %v2542_v5  ;;  %v1502_v5 = vrot.slane %v1500_v0, 5  ;;  %v1514_v6 = vshll.u32 %v2958_v14, 16  ;;  %v678_v61 = vsel %vm2831_vm7, %v2097_v38, %v677_v43  ;;  %v682_v62 = vsel %vm2831_vm7, %v2098_v16, %v681_v34  ;;  %v2552_v34 = vld [vmem:[%s2669_s5 + $0x40] ss:$8 sps:$4 sm:$0xff]   ;;  %v2209_v0 = vld [vmem:[%s2669_s5 + $0x38] sm:$0xf] }
  0x4a   : > { %2328 = vmatmul.mubr.msk.bf16.vlgmr.msra.gmra.mrb[0].mxu1 %vm445_vm3, %v2084_v12  ;;  %2395 = vmatprep.subr.bf16.mxu0 %v2908_v17  ;;  %v1507_v63 = vrot.slane %v1505_v45, 4  ;;  %v1510_v10 = vrot.slane %v1508_v54, 5  ;;  %v2551_v12 = vld [vmem:[%s2664_s28 + $0x78] sm:$0xff]   ;;  %v1528_v22 = vshll.u32 %v2972_v11, 16  ;;  %v1536_v28 = vshll.u32 %v2205_v7, 16 }
  0x4b   : > { %2336 = vmatpush3.bf16.msra.mxu1 %v2815_v23  ;;  %2331 = vmatprep.mubr.msk.bf16.mxu1 %vm445_vm3, %v2085_v3  ;;  %v2199_v23 = vld [vmem:[%s2669_s5 + $0x10] sm:$0xf]  ;;  %v1516_v8 = vrot.slane %v1514_v6, 5  ;;  %v1519_v3 = vshrl.u32 %v2203_v60, 16  ;;  %v1542_v26 = vshll.u32 %v2978_v49, 16  ;;  %v2102_v53 = vcombine.low %v2951_v40, %v2955_v41 }
  0x4c   : > { %2380 = vmatmul.mubr.msk.bf16.gmra.mrb[4].mxu0 %vm445_vm3, %v2174_v25  ;;  %2337 = vmatprep.subr.bf16.mxu1 %v2544_v20  ;;  %v1491_v39 = vshrl.u32 %v2199_v23, 16  ;;  %v1494_v59 = vshll.u32 %v2199_v23, 16  ;;  %v1511_v21 = vor.u32 %v1510_v10, %v1507_v63  ;;  %v1533_v25 = vshrl.u32 %v2205_v7, 16  ;;  %v2207_v40 = vld [vmem:[%s2669_s5 + $0x30] sm:$0xf] }
  0x4d   : > { %2387 = vmatprep.mubr.msk.bf16.mxu0 %vm445_vm3, %v2546_v18  ;;  %v1522_v18 = vshll.u32 %v2203_v60, 16  ;;  %v1521_v43 = vrot.slane %v1519_v3, 4  ;;  %v1538_v38 = vrot.slane %v1536_v28, 5  ;;  %v2103_v35 = vcombine.low %v678_v61, %v682_v62  ;;  %v3005_v41 = vld [vmem:[%s2669_s5 + $0x34] sm:$0x1] }
  0x4e   : > { %v1493_v44 = vrot.slane %v1491_v39, 4  ;;  %v1496_v56 = vrot.slane %v1494_v59, 5  ;;  %v1512_v29 = vrot.slane %v1511_v21, 4  ;;  %v1535_v31 = vrot.slane %v1533_v25, 4  ;;  %v2211_v63 = vld [vmem:[%s2669_s5 + $0x40] sm:$0xf] }
  0x4f   : > { %2338 = vmatpush3.bf16.msra.mxu1 %v2544_v20  ;;  %v1524_v48 = vrot.slane %v1522_v18, 5  ;;  %v1530_v9 = vrot.slane %v1528_v22, 5  ;;  %v690_v1 = vsel %vm2831_vm7, %v2100_v55, %v689_v47  ;;  %v1550_v45 = vshll.u32 %v2207_v40, 16  ;;  %v2555_v3 = vld [vmem:[%s2669_s5 + $0x8] ss:$8 sps:$4 sm:$0xff]  }
  0x50   : > { %2347 = vmatprep.subr.bf16.mxu1 %v2925_v33  ;;  %v1497_v20 = vor.u32 %v1496_v56, %v1493_v44  ;;  %v1517_v16 = vsel %vm2725_vm4, %v1512_v29, %v1516_v8  ;;  %v1539_v39 = vor.u32 %v1538_v38, %v1535_v31  ;;  %v1556_v54 = vshll.u32 %v3005_v41, 16  ;;  %v2213_v8 = vld [vmem:[%s2669_s5 + $0x48] sm:$0xf]  ;;  %v3036_v21 = vld [vmem:[%s2669_s5 + $0x4c] sm:$0x1] }
  0x51   : > { %v1561_v56 = vshrl.u32 %v2209_v0, 16  ;;  %v1016_v55 = vshll.u32 %v2841_v58, 16  ;;  %v1552_v60 = vrot.slane %v1550_v45, 5  ;;  %v1575_v22 = vshrl.u32 %v2211_v63, 16 }
  0x52   : > { %2332 = vmatmul.mubr.msk.bf16.gmra.mrb[4].mxu1 %vm445_vm3, %v2086_v52  ;;  %v1498_v19 = vrot.slane %v1497_v20, 4  ;;  %v2999_v52 = vld [vmem:[%s2664_s28 + $0x80] sm:$0xff]   ;;  %v1540_v44 = vrot.slane %v1539_v39, 4  ;;  %v1558_v61 = vrot.slane %v1556_v54, 5  ;;  %v1578_v25 = vshll.u32 %v2211_v63, 16 }
  0x53   : > { %2339 = vmatprep.mubr.msk.bf16.mxu1 %vm445_vm3, %v2101_v51  ;;  %v1525_v51 = vor.u32 %v1524_v48, %v1521_v43  ;;  %v1563_v62 = vrot.slane %v1561_v56, 4  ;;  %v3030_v20 = vld [vmem:[%s2669_s5 + $0x44] sm:$0x1]  ;;  %v1589_v43 = vshrl.u32 %v2213_v8, 16  ;;  %v1592_v48 = vshll.u32 %v2213_v8, 16 }
  0x54   : > { %2388 = vmatmul.mubr.msk.bf16.vlgmr.msra.gmra.mrb[0].mxu0 %vm445_vm3, %v2548_v46  ;;  %v1503_v23 = vsel %vm2725_vm4, %v1498_v19, %v1502_v5  ;;  %v1544_v46 = vrot.slane %v1542_v26, 5  ;;  %v1564_v5 = vshll.u32 %v2209_v0, 16  ;;  %v1584_v28 = vshll.u32 %v3030_v20, 16  ;;  %v2227_v54 = vld [vmem:[%s2669_s5 + $0x20] sm:$0xe] }
  0x55   : > { %2396 = vmatpush3.bf16.msra.mxu0 %v2908_v17  ;;  %2391 = vmatprep.mubr.msk.bf16.mxu0 %vm445_vm3, %v2550_v42  ;;  %v2994_v17 = vsel %vm2831_vm7, %v2099_v50, %v685_v24  ;;  %v2215_v24 = vcombine.low %v1503_v23, %v1517_v16  ;;  %v1526_v59 = vrot.slane %v1525_v51, 4  ;;  %v3013_v42 = vld [vmem:[%s2669_s5 + $0x3c] sm:$0x1]  ;;  %v1547_v50 = vshrl.u32 %v2207_v40, 16  ;;  %v2225_v40 = vld [vmem:[%s2669_s5 + $0x10] sm:$0xe] }
  0x56   : > { %2397 = vmatprep.subr.bf16.mxu0 %v2551_v12  ;;  %v1570_v47 = vshll.u32 %v3013_v42, 16  ;;  %v2104_v6 = vcombine.low %v2994_v17, %v690_v1  ;;  %v1545_v7 = vsel %vm2725_vm4, %v1540_v44, %v1544_v46  ;;  %v1598_v26 = vshll.u32 %v3036_v21, 16  ;;  %v2557_v17 = vld [vmem:[%s2664_s28 + $0x88] sm:$0xff]   ;;  %v2226_v1 = vld [vmem:[%s2669_s5 + $0x18] sm:$0xe] }
  0x57   : > { %v1549_v13 = vrot.slane %v1547_v50, 4  ;;  %v1531_v10 = vsel %vm2725_vm4, %v1526_v59, %v1530_v9  ;;  %v1577_v29 = vrot.slane %v1575_v22, 4  ;;  %v1580_v31 = vrot.slane %v1578_v25, 5  ;;  %v2556_v56 = vld [vmem:[%s2669_s5 + $0x18] ss:$8 sps:$4 sm:$0xff]  }
  0x58   : > { %v1741_v38 = vrot.slane %v2945_v37, 5  ;;  %v1591_v23 = vrot.slane %v1589_v43, 4  ;;  %v1594_v51 = vrot.slane %v1592_v48, 5  ;;  %v1600_v39 = vrot.slane %v1598_v26, 5  ;;  %v2230_v22 = vld [vmem:[%s2669_s5 + $0x38] sm:$0xe] }
  0x59   : > { %2398 = vmatpush3.bf16.msra.mxu0 %v2551_v12  ;;  %v1572_v12 = vrot.slane %v1570_v47, 5  ;;  %v1553_v18 = vor.u32 %v1552_v60, %v1549_v13  ;;  %v1581_v9 = vor.u32 %v1580_v31, %v1577_v29  ;;  %v1749_v59 = vrot.slane %v2972_v11, 5  ;;  %v2141_v48 = vld [vmem:[%s2669_s5 + $0x38] sm:$0xf]  ;;  %v2143_v29 = vld [vmem:[%s2669_s5 + $0x40] sm:$0xf] }
  0x5a   : > { %2340 = vmatmul.mubr.msk.bf16.vlgmr.msra.gmra.mrb[0].mxu1 %vm445_vm3, %v2102_v53  ;;  %2407 = vmatprep.subr.bf16.mxu0 %v2999_v52  ;;  %v1595_v46 = vor.u32 %v1594_v51, %v1591_v23  ;;  %v2233_v44 = vrot.slane %v2225_v40, 9  ;;  %v2234_v45 = vrot.slane %v2226_v1, 9  ;;  %v2235_v47 = vrot.slane %v2227_v54, 9  ;;  %v2231_v40 = vld [vmem:[%s2669_s5 + $0x40] sm:$0xe] }
  0x5b   : > { %2348 = vmatpush3.bf16.msra.mxu1 %v2925_v33  ;;  %2343 = vmatprep.mubr.msk.bf16.mxu1 %vm445_vm3, %v2103_v35  ;;  %v1566_v33 = vrot.slane %v1564_v5, 5  ;;  %v1554_v53 = vrot.slane %v1553_v18, 4  ;;  %v1582_v50 = vrot.slane %v1581_v9, 4  ;;  %v2228_v5 = vld [vmem:[%s2669_s5 + $0x28] sm:$0xe]  ;;  %v1753_v60 = vrot.slane %v2978_v49, 5 }
  0x5c   : > { %2392 = vmatmul.mubr.msk.bf16.gmra.mrb[4].mxu0 %vm445_vm3, %v2552_v34  ;;  %2349 = vmatprep.subr.bf16.mxu1 %v2553_v27  ;;  %v2216_v34 = vcombine.low %v1531_v10, %v1545_v7  ;;  %v1596_v13 = vrot.slane %v1595_v46, 4  ;;  %v1742_v11 = vsel %vm2831_vm7, %v2233_v44, %v1741_v38  ;;  %v2236_v63 = vrot.slane %v2228_v5, 9 }
  0x5d   : > { %2399 = vmatprep.mubr.msk.bf16.mxu0 %vm445_vm3, %v2215_v24  ;;  %v1567_v19 = vor.u32 %v1566_v33, %v1563_v62  ;;  %v1559_v16 = vsel %vm2725_vm4, %v1554_v53, %v1558_v61  ;;  %v1745_v24 = vrot.slane %v2958_v14, 5  ;;  %v2137_v61 = vld [vmem:[%s2669_s5 + $0x28] sm:$0xf]  ;;  %v2139_v62 = vld [vmem:[%s2669_s5 + $0x30] sm:$0xf]  ;;  %v1018_v7 = vrot.slane %v1016_v55, 5 }
  0x5e   : > { %v1007_v10 = vshrl.u32 %v2137_v61, 16  ;;  %v2229_v33 = vld [vmem:[%s2669_s5 + $0x30] sm:$0xe]  ;;  %v1010_v49 = vshll.u32 %v2137_v61, 16  ;;  %v1021_v18 = vshrl.u32 %v2139_v62, 16  ;;  %v1030_v43 = vshll.u32 %v2846_v15, 16 }
  0x5f   : > { %2350 = vmatpush3.bf16.msra.mxu1 %v2553_v27  ;;  %v1568_v35 = vrot.slane %v1567_v19, 4  ;;  %v1586_v27 = vrot.slane %v1584_v28, 5  ;;  %v1024_v19 = vshll.u32 %v2139_v62, 16  ;;  %v2237_v26 = vrot.slane %v2229_v33, 9 }
  0x60   : > { %2419 = vmatprep.subr.bf16.mxu1 %v2679_v2  ;;  %v1009_v28 = vrot.slane %v1007_v10, 4  ;;  %v1012_v58 = vrot.slane %v1010_v49, 5  ;;  %v1023_v55 = vrot.slane %v1021_v18, 4  ;;  %v1757_v53 = vrot.slane %v3005_v41, 5  ;;  %v2559_v41 = vld [vmem:[%s2669_s5 + $0x38] ss:$8 sps:$4 sm:$0xff]  }
  0x61   : > { %v1573_v37 = vsel %vm2725_vm4, %v1568_v35, %v1572_v12  ;;  %v1587_v14 = vsel %vm2725_vm4, %v1582_v50, %v1586_v27  ;;  %v2558_v12 = vld [vmem:[%s2669_s5 + $0x28] ss:$8 sps:$4 sm:$0xff]   ;;  %v1754_v31 = vsel %vm2831_vm7, %v2236_v63, %v1753_v60  ;;  %v1026_v38 = vrot.slane %v1024_v19, 5 }
  0x62   : > { %2344 = vmatmul.mubr.msk.bf16.gmra.mrb[4].mxu1 %vm445_vm3, %v2104_v6  ;;  %v2217_v0 = vcombine.low %v1559_v16, %v1573_v37  ;;  %v1746_v6 = vsel %vm2831_vm7, %v2234_v45, %v1745_v24  ;;  %v1761_v35 = vrot.slane %v3013_v42, 5  ;;  %v1013_v15 = vor.u32 %v1012_v58, %v1009_v28  ;;  %v2232_v50 = vld [vmem:[%s2669_s5 + $0x48] sm:$0xe]  ;;  %v1886_v18 = vld [vmem:[#allocation2 + $0x10] sm:$0xff] }
  0x63   : > { %2351 = vmatprep.mubr.msk.bf16.mxu1 %vm445_vm3, %v2555_v3  ;;  %v2241_v8 = vcombine.low %v1742_v11, %v1746_v6  ;;  %v3076_v3 = vsel %vm2831_vm7, %v2235_v47, %v1749_v59  ;;  %v1035_v23 = vshrl.u32 %v2141_v48, 16  ;;  %v1038_v51 = vshll.u32 %v2141_v48, 16 }
  0x64   : > { %2400 = vmatmul.mubr.msk.bf16.vlgmr.msra.gmra.mrb[0].mxu0 %vm445_vm3, %v2216_v34  ;;  %v2238_v34 = vrot.slane %v2230_v22, 9  ;;  %v1027_v16 = vor.u32 %v1026_v38, %v1023_v55  ;;  %v1758_v9 = vsel %vm2831_vm7, %v2237_v26, %v1757_v53  ;;  %v1049_v42 = vshrl.u32 %v2143_v29, 16  ;;  %v1885_v55 = vld [vmem:[#allocation2 + $0x8] sm:$0xff] }
  0x65   : > { %2408 = vmatpush3.bf16.msra.mxu0 %v2999_v52  ;;  %2403 = vmatprep.mubr.msk.bf16.mxu0 %vm445_vm3, %v2217_v0  ;;  %v1601_v52 = vsel %vm2725_vm4, %v1596_v13, %v1600_v39  ;;  %v1052_v27 = vshll.u32 %v2143_v29, 16  ;;  %v1037_v37 = vrot.slane %v1035_v23, 4  ;;  %v1040_v46 = vrot.slane %v1038_v51, 5 }
  0x66   : > { %2409 = vmatprep.subr.bf16.mxu0 %v2557_v17  ;;  %v2218_v25 = vcombine.low %v1587_v14, %v1601_v52  ;;  %v1762_v39 = vsel %vm2831_vm7, %v2238_v34, %v1761_v35  ;;  %v1044_v1 = vshll.u32 %v2859_v32, 16  ;;  %v1028_v24 = vrot.slane %v1027_v16, 4 }
  0x67   : > { %v1051_v59 = vrot.slane %v1049_v42, 4  ;;  %v1054_v0 = vrot.slane %v1052_v27, 5  ;;  %v1058_v44 = vshll.u32 %v2867_v36, 16  ;;  %v2242_v45 = vcombine.low %v3076_v3, %v1754_v31  ;;  %v1891_v27 = vld [vmem:[#allocation2 + $0x38] sm:$0xff] }
  0x68   : > { %v2243_v5 = vcombine.low %v1758_v9, %v1762_v39  ;;  %v2239_v32 = vrot.slane %v2231_v40, 9  ;;  %v1765_v11 = vrot.slane %v3030_v20, 5  ;;  %v2240_v6 = vrot.slane %v2232_v50, 9  ;;  %v2252_v50 = vld [vmem:[%s3171_s2] ss:$0 sm:$0xff] (!%p2251_p9) }
  0x69   : > { %2410 = vmatpush3.bf16.msra.mxu0 %v2557_v17  ;;  %v1032_v17 = vrot.slane %v1030_v43, 5  ;;  %v1055_v47 = vor.u32 %v1054_v0, %v1051_v59  ;;  %v1769_v36 = vrot.slane %v3036_v21, 5  ;;  %v1060_v60 = vrot.slane %v1058_v44, 5  ;;  %v1887_v43 = vld [vmem:[#allocation2 + $0x18] sm:$0xff]  ;;  %v2253_v44 = vld [vmem:[%s3172_s3] ss:$0 sm:$0xff] (!%p2251_p9) }
  0x6a   : > { %2352 = vmatmul.mubr.msk.bf16.vlgmr.msra.gmra.mrb[0].mxu1 %vm445_vm3, %v2556_v56  ;;  %v1041_v56 = vor.u32 %v1040_v46, %v1037_v37  ;;  %v1766_v52 = vsel %vm2831_vm7, %v2239_v32, %v1765_v11  ;;  %v1889_v46 = vld [vmem:[#allocation2 + $0x28] sm:$0xff]  ;;  %vm1966_vm8 = vcmask (!%p2251_p9), 257024  }
  0x6b   : > { %2421 = vmatpush3.bf16.msra.mxu1 %v2679_v2  ;;  %2355 = vmatprep.mubr.msk.bf16.mxu1 %vm445_vm3, %v2558_v12  ;;  %v1014_v2 = vrot.slane %v1013_v15, 4  ;;  %v1033_v13 = vsel %vm2725_vm4, %v1028_v24, %v1032_v17  ;;  %v1056_v62 = vrot.slane %v1055_v47, 4  ;;  %v1770_v20 = vsel %vm2831_vm7, %v2240_v6, %v1769_v36  ;;  %v1890_v15 = vld [vmem:[#allocation2 + $0x30] sm:$0xff] }
  0x6c   : > { %2404 = vmatmul.mubr.msk.bf16.gmra.mrb[4].mxu0 %vm445_vm3, %v2218_v25  ;;  %2420 = vmatprep.subr.bf16.mxu1 %v2684_v4  ;;  %v1042_v61 = vrot.slane %v1041_v56, 4  ;;  %v2244_v10 = vcombine.low %v1766_v52, %v1770_v20  ;;  %v1884_v25 = vld [vmem:[#allocation2] sm:$0xff] }
  0x6d   : > { %2411 = vmatprep.mubr.msk.bf16.mxu0 %vm445_vm3, %v2241_v8  ;;  %v1019_v54 = vsel %vm2725_vm4, %v1014_v2, %v1018_v7  ;;  %v1061_v63 = vsel %vm2725_vm4, %v1056_v62, %v1060_v60 }
  0x6e   : > { %v2147_v14 = vcombine.low %v1019_v54, %v1033_v13 }
  0x6f   : > { %2422 = vmatpush3.bf16.msra.mxu1 %v2684_v4  ;;  %v1046_v4 = vrot.slane %v1044_v1, 5 }
  0x71   : > { %v1047_v21 = vsel %vm2725_vm4, %v1042_v61, %v1046_v4 }
  0x72   : > { %2356 = vmatmul.mubr.msk.bf16.gmra.mrb[4].mxu1 %vm445_vm3, %v2559_v41  ;;  %v2148_v7 = vcombine.low %v1047_v21, %v1061_v63  ;;  %v1888_v41 = vld [vmem:[#allocation2 + $0x20] sm:$0xff] }
  0x73   : > { %2367 = vmatprep.mubr.msk.bf16.mxu1 %vm445_vm3, %v2147_v14 }
  0x74   : > { %2412 = vmatmul.mubr.msk.bf16.vlgmr.msra.gmra.mrb[0].mxu0 %vm445_vm3, %v2242_v45 }
  0x75   : > { %2415 = vmatprep.mubr.msk.bf16.mxu0 %vm445_vm3, %v2243_v5 }
  0x7c   : > { %2416 = vmatmul.mubr.msk.bf16.gmra.mrb[4].mxu0 %vm445_vm3, %v2244_v10 }
  0x7e   : > { %2368 = vmatmul.mubr.msk.bf16.vlgmr.msra.gmra.mrb[4].mxu1 %vm445_vm3, %v2148_v7 }
 0x13d   : > { %v2353_v33 = vpop.f32.mrb[0].mxu1 }
 0x13e   : > { %v895_v12 = vpop.f32.mrb[1].mxu1 }
 0x13f   : > { %v2354_v8 = vpop.f32.mrb[2].mxu1 }
 0x140   : > { %v898_v3 = vpop.f32.mrb[3].mxu1 }
 0x147   : > { %v2413_v49 = vpop.f32.mrb[0].mxu0 }
 0x148   : > { %v2423_v57 = vadd.f32 %v2413_v49, %v2353_v33  ;;  %v1845_v22 = vpop.f32.mrb[1].mxu0 }
 0x149   : > { %v2424_v28 = vadd.f32 %v1845_v22, %v895_v12  ;;  %v2414_v19 = vpop.f32.mrb[2].mxu0 }
 0x14a   : > { %v1894_v30 = vadd.f32 %v2423_v57, %v1886_v18  ;;  %v2425_v48 = vadd.f32 %v2414_v19, %v2354_v8  ;;  %v1848_v58 = vpop.f32.mrb[3].mxu0 }
 0x14b   : > { %v1892_v26 = vadd.f32 %v2424_v28, %v1884_v25  ;;  %v2426_v53 = vadd.f32 %v1848_v58, %v898_v3 }
 0x14c   : > { %1902 = vst.msk [vmem:[#allocation2 + $0x10] sm:$0xff] %vm445_vm3, %v1894_v30  ;;  %v1895_v29 = vadd.f32 %v2425_v48, %v1887_v43 }
 0x14d   : > { %1900 = vst.msk [vmem:[#allocation2] sm:$0xff] %vm445_vm3, %v1892_v26  ;;  %v1893_v31 = vadd.f32 %v2426_v53, %v1885_v55 }
 0x14e   : > { %1903 = vst.msk [vmem:[#allocation2 + $0x18] sm:$0xff] %vm445_vm3, %v1895_v29 }
 0x14f   : > { %1901 = vst.msk [vmem:[#allocation2 + $0x8] sm:$0xff] %vm445_vm3, %v1893_v31  ;;  %v2417_v38 = vpop.f32.mrb[4].mxu0 }
 0x150   : > { %v1861_v34 = vpop.f32.mrb[5].mxu0 }
 0x151   : > { %v2369_v35 = vpop.f32.mrb[4].mxu1  ;;  %v2418_v17 = vpop.f32.mrb[6].mxu0 }
 0x152   : > { %v2427_v23 = vadd.f32 %v2417_v38, %v2369_v35  ;;  %v1152_v51 = vpop.f32.mrb[5].mxu1  ;;  %v1864_v16 = vpop.f32.mrb[7].mxu0 }
 0x153   : > { %v2428_v9 = vadd.f32 %v1861_v34, %v1152_v51  ;;  %v2370_v42 = vpop.f32.mrb[6].mxu1  ;;  %1911 = sbr.rel (%p2251_p9) target bundleno = 362 (0x16a), region = 44  ;;  %v1914_v56 = vld [vmem:[#allocation2 + $0x10] sm:$0xff] (!%p2251_p9) }
 0x154   : > { %v1898_v2 = vadd.f32 %v2427_v23, %v1890_v15  ;;  %v2429_v39 = vadd.f32 %v2418_v17, %v2370_v42  ;;  %v1155_v37 = vpop.f32.mrb[7].mxu1  ;;  %v1912_v0 = vld [vmem:[#allocation2] sm:$0xff] (!%p2251_p9)  ;;  %v1929_v47 = vmul.f32 (!%p2251_p9), %v2252_v50, %v1914_v56 }
 0x155   : > { %v1896_v40 = vadd.f32 %v2428_v9, %v1888_v41  ;;  %v2430_v1 = vadd.f32 %v1864_v16, %v1155_v37  ;;  %v1927_v45 = vmul.f32 (!%p2251_p9), %v2252_v50, %v1912_v0  ;;  %v1915_v13 = vld [vmem:[#allocation2 + $0x18] sm:$0xff] (!%p2251_p9) }
 0x156   : > { %1906 = vst.msk [vmem:[#allocation2 + $0x30] sm:$0xff] %vm445_vm3, %v1898_v2  ;;  %v1899_v24 = vadd.f32 %v2429_v39, %v1891_v27  ;;  %v1913_v54 = vld [vmem:[#allocation2 + $0x8] sm:$0xff] (!%p2251_p9)  ;;  %v1930_v32 = vmul.f32 (!%p2251_p9), %v2252_v50, %v1915_v13  ;;  %v1944_v20 = vadd.f32 (!%p2251_p9), %v2253_v44, %v1929_v47 }
 0x157   : > { %1904 = vst.msk [vmem:[#allocation2 + $0x20] sm:$0xff] %vm445_vm3, %v1896_v40  ;;  %v1897_v59 = vadd.f32 %v2430_v1, %v1889_v46  ;;  %v1928_v5 = vmul.f32 (!%p2251_p9), %v2252_v50, %v1913_v54  ;;  %v1942_v36 = vadd.f32 (!%p2251_p9), %v2253_v44, %v1927_v45 }
 0x158   : > { %1907 = vst.msk [vmem:[#allocation2 + $0x38] sm:$0xff] %vm445_vm3, %v1899_v24  ;;  %v1945_v21 = vadd.f32 (!%p2251_p9), %v2253_v44, %v1930_v32  ;;  %v1952_v3 = vmax.f32 (!%p2251_p9), %v1944_v20, 0.0 }
 0x159   : > { %1905 = vst.msk [vmem:[#allocation2 + $0x28] sm:$0xff] %vm445_vm3, %v1897_v59  ;;  %v1943_v52 = vadd.f32 (!%p2251_p9), %v2253_v44, %v1928_v5  ;;  %v1950_v10 = vmax.f32 (!%p2251_p9), %v1942_v36, 0.0 }
 0x15a   : > { %v1953_v49 = vmax.f32 %v1945_v21, 0.0  ;;  %v1960_v43 = vpack.c.bf16 %v1952_v3, %v1952_v3 }
 0x15b   : > { %v1951_v8 = vmax.f32 %v1943_v52, 0.0  ;;  %v1958_v57 = vpack.c.bf16 %v1950_v10, %v1950_v10 }
 0x15c   : > { %v1961_v30 = vpack.c.bf16 %v1953_v49, %v1953_v49  ;;  %1969 = vst.msk [vmem:[%s2674_s9 + $0x8] sm:$0xf] %vm1966_vm8, %v1960_v43 }
 0x15d   : > { %v1918_v6 = vld [vmem:[#allocation2 + $0x30] sm:$0xff]  ;;  %v1959_v19 = vpack.c.bf16 %v1951_v8, %v1951_v8  ;;  %1967 = vst.msk [vmem:[%s2674_s9] sm:$0xf] %vm1966_vm8, %v1958_v57 }
 0x15e   : > { %v1916_v14 = vld [vmem:[#allocation2 + $0x20] sm:$0xff]  ;;  %v1933_v61 = vmul.f32 %v2252_v50, %v1918_v6  ;;  %1970 = vst.msk [vmem:[%s2674_s9 + $0xc] sm:$0xf] %vm1966_vm8, %v1961_v30 }
 0x15f   : > { %v1931_v4 = vmul.f32 %v2252_v50, %v1916_v14  ;;  %v1919_v62 = vld [vmem:[#allocation2 + $0x38] sm:$0xff]  ;;  %1968 = vst.msk [vmem:[%s2674_s9 + $0x4] sm:$0xf] %vm1966_vm8, %v1959_v19 }
 0x160   : > { %v1917_v11 = vld [vmem:[#allocation2 + $0x28] sm:$0xff]  ;;  %v1934_v63 = vmul.f32 %v2252_v50, %v1919_v62  ;;  %v1948_v12 = vadd.f32 %v2253_v44, %v1933_v61 }
 0x161   : > { %v1932_v60 = vmul.f32 %v2252_v50, %v1917_v11  ;;  %v1946_v7 = vadd.f32 %v2253_v44, %v1931_v4 }
 0x162   : > { %v1949_v18 = vadd.f32 %v2253_v44, %v1934_v63  ;;  %v1956_v28 = vmax.f32 %v1948_v12, 0.0 }
 0x163   : > { %v1947_v33 = vadd.f32 %v2253_v44, %v1932_v60  ;;  %v1954_v22 = vmax.f32 %v1946_v7, 0.0 }
 0x164   : > { %v1957_v48 = vmax.f32 %v1949_v18, 0.0  ;;  %v1964_v26 = vpack.c.bf16 %v1956_v28, %v1956_v28 }
 0x165   : > { %v1955_v25 = vmax.f32 %v1947_v33, 0.0  ;;  %v1962_v58 = vpack.c.bf16 %v1954_v22, %v1954_v22 }
 0x166   : > { %v1965_v53 = vpack.c.bf16 %v1957_v48, %v1957_v48  ;;  %1973 = vst.msk [vmem:[%s2674_s9 + $0x18] sm:$0xf] %vm1966_vm8, %v1964_v26 }
 0x167   : > { %v1963_v55 = vpack.c.bf16 %v1955_v25, %v1955_v25  ;;  %1971 = vst.msk [vmem:[%s2674_s9 + $0x10] sm:$0xf] %vm1966_vm8, %v1962_v58 }
 0x168   : > { %1974 = vst.msk [vmem:[%s2674_s9 + $0x1c] sm:$0xf] %vm1966_vm8, %v1965_v53 }
 0x169   : > { %1972 = vst.msk [vmem:[%s2674_s9 + $0x14] sm:$0xf] %vm1966_vm8, %v1963_v55 }
 0x16a PF: > { %s14_s19 = sadd.s32 1, %s2598_s19   ;;  %s3178_s15 = smov %s2590_s17 }
 0x16b   : > { %p11_p10 = scmp.ge.s32.totalorder %s14_s19, 26   ;;  %s3179_s16 = smov %s2594_s18 }
 0x16c   : > { %s3180_s17 = smov %s3183_s20  ;;  %s3181_s18 = smov %s3187_s21 }
 0x16d   :  { %13 = sbr.rel (!%p11_p10) target bundleno = 3 (0x3), region = 79 }

// kernel: unet3d_forward.11
= control target key start
LH: loop header
LB: loop body
LE: loop exit
PB: predicated region body
PF: predicated region fallthrough
CT: control target
= control target key end

     0   :  { %s1817_s15 = smov 0   ;;  %s1819_s16 = smov 0   ;;  %s2040_s0 = inlined_call_operand.vmem [shape: bf16[10,4,5,5,32], index: 0, kind: input, shape index: {}]   ;;  %s2041_s1 = inlined_call_operand.vmem [shape: bf16[3,288,64], index: 1, kind: input, shape index: {}]   ;;  %s2042_s2 = inlined_call_operand.vmem [shape: f32[1,64], index: 2, kind: input, shape index: {}]   ;;  %s2043_s3 = inlined_call_operand.vmem [shape: f32[1,64], index: 3, kind: input, shape index: {}]   ;;  %s2044_s4 = inlined_call_operand.vmem [shape: bf16[4,4,4,64], index: 4, kind: output, shape index: {}]  }
   0x1   :  { %s1821_s17 = smov 0   ;;  %s1823_s18 = smov 0  }
   0x2   :  { %s1825_s19 = smov 0  }
   0x3 LB: > { %s26_s20 = sadd.s32 1, %s1778_s17  ;;  %s29_s21 = sadd.s32 1, %s1782_s18  ;;  %s1786_s19 = sphi %s1825_s19, %s14_s19   ;;  %s1782_s18 = sphi %s1823_s18, %s2054_s18   ;;  %s1778_s17 = sphi %s1821_s17, %s2053_s17   ;;  %s1774_s16 = sphi %s1819_s16, %s2052_s16   ;;  %s1770_s15 = sphi %s1817_s15, %s2051_s15  }
   0x4   : > { %p27_p0 = scmp.ge.s32.totalorder %s26_s20, 3  ;;  %p1481_p1 = scmp.ge.s32.totalorder %s1786_s19, 1 }
   0x5   : > { %p211_p2 = scmp.lt.s32.totalorder %s1786_s19, 13 }
   0x6   : > { %s2056_s20 = smov (%p27_p0, %s26_s20), 0  ;;  %s2058_s21 = smov (!%p27_p0, %s29_s21), %s1782_s18 }
   0x7   : > { %p212_p3 = pnand %p1481_p1, %p211_p2  ;;  %p31_p4 = scmp.ge.s32.totalorder %s2058_s21, 4 }
   0x8   : > { %s1482_s22 = sshll.u32 (!%p212_p3), %s1774_s16, 1  ;;  %p261_p5 = scmp.lt.s32.totalorder (!%p212_p3), %s1770_s15, 2 }
   0x9   : > { %s2060_s21 = smov (%p31_p4, %s2058_s21), 0  ;;  %215 = sbr.rel (%p212_p3) target bundleno = 317 (0x13d), region = 36 }
   0xa   : > { %s251_s23 = sadd.s32 (!%p212_p3), %s1770_s15, %s1482_s22  ;;  %p268_p7 = scmp.lt.s32.totalorder (!%p212_p3), %s1774_s16, 3 }
   0xb   : > { %p252_p6 = scmp.lt.s32.totalorder (!%p212_p3), %s251_s23, 9  ;;  %p1487_p8 = scmp.ne.s32.totalorder (!%p212_p3), %s1770_s15, 0 }
  0x10   : > { %s262_s24 = scalar_select %p261_p5, %s1770_s15, 2 }
  0x11   : > { %s2062_s23 = smov (!%p252_p6, %s251_s23), 9  ;;  %s2064_s16 = smov (!%p268_p7, %s1774_s16), 3 }
  0x12   : > { %s1661_s25 = smul.u32 144, %s262_s24  ;;  %s1560_s7 = sshll.u32 %s2064_s16, 3  ;;  %vm280_vm0 = vcmask (!%p1487_p8), 523264   ;;  %v1788_v0 = vmov (!%p1487_p8), 0.0  }
  0x13   : > { %s1660_s26 = smul.u32 80, %s2062_s23  ;;  %s1865_s10 = scalar_lea.vmem %s2044_s4, %s1560_s7  ;;  %281 = vst.msk [vmem:[#allocation2] sm:$0xff] (!%p1487_p8), %vm280_vm0, %v1788_v0  ;;  %282 = vst.msk [vmem:[#allocation2 + $0x8] sm:$0xff] (!%p1487_p8), %vm280_vm0, %v1788_v0 }
  0x14   : > { %s1855_s29 = scalar_lea.vmem %s2041_s1, %s1661_s25  ;;  %279 = sbr.rel (%p1487_p8) target bundleno = 27 (0x1b), region = 40 }
  0x15   : > { %s1860_s6 = scalar_lea.vmem %s2040_s0, %s1660_s26 }
  0x1b PF: > { %v1706_v1 = vld [vmem:[%s1855_s29 + $0x10] sm:$0xff]   ;;  %v1789_v2 = vmov 0.0   ;;  %v1707_v3 = vld [vmem:[%s1855_s29] sm:$0xff]   ;;  %v309_v4 = vlaneseq  ;;  %v1708_v5 = vld [vmem:[%s1855_s29 + $0x18] sm:$0xff]   ;;  %vm1790_vm1 = vmmov 0   ;;  %vm333_vm2 = vcmask 261120  }
  0x1c   : > { %1588 = vmatprep.subr.bf16.mxu0 %v1789_v2  ;;  %1596 = vmatprep.subr.bf16.mxu1 %v1789_v2  ;;  %v1709_v6 = vld [vmem:[%s1855_s29 + $0x8] sm:$0xff]   ;;  %v1736_v8 = vld.sshfl [vmem:[%s1860_s6 + $0x14] sm:$0xf pattern:$0x76325410]  ;;  %v1714_v16 = vld [vmem:[%s1855_s29 + $0x20] sm:$0xff]  }
  0x1d   : > { %1589 = vmatpush3.bf16.msra.mxu0 %v1706_v1  ;;  %1592 = vmatprep.mubr.msk.bf16.mxu0 %vm1790_vm1, %v1789_v2  ;;  %v310_v7 = vshrl.u32 %v309_v4, 7  ;;  %v1737_v9 = vld.sshfl [vmem:[%s1860_s6 + $0x1c] sm:$0xf pattern:$0x76325410]  ;;  %v1715_v17 = vld [vmem:[%s1855_s29 + $0x30] sm:$0xff]  }
  0x1e   : > { %1597 = vmatpush3.bf16.msra.mxu1 %v1707_v3  ;;  %1590 = vmatprep.subr.bf16.mxu0 %v1789_v2  ;;  %v1791_v10 = vmov 1983009808   ;;  %v1738_v12 = vld.sshfl [vmem:[%s1860_s6] sm:$0xf pattern:$0x76325410]  ;;  %v320_v23 = vcombine.low %v1736_v8, %v1737_v9 }
  0x1f   : > { %1598 = vmatprep.subr.bf16.mxu1 %v1789_v2  ;;  %1600 = vmatprep.mubr.msk.bf16.mxu1 %vm1790_vm1, %v1789_v2  ;;  %v307_v11 = vunpack.c.l.s4 %v1791_v10  ;;  %v1739_v14 = vld.sshfl [vmem:[%s1860_s6 + $0x8] sm:$0xf pattern:$0x76325410]  ;;  %vm495_vm3 = vsmask.f32 1280 }
  0x20   : > { %v1498_v18 = vld.sshfl [vmem:[%s1860_s6] sm:$0x13 pattern:$0x76325410]  ;;  %v398_v24 = vcombine.low %v1738_v12, %v1739_v14  ;;  %vm496_vm4 = vsmask.f32 3336 }
  0x21   : > { %1591 = vmatpush3.bf16.msra.mxu0 %v1708_v5  ;;  %v308_v13 = vunpack.c.0.s8 %v307_v11  ;;  %v1499_v19 = vld.sshfl [vmem:[%s1860_s6 + $0x4] sm:$0x13 pattern:$0x76325410]  ;;  %v470_v21 = vcombine.high %v1498_v18, %v1498_v18  ;;  %v1716_v27 = vld [vmem:[%s1855_s29 + $0x28] sm:$0xff]   ;;  %v1717_v28 = vld [vmem:[%s1855_s29 + $0x38] sm:$0xff]  }
  0x22   : > { %1599 = vmatpush3.bf16.msra.mxu1 %v1709_v6  ;;  %1604 = vmatprep.subr.bf16.mxu0 %v1789_v2  ;;  %v1500_v20 = vld.sshfl [vmem:[%s1860_s6 + $0x8] sm:$0x13 pattern:$0x76325410]  ;;  %v478_v22 = vcombine.high %v1499_v19, %v1499_v19  ;;  %vm1896_vm5 = vmor %vm495_vm3, %vm496_vm4  ;;  %vm498_vm6 = vsmask.f32 5392 }
  0x23   : > { %1612 = vmatprep.subr.bf16.mxu1 %v1789_v2  ;;  %v1886_v15 = vsub.s32 %v308_v13, %v310_v7  ;;  %v1501_v25 = vld.sshfl [vmem:[%s1860_s6 + $0xc] sm:$0x13 pattern:$0x76325410]  ;;  %v486_v26 = vcombine.high %v1500_v20, %v1500_v20  ;;  %vm500_vm7 = vsmask.f32 7448  ;;  %vm1907_vm8 = vmor %vm1896_vm5, %vm498_vm6 }
  0x24   : > { %v494_v29 = vcombine.high %v1501_v25, %v1501_v25  ;;  %v503_v31 = vshrl.u32 %v1498_v18, 16  ;;  %1593 = vmatmul.mubr.msk.bf16.vlgmr.msra.gmra.mrb[0].mxu0 %vm333_vm2, %v320_v23  ;;  %v506_v32 = vshll.u32 %v1498_v18, 16  ;;  %v512_v33 = vshll.u32 %v470_v21, 16  ;;  %vm1919_vm9 = vmor %vm1907_vm8, %vm500_vm7  ;;  %v1721_v5 = vld [vmem:[%s1855_s29 + $0x50] sm:$0xff]   ;;  %v1723_v10 = vld [vmem:[%s1855_s29 + $0x58] sm:$0xff]   ;;  %p1555_p9 = scmp.ne.s32.totalorder %s1770_s15, 2 }
  0x25   : > { %1601 = vmatmul.mubr.msk.bf16.vlgmr.msra.gmra.mrb[0].mxu1 %vm333_vm2, %v398_v24  ;;  %v517_v34 = vshrl.u32 %v1499_v19, 16  ;;  %v520_v35 = vshll.u32 %v1499_v19, 16  ;;  %1605 = vmatpush3.bf16.msra.mxu0 %v1714_v16  ;;  %v526_v37 = vshll.u32 %v478_v22, 16  ;;  %v531_v38 = vshrl.u32 %v1500_v20, 16 }
  0x26   : > { %1613 = vmatpush3.bf16.msra.mxu1 %v1715_v17  ;;  %v505_v36 = vrot.slane %v503_v31, 6  ;;  %v534_v39 = vshll.u32 %v1500_v20, 16  ;;  %1606 = vmatprep.subr.bf16.mxu0 %v1789_v2  ;;  %v508_v41 = vrot.slane %v506_v32, 7  ;;  %v514_v42 = vrot.slane %v512_v33, 7 }
  0x27   : > { %1614 = vmatprep.subr.bf16.mxu1 %v1789_v2  ;;  %v519_v43 = vrot.slane %v517_v34, 6  ;;  %v522_v44 = vrot.slane %v520_v35, 7  ;;  %1608 = vmatprep.mubr.msk.bf16.mxu0 %vm1790_vm1, %v1789_v2  ;;  %v528_v45 = vrot.slane %v526_v37, 7  ;;  %v533_v46 = vrot.slane %v531_v38, 6 }
  0x28   : > { %v536_v47 = vrot.slane %v534_v39, 7  ;;  %v540_v48 = vshll.u32 %v486_v26, 16  ;;  %1616 = vmatprep.mubr.msk.bf16.mxu1 %vm1790_vm1, %v1789_v2  ;;  %v509_v49 = vor.u32 %v508_v41, %v505_v36  ;;  %v545_v51 = vshrl.u32 %v1501_v25, 16  ;;  %v1722_v36 = vld [vmem:[%s1855_s29 + $0x48] sm:$0xff]  }
  0x29   : > { %v523_v50 = vor.u32 %v522_v44, %v519_v43  ;;  %v548_v52 = vshll.u32 %v1501_v25, 16  ;;  %v1740_v53 = vld.sshfl [vmem:[%s1860_s6 + $0x28] sm:$0xf pattern:$0x76325410]  ;;  %1607 = vmatpush3.bf16.msra.mxu0 %v1716_v27  ;;  %v554_v57 = vshll.u32 %v494_v29, 16 }
  0x2a   : > { %1615 = vmatpush3.bf16.msra.mxu1 %v1717_v28  ;;  %v537_v55 = vor.u32 %v536_v47, %v533_v46  ;;  %v542_v56 = vrot.slane %v540_v48, 7  ;;  %v1741_v58 = vld.sshfl [vmem:[%s1860_s6 + $0x30] sm:$0xf pattern:$0x76325410]  ;;  %1620 = vmatprep.subr.bf16.mxu0 %v1789_v2  ;;  %v510_v59 = vrot.slane %v509_v49, 2 }
  0x2b   : > { %v524_v60 = vrot.slane %v523_v50, 2  ;;  %v547_v61 = vrot.slane %v545_v51, 6  ;;  %v550_v62 = vrot.slane %v548_v52, 7  ;;  %1628 = vmatprep.subr.bf16.mxu1 %v1789_v2  ;;  %v556_v4 = vrot.slane %v554_v57, 7  ;;  %v1718_v28 = vld [vmem:[%s1855_s29 + $0x40] sm:$0xff]  }
  0x2c   : > { %v538_v63 = vrot.slane %v537_v55, 2  ;;  %v515_v0 = vsel %vm1919_vm9, %v510_v59, %v514_v42  ;;  %v666_v7 = vcombine.low %v1740_v53, %v1741_v58  ;;  %v1941_v11 = vld.sshfl [vmem:[%s1860_s6 + $0x3c] sm:$0xf pattern:$0x76325410]  ;;  %vm1343_vm10 = vcmask 523264  }
  0x2d   : > { %v1930_v1 = vsel %vm1919_vm9, %v524_v60, %v528_v45  ;;  %v551_v3 = vor.u32 %v550_v62, %v547_v61  ;;  %v1944_v12 = vld.sshfl [vmem:[%s1860_s6 + $0x44] sm:$0xf pattern:$0x76325410]  ;;  %vm1382_vm11 = vcmask (!%p1555_p9), 517120  }
  0x2e   : > { %v562_v6 = vcombine.low %v515_v0, %v1930_v1  ;;  %v1936_v8 = vsel %vm1919_vm9, %v538_v63, %v542_v56  ;;  %1617 = vmatmul.mubr.msk.bf16.vlgmr.msra.gmra.mrb[4].mxu1 %vm333_vm2, %v666_v7  ;;  %v1523_v14 = vld.sshfl [vmem:[%s1860_s6 + $0x28] sm:$0x13 pattern:$0x76325410]  ;;  %v754_v57 = vcombine.low %v1941_v11, %v1944_v12  ;;  %v1726_v58 = vld [vmem:[%s1855_s29 + $0x60] sm:$0xff]  }
  0x2f   : > { %v552_v9 = vrot.slane %v551_v3, 2  ;;  %1629 = vmatpush3.bf16.msra.mxu1 %v1721_v5  ;;  %1632 = vmatprep.mubr.msk.bf16.mxu1 %vm1790_vm1, %v1789_v2  ;;  %v1524_v18 = vld.sshfl [vmem:[%s1860_s6 + $0x2c] sm:$0x13 pattern:$0x76325410]  ;;  %v828_v19 = vcombine.high %v1523_v14, %v1523_v14  ;;  %v854_v22 = vshrl.u32 %v1523_v14, 16 }
  0x30   : > { %v570_v17 = vrot.slane %v562_v6, %v1886_v15  ;;  %1630 = vmatprep.subr.bf16.mxu1 %v1789_v2  ;;  %v1525_v20 = vld.sshfl [vmem:[%s1860_s6 + $0x30] sm:$0x13 pattern:$0x76325410]  ;;  %v836_v21 = vcombine.high %v1524_v18, %v1524_v18  ;;  %v857_v23 = vshll.u32 %v1523_v14, 16  ;;  %v868_v31 = vshrl.u32 %v1524_v18, 16 }
  0x31   : > { %v1948_v13 = vsel %vm1919_vm9, %v552_v9, %v556_v4  ;;  %v1526_v25 = vld.sshfl [vmem:[%s1860_s6 + $0x34] sm:$0x13 pattern:$0x76325410]  ;;  %v844_v26 = vcombine.high %v1525_v20, %v1525_v20  ;;  %v863_v27 = vshll.u32 %v828_v19, 16  ;;  %v856_v29 = vrot.slane %v854_v22, 6 }
  0x32   : > { %v563_v16 = vcombine.low %v1936_v8, %v1948_v13  ;;  %v859_v30 = vrot.slane %v857_v23, 7  ;;  %v852_v33 = vcombine.high %v1526_v25, %v1526_v25  ;;  %v871_v34 = vshll.u32 %v1524_v18, 16  ;;  %v1744_v61 = vld.sshfl [vmem:[%s1860_s6 + $0x4] sm:$0xf pattern:$0x76325410] }
  0x33   : > { %1631 = vmatpush3.bf16.msra.mxu1 %v1723_v10  ;;  %v877_v35 = vshll.u32 %v836_v21, 16  ;;  %v870_v38 = vrot.slane %v868_v31, 6  ;;  %v882_v39 = vshrl.u32 %v1525_v20, 16  ;;  %v885_v40 = vshll.u32 %v1525_v20, 16  ;;  %v1728_v9 = vld [vmem:[%s1855_s29 + $0x68] sm:$0xff]  }
  0x34   : > { %v577_v24 = vrot.slane %v563_v16, %v1886_v15  ;;  %1644 = vmatprep.subr.bf16.mxu1 %v1789_v2  ;;  %v860_v37 = vor.u32 %v859_v30, %v856_v29  ;;  %v865_v41 = vrot.slane %v863_v27, 7  ;;  %v873_v42 = vrot.slane %v871_v34, 7  ;;  %v1745_v3 = vld.sshfl [vmem:[%s1860_s6 + $0xc] sm:$0xf pattern:$0x76325410] }
  0x35   : > { %v891_v43 = vshll.u32 %v844_v26, 16  ;;  %v896_v44 = vshrl.u32 %v1526_v25, 16  ;;  %v884_v46 = vrot.slane %v882_v39, 6  ;;  %v887_v47 = vrot.slane %v885_v40, 7 }
  0x36   : > { %v578_v32 = vcombine.low %v570_v17, %v577_v24  ;;  %v861_v45 = vrot.slane %v860_v37, 2  ;;  %v899_v48 = vshll.u32 %v1526_v25, 16  ;;  %v874_v49 = vor.u32 %v873_v42, %v870_v38  ;;  %v1551_v11 = vld.sshfl [vmem:[%s1860_s6 + $0x10] sm:$0x13 pattern:$0x76325410] }
  0x37   : > { %v879_v50 = vrot.slane %v877_v35, 7  ;;  %v898_v51 = vrot.slane %v896_v44, 6  ;;  %v905_v52 = vshll.u32 %v852_v33, 16  ;;  %v888_v53 = vor.u32 %v887_v47, %v884_v46  ;;  %v1727_v24 = vld [vmem:[%s1855_s29 + $0x70] sm:$0xff]   ;;  %v1732_v25 = vld [vmem:[%s1855_s29 + $0x80] sm:$0xff]   ;;  %v1735_v33 = vld [vmem:[%s1855_s29 + $0x88] sm:$0xff]  }
  0x38   : > { %1609 = vmatmul.mubr.msk.bf16.vlgmr.msra.gmra.mrb[4].mxu0 %vm333_vm2, %v578_v32  ;;  %v893_v55 = vrot.slane %v891_v43, 7  ;;  %v901_v56 = vrot.slane %v899_v48, 7  ;;  %v866_v59 = vsel %vm1919_vm9, %v861_v45, %v865_v41  ;;  %v875_v60 = vrot.slane %v874_v49, 2  ;;  %v1729_v32 = vld [vmem:[%s1855_s29 + $0x78] sm:$0xff]  }
  0x39   : > { %1621 = vmatpush3.bf16.msra.mxu0 %v1718_v28  ;;  %1624 = vmatprep.mubr.msk.bf16.mxu0 %vm1790_vm1, %v1789_v2  ;;  %v889_v62 = vrot.slane %v888_v53, 2  ;;  %v907_v0 = vrot.slane %v905_v52, 7  ;;  %v1203_v16 = vcombine.high %v1551_v11, %v1551_v11  ;;  %v1247_v17 = vshrl.u32 %v1551_v11, 16 }
  0x3a   : > { %1622 = vmatprep.subr.bf16.mxu0 %v1789_v2  ;;  %v902_v63 = vor.u32 %v901_v56, %v898_v51  ;;  %v880_v4 = vsel %vm1919_vm9, %v875_v60, %v879_v50  ;;  %v1250_v18 = vshll.u32 %v1551_v11, 16  ;;  %v1017_v20 = vcombine.low %v1744_v61, %v1745_v3  ;;  %v1746_v21 = vld.sshfl [vmem:[%s1860_s6 + $0x18] sm:$0xf pattern:$0x76325410] }
  0x3b   : > { %v894_v5 = vsel %vm1919_vm9, %v889_v62, %v893_v55  ;;  %v913_v7 = vcombine.low %v866_v59, %v880_v4  ;;  %v1747_v22 = vld.sshfl [vmem:[%s1860_s6 + $0x20] sm:$0xf pattern:$0x76325410]  ;;  %v1256_v23 = vshll.u32 %v1203_v16, 16  ;;  %v1249_v26 = vrot.slane %v1247_v17, 6 }
  0x3c   : > { %v903_v6 = vrot.slane %v902_v63, 2  ;;  %v1252_v27 = vrot.slane %v1250_v18, 7  ;;  %v1264_v31 = vcombine.low %v1930_v1, %v1936_v8 }
  0x3d   : > { %1623 = vmatpush3.bf16.msra.mxu0 %v1722_v36  ;;  %v921_v14 = vrot.slane %v913_v7, %v1886_v15  ;;  %v1258_v30 = vrot.slane %v1256_v23, 7  ;;  %v1105_v36 = vcombine.low %v1746_v21, %v1747_v22  ;;  %v1339_v22 = vld [vmem:[#allocation2] sm:$0xff] }
  0x3e   : > { %1636 = vmatprep.subr.bf16.mxu0 %v1789_v2  ;;  %v908_v10 = vsel %vm1919_vm9, %v903_v6, %v907_v0  ;;  %v1253_v29 = vor.u32 %v1252_v27, %v1249_v26  ;;  %v1272_v8 = vrot.slane %v1264_v31, %v1886_v15 }
  0x3f   : > { %v914_v12 = vcombine.low %v894_v5, %v908_v10 }
  0x40   : > { %1625 = vmatmul.mubr.msk.bf16.vlgmr.msra.gmra.mrb[8].mxu0 %vm333_vm2, %v754_v57  ;;  %v1254_v34 = vrot.slane %v1253_v29, 2 }
  0x41   : > { %1637 = vmatpush3.bf16.msra.mxu0 %v1726_v58  ;;  %1640 = vmatprep.mubr.msk.bf16.mxu0 %vm1790_vm1, %v1789_v2  ;;  %v928_v19 = vrot.slane %v914_v12, %v1886_v15 }
  0x42   : > { %1638 = vmatprep.subr.bf16.mxu0 %v1789_v2  ;;  %v1259_v35 = vsel %vm1919_vm9, %v1254_v34, %v1258_v30  ;;  %v1556_v34 = vld [vmem:[%s2042_s2] ss:$0 sm:$0xff] (!%p1555_p9) }
  0x43   : > { %v929_v28 = vcombine.low %v921_v14, %v928_v19  ;;  %v1265_v1 = vcombine.low %v1948_v13, %v1259_v35  ;;  %v1557_v35 = vld [vmem:[%s2043_s3] ss:$0 sm:$0xff] (!%p1555_p9) }
  0x45   : > { %1639 = vmatpush3.bf16.msra.mxu0 %v1728_v9  ;;  %1633 = vmatmul.mubr.msk.bf16.vlgmr.msra.gmra.mrb[8].mxu1 %vm333_vm2, %v929_v28  ;;  %v1279_v37 = vrot.slane %v1265_v1, %v1886_v15  ;;  %v1340_v28 = vld [vmem:[#allocation2 + $0x8] sm:$0xff] }
  0x46   : > { %1652 = vmatprep.subr.bf16.mxu0 %v1789_v2  ;;  %1645 = vmatpush3.bf16.msra.mxu1 %v1727_v24 }
  0x47   : > { %1646 = vmatprep.subr.bf16.mxu1 %v1789_v2  ;;  %1648 = vmatprep.mubr.msk.bf16.mxu1 %vm1790_vm1, %v1789_v2  ;;  %v1280_v38 = vcombine.low %v1272_v8, %v1279_v37 }
  0x48   : > { %1641 = vmatmul.mubr.msk.bf16.vlgmr.msra.gmra.mrb[12].mxu0 %vm333_vm2, %v1017_v20 }
  0x49   : > { %1653 = vmatpush3.bf16.msra.mxu0 %v1732_v25  ;;  %1656 = vmatprep.mubr.msk.bf16.mxu0 %vm1790_vm1, %v1789_v2 }
  0x4a   : > { %1654 = vmatprep.subr.bf16.mxu0 %v1789_v2  ;;  %1647 = vmatpush3.bf16.msra.mxu1 %v1729_v32 }
  0x4d   : > { %1655 = vmatpush3.bf16.msra.mxu0 %v1735_v33  ;;  %1649 = vmatmul.mubr.msk.bf16.vlgmr.msra.gmra.mrb[12].mxu1 %vm333_vm2, %v1105_v36 }
  0x50   : > { %1657 = vmatmul.mubr.msk.bf16.vlgmr.msra.gmra.mrb[16].mxu0 %vm333_vm2, %v1280_v38 }
  0xf7   : > { %v371_v39 = vpop.f32.mrb[0].mxu0 }
  0xf8   : > { %v448_v40 = vpop.f32.mrb[0].mxu1  ;;  %v1594_v41 = vpop.f32.mrb[1].mxu0 }
  0xf9   : > { %v449_v2 = vadd.f32 %v448_v40, %v371_v39  ;;  %v1602_v54 = vpop.f32.mrb[1].mxu1  ;;  %v374_v42 = vpop.f32.mrb[2].mxu0 }
  0xfa   : > { %v451_v43 = vpop.f32.mrb[2].mxu1  ;;  %v1595_v13 = vpop.f32.mrb[3].mxu0 }
  0xfb   : > { %v452_v44 = vadd.f32 %v451_v43, %v374_v42  ;;  %v1603_v45 = vpop.f32.mrb[3].mxu1 }
 0x101   : > { %v716_v46 = vpop.f32.mrb[4].mxu1 }
 0x102   : > { %v1618_v47 = vpop.f32.mrb[5].mxu1 }
 0x103   : > { %v719_v48 = vpop.f32.mrb[6].mxu1 }
 0x104   : > { %v1619_v49 = vpop.f32.mrb[7].mxu1 }
 0x10b   : > { %v628_v15 = vpop.f32.mrb[4].mxu0 }
 0x10c   : > { %v635_v50 = vadd.f32 %v628_v15, %v449_v2  ;;  %v1610_v51 = vpop.f32.mrb[5].mxu0 }
 0x10d   : > { %v631_v52 = vpop.f32.mrb[6].mxu0 }
 0x10e   : > { %v636_v53 = vadd.f32 %v631_v52, %v452_v44  ;;  %v723_v55 = vadd.f32 %v716_v46, %v635_v50  ;;  %v1611_v56 = vpop.f32.mrb[7].mxu0 }
 0x110   : > { %v724_v57 = vadd.f32 %v719_v48, %v636_v53 }
 0x113   : > { %v804_v58 = vpop.f32.mrb[8].mxu0 }
 0x114   : > { %v811_v59 = vadd.f32 %v804_v58, %v723_v55  ;;  %v1626_v60 = vpop.f32.mrb[9].mxu0 }
 0x115   : > { %v807_v61 = vpop.f32.mrb[10].mxu0 }
 0x116   : > { %v812_v62 = vadd.f32 %v807_v61, %v724_v57  ;;  %v1627_v63 = vpop.f32.mrb[11].mxu0 }
 0x118   : > { %v979_v0 = vpop.f32.mrb[8].mxu1 }
 0x119   : > { %v986_v4 = vadd.f32 %v979_v0, %v811_v59  ;;  %v1634_v5 = vpop.f32.mrb[9].mxu1 }
 0x11a   : > { %v982_v7 = vpop.f32.mrb[10].mxu1 }
 0x11b   : > { %v1067_v3 = vpop.f32.mrb[12].mxu0  ;;  %v987_v10 = vadd.f32 %v982_v7, %v812_v62  ;;  %v1635_v11 = vpop.f32.mrb[11].mxu1 }
 0x11c   : > { %v1642_v6 = vpop.f32.mrb[13].mxu0  ;;  %v1074_v12 = vadd.f32 %v1067_v3, %v986_v4 }
 0x11d   : > { %v1070_v9 = vpop.f32.mrb[14].mxu0 }
 0x11e   : > { %v1643_v14 = vpop.f32.mrb[15].mxu0  ;;  %v1075_v16 = vadd.f32 %v1070_v9, %v987_v10 }
 0x120   : > { %v1155_v17 = vpop.f32.mrb[12].mxu1 }
 0x121   : > { %v1162_v18 = vadd.f32 %v1155_v17, %v1074_v12  ;;  %v1650_v19 = vpop.f32.mrb[13].mxu1 }
 0x122   : > { %v1158_v20 = vpop.f32.mrb[14].mxu1 }
 0x123   : > { %v1330_v21 = vpop.f32.mrb[16].mxu0  ;;  %v1163_v23 = vadd.f32 %v1158_v20, %v1075_v16  ;;  %v1651_v24 = vpop.f32.mrb[15].mxu1 }
 0x124   : > { %v1337_v25 = vadd.f32 %v1330_v21, %v1162_v18  ;;  %v1658_v26 = vpop.f32.mrb[17].mxu0  ;;  %1349 = sbr.rel (%p1555_p9) target bundleno = 317 (0x13d), region = 44 }
 0x125   : > { %v1333_v27 = vpop.f32.mrb[18].mxu0 }
 0x126   : > { %v1341_v29 = vadd.f32 %v1339_v22, %v1337_v25  ;;  %v1338_v30 = vadd.f32 %v1333_v27, %v1163_v23  ;;  %v1659_v31 = vpop.f32.mrb[19].mxu0 }
 0x128   : > { %1344 = vst.msk [vmem:[#allocation2] sm:$0xff] %vm1343_vm10, %v1341_v29  ;;  %v1342_v32 = vadd.f32 %v1340_v28, %v1338_v30 }
 0x12a   : > { %1345 = vst.msk [vmem:[#allocation2 + $0x8] sm:$0xff] %vm1343_vm10, %v1342_v32 }
 0x12f   : > { %v1350_v33 = vld [vmem:[#allocation2] sm:$0xff] }
 0x130   : > { %v1359_v36 = vmul.f32 %v1556_v34, %v1350_v33 }
 0x131   : > { %v1351_v1 = vld [vmem:[#allocation2 + $0x8] sm:$0xff] }
 0x132   : > { %v1360_v8 = vmul.f32 %v1556_v34, %v1351_v1  ;;  %v1368_v37 = vadd.f32 %v1557_v35, %v1359_v36 }
 0x134   : > { %v1369_v38 = vadd.f32 %v1557_v35, %v1360_v8  ;;  %v1370_v39 = vmax.f32 %v1368_v37, 0.0 }
 0x136   : > { %v1371_v40 = vmax.f32 %v1369_v38, 0.0  ;;  %v1378_v2 = vpack.c.bf16 %v1370_v39, %v1370_v39  ;;  %v1374_v41 = vcombine.high %v1370_v39, %v1370_v39 }
 0x138   : > { %v1380_v54 = vpack.c.bf16 %v1371_v40, %v1371_v40  ;;  %v1375_v42 = vcombine.high %v1371_v40, %v1371_v40  ;;  %1383 = vst.msk [vmem:[%s1865_s10] sm:$0x3] %vm1382_vm11, %v1378_v2  ;;  %v1379_v43 = vpack.c.bf16 %v1374_v41, %v1374_v41 }
 0x13a   : > { %1385 = vst.msk [vmem:[%s1865_s10 + $0x4] sm:$0x3] %vm1382_vm11, %v1380_v54  ;;  %v1381_v44 = vpack.c.bf16 %v1375_v42, %v1375_v42  ;;  %1384 = vst.msk [vmem:[%s1865_s10 + $0x2] sm:$0x3] %vm1382_vm11, %v1379_v43 }
 0x13c   : > { %1386 = vst.msk [vmem:[%s1865_s10 + $0x6] sm:$0x3] %vm1382_vm11, %v1381_v44 }
 0x13d PF: > { %s14_s19 = sadd.s32 1, %s1786_s19   ;;  %s2051_s15 = smov %s1778_s17 }
 0x13e   : > { %p11_p10 = scmp.ge.s32.totalorder %s14_s19, 14   ;;  %s2052_s16 = smov %s1782_s18 }
 0x13f   : > { %s2053_s17 = smov %s2056_s20  ;;  %s2054_s18 = smov %s2060_s21 }
 0x140   :  { %13 = sbr.rel (!%p11_p10) target bundleno = 3 (0x3), region = 82 }

// kernel: tile.13
= control target key start
LH: loop header
LB: loop body
LE: loop exit
PB: predicated region body
PF: predicated region fallthrough
CT: control target
= control target key end

     0   :  { %s22_s0 = inlined_call_operand.vmem [shape: f32[64], index: 0, kind: input, shape index: {}]   ;;  %s23_s1 = inlined_call_operand.vmem [shape: f32[8,64], index: 1, kind: output, shape index: {}]  }
   0x1   :  { %v4_v0 = vld [vmem:[%s22_s0] ss:$0 sm:$0xff] }
   0x2   :  { %5 = vst [vmem:[%s23_s1] sm:$0xff] %v4_v0 }

// kernel: tile.14
= control target key start
LH: loop header
LB: loop body
LE: loop exit
PB: predicated region body
PF: predicated region fallthrough
CT: control target
= control target key end

     0   :  { %vm3_vm0 = vcmask 523264   ;;  %s41_s8 = smov 64   ;;  %vm9_vm1 = vcmask 1048064   ;;  %s70_s0 = inlined_call_operand.vmem [shape: f32[8,64], index: 0, kind: input, shape index: {}]   ;;  %s71_s1 = inlined_call_operand.vmem [shape: f32[1,512], index: 1, kind: output, shape index: {}]  }
   0x1   :  { %v36_v0 = vld [vmem:[%s70_s0 + $0x1] ss:$2 sm:$0xf]   ;;  %v2_v1 = vld [vmem:[%s70_s0] ss:$2 sm:$0xf]  }
   0x2   :  { %7 = vrot.lane.b32.xlu0 %v36_v0, %s41_s8  ;;  %4 = vst.msk [vmem:[#allocation0] ss:$8 sm:$0xf] %vm3_vm0, %v2_v1  }
  0x74   :  { %v8_v2 = vpop.permute.xlu0 %7  }
  0x75   :  { %10 = vst.msk [vmem:[#allocation0] ss:$8 sm:$0xf] %vm9_vm1, %v8_v2  }
  0x7c   :  { %v14_v3 = vld [vmem:[#allocation0] sm:$0x1]  ;;  %v18_v4 = vld [vmem:[#allocation0 + $0x8] sm:$0x1]  ;;  %v23_v5 = vld [vmem:[#allocation0 + $0x10] sm:$0x1] }
  0x7d   :  { %16 = vst [vmem:[%s71_s1] sm:$0x1] %v14_v3  ;;  %37 = vst [vmem:[%s71_s1 + $0x1] sm:$0x1] %v18_v4  ;;  %v29_v6 = vld [vmem:[#allocation0 + $0x18] sm:$0x1] }
  0x7e   :  { %38 = vst [vmem:[%s71_s1 + $0x2] sm:$0x1] %v23_v5  ;;  %39 = vst [vmem:[%s71_s1 + $0x3] sm:$0x1] %v29_v6 }

// kernel: unet3d_forward.12
= control target key start
LH: loop header
LB: loop body
LE: loop exit
PB: predicated region body
PF: predicated region fallthrough
CT: control target
= control target key end

     0   :  { %s1775_s15 = smov 0   ;;  %s1777_s16 = smov 0   ;;  %s2011_s0 = inlined_call_operand.vmem [shape: bf16[6,4,3,3,64], index: 0, kind: input, shape index: {}]   ;;  %s2012_s1 = inlined_call_operand.vmem [shape: bf16[3,576,128], index: 1, kind: input, shape index: {}]   ;;  %s2013_s2 = inlined_call_operand.vmem [shape: f32[1,128], index: 2, kind: input, shape index: {}]   ;;  %s2014_s3 = inlined_call_operand.vmem [shape: f32[1,128], index: 3, kind: input, shape index: {}]   ;;  %s2015_s4 = inlined_call_operand.vmem [shape: bf16[2,2,2,128], index: 4, kind: output, shape index: {}]  }
   0x1   :  { %s1779_s17 = smov 0   ;;  %s1781_s18 = smov 0  }
   0x2   :  { %s1783_s19 = smov 0  }
   0x3 LB: > { %s26_s20 = sadd.s32 1, %s1735_s17  ;;  %s29_s21 = sadd.s32 1, %s1739_s18  ;;  %s1743_s19 = sphi %s1783_s19, %s14_s19   ;;  %s1739_s18 = sphi %s1781_s18, %s2021_s18   ;;  %s1735_s17 = sphi %s1779_s17, %s2020_s17   ;;  %s1731_s16 = sphi %s1777_s16, %s2019_s16   ;;  %s1727_s15 = sphi %s1775_s15, %s2018_s15  }
   0x4   : > { %p27_p0 = scmp.ge.s32.totalorder %s26_s20, 3  ;;  %p1387_p1 = scmp.ge.s32.totalorder %s1743_s19, 1 }
   0x5   : > { %p211_p2 = scmp.lt.s32.totalorder %s1743_s19, 7 }
   0x6   : > { %s2023_s20 = smov (%p27_p0, %s26_s20), 0  ;;  %s2025_s21 = smov (!%p27_p0, %s29_s21), %s1739_s18 }
   0x7   : > { %p212_p3 = pnand %p1387_p1, %p211_p2  ;;  %p31_p4 = scmp.ge.s32.totalorder %s2025_s21, 2 }
   0x8   : > { %s1388_s22 = sshll.u32 (!%p212_p3), %s1731_s16, 1  ;;  %p260_p5 = scmp.lt.s32.totalorder (!%p212_p3), %s1727_s15, 2 }
   0x9   : > { %s2027_s21 = smov (%p31_p4, %s2025_s21), 0  ;;  %215 = sbr.rel (%p212_p3) target bundleno = 345 (0x159), region = 36 }
   0xa   : > { %s250_s23 = sadd.s32 (!%p212_p3), %s1727_s15, %s1388_s22  ;;  %p267_p7 = scmp.lt.s32.totalorder (!%p212_p3), %s1731_s16, 1 }
   0xb   : > { %p251_p6 = scmp.lt.s32.totalorder (!%p212_p3), %s250_s23, 5  ;;  %p1392_p8 = scmp.ne.s32.totalorder (!%p212_p3), %s1727_s15, 0 }
  0x10   : > { %s261_s24 = scalar_select %p260_p5, %s1727_s15, 2 }
  0x11   : > { %s2029_s23 = smov (!%p251_p6, %s250_s23), 5  ;;  %s2031_s16 = smov (!%p267_p7, %s1731_s16), 1 }
  0x12   : > { %s1623_s25 = smul.u32 288, %s261_s24  ;;  %s1391_s7 = sshll.u32 %s2031_s16, 1  ;;  %v1745_v0 = vmov (!%p1392_p8), 0.0  }
  0x13   : > { %s1622_s26 = smul.u32 24, %s2029_s23  ;;  %s1823_s10 = scalar_lea.vmem %s2015_s4, %s1391_s7  ;;  %278 = vst [vmem:[#allocation2] sm:$0xf] (!%p1392_p8), %v1745_v0 }
  0x14   : > { %s1813_s29 = scalar_lea.vmem %s2012_s1, %s1623_s25  ;;  %277 = sbr.rel (%p1392_p8) target bundleno = 27 (0x1b), region = 40 }
  0x15   : > { %s1818_s6 = scalar_lea.vmem %s2011_s0, %s1622_s26 }
  0x1b PF: > { %v1669_v1 = vld [vmem:[%s1813_s29 + $0x20] sm:$0xff]   ;;  %v1746_v2 = vmov 0.0   ;;  %v1671_v4 = vld [vmem:[%s1813_s29 + $0x28] sm:$0xff]   ;;  %vm1747_vm0 = vmmov 0   ;;  %v306_v6 = vlaneseq  ;;  %v1673_v7 = vld [vmem:[%s1813_s29 + $0x30] sm:$0xff]   ;;  %vm341_vm1 = vcmask 523264  }
  0x1c   : > { %1514 = vmatprep.subr.bf16.mxu0 %v1746_v2  ;;  %1526 = vmatprep.subr.bf16.mxu1 %v1746_v2  ;;  %v1670_v3 = vld [vmem:[%s1813_s29] sm:$0xff]   ;;  %v1672_v5 = vld [vmem:[%s1813_s29 + $0x8] sm:$0xff]   ;;  %v1674_v8 = vld [vmem:[%s1813_s29 + $0x10] sm:$0xff]   ;;  %v1748_v12 = vmov 1966171168   ;;  %p1464_p9 = scmp.ne.s32.totalorder %s1727_s15, 2 }
  0x1d   : > { %1515 = vmatpush3.bf16.msra.mxu0 %v1669_v1  ;;  %1522 = vmatprep.mubr.msk.bf16.mxu0 %vm1747_vm0, %v1746_v2  ;;  %v1841_v9 = vshrl.u32 %v306_v6, 7  ;;  %v1393_v10 = vld [vmem:[%s1818_s6 + $0x6] sm:$0x1]  ;;  %v1394_v11 = vld [vmem:[%s1818_s6 + $0x8] sm:$0x1]  ;;  %v304_v13 = vunpack.c.l.s4 %v1748_v12  ;;  %v1675_v16 = vld [vmem:[%s1813_s29 + $0x38] sm:$0xff]  }
  0x1e   : > { %1527 = vmatpush3.bf16.msra.mxu1 %v1670_v3  ;;  %1516 = vmatprep.subr.bf16.mxu0 %v1746_v2  ;;  %v279_v14 = vld [vmem:[%s1818_s6] sm:$0x1]  ;;  %v280_v15 = vld [vmem:[%s1818_s6 + $0x2] sm:$0x1]  ;;  %v1676_v17 = vld [vmem:[%s1813_s29 + $0x18] sm:$0xff]   ;;  %v302_v18 = vcombine.low %v1393_v10, %v1394_v11 }
  0x1f   : > { %1528 = vmatprep.subr.bf16.mxu1 %v1746_v2  ;;  %1534 = vmatprep.mubr.msk.bf16.mxu1 %vm1747_vm0, %v1746_v2  ;;  %v305_v19 = vunpack.c.0.s8 %v304_v13  ;;  %v387_v20 = vcombine.low %v279_v14, %v280_v15  ;;  %v1677_v24 = vld [vmem:[%s1813_s29 + $0x40] sm:$0xff]   ;;  %vm489_vm2 = vsmask.f32 256  ;;  %v1679_v28 = vld [vmem:[%s1813_s29 + $0x48] sm:$0xff]   ;;  %vm490_vm3 = vsmask.f32 1284 }
  0x20   : > { %v1678_v25 = vld [vmem:[%s1813_s29 + $0x60] sm:$0xff]   ;;  %v1680_v29 = vld [vmem:[%s1813_s29 + $0x68] sm:$0xff]   ;;  %vm491_vm4 = vmor %vm489_vm2, %vm490_vm3  ;;  %vm492_vm5 = vsmask.f32 2312  ;;  %vm494_vm7 = vsmask.f32 3340 }
  0x21   : > { %1517 = vmatpush3.bf16.msra.mxu0 %v1671_v4  ;;  %v1853_v21 = vsub.s32 %v305_v19, %v1841_v9  ;;  %v1405_v30 = vld.sshfl [vmem:[%s1818_s6] sm:$0x11 pattern:$0x75316420]  ;;  %vm493_vm6 = vmor %vm491_vm4, %vm492_vm5  ;;  %vm496_vm8 = vsmask.f32 4368 }
  0x22   : > { %1529 = vmatpush3.bf16.msra.mxu1 %v1672_v5  ;;  %1518 = vmatprep.subr.bf16.mxu0 %v1746_v2  ;;  %v1406_v31 = vld.sshfl [vmem:[%s1818_s6 + $0x2] sm:$0x11 pattern:$0x75316420]  ;;  %v480_v32 = vcombine.high %v1405_v30, %v1405_v30  ;;  %vm498_vm9 = vsmask.f32 5396  ;;  %vm495_vm10 = vmor %vm493_vm6, %vm494_vm7 }
  0x23   : > { %1530 = vmatprep.subr.bf16.mxu1 %v1746_v2  ;;  %v309_v22 = vrot.slane %v302_v18, %v1853_v21  ;;  %v394_v23 = vrot.slane %v387_v20, %v1853_v21  ;;  %v488_v33 = vcombine.high %v1406_v31, %v1406_v31  ;;  %vm500_vm11 = vsmask.f32 6424  ;;  %v1681_v36 = vld [vmem:[%s1813_s29 + $0x50] sm:$0xff]   ;;  %vm497_vm13 = vmor %vm495_vm10, %vm496_vm8  ;;  %v1414_v40 = vld [vmem:[%s1818_s6 + $0xc] sm:$0x1] }
  0x24   : > { %vm502_vm12 = vsmask.f32 7452  ;;  %v505_v34 = vshrl.u32 %v1405_v30, 16  ;;  %v510_v35 = vshll.u32 %v480_v32, 16  ;;  %v1682_v37 = vld [vmem:[%s1813_s29 + $0x70] sm:$0xff]   ;;  %v514_v38 = vshrl.u32 %v1406_v31, 16  ;;  %vm499_vm14 = vmor %vm497_vm13, %vm498_vm9 }
  0x25   : > { %1519 = vmatpush3.bf16.msra.mxu0 %v1673_v7  ;;  %v316_v26 = vrot.slane %v309_v22, %v1853_v21  ;;  %v401_v27 = vrot.slane %v394_v23, %v1853_v21  ;;  %v519_v39 = vshll.u32 %v488_v33, 16  ;;  %v1415_v41 = vld [vmem:[%s1818_s6 + $0xe] sm:$0x1]  ;;  %vm501_vm15 = vmor %vm499_vm14, %vm500_vm11  ;;  %v1683_v46 = vld [vmem:[%s1813_s29 + $0x58] sm:$0xff]  }
  0x26   : > { %1531 = vmatpush3.bf16.msra.mxu1 %v1674_v8  ;;  %1520 = vmatprep.subr.bf16.mxu0 %v1746_v2  ;;  %v626_v42 = vcombine.low %v1414_v40, %v1415_v41  ;;  %vm1884_vm2 = vmor %vm501_vm15, %vm502_vm12  ;;  %v1684_v49 = vld [vmem:[%s1813_s29 + $0x78] sm:$0xff]   ;;  %v1685_v52 = vld [vmem:[%s1813_s29 + $0x80] sm:$0xff]  }
  0x27   : > { %1532 = vmatprep.subr.bf16.mxu1 %v1746_v2  ;;  %v512_v44 = vsel %vm1884_vm2, %v505_v34, %v510_v35  ;;  %v1892_v45 = vsel %vm1884_vm2, %v514_v38, %v519_v39  ;;  %v1686_v54 = vld [vmem:[%s1813_s29 + $0xa0] sm:$0xff]   ;;  %v1430_v55 = vld.sshfl [vmem:[%s1818_s6 + $0xc] sm:$0x11 pattern:$0x75316420]  ;;  %v1689_v4 = vld [vmem:[%s1813_s29 + $0x90] sm:$0xff]  }
  0x28   : > { %v530_v47 = vcombine.low %v512_v44, %v1892_v45  ;;  %v633_v48 = vrot.slane %v626_v42, %v1853_v21  ;;  %v1421_v56 = vld [vmem:[%s1818_s6 + $0x12] sm:$0x1]  ;;  %v1422_v57 = vld [vmem:[%s1818_s6 + $0x14] sm:$0x1]  ;;  %v816_v59 = vcombine.high %v1430_v55, %v1430_v55  ;;  %v826_v60 = vshrl.u32 %v1430_v55, 16  ;;  %v1687_v61 = vld [vmem:[%s1813_s29 + $0x88] sm:$0xff]  }
  0x29   : > { %1521 = vmatpush3.bf16.msra.mxu0 %v1675_v16  ;;  %v1431_v58 = vld.sshfl [vmem:[%s1818_s6 + $0xe] sm:$0x11 pattern:$0x75316420]  ;;  %v722_v6 = vcombine.low %v1421_v56, %v1422_v57  ;;  %v1690_v8 = vld [vmem:[%s1813_s29 + $0xb0] sm:$0xff]   ;;  %v1691_v11 = vld [vmem:[%s1813_s29 + $0x98] sm:$0xff]  }
  0x2a   : > { %1533 = vmatpush3.bf16.msra.mxu1 %v1676_v17  ;;  %1538 = vmatprep.subr.bf16.mxu0 %v1746_v2  ;;  %v537_v50 = vrot.slane %v530_v47, %v1853_v21  ;;  %v640_v53 = vrot.slane %v633_v48, %v1853_v21  ;;  %v824_v62 = vcombine.high %v1431_v58, %v1431_v58  ;;  %v835_v63 = vshrl.u32 %v1431_v58, 16  ;;  %v1688_v0 = vld [vmem:[%s1813_s29 + $0xa8] sm:$0xff]   ;;  %v1692_v14 = vld [vmem:[%s1813_s29 + $0xb8] sm:$0xff]   ;;  %v1693_v17 = vld [vmem:[%s1813_s29 + $0xc0] sm:$0xff]  }
  0x2b   : > { %1550 = vmatprep.subr.bf16.mxu1 %v1746_v2  ;;  %v831_v1 = vshll.u32 %v816_v59, 16  ;;  %v729_v12 = vrot.slane %v722_v6, %v1853_v21  ;;  %v1694_v18 = vld [vmem:[%s1813_s29 + $0xe0] sm:$0xff]   ;;  %v1695_v19 = vld [vmem:[%s1813_s29 + $0xc8] sm:$0xff]   ;;  %v1699_v33 = vld [vmem:[%s1813_s29 + $0xd8] sm:$0xff]  }
  0x2c   : > { %1523 = vmatmul.mubr.msk.bf16.vlgmr.msra.gmra.mrb[0].mxu0 %vm341_vm1, %v316_v26  ;;  %v544_v51 = vrot.slane %v537_v50, %v1853_v21  ;;  %v840_v3 = vshll.u32 %v824_v62, 16  ;;  %v1696_v20 = vld [vmem:[%s1813_s29 + $0xe8] sm:$0xff]   ;;  %v1439_v22 = vld [vmem:[%s1818_s6 + $0x2] sm:$0x1]  ;;  %v1440_v23 = vld [vmem:[%s1818_s6 + $0x4] sm:$0x1] }
  0x2d   : > { %1535 = vmatmul.mubr.msk.bf16.vlgmr.msra.gmra.mrb[0].mxu1 %vm341_vm1, %v401_v27  ;;  %1539 = vmatpush3.bf16.msra.mxu0 %v1677_v24  ;;  %v833_v5 = vsel %vm1884_vm2, %v826_v60, %v831_v1  ;;  %v736_v15 = vrot.slane %v729_v12, %v1853_v21  ;;  %v1446_v24 = vld [vmem:[%s1818_s6 + $0x8] sm:$0x1]  ;;  %v947_v26 = vcombine.low %v1439_v22, %v1440_v23  ;;  %v1456_v30 = vld.sshfl [vmem:[%s1818_s6 + $0x4] sm:$0x11 pattern:$0x75316420] }
  0x2e   : > { %1551 = vmatpush3.bf16.msra.mxu1 %v1678_v25  ;;  %1540 = vmatprep.subr.bf16.mxu0 %v1746_v2  ;;  %v842_v7 = vsel %vm1884_vm2, %v835_v63, %v840_v3  ;;  %v1447_v25 = vld [vmem:[%s1818_s6 + $0xa] sm:$0x1]  ;;  %v1700_v34 = vld [vmem:[%s1813_s29 + $0xf8] sm:$0xff]   ;;  %v1145_v35 = vcombine.high %v1456_v30, %v1456_v30  ;;  %v1701_v38 = vld [vmem:[%s1813_s29 + $0x100] sm:$0xff]   ;;  %v1156_v39 = vshrl.u32 %v1456_v30, 16 }
  0x2f   : > { %1552 = vmatprep.subr.bf16.mxu1 %v1746_v2  ;;  %1546 = vmatprep.mubr.msk.bf16.mxu0 %vm1747_vm0, %v1746_v2  ;;  %v851_v10 = vcombine.low %v833_v5, %v842_v7  ;;  %v1043_v27 = vcombine.low %v1446_v24, %v1447_v25  ;;  %v954_v31 = vrot.slane %v947_v26, %v1853_v21  ;;  %v1702_v41 = vld [vmem:[%s1813_s29 + $0x108] sm:$0xff]   ;;  %v1704_v48 = vld [vmem:[%s1813_s29 + $0x118] sm:$0xff]   ;;  %v1255_v25 = vld [vmem:[#allocation2] sm:$0xf] }
  0x30   : > { %1558 = vmatprep.mubr.msk.bf16.mxu1 %vm1747_vm0, %v1746_v2  ;;  %v1161_v40 = vshll.u32 %v1145_v35, 16  ;;  %v1749_v35 = vmov (!%p1464_p9), 1983009808  }
  0x31   : > { %1541 = vmatpush3.bf16.msra.mxu0 %v1679_v28  ;;  %v858_v13 = vrot.slane %v851_v10, %v1853_v21  ;;  %v1697_v28 = vld [vmem:[%s1813_s29 + $0xd0] sm:$0xff]   ;;  %v1050_v32 = vrot.slane %v1043_v27, %v1853_v21 }
  0x32   : > { %1553 = vmatpush3.bf16.msra.mxu1 %v1680_v29  ;;  %1542 = vmatprep.subr.bf16.mxu0 %v1746_v2  ;;  %v1698_v29 = vld [vmem:[%s1813_s29 + $0xf0] sm:$0xff]   ;;  %v1163_v42 = vsel %vm1884_vm2, %v1156_v39, %v1161_v40 }
  0x33   : > { %1554 = vmatprep.subr.bf16.mxu1 %v1746_v2  ;;  %v865_v16 = vrot.slane %v858_v13, %v1853_v21  ;;  %v1172_v44 = vcombine.low %v1892_v45, %v1163_v42 }
  0x35   : > { %1543 = vmatpush3.bf16.msra.mxu0 %v1681_v36  ;;  %v961_v36 = vrot.slane %v954_v31, %v1853_v21  ;;  %v1179_v47 = vrot.slane %v1172_v44, %v1853_v21 }
  0x36   : > { %1555 = vmatpush3.bf16.msra.mxu1 %v1682_v37  ;;  %1544 = vmatprep.subr.bf16.mxu0 %v1746_v2  ;;  %v1057_v37 = vrot.slane %v1050_v32, %v1853_v21  ;;  %v1465_v32 = vld [vmem:[%s2013_s2] ss:$0 sm:$0xff] (!%p1464_p9) }
  0x37   : > { %1556 = vmatprep.subr.bf16.mxu1 %v1746_v2 }
  0x39   : > { %1545 = vmatpush3.bf16.msra.mxu0 %v1683_v46  ;;  %v1703_v46 = vld [vmem:[%s1813_s29 + $0x110] sm:$0xff]  }
  0x3a   : > { %1557 = vmatpush3.bf16.msra.mxu1 %v1684_v49  ;;  %1562 = vmatprep.subr.bf16.mxu0 %v1746_v2  ;;  %v1186_v49 = vrot.slane %v1179_v47, %v1853_v21 }
  0x3b   : > { %1574 = vmatprep.subr.bf16.mxu1 %v1746_v2 }
  0x3c   : > { %1547 = vmatmul.mubr.msk.bf16.vlgmr.msra.gmra.mrb[4].mxu0 %vm341_vm1, %v544_v51 }
  0x3d   : > { %1559 = vmatmul.mubr.msk.bf16.vlgmr.msra.gmra.mrb[4].mxu1 %vm341_vm1, %v640_v53  ;;  %1563 = vmatpush3.bf16.msra.mxu0 %v1685_v52 }
  0x3e   : > { %1575 = vmatpush3.bf16.msra.mxu1 %v1686_v54  ;;  %1564 = vmatprep.subr.bf16.mxu0 %v1746_v2 }
  0x3f   : > { %1576 = vmatprep.subr.bf16.mxu1 %v1746_v2  ;;  %1570 = vmatprep.mubr.msk.bf16.mxu0 %vm1747_vm0, %v1746_v2 }
  0x40   : > { %1582 = vmatprep.mubr.msk.bf16.mxu1 %vm1747_vm0, %v1746_v2 }
  0x41   : > { %1565 = vmatpush3.bf16.msra.mxu0 %v1687_v61 }
  0x42   : > { %1577 = vmatpush3.bf16.msra.mxu1 %v1688_v0  ;;  %1566 = vmatprep.subr.bf16.mxu0 %v1746_v2 }
  0x43   : > { %1578 = vmatprep.subr.bf16.mxu1 %v1746_v2 }
  0x45   : > { %1567 = vmatpush3.bf16.msra.mxu0 %v1689_v4 }
  0x46   : > { %1579 = vmatpush3.bf16.msra.mxu1 %v1690_v8  ;;  %1568 = vmatprep.subr.bf16.mxu0 %v1746_v2 }
  0x47   : > { %1580 = vmatprep.subr.bf16.mxu1 %v1746_v2 }
  0x49   : > { %1569 = vmatpush3.bf16.msra.mxu0 %v1691_v11 }
  0x4a   : > { %1581 = vmatpush3.bf16.msra.mxu1 %v1692_v14  ;;  %1586 = vmatprep.subr.bf16.mxu0 %v1746_v2 }
  0x4b   : > { %1598 = vmatprep.subr.bf16.mxu1 %v1746_v2 }
  0x4c   : > { %1571 = vmatmul.mubr.msk.bf16.vlgmr.msra.gmra.mrb[8].mxu0 %vm341_vm1, %v736_v15 }
  0x4d   : > { %1583 = vmatmul.mubr.msk.bf16.vlgmr.msra.gmra.mrb[8].mxu1 %vm341_vm1, %v865_v16  ;;  %1587 = vmatpush3.bf16.msra.mxu0 %v1693_v17 }
  0x4e   : > { %1599 = vmatpush3.bf16.msra.mxu1 %v1694_v18  ;;  %1588 = vmatprep.subr.bf16.mxu0 %v1746_v2 }
  0x4f   : > { %1600 = vmatprep.subr.bf16.mxu1 %v1746_v2  ;;  %1594 = vmatprep.mubr.msk.bf16.mxu0 %vm1747_vm0, %v1746_v2 }
  0x50   : > { %1606 = vmatprep.mubr.msk.bf16.mxu1 %vm1747_vm0, %v1746_v2 }
  0x51   : > { %1589 = vmatpush3.bf16.msra.mxu0 %v1695_v19 }
  0x52   : > { %1601 = vmatpush3.bf16.msra.mxu1 %v1696_v20  ;;  %1590 = vmatprep.subr.bf16.mxu0 %v1746_v2 }
  0x53   : > { %1602 = vmatprep.subr.bf16.mxu1 %v1746_v2 }
  0x55   : > { %1591 = vmatpush3.bf16.msra.mxu0 %v1697_v28 }
  0x56   : > { %1603 = vmatpush3.bf16.msra.mxu1 %v1698_v29  ;;  %1592 = vmatprep.subr.bf16.mxu0 %v1746_v2 }
  0x57   : > { %1604 = vmatprep.subr.bf16.mxu1 %v1746_v2 }
  0x59   : > { %1593 = vmatpush3.bf16.msra.mxu0 %v1699_v33  ;;  %v1466_v33 = vld [vmem:[%s2014_s3] ss:$0 sm:$0xff] (!%p1464_p9) }
  0x5a   : > { %1605 = vmatpush3.bf16.msra.mxu1 %v1700_v34  ;;  %1610 = vmatprep.subr.bf16.mxu0 %v1746_v2 }
  0x5c   : > { %1595 = vmatmul.mubr.msk.bf16.vlgmr.msra.gmra.mrb[12].mxu0 %vm341_vm1, %v961_v36  ;;  %v1282_v36 = vunpack.c.l.s4 (!%p1464_p9), %v1749_v35 }
  0x5d   : > { %1607 = vmatmul.mubr.msk.bf16.vlgmr.msra.gmra.mrb[12].mxu1 %vm341_vm1, %v1057_v37  ;;  %1611 = vmatpush3.bf16.msra.mxu0 %v1701_v38 }
  0x5e   : > { %1618 = vmatprep.mubr.msk.bf16.mxu0 %vm1747_vm0, %v1746_v2  ;;  %1612 = vmatprep.subr.bf16.mxu0 %v1746_v2  ;;  %v1283_v38 = vunpack.c.0.s8 (!%p1464_p9), %v1282_v36 }
  0x60   : > { %v1286_v40 = vsub.s32 (!%p1464_p9), %v1283_v38, %v1841_v9 }
  0x61   : > { %1613 = vmatpush3.bf16.msra.mxu0 %v1702_v41 }
  0x62   : > { %1614 = vmatprep.subr.bf16.mxu0 %v1746_v2 }
  0x65   : > { %1615 = vmatpush3.bf16.msra.mxu0 %v1703_v46 }
  0x66   : > { %1616 = vmatprep.subr.bf16.mxu0 %v1746_v2 }
  0x69   : > { %1617 = vmatpush3.bf16.msra.mxu0 %v1704_v48 }
  0x6c   : > { %1619 = vmatmul.mubr.msk.bf16.vlgmr.msra.gmra.mrb[16].mxu0 %vm341_vm1, %v1186_v49 }
  0xff   : > { %v379_v43 = vpop.f32.mrb[0].mxu0 }
 0x100   : > { %v463_v50 = vpop.f32.mrb[0].mxu1  ;;  %v1524_v51 = vpop.f32.mrb[1].mxu0 }
 0x101   : > { %v464_v52 = vadd.f32 %v463_v50, %v379_v43  ;;  %v1536_v45 = vpop.f32.mrb[1].mxu1  ;;  %v382_v53 = vpop.f32.mrb[2].mxu0 }
 0x102   : > { %v466_v54 = vpop.f32.mrb[2].mxu1  ;;  %v1525_v55 = vpop.f32.mrb[3].mxu0 }
 0x103   : > { %v1537_v56 = vpop.f32.mrb[3].mxu1 }
 0x10f   : > { %v606_v57 = vpop.f32.mrb[4].mxu0 }
 0x110   : > { %v702_v58 = vpop.f32.mrb[4].mxu1  ;;  %v612_v59 = vadd.f32 %v606_v57, %v464_v52  ;;  %v1548_v60 = vpop.f32.mrb[5].mxu0 }
 0x111   : > { %v1560_v61 = vpop.f32.mrb[5].mxu1  ;;  %v609_v2 = vpop.f32.mrb[6].mxu0 }
 0x112   : > { %v705_v62 = vpop.f32.mrb[6].mxu1  ;;  %v708_v21 = vadd.f32 %v702_v58, %v612_v59  ;;  %v1549_v63 = vpop.f32.mrb[7].mxu0 }
 0x113   : > { %v1561_v0 = vpop.f32.mrb[7].mxu1 }
 0x11f   : > { %v798_v1 = vpop.f32.mrb[8].mxu0 }
 0x120   : > { %v927_v3 = vpop.f32.mrb[8].mxu1  ;;  %v804_v4 = vadd.f32 %v798_v1, %v708_v21  ;;  %v1572_v5 = vpop.f32.mrb[9].mxu0 }
 0x121   : > { %v1584_v6 = vpop.f32.mrb[9].mxu1  ;;  %v801_v7 = vpop.f32.mrb[10].mxu0 }
 0x122   : > { %v930_v8 = vpop.f32.mrb[10].mxu1  ;;  %v933_v10 = vadd.f32 %v927_v3, %v804_v4  ;;  %v1573_v11 = vpop.f32.mrb[11].mxu0 }
 0x123   : > { %v1585_v12 = vpop.f32.mrb[11].mxu1 }
 0x12f   : > { %v1023_v13 = vpop.f32.mrb[12].mxu0 }
 0x130   : > { %v1119_v14 = vpop.f32.mrb[12].mxu1  ;;  %v1029_v15 = vadd.f32 %v1023_v13, %v933_v10  ;;  %v1596_v16 = vpop.f32.mrb[13].mxu0 }
 0x131   : > { %v1608_v17 = vpop.f32.mrb[13].mxu1  ;;  %v1026_v18 = vpop.f32.mrb[14].mxu0 }
 0x132   : > { %v1122_v19 = vpop.f32.mrb[14].mxu1  ;;  %v1125_v20 = vadd.f32 %v1119_v14, %v1029_v15  ;;  %v1597_v22 = vpop.f32.mrb[15].mxu0 }
 0x133   : > { %v1609_v23 = vpop.f32.mrb[15].mxu1 }
 0x13e   : > { %1261 = sbr.rel (%p1464_p9) target bundleno = 345 (0x159), region = 44 }
 0x13f   : > { %v1248_v24 = vpop.f32.mrb[16].mxu0 }
 0x140   : > { %v1254_v26 = vadd.f32 %v1248_v24, %v1125_v20  ;;  %v1620_v27 = vpop.f32.mrb[17].mxu0 }
 0x141   : > { %v1251_v28 = vpop.f32.mrb[18].mxu0 }
 0x142   : > { %v1256_v29 = vadd.f32 %v1255_v25, %v1254_v26  ;;  %v1621_v30 = vpop.f32.mrb[19].mxu0 }
 0x144   : > { %1257 = vst [vmem:[#allocation2] sm:$0xf] %v1256_v29 }
 0x14b   : > { %v1262_v31 = vld [vmem:[#allocation2] sm:$0xf] }
 0x14c   : > { %v1270_v34 = vmul.f32 %v1465_v32, %v1262_v31 }
 0x14e   : > { %v1278_v37 = vadd.f32 %v1466_v33, %v1270_v34 }
 0x150   : > { %v1279_v39 = vmax.f32 %v1278_v37, 0.0 }
 0x152   : > { %v1287_v41 = vrot.slane %v1279_v39, %v1286_v40 }
 0x154   : > { %v1291_v42 = vpack.c.bf16 %v1287_v41, %v1287_v41  ;;  %v1288_v44 = vcombine.high %v1287_v41, %v1287_v41 }
 0x156   : > { %1293 = vst [vmem:[%s1823_s10] sm:$0x1] %v1291_v42  ;;  %v1292_v46 = vpack.c.bf16 %v1288_v44, %v1288_v44 }
 0x158   : > { %1294 = vst [vmem:[%s1823_s10 + $0x1] sm:$0x1] %v1292_v46 }
 0x159 PF: > { %s14_s19 = sadd.s32 1, %s1743_s19   ;;  %s2018_s15 = smov %s1735_s17 }
 0x15a   : > { %p11_p10 = scmp.ge.s32.totalorder %s14_s19, 8   ;;  %s2019_s16 = smov %s1739_s18 }
 0x15b   : > { %s2020_s17 = smov %s2023_s20  ;;  %s2021_s18 = smov %s2027_s21 }
 0x15c   :  { %13 = sbr.rel (!%p11_p10) target bundleno = 3 (0x3), region = 82 }

// kernel: unet3d_forward.13
= control target key start
LH: loop header
LB: loop body
LE: loop exit
PB: predicated region body
PF: predicated region fallthrough
CT: control target
= control target key end

     0   :  { %s807_s12 = smov 0   ;;  %s939_s0 = inlined_call_operand.vmem [shape: bf16[2,2,2,128], index: 0, kind: input, shape index: {}]   ;;  %s940_s1 = inlined_call_operand.vmem [shape: bf16[128,512], index: 1, kind: input, shape index: {}]   ;;  %s941_s2 = inlined_call_operand.vmem [shape: f32[1,512], index: 2, kind: input, shape index: {}]   ;;  %s942_s3 = inlined_call_operand.vmem [shape: bf16[2,2,2,512], index: 3, kind: output, shape index: {}]  }
   0x1 LB: > { %s668_s13 = sadd.s32 4294967295, %s782_s12   ;;  %p672_p0 = scmp.ge.s32.totalorder %s782_s12, 1  ;;  %s782_s12 = sphi %s807_s12, %s13_s12  }
   0x2   : > { %p136_p1 = scmp.lt.s32.totalorder %s782_s12, 3 }
   0x4   : > { %p137_p2 = pnand %p672_p0, %p136_p1 }
   0x5   : > { %v728_v0 = vld [vmem:[%s940_s1 + $0x4] ss:$16 sps:$4 sm:$0xff] (!%p137_p2)   ;;  %v730_v1 = vld [vmem:[%s940_s1 + $0xc] ss:$16 sps:$4 sm:$0xff] (!%p137_p2)   ;;  %v784_v2 = vmov (!%p137_p2), 0   ;;  %p158_p3 = scmp.lt.s32.totalorder (!%p137_p2), %s668_s13, 1  ;;  %v203_v21 = vlaneseq (!%p137_p2) }
   0x6   : > { %140 = sbr.rel (%p137_p2) target bundleno = 272 (0x110), region = 32  ;;  %433 = vmatprep.mubr.bf16.mxu0 (!%p137_p2), %v784_v2  ;;  %474 = vmatprep.mubr.bf16.mxu1 (!%p137_p2), %v784_v2  ;;  %v732_v3 = vld [vmem:[%s940_s1] ss:$16 sps:$4 sm:$0xff] (!%p137_p2)   ;;  %v733_v4 = vld [vmem:[%s940_s1 + $0x8] ss:$16 sps:$4 sm:$0xff] (!%p137_p2)  }
   0x7   : > { %401 = vmatprep.subr.bf16.mxu0 (!%p137_p2), %v728_v0  ;;  %442 = vmatprep.subr.bf16.mxu1 (!%p137_p2), %v730_v1  ;;  %v734_v5 = vld [vmem:[%s940_s1 + $0x24] ss:$16 sps:$4 sm:$0xff] (!%p137_p2)   ;;  %v736_v6 = vld [vmem:[%s940_s1 + $0x2c] ss:$16 sps:$4 sm:$0xff] (!%p137_p2)   ;;  %v738_v7 = vld [vmem:[%s940_s1 + $0x20] ss:$16 sps:$4 sm:$0xff] (!%p137_p2)  }
   0x8   : > { %402 = vmatpush1.bf16.msra.mxu0 (!%p137_p2), %v732_v3  ;;  %443 = vmatpush1.bf16.msra.mxu1 (!%p137_p2), %v733_v4  ;;  %v739_v8 = vld [vmem:[%s940_s1 + $0x28] ss:$16 sps:$4 sm:$0xff] (!%p137_p2)   ;;  %v740_v9 = vld [vmem:[%s940_s1 + $0x44] ss:$16 sps:$4 sm:$0xff] (!%p137_p2)   ;;  %v742_v10 = vld [vmem:[%s940_s1 + $0x4c] ss:$16 sps:$4 sm:$0xff] (!%p137_p2)  }
   0x9   : > { %403 = vmatprep.subr.bf16.mxu0 (!%p137_p2), %v734_v5  ;;  %444 = vmatprep.subr.bf16.mxu1 (!%p137_p2), %v736_v6  ;;  %v744_v11 = vld [vmem:[%s940_s1 + $0x40] ss:$16 sps:$4 sm:$0xff] (!%p137_p2)   ;;  %v745_v12 = vld [vmem:[%s940_s1 + $0x48] ss:$16 sps:$4 sm:$0xff] (!%p137_p2)   ;;  %v746_v13 = vld [vmem:[%s940_s1 + $0x64] ss:$16 sps:$4 sm:$0xff] (!%p137_p2)  }
   0xa   : > { %v748_v14 = vld [vmem:[%s940_s1 + $0x6c] ss:$16 sps:$4 sm:$0xff] (!%p137_p2)   ;;  %v750_v15 = vld [vmem:[%s940_s1 + $0x60] ss:$16 sps:$4 sm:$0xff] (!%p137_p2)   ;;  %v751_v16 = vld [vmem:[%s940_s1 + $0x68] ss:$16 sps:$4 sm:$0xff] (!%p137_p2)  }
   0xb   : > { %v752_v17 = vld [vmem:[%s940_s1 + $0x84] ss:$16 sps:$4 sm:$0xff] (!%p137_p2)   ;;  %v754_v18 = vld [vmem:[%s940_s1 + $0x8c] ss:$16 sps:$4 sm:$0xff] (!%p137_p2)   ;;  %v756_v19 = vld [vmem:[%s940_s1 + $0x80] ss:$16 sps:$4 sm:$0xff] (!%p137_p2)  }
   0xc   : > { %404 = vmatpush1.bf16.msra.mxu0 (!%p137_p2), %v738_v7  ;;  %445 = vmatpush1.bf16.msra.mxu1 (!%p137_p2), %v739_v8  ;;  %v757_v20 = vld [vmem:[%s940_s1 + $0x88] ss:$16 sps:$4 sm:$0xff] (!%p137_p2)   ;;  %v785_v22 = vmov (!%p137_p2), 1966171168   ;;  %v758_v24 = vld [vmem:[%s940_s1 + $0xa4] ss:$16 sps:$4 sm:$0xff] (!%p137_p2)  }
   0xd   : > { %405 = vmatprep.subr.bf16.mxu0 %v740_v9  ;;  %446 = vmatprep.subr.bf16.mxu1 %v742_v10  ;;  %s944_s13 = smov (!%p158_p3, %s668_s13), 1  ;;  %v227_v23 = vunpack.c.l.s4 %v785_v22  ;;  %v760_v25 = vld [vmem:[%s940_s1 + $0xac] ss:$16 sps:$4 sm:$0xff]   ;;  %v762_v26 = vld [vmem:[%s940_s1 + $0xa0] ss:$16 sps:$4 sm:$0xff]   ;;  %v204_v27 = vshrl.u32 %v203_v21, 7 }
   0xe   : > { %s673_s29 = sshll.u32 %s944_s13, 1  ;;  %v763_v29 = vld [vmem:[%s940_s1 + $0xa8] ss:$16 sps:$4 sm:$0xff]   ;;  %v764_v30 = vld [vmem:[%s940_s1 + $0xc4] ss:$16 sps:$4 sm:$0xff]   ;;  %s674_s7 = sshll.u32 %s944_s13, 3 }
   0xf   : > { %s161_s9 = scalar_lea.vmem %s939_s0, %s673_s29  ;;  %v228_v28 = vunpack.c.0.s8 %v227_v23  ;;  %v766_v31 = vld [vmem:[%s940_s1 + $0xcc] ss:$16 sps:$4 sm:$0xff]   ;;  %v768_v36 = vld [vmem:[%s940_s1 + $0xc0] ss:$16 sps:$4 sm:$0xff]   ;;  %v769_v37 = vld [vmem:[%s940_s1 + $0xc8] ss:$16 sps:$4 sm:$0xff]   ;;  %s165_s10 = scalar_lea.vmem %s942_s3, %s674_s7 }
  0x10   : > { %406 = vmatpush1.bf16.msra.mxu0 %v744_v11  ;;  %447 = vmatpush1.bf16.msra.mxu1 %v745_v12  ;;  %v167_v32 = vld [vmem:[%s161_s9] sm:$0x1]  ;;  %v168_v33 = vld [vmem:[%s161_s9 + $0x1] sm:$0x1]  ;;  %v770_v38 = vld [vmem:[%s940_s1 + $0xe4] ss:$16 sps:$4 sm:$0xff]  }
  0x11   : > { %407 = vmatprep.subr.bf16.mxu0 %v746_v13  ;;  %448 = vmatprep.subr.bf16.mxu1 %v748_v14  ;;  %v225_v34 = vcombine.low %v167_v32, %v168_v33  ;;  %v903_v35 = vsub.s32 %v228_v28, %v204_v27  ;;  %v772_v39 = vld [vmem:[%s940_s1 + $0xec] ss:$16 sps:$4 sm:$0xff]   ;;  %v774_v41 = vld [vmem:[%s940_s1 + $0xe0] ss:$16 sps:$4 sm:$0xff]   ;;  %v775_v42 = vld [vmem:[%s940_s1 + $0xe8] ss:$16 sps:$4 sm:$0xff]  }
  0x12   : > { %v205_v44 = vsub.s32 0, %v204_v27  ;;  %v213_v45 = vsub.s32 2, %v204_v27  ;;  %v201_v46 = vld [vmem:[%s941_s2] sm:$0xf]  ;;  %v209_v47 = vsub.s32 1, %v204_v27  ;;  %v217_v50 = vsub.s32 3, %v204_v27 }
  0x13   : > { %v232_v40 = vrot.slane %v225_v34, %v903_v35  ;;  %v786_v48 = vmov 1983009808  }
  0x14   : > { %408 = vmatpush1.bf16.msra.mxu0 %v750_v15  ;;  %449 = vmatpush1.bf16.msra.mxu1 %v751_v16  ;;  %v490_v49 = vunpack.c.l.s4 %v786_v48  ;;  %v206_v51 = vrot.slane %v201_v46, %v205_v44  ;;  %v214_v52 = vrot.slane %v201_v46, %v213_v45  ;;  %v210_v53 = vrot.slane %v201_v46, %v209_v47 }
  0x15   : > { %409 = vmatprep.subr.bf16.mxu0 %v752_v17  ;;  %450 = vmatprep.subr.bf16.mxu1 %v754_v18  ;;  %v239_v43 = vrot.slane %v232_v40, %v903_v35  ;;  %v218_v55 = vrot.slane %v201_v46, %v217_v50 }
  0x16   : > { %v491_v54 = vunpack.c.0.s8 %v490_v49 }
  0x18   : > { %410 = vmatpush1.bf16.msra.mxu0 %v756_v19  ;;  %451 = vmatpush1.bf16.msra.mxu1 %v757_v20  ;;  %v494_v63 = vsub.s32 %v491_v54, %v204_v27 }
  0x19   : > { %411 = vmatprep.subr.bf16.mxu0 %v758_v24  ;;  %452 = vmatprep.subr.bf16.mxu1 %v760_v25 }
  0x1c   : > { %412 = vmatpush1.bf16.msra.mxu0 %v762_v26  ;;  %453 = vmatpush1.bf16.msra.mxu1 %v763_v29 }
  0x1d   : > { %413 = vmatprep.subr.bf16.mxu0 %v764_v30  ;;  %454 = vmatprep.subr.bf16.mxu1 %v766_v31 }
  0x20   : > { %414 = vmatpush1.bf16.msra.mxu0 %v768_v36  ;;  %455 = vmatpush1.bf16.msra.mxu1 %v769_v37 }
  0x21   : > { %415 = vmatprep.subr.bf16.mxu0 %v770_v38  ;;  %456 = vmatprep.subr.bf16.mxu1 %v772_v39 }
  0x24   : > { %416 = vmatpush1.bf16.msra.mxu0 %v774_v41  ;;  %457 = vmatpush1.bf16.msra.mxu1 %v775_v42 }
  0x27   : > { %434 = vmatmul.mubr.bf16.vlgmr.msra.gmra.mrb[0].mxu0 %v239_v43  ;;  %475 = vmatmul.mubr.bf16.vlgmr.msra.gmra.mrb[0].mxu1 %v239_v43 }
  0xfa   : > { %v435_v56 = vpop.f32.mrb[0].mxu0  ;;  %v476_v57 = vpop.f32.mrb[0].mxu1 }
  0xfb   : > { %v436_v58 = vadd.f32 %v435_v56, %v206_v51  ;;  %v477_v59 = vadd.f32 %v476_v57, %v214_v52  ;;  %v437_v60 = vpop.f32.mrb[1].mxu0  ;;  %v478_v61 = vpop.f32.mrb[1].mxu1 }
  0xfc   : > { %v438_v62 = vadd.f32 %v437_v60, %v210_v53  ;;  %v479_v0 = vadd.f32 %v478_v61, %v218_v55  ;;  %v439_v1 = vpop.f32.mrb[2].mxu0  ;;  %v480_v2 = vpop.f32.mrb[2].mxu1 }
  0xfd   : > { %v440_v3 = vpop.f32.mrb[3].mxu0  ;;  %v481_v4 = vpop.f32.mrb[3].mxu1 }
  0xfe   : > { %v487_v5 = vcombine.low %v436_v58, %v438_v62  ;;  %v488_v6 = vcombine.low %v477_v59, %v479_v0 }
 0x100   : > { %v495_v7 = vrot.slane %v487_v5, %v494_v63  ;;  %v502_v8 = vrot.slane %v488_v6, %v494_v63 }
 0x102   : > { %v503_v9 = vcombine.low %v495_v7, %v502_v8  ;;  %v504_v10 = vcombine.high %v495_v7, %v502_v8  ;;  %v707_v11 = vcombine.low %v502_v8, %v502_v8  ;;  %v708_v12 = vcombine.high %v502_v8, %v502_v8 }
 0x104   : > { %v512_v13 = vrot.slane %v503_v9, %v494_v63  ;;  %v519_v14 = vrot.slane %v707_v11, %v494_v63  ;;  %v529_v15 = vrot.slane %v504_v10, %v494_v63  ;;  %v536_v16 = vrot.slane %v708_v12, %v494_v63 }
 0x106   : > { %v520_v17 = vcombine.high %v512_v13, %v512_v13  ;;  %v521_v18 = vcombine.high %v519_v14, %v519_v14  ;;  %v537_v19 = vcombine.high %v529_v15, %v529_v15  ;;  %v538_v20 = vcombine.high %v536_v16, %v536_v16 }
 0x108   : > { %v709_v21 = vpack.c.bf16 %v520_v17, %v512_v13  ;;  %v710_v22 = vpack.c.bf16 %v521_v18, %v519_v14  ;;  %v711_v23 = vpack.c.bf16 %v537_v19, %v529_v15  ;;  %v712_v24 = vpack.c.bf16 %v538_v20, %v536_v16 }
 0x10a   : > { %v571_v25 = vrot.slane %v709_v21, %v903_v35  ;;  %v578_v26 = vrot.slane %v710_v22, %v903_v35  ;;  %v595_v27 = vrot.slane %v711_v23, %v903_v35  ;;  %v602_v28 = vrot.slane %v712_v24, %v903_v35 }
 0x10c   : > { %v579_v29 = vcombine.low %v571_v25, %v578_v26  ;;  %v603_v30 = vcombine.low %v595_v27, %v602_v28 }
 0x10e   : > { %713 = vst.sshfl [vmem:[%s165_s10] sm:$0x55 pattern:$0x73625140] %v579_v29 }
 0x10f   : > { %714 = vst.sshfl [vmem:[%s165_s10 + $0x4] sm:$0x55 pattern:$0x73625140] %v603_v30 }
 0x110 PF: > { %s13_s12 = sadd.s32 1, %s782_s12  }
 0x111   : > { %p10_p4 = scmp.ge.s32.totalorder %s13_s12, 4  }
 0x113   :  { %12 = sbr.rel (!%p10_p4) target bundleno = 1 (0x1), region = 62 }

// kernel: tile.18
= control target key start
LH: loop header
LB: loop body
LE: loop exit
PB: predicated region body
PF: predicated region fallthrough
CT: control target
= control target key end

     0   :  { %s22_s0 = inlined_call_operand.vmem [shape: f32[32], index: 0, kind: input, shape index: {}]   ;;  %s23_s1 = inlined_call_operand.vmem [shape: f32[8,32], index: 1, kind: output, shape index: {}]  }
   0x1   :  { %v4_v0 = vld [vmem:[%s22_s0] ss:$0 sm:$0xff] }
   0x2   :  { %5 = vst [vmem:[%s23_s1] sm:$0xff] %v4_v0 }

// kernel: tile.19
= control target key start
LH: loop header
LB: loop body
LE: loop exit
PB: predicated region body
PF: predicated region fallthrough
CT: control target
= control target key end

     0   :  { %s7_s6 = smov 3  ;;  %s14_s9 = smov 3  ;;  %vm4_vm0 = vcmask 261120   ;;  %vm11_vm1 = vcmask 1048320   ;;  %vm18_vm2 = vcmask 785920   ;;  %vm25_vm3 = vcmask 523520   ;;  %s76_s0 = inlined_call_operand.vmem [shape: f32[8,32], index: 0, kind: input, shape index: {}]   ;;  %s77_s1 = inlined_call_operand.vmem [shape: f32[1,256], index: 1, kind: output, shape index: {}]  }
   0x1   :  { %v38_v0 = vld [vmem:[%s76_s0 + $0x3] ss:$4 sm:%s7_s6]   ;;  %s45_s10 = smov 96   ;;  %s21_s11 = smov 3  ;;  %v39_v1 = vld [vmem:[%s76_s0 + $0x2] ss:$4 sm:%s14_s9]  }
   0x2   :  { %9 = vrot.lane.b32.xlu0 %v38_v0, %s45_s10  ;;  %v40_v2 = vld [vmem:[%s76_s0 + $0x1] ss:$4 sm:%s21_s11]   ;;  %s2_s16 = smov 3  ;;  %s46_s17 = smov 32  }
   0x3   :  { %23 = vrot.lane.b32.xlu1 %v40_v2, %s46_s17  ;;  %v3_v3 = vld [vmem:[%s76_s0] ss:$4 sm:%s2_s16]   ;;  %s47_s0 = smov 64  }
   0x4   :  { %5 = vst.msk [vmem:[#allocation0] ss:$8 sm:$0x3] %vm4_vm0, %v3_v3  }
   0x6   :  { %16 = vrot.lane.b32.xlu0 %v39_v1, %s47_s0 }
  0x74   :  { %v10_v4 = vpop.permute.xlu0 %9  }
  0x75   :  { %12 = vst.msk [vmem:[#allocation0] ss:$8 sm:$0x3] %vm11_vm1, %v10_v4   ;;  %v24_v5 = vpop.permute.xlu1 %23  }
  0x78   :  { %v17_v6 = vpop.permute.xlu0 %16  }
  0x79   :  { %19 = vst.msk [vmem:[#allocation0] ss:$8 sm:$0x3] %vm18_vm2, %v17_v6  }
  0x7a   :  { %26 = vst.msk [vmem:[#allocation0] ss:$8 sm:$0x3] %vm25_vm3, %v24_v5  }
  0x81   :  { %v30_v7 = vld [vmem:[#allocation0] sm:$0x1]  ;;  %v34_v8 = vld [vmem:[#allocation0 + $0x8] sm:$0x1] }
  0x82   :  { %32 = vst [vmem:[%s77_s1] sm:$0x1] %v30_v7  ;;  %41 = vst [vmem:[%s77_s1 + $0x1] sm:$0x1] %v34_v8 }

// kernel: unet3d_forward.15
= control target key start
LH: loop header
LB: loop body
LE: loop exit
PB: predicated region body
PF: predicated region fallthrough
CT: control target
= control target key end

     0   :  { %s521_s12 = smov 0   ;;  %s569_s0 = inlined_call_operand.vmem [shape: bf16[4,4,4,64], index: 0, kind: input, shape index: {}]   ;;  %s570_s1 = inlined_call_operand.vmem [shape: bf16[64,256], index: 1, kind: input, shape index: {}]   ;;  %s571_s2 = inlined_call_operand.vmem [shape: f32[1,256], index: 2, kind: input, shape index: {}]   ;;  %s572_s3 = inlined_call_operand.vmem [shape: bf16[4,4,4,256], index: 3, kind: output, shape index: {}]  }
   0x1 LB: > { %s435_s13 = sadd.s32 4294967295, %s497_s12   ;;  %p439_p0 = scmp.ge.s32.totalorder %s497_s12, 1  ;;  %s497_s12 = sphi %s521_s12, %s13_s12  }
   0x2   : > { %p137_p1 = scmp.lt.s32.totalorder %s497_s12, 5 }
   0x4   : > { %p138_p2 = pnand %p439_p0, %p137_p1 }
   0x5   : > { %v479_v0 = vld [vmem:[%s570_s1 + $0x4] ss:$8 sps:$4 sm:$0xff] (!%p138_p2)   ;;  %p161_p3 = scmp.lt.s32.totalorder (!%p138_p2), %s435_s13, 3  ;;  %v186_v1 = vlaneseq (!%p138_p2)  ;;  %v481_v2 = vld [vmem:[%s570_s1] ss:$8 sps:$4 sm:$0xff] (!%p138_p2)   ;;  %v499_v3 = vmov (!%p138_p2), 0  }
   0x6   : > { %141 = sbr.rel (%p138_p2) target bundleno = 248 (0xf8), region = 32  ;;  %293 = vmatprep.mubr.bf16.mxu0 (!%p138_p2), %v499_v3  ;;  %261 = vmatprep.subr.bf16.mxu0 (!%p138_p2), %v479_v0  ;;  %v482_v4 = vld [vmem:[%s570_s1 + $0x14] ss:$8 sps:$4 sm:$0xff] (!%p138_p2)   ;;  %v500_v5 = vmov (!%p138_p2), 1983009808   ;;  %vm257_vm0 = vcmask (!%p138_p2), 523264  }
   0x7   : > { %v203_v6 = vunpack.c.l.s4 (!%p138_p2), %v500_v5  ;;  %262 = vmatpush1.bf16.msra.mxu0 (!%p138_p2), %v481_v2  ;;  %v484_v7 = vld [vmem:[%s570_s1 + $0x10] ss:$8 sps:$4 sm:$0xff] (!%p138_p2)   ;;  %v187_v8 = vshrl.u32 (!%p138_p2), %v186_v1, 7  ;;  %v485_v9 = vld [vmem:[%s570_s1 + $0x24] ss:$8 sps:$4 sm:$0xff] (!%p138_p2)  }
   0x8   : > { %263 = vmatprep.subr.bf16.mxu0 (!%p138_p2), %v482_v4  ;;  %v487_v15 = vld [vmem:[%s570_s1 + $0x20] ss:$8 sps:$4 sm:$0xff] (!%p138_p2)   ;;  %v488_v18 = vld [vmem:[%s570_s1 + $0x34] ss:$8 sps:$4 sm:$0xff] (!%p138_p2)   ;;  %v490_v22 = vld [vmem:[%s570_s1 + $0x30] ss:$8 sps:$4 sm:$0xff] (!%p138_p2)  }
   0x9   : > { %v204_v10 = vunpack.c.0.s8 (!%p138_p2), %v203_v6  ;;  %v188_v24 = vsub.s32 (!%p138_p2), 0, %v187_v8  ;;  %v184_v25 = vld [vmem:[%s571_s2] sm:$0x3] (!%p138_p2)  ;;  %v192_v26 = vsub.s32 (!%p138_p2), 1, %v187_v8 }
   0xb   : > { %v207_v14 = vsub.s32 (!%p138_p2), %v204_v10, %v187_v8  ;;  %264 = vmatpush1.bf16.msra.mxu0 (!%p138_p2), %v484_v7  ;;  %v189_v27 = vrot.slane (!%p138_p2), %v184_v25, %v188_v24  ;;  %v193_v28 = vrot.slane (!%p138_p2), %v184_v25, %v192_v26 }
   0xc   : > { %265 = vmatprep.subr.bf16.mxu0 (!%p138_p2), %v485_v9 }
   0xd   : > { %s574_s13 = smov (!%p161_p3, %s435_s13), 3 }
   0xe   : > { %s467_s24 = sshll.u32 %s574_s13, 3  ;;  %s468_s9 = sshll.u32 %s574_s13, 4 }
   0xf   : > { %s165_s27 = scalar_lea.vmem %s569_s0, %s467_s24  ;;  %266 = vmatpush1.bf16.msra.mxu0 %v487_v15  ;;  %s170_s14 = scalar_lea.vmem %s572_s3, %s468_s9 }
  0x10   : > { %v172_v11 = vld [vmem:[%s165_s27] sm:$0x3]  ;;  %v173_v12 = vld [vmem:[%s165_s27 + $0x2] sm:$0x3]  ;;  %v174_v13 = vld [vmem:[%s165_s27 + $0x4] sm:$0x3]  ;;  %267 = vmatprep.subr.bf16.mxu0 %v488_v18 }
  0x11   : > { %v175_v16 = vld [vmem:[%s165_s27 + $0x6] sm:$0x3]  ;;  %v200_v17 = vcombine.low %v172_v11, %v173_v12 }
  0x12   : > { %v201_v19 = vcombine.low %v174_v13, %v175_v16 }
  0x13   : > { %v208_v20 = vrot.slane %v200_v17, %v207_v14  ;;  %268 = vmatpush1.bf16.msra.mxu0 %v490_v22 }
  0x14   : > { %v215_v21 = vrot.slane %v201_v19, %v207_v14 }
  0x16   : > { %v216_v23 = vcombine.low %v208_v20, %v215_v21 }
  0x18   : > { %452 = vmatmul.mubr.msk.bf16.vlgmr.msra.gmra.mrb[0].mxu0 %vm257_vm0, %v216_v23 }
  0xeb   : > { %v295_v29 = vpop.f32.mrb[0].mxu0 }
  0xec   : > { %v296_v30 = vadd.f32 %v295_v29, %v189_v27  ;;  %v297_v31 = vpop.f32.mrb[1].mxu0 }
  0xed   : > { %v298_v32 = vadd.f32 %v297_v31, %v193_v28  ;;  %v299_v33 = vpop.f32.mrb[2].mxu0 }
  0xee   : > { %v300_v34 = vadd.f32 %v299_v33, %v189_v27  ;;  %v301_v35 = vpop.f32.mrb[3].mxu0 }
  0xef   : > { %v308_v36 = vcombine.low %v296_v30, %v298_v32  ;;  %v309_v37 = vcombine.high %v296_v30, %v298_v32  ;;  %v453_v38 = vcombine.low %v298_v32, %v298_v32  ;;  %v454_v39 = vcombine.high %v298_v32, %v298_v32 }
  0xf0   : > { %v302_v40 = vadd.f32 %v301_v35, %v193_v28 }
  0xf1   : > { %v457_v41 = vpack.c.bf16 %v453_v38, %v308_v36  ;;  %v458_v42 = vpack.c.bf16 %v454_v39, %v309_v37 }
  0xf2   : > { %v310_v43 = vcombine.low %v300_v34, %v302_v40  ;;  %v311_v44 = vcombine.high %v300_v34, %v302_v40  ;;  %v455_v45 = vcombine.low %v302_v40, %v302_v40  ;;  %v456_v46 = vcombine.high %v302_v40, %v302_v40 }
  0xf3   : > { %461 = vst.sshfl [vmem:[%s170_s14] sm:$0x33 pattern:$0x76325410] %v457_v41 }
  0xf4   : > { %462 = vst.sshfl [vmem:[%s170_s14 + $0x4] sm:$0x33 pattern:$0x76325410] %v458_v42  ;;  %v459_v47 = vpack.c.bf16 %v455_v45, %v310_v43  ;;  %v460_v48 = vpack.c.bf16 %v456_v46, %v311_v44 }
  0xf6   : > { %463 = vst.sshfl [vmem:[%s170_s14 + $0x8] sm:$0x33 pattern:$0x76325410] %v459_v47 }
  0xf7   : > { %464 = vst.sshfl [vmem:[%s170_s14 + $0xc] sm:$0x33 pattern:$0x76325410] %v460_v48 }
  0xf8 PF: > { %s13_s12 = sadd.s32 1, %s497_s12  }
  0xf9   : > { %p10_p4 = scmp.ge.s32.totalorder %s13_s12, 6  }
  0xfb   :  { %12 = sbr.rel (!%p10_p4) target bundleno = 1 (0x1), region = 62 }

// kernel: unet3d_forward.17
= control target key start
LH: loop header
LB: loop body
LE: loop exit
PB: predicated region body
PF: predicated region fallthrough
CT: control target
= control target key end

     0   :  { %s453_s12 = smov 0   ;;  %s487_s0 = inlined_call_operand.vmem [shape: bf16[8,8,8,32], index: 0, kind: input, shape index: {}]   ;;  %s488_s1 = inlined_call_operand.vmem [shape: bf16[32,3], index: 1, kind: input, shape index: {}]   ;;  %s489_s2 = inlined_call_operand.vmem [shape: f32[1,3], index: 2, kind: input, shape index: {}]   ;;  %s490_s3 = inlined_call_operand.vmem [shape: f32[8,8,8,3], index: 3, kind: output, shape index: {}]  }
   0x1 LB: > { %s365_s13 = sadd.s32 4294967295, %s431_s12   ;;  %p369_p0 = scmp.ge.s32.totalorder %s431_s12, 1  ;;  %s431_s12 = sphi %s453_s12, %s13_s12  }
   0x2   : > { %p137_p1 = scmp.lt.s32.totalorder %s431_s12, 9 }
   0x4   : > { %p138_p2 = pnand %p369_p0, %p137_p1 }
   0x5   : > { %v419_v0 = vld [vmem:[%s488_s1] sm:$0xff] (!%p138_p2)   ;;  %p161_p3 = scmp.lt.s32.totalorder (!%p138_p2), %s365_s13, 7  ;;  %v420_v1 = vld [vmem:[%s488_s1 + $0x8] sm:$0xff] (!%p138_p2)   ;;  %vm223_vm0 = vcmask (!%p138_p2), 261120   ;;  %vm301_vm1 = vcmask (!%p138_p2), 23552  }
   0x6   : > { %141 = sbr.rel (%p138_p2) target bundleno = 236 (0xec), region = 32  ;;  %395 = vmatprep.subr.bf16.mxu0 (!%p138_p2), %v419_v0  ;;  %407 = vmatprep.subr.bf16.mxu1 (!%p138_p2), %v419_v0  ;;  %v374_v6 = vld [vmem:[%s489_s2] ss:$0 sm:$0xff] (!%p138_p2) }
   0x7   : > { %396 = vmatpush3.bf16.msra.mxu0 (!%p138_p2), %v419_v0  ;;  %409 = vmatpush3.bf16.msra.mxu1 (!%p138_p2), %v419_v0 }
   0x8   : > { %397 = vmatprep.subr.bf16.mxu0 (!%p138_p2), %v420_v1  ;;  %408 = vmatprep.subr.bf16.mxu1 (!%p138_p2), %v420_v1 }
   0xb   : > { %398 = vmatpush3.bf16.msra.mxu0 (!%p138_p2), %v420_v1  ;;  %410 = vmatpush3.bf16.msra.mxu1 (!%p138_p2), %v420_v1 }
   0xd   : > { %s492_s13 = smov (!%p161_p3, %s365_s13), 7 }
   0xe   : > { %s387_s18 = sshll.u32 %s492_s13, 5  ;;  %s388_s22 = sshll.u32 %s492_s13, 6 }
   0xf   : > { %s165_s21 = scalar_lea.vmem %s487_s0, %s387_s18  ;;  %s170_s27 = scalar_lea.vmem %s490_s3, %s388_s22 }
  0x10   : > { %v421_v2 = vld [vmem:[%s165_s21] sm:$0xff]   ;;  %v422_v3 = vld [vmem:[%s165_s21 + $0x10] sm:$0xff]   ;;  %v423_v4 = vld [vmem:[%s165_s21 + $0x8] sm:$0xff]  }
  0x11   : > { %399 = vmatprep.mubr.msk.bf16.mxu0 %vm223_vm0, %v421_v2  ;;  %403 = vmatprep.mubr.msk.bf16.mxu1 %vm223_vm0, %v422_v3  ;;  %v424_v5 = vld [vmem:[%s165_s21 + $0x18] sm:$0xff]  }
  0x12   : > { %400 = vmatmul.mubr.msk.bf16.vlgmr.msra.gmra.mrb[0].mxu0 %vm223_vm0, %v423_v4  ;;  %404 = vmatmul.mubr.msk.bf16.vlgmr.msra.gmra.mrb[0].mxu1 %vm223_vm0, %v424_v5 }
  0xe5   : > { %v401_v7 = vpop.f32.mrb[0].mxu0  ;;  %v405_v9 = vpop.f32.mrb[0].mxu1 }
  0xe6   : > { %v279_v8 = vadd.f32 %v401_v7, %v374_v6  ;;  %v270_v10 = vpop.f32.mrb[1].mxu0  ;;  %v295_v11 = vadd.f32 %v405_v9, %v374_v6  ;;  %v286_v13 = vpop.f32.mrb[1].mxu1 }
  0xe7   : > { %v271_v12 = vadd.f32 %v374_v6, %v270_v10  ;;  %v402_v14 = vpop.f32.mrb[2].mxu0  ;;  %v287_v15 = vadd.f32 %v374_v6, %v286_v13  ;;  %v406_v17 = vpop.f32.mrb[2].mxu1 }
  0xe8   : > { %304 = vst.msk [vmem:[%s170_s27 + $0x10] sm:$0xff] %vm301_vm1, %v279_v8  ;;  %v282_v16 = vadd.f32 %v402_v14, %v374_v6  ;;  %v273_v18 = vpop.f32.mrb[3].mxu0  ;;  %308 = vst.msk [vmem:[%s170_s27 + $0x30] sm:$0xff] %vm301_vm1, %v295_v11  ;;  %v298_v19 = vadd.f32 %v406_v17, %v374_v6  ;;  %v289_v21 = vpop.f32.mrb[3].mxu1 }
  0xe9   : > { %302 = vst.msk [vmem:[%s170_s27] sm:$0xff] %vm301_vm1, %v271_v12  ;;  %v274_v20 = vadd.f32 %v374_v6, %v273_v18  ;;  %306 = vst.msk [vmem:[%s170_s27 + $0x20] sm:$0xff] %vm301_vm1, %v287_v15  ;;  %v290_v22 = vadd.f32 %v374_v6, %v289_v21 }
  0xea   : > { %305 = vst.msk [vmem:[%s170_s27 + $0x18] sm:$0xff] %vm301_vm1, %v282_v16  ;;  %309 = vst.msk [vmem:[%s170_s27 + $0x38] sm:$0xff] %vm301_vm1, %v298_v19 }
  0xeb   : > { %303 = vst.msk [vmem:[%s170_s27 + $0x8] sm:$0xff] %vm301_vm1, %v274_v20  ;;  %307 = vst.msk [vmem:[%s170_s27 + $0x28] sm:$0xff] %vm301_vm1, %v290_v22 }
  0xec PF: > { %s13_s12 = sadd.s32 1, %s431_s12  }
  0xed   : > { %p10_p4 = scmp.ge.s32.totalorder %s13_s12, 10  }
  0xef   :  { %12 = sbr.rel (!%p10_p4) target bundleno = 1 (0x1), region = 62 }

// kernel: unet3d_forward.14
= control target key start
LH: loop header
LB: loop body
LE: loop exit
PB: predicated region body
PF: predicated region fallthrough
CT: control target
= control target key end

     0   :  { %s3990_s21 = smov 0   ;;  %s3992_s22 = smov 0   ;;  %s4501_s0 = inlined_call_operand.vmem [shape: bf16[6,1,6,6,64], index: 0, kind: input, shape index: {}]   ;;  %s4502_s1 = inlined_call_operand.vmem [shape: bf16[6,1,6,6,64], index: 1, kind: input, shape index: {}]   ;;  %s4503_s2 = inlined_call_operand.vmem [shape: bf16[3,576,64], index: 2, kind: input, shape index: {}]   ;;  %s4504_s3 = inlined_call_operand.vmem [shape: bf16[3,576,64], index: 3, kind: input, shape index: {}]   ;;  %s4505_s4 = inlined_call_operand.vmem [shape: f32[1,64], index: 4, kind: input, shape index: {}]   ;;  %s4506_s5 = inlined_call_operand.vmem [shape: f32[1,64], index: 5, kind: input, shape index: {}]   ;;  %s4507_s6 = inlined_call_operand.vmem [shape: bf16[4,4,4,64], index: 6, kind: output, shape index: {}]  }
   0x1   :  { %s3994_s23 = smov 0   ;;  %s3996_s24 = smov 0  }
   0x2   :  { %s3998_s25 = smov 0  }
   0x3 LB: > { %s28_s26 = sadd.s32 1, %s3941_s23  ;;  %s31_s27 = sadd.s32 1, %s3945_s24  ;;  %s3949_s25 = sphi %s3998_s25, %s16_s25   ;;  %s3945_s24 = sphi %s3996_s24, %s4517_s24   ;;  %s3941_s23 = sphi %s3994_s23, %s4516_s23   ;;  %s3937_s22 = sphi %s3992_s22, %s4515_s22   ;;  %s3933_s21 = sphi %s3990_s21, %s4514_s21  }
   0x4   : > { %p29_p0 = scmp.ge.s32.totalorder %s28_s26, 3  ;;  %p3239_p1 = scmp.ge.s32.totalorder %s3949_s25, 1 }
   0x5   : > { %p289_p2 = scmp.lt.s32.totalorder %s3949_s25, 13 }
   0x6   : > { %s4519_s26 = smov (%p29_p0, %s28_s26), 0  ;;  %s4521_s27 = smov (!%p29_p0, %s31_s27), %s3945_s24 }
   0x7   : > { %p290_p3 = pnand %p3239_p1, %p289_p2  ;;  %p33_p4 = scmp.ge.s32.totalorder %s4521_s27, 4 }
   0x8   : > { %s344_s28 = sadd.s32 (!%p290_p3), %s3933_s21, %s3937_s22  ;;  %p364_p5 = scmp.lt.s32.totalorder (!%p290_p3), %s3933_s21, 2 }
   0x9   : > { %s4523_s27 = smov (%p33_p4, %s4521_s27), 0  ;;  %293 = sbr.rel (%p290_p3) target bundleno = 422 (0x1a6), region = 44 }
   0xa   : > { %p345_p6 = scmp.lt.s32.totalorder (!%p290_p3), %s344_s28, 5  ;;  %p376_p7 = scmp.lt.s32.totalorder (!%p290_p3), %s3937_s22, 3 }
   0xb   : > { %p3246_p8 = scmp.ne.s32.totalorder (!%p290_p3), %s3933_s21, 0 }
  0x10   : > { %s365_s29 = scalar_select %p364_p5, %s3933_s21, 2 }
  0x11   : > { %s4525_s28 = smov (!%p345_p6, %s344_s28), 5  ;;  %s4527_s22 = smov (!%p376_p7, %s3937_s22), 3 }
  0x12   : > { %s3770_s30 = smul.u32 288, %s365_s29  ;;  %s3462_s20 = sshll.u32 %s4527_s22, 3  ;;  %vm388_vm0 = vcmask (!%p3246_p8), 523264   ;;  %v3951_v0 = vmov (!%p3246_p8), 0.0  }
  0x13   : > { %s3769_s7 = smul.u32 24, %s4525_s28  ;;  %s4048_s8 = scalar_lea.vmem %s4507_s6, %s3462_s20  ;;  %389 = vst.msk [vmem:[#allocation2] sm:$0xff] (!%p3246_p8), %vm388_vm0, %v3951_v0  ;;  %390 = vst.msk [vmem:[#allocation2 + $0x8] sm:$0xff] (!%p3246_p8), %vm388_vm0, %v3951_v0 }
  0x14   : > { %s4028_s10 = scalar_lea.vmem %s4503_s2, %s3770_s30  ;;  %s4033_s13 = scalar_lea.vmem %s4504_s3, %s3770_s30 }
  0x15   : > { %s4038_s16 = scalar_lea.vmem %s4501_s0, %s3769_s7  ;;  %s4043_s19 = scalar_lea.vmem %s4502_s1, %s3769_s7 }
  0x16   : > { %387 = sbr.rel (%p3246_p8) target bundleno = 29 (0x1d), region = 48 }
  0x1d PF: > { %v3815_v1 = vld [vmem:[%s4028_s10 + $0x20] sm:$0xff]   ;;  %v3952_v2 = vmov 0.0   ;;  %v3817_v4 = vld [vmem:[%s4028_s10 + $0x28] sm:$0xff]   ;;  %vm3953_vm1 = vmmov 0   ;;  %v519_v6 = vlaneseq  ;;  %v3819_v7 = vld [vmem:[%s4028_s10 + $0x30] sm:$0xff]   ;;  %vm729_vm7 = vcmask 1040384  }
  0x1e   : > { %3553 = vmatprep.subr.bf16.mxu0 %v3952_v2  ;;  %3565 = vmatprep.subr.bf16.mxu1 %v3952_v2  ;;  %v3816_v3 = vld [vmem:[%s4028_s10] sm:$0xff]   ;;  %v3818_v5 = vld [vmem:[%s4028_s10 + $0x8] sm:$0xff]   ;;  %v3820_v8 = vld [vmem:[%s4028_s10 + $0x10] sm:$0xff]   ;;  %vm443_vm2 = vsmask.f32 1280  ;;  %vm730_vm10 = vcmask 1042434  }
  0x1f   : > { %3554 = vmatpush3.bf16.msra.mxu0 %v3815_v1  ;;  %3561 = vmatprep.mubr.msk.bf16.mxu0 %vm3953_vm1, %v3952_v2  ;;  %v4066_v9 = vshrl.u32 %v519_v6, 7  ;;  %v3821_v10 = vld [vmem:[%s4028_s10 + $0x38] sm:$0xff]   ;;  %v3247_v11 = vld.sshfl [vmem:[%s4038_s16] sm:$0x13 pattern:$0x76325410]  ;;  %vm731_vm11 = vmor %vm729_vm7, %vm730_vm10 }
  0x20   : > { %3566 = vmatpush3.bf16.msra.mxu1 %v3816_v3  ;;  %3555 = vmatprep.subr.bf16.mxu0 %v3952_v2  ;;  %v3822_v12 = vld [vmem:[%s4028_s10 + $0x18] sm:$0xff]   ;;  %v3248_v13 = vld.sshfl [vmem:[%s4038_s16 + $0x4] sm:$0x13 pattern:$0x76325410]  ;;  %v418_v14 = vcombine.high %v3247_v11, %v3247_v11  ;;  %v451_v20 = vshrl.u32 %v3247_v11, 16 }
  0x21   : > { %3567 = vmatprep.subr.bf16.mxu1 %v3952_v2  ;;  %3573 = vmatprep.mubr.msk.bf16.mxu1 %vm3953_vm1, %v3952_v2  ;;  %vm444_vm3 = vsmask.f32 3336  ;;  %v3249_v15 = vld.sshfl [vmem:[%s4038_s16 + $0x8] sm:$0x13 pattern:$0x76325410]  ;;  %v426_v16 = vcombine.high %v3248_v13, %v3248_v13 }
  0x22   : > { %vm446_vm4 = vsmask.f32 5392  ;;  %v3250_v17 = vld.sshfl [vmem:[%s4038_s16 + $0xc] sm:$0x13 pattern:$0x76325410]  ;;  %v434_v18 = vcombine.high %v3249_v15, %v3249_v15  ;;  %vm445_vm5 = vmor %vm443_vm2, %vm444_vm3 }
  0x23   : > { %3556 = vmatpush3.bf16.msra.mxu0 %v3817_v4  ;;  %vm448_vm6 = vsmask.f32 7448  ;;  %v442_v19 = vcombine.high %v3250_v17, %v3250_v17  ;;  %v454_v21 = vshll.u32 %v3247_v11, 16  ;;  %v460_v22 = vshll.u32 %v418_v14, 16  ;;  %vm4078_vm8 = vmor %vm445_vm5, %vm446_vm4  ;;  %v3826_v1 = vld [vmem:[%s4028_s10 + $0x60] sm:$0xff]   ;;  %v3828_v11 = vld [vmem:[%s4028_s10 + $0x68] sm:$0xff]  }
  0x24   : > { %3568 = vmatpush3.bf16.msra.mxu1 %v3818_v5  ;;  %3557 = vmatprep.subr.bf16.mxu0 %v3952_v2  ;;  %v465_v23 = vshrl.u32 %v3248_v13, 16  ;;  %v468_v24 = vshll.u32 %v3248_v13, 16  ;;  %v474_v25 = vshll.u32 %v426_v16, 16  ;;  %v479_v26 = vshrl.u32 %v3249_v15, 16  ;;  %vm4087_vm9 = vmor %vm4078_vm8, %vm448_vm6  ;;  %p3457_p9 = scmp.ne.s32.totalorder %s3933_s21, 2 }
  0x25   : > { %3569 = vmatprep.subr.bf16.mxu1 %v3952_v2  ;;  %v453_v28 = vrot.slane %v451_v20, 6  ;;  %v456_v29 = vrot.slane %v454_v21, 7  ;;  %v462_v30 = vrot.slane %v460_v22, 7  ;;  %v482_v31 = vshll.u32 %v3249_v15, 16 }
  0x26   : > { %v467_v32 = vrot.slane %v465_v23, 6  ;;  %v470_v33 = vrot.slane %v468_v24, 7  ;;  %v476_v34 = vrot.slane %v474_v25, 7  ;;  %v481_v35 = vrot.slane %v479_v26, 6  ;;  %v3827_v25 = vld [vmem:[%s4028_s10 + $0x48] sm:$0xff]  }
  0x27   : > { %3558 = vmatpush3.bf16.msra.mxu0 %v3819_v7  ;;  %v457_v36 = vor.u32 %v456_v29, %v453_v28  ;;  %v484_v37 = vrot.slane %v482_v31, 7  ;;  %v488_v38 = vshll.u32 %v434_v18, 16  ;;  %v493_v39 = vshrl.u32 %v3250_v17, 16  ;;  %v3825_v7 = vld [vmem:[%s4028_s10 + $0x40] sm:$0xff]   ;;  %v3830_v28 = vld [vmem:[%s4028_s10 + $0x70] sm:$0xff]  }
  0x28   : > { %3570 = vmatpush3.bf16.msra.mxu1 %v3820_v8  ;;  %3559 = vmatprep.subr.bf16.mxu0 %v3952_v2  ;;  %v471_v41 = vor.u32 %v470_v33, %v467_v32  ;;  %v496_v42 = vshll.u32 %v3250_v17, 16  ;;  %v502_v43 = vshll.u32 %v442_v19, 16  ;;  %v3954_v50 = vmov 1983009808  }
  0x29   : > { %3571 = vmatprep.subr.bf16.mxu1 %v3952_v2  ;;  %v458_v44 = vrot.slane %v457_v36, 2  ;;  %v485_v45 = vor.u32 %v484_v37, %v481_v35  ;;  %v495_v46 = vrot.slane %v493_v39, 6  ;;  %v490_v48 = vrot.slane %v488_v38, 7  ;;  %v3829_v37 = vld [vmem:[%s4028_s10 + $0x50] sm:$0xff]   ;;  %v3832_v38 = vld [vmem:[%s4028_s10 + $0x78] sm:$0xff]  }
  0x2a   : > { %v472_v47 = vrot.slane %v471_v41, 2  ;;  %v498_v49 = vrot.slane %v496_v42, 7  ;;  %v517_v51 = vunpack.c.l.s4 %v3954_v50  ;;  %v3899_v52 = vld.sshfl [vmem:[%s4038_s16] sm:$0xf pattern:$0x76325410] }
  0x2b   : > { %3560 = vmatpush3.bf16.msra.mxu0 %v3821_v10  ;;  %v3900_v53 = vld.sshfl [vmem:[%s4038_s16 + $0x8] sm:$0xf pattern:$0x76325410]  ;;  %v463_v54 = vsel %vm4087_vm9, %v458_v44, %v462_v30  ;;  %v486_v55 = vrot.slane %v485_v45, 2  ;;  %v504_v56 = vrot.slane %v502_v43, 7 }
  0x2c   : > { %3572 = vmatpush3.bf16.msra.mxu1 %v3822_v12  ;;  %3577 = vmatprep.subr.bf16.mxu0 %v3952_v2  ;;  %v4097_v57 = vsel %vm4087_vm9, %v472_v47, %v476_v34  ;;  %v499_v58 = vor.u32 %v498_v49, %v495_v46  ;;  %v518_v59 = vunpack.c.0.s8 %v517_v51  ;;  %vm732_vm12 = vcmask 1044484   ;;  %v3261_v5 = vld.sshfl [vmem:[%s4038_s16] sm:$0x12 pattern:$0x76325410]  ;;  %v3831_v39 = vld [vmem:[%s4028_s10 + $0x58] sm:$0xff]  }
  0x2d   : > { %3589 = vmatprep.subr.bf16.mxu1 %v3952_v2  ;;  %v514_v60 = vcombine.low %v463_v54, %v4097_v57  ;;  %v4102_v61 = vsel %vm4087_vm9, %v486_v55, %v490_v48  ;;  %vm555_vm13 = vcmask 523264   ;;  %vm734_vm14 = vcmask 1046534   ;;  %vm733_vm15 = vmor %vm731_vm11, %vm732_vm12  ;;  %v3262_v8 = vld.sshfl [vmem:[%s4038_s16 + $0x4] sm:$0x12 pattern:$0x76325410] }
  0x2e   : > { %v500_v62 = vrot.slane %v499_v58, 2  ;;  %v4105_v63 = vsub.s32 %v518_v59, %v4066_v9  ;;  %v620_v6 = vcombine.low %v3899_v52, %v3900_v53  ;;  %v704_v9 = vcombine.high %v3261_v5, %v3261_v5  ;;  %v3263_v12 = vld.sshfl [vmem:[%s4038_s16 + $0x8] sm:$0x12 pattern:$0x76325410]  ;;  %vm4128_vm0 = vmor %vm733_vm15, %vm734_vm14  ;;  %v3836_v49 = vld [vmem:[%s4028_s10 + $0xa0] sm:$0xff]  }
  0x2f   : > { %v712_v13 = vcombine.high %v3262_v8, %v3262_v8  ;;  %v3265_v14 = vrot.slane %v3261_v5, 9  ;;  %v3266_v15 = vrot.slane %v3262_v8, 9  ;;  %v3264_v16 = vld.sshfl [vmem:[%s4038_s16 + $0xc] sm:$0x12 pattern:$0x76325410]  ;;  %v720_v17 = vcombine.high %v3263_v12, %v3263_v12 }
  0x30   : > { %v4111_v0 = vsel %vm4087_vm9, %v500_v62, %v504_v56  ;;  %v522_v4 = vrot.slane %v514_v60, %v4105_v63  ;;  %3574 = vmatmul.mubr.msk.bf16.vlgmr.msra.gmra.mrb[0].mxu1 %vm555_vm13, %v620_v6  ;;  %v738_v19 = vrot.slane %v704_v9, 7  ;;  %v3267_v20 = vrot.slane %v3263_v12, 9  ;;  %v3901_v27 = vld.sshfl [vmem:[%s4038_s16 + $0x4] sm:$0xf pattern:$0x76325410] }
  0x31   : > { %v515_v3 = vcombine.low %v4102_v61, %v4111_v0  ;;  %3590 = vmatpush3.bf16.msra.mxu1 %v3826_v1  ;;  %3597 = vmatprep.mubr.msk.bf16.mxu1 %vm3953_vm1, %v3952_v2  ;;  %v728_v22 = vcombine.high %v3264_v16, %v3264_v16  ;;  %v742_v23 = vrot.slane %v712_v13, 7  ;;  %v3268_v24 = vrot.slane %v3264_v16, 9  ;;  %v3902_v32 = vld.sshfl [vmem:[%s4038_s16 + $0xc] sm:$0xf pattern:$0x76325410] }
  0x32   : > { %3591 = vmatprep.subr.bf16.mxu1 %v3952_v2  ;;  %v746_v26 = vrot.slane %v720_v17, 7  ;;  %v739_v29 = vsel %vm4128_vm0, %v3265_v14, %v738_v19  ;;  %v3290_v42 = vld.sshfl [vmem:[%s4038_s16 + $0x10] sm:$0x13 pattern:$0x76325410]  ;;  %v880_v48 = vcombine.low %v3901_v27, %v3902_v32  ;;  %v3835_v58 = vld [vmem:[%s4028_s10 + $0x80] sm:$0xff]  }
  0x33   : > { %v4121_v10 = vrot.slane %v515_v3, %v4105_v63  ;;  %v4144_v30 = vsel %vm4128_vm0, %v3266_v15, %v742_v23  ;;  %v750_v31 = vrot.slane %v728_v22, 7  ;;  %v990_v44 = vcombine.high %v3290_v42, %v3290_v42  ;;  %v3303_v47 = vld.sshfl [vmem:[%s4038_s16 + $0x10] sm:$0x12 pattern:$0x76325410]  ;;  %v3838_v62 = vld [vmem:[%s4028_s10 + $0xa8] sm:$0xff]  }
  0x34   : > { %v4151_v33 = vsel %vm4128_vm0, %v3267_v20, %v746_v26  ;;  %v760_v35 = vcombine.low %v739_v29, %v4144_v30  ;;  %v1034_v45 = vshrl.u32 %v3290_v42, 16  ;;  %v1037_v46 = vshll.u32 %v3290_v42, 16  ;;  %v3840_v8 = vld [vmem:[%s4028_s10 + $0xb0] sm:$0xff]   ;;  %v3842_v20 = vld [vmem:[%s4028_s10 + $0xb8] sm:$0xff]   ;;  %v3844_v26 = vld [vmem:[%s4028_s10 + $0xe0] sm:$0xff]  }
  0x35   : > { %v530_v21 = vcombine.low %v522_v4, %v4121_v10  ;;  %3592 = vmatpush3.bf16.msra.mxu1 %v3828_v11  ;;  %v4156_v34 = vsel %vm4128_vm0, %v3268_v24, %v750_v31  ;;  %v1181_v50 = vcombine.high %v3303_v47, %v3303_v47  ;;  %v1043_v53 = vshll.u32 %v990_v44, 16  ;;  %v3837_v4 = vld [vmem:[%s4028_s10 + $0x88] sm:$0xff]   ;;  %v3329_v9 = vld.sshfl [vmem:[%s4038_s16 + $0x14] sm:$0x13 pattern:$0x76325410] }
  0x36   : > { %3593 = vmatprep.subr.bf16.mxu1 %v3952_v2  ;;  %v761_v36 = vcombine.low %v4151_v33, %v4156_v34  ;;  %v768_v41 = vrot.slane %v760_v35, %v4105_v63  ;;  %v1036_v51 = vrot.slane %v1034_v45, 6  ;;  %v1039_v52 = vrot.slane %v1037_v46, 7  ;;  %v3839_v15 = vld [vmem:[%s4028_s10 + $0x90] sm:$0xff]   ;;  %v3846_v31 = vld [vmem:[%s4028_s10 + $0xe8] sm:$0xff]   ;;  %v3850_v44 = vld [vmem:[%s4028_s10 + $0xf8] sm:$0xff]  }
  0x37   : > { %3562 = vmatmul.mubr.msk.bf16.vlgmr.msra.gmra.mrb[0].mxu0 %vm555_vm13, %v530_v21  ;;  %v3307_v54 = vrot.slane %v3303_v47, 9  ;;  %v1196_v55 = vrot.slane %v1181_v50, 7  ;;  %v1045_v60 = vrot.slane %v1043_v53, 7  ;;  %v1206_v6 = vcombine.low %v4144_v30, %v4151_v33  ;;  %v3843_v30 = vld [vmem:[%s4028_s10 + $0xc0] sm:$0xff]  }
  0x38   : > { %3578 = vmatpush3.bf16.msra.mxu0 %v3825_v7  ;;  %3585 = vmatprep.mubr.msk.bf16.mxu0 %vm3953_vm1, %v3952_v2  ;;  %v4170_v43 = vrot.slane %v761_v36, %v4105_v63  ;;  %v1040_v59 = vor.u32 %v1039_v52, %v1036_v51  ;;  %v1055_v11 = vcombine.low %v4097_v57, %v4102_v61  ;;  %v1480_v14 = vshrl.u32 %v3329_v9, 16  ;;  %v3841_v61 = vld [vmem:[%s4028_s10 + $0x98] sm:$0xff]   ;;  %v4228_v33 = vld.sshfl [vmem:[%s4038_s16 + $0x14] sm:$0x12 pattern:$0x76325410] }
  0x39   : > { %3579 = vmatprep.subr.bf16.mxu0 %v3952_v2  ;;  %3594 = vmatpush3.bf16.msra.mxu1 %v3830_v28  ;;  %v4183_v3 = vsel %vm4128_vm0, %v3307_v54, %v1196_v55  ;;  %v1436_v13 = vcombine.high %v3329_v9, %v3329_v9  ;;  %v1214_v16 = vrot.slane %v1206_v6, %v4105_v63  ;;  %v1483_v19 = vshll.u32 %v3329_v9, 16  ;;  %v3848_v36 = vld [vmem:[%s4028_s10 + $0xf0] sm:$0xff]   ;;  %v3357_v45 = vld.sshfl [vmem:[%s4043_s19] sm:$0x13 pattern:$0x76325410] }
  0x3a   : > { %3595 = vmatprep.subr.bf16.mxu1 %v3952_v2  ;;  %v776_v56 = vcombine.low %v768_v41, %v4170_v43  ;;  %v1041_v1 = vrot.slane %v1040_v59, 2  ;;  %v1207_v7 = vcombine.low %v4156_v34, %v4183_v3  ;;  %v1482_v21 = vrot.slane %v1480_v14, 6  ;;  %v3845_v34 = vld [vmem:[%s4028_s10 + $0xc8] sm:$0xff]   ;;  %v3854_v51 = vld [vmem:[%s4033_s13] sm:$0xff]  }
  0x3b   : > { %v1489_v22 = vshll.u32 %v1436_v13, 16  ;;  %v1485_v57 = vrot.slane %v1483_v19, 7  ;;  %v1627_v42 = vcombine.high %v4228_v33, %v4228_v33  ;;  %v3358_v46 = vld.sshfl [vmem:[%s4043_s19 + $0x4] sm:$0x13 pattern:$0x76325410]  ;;  %v1857_v54 = vcombine.high %v3357_v45, %v3357_v45 }
  0x3c   : > { %3580 = vmatpush3.bf16.msra.mxu0 %v3827_v25  ;;  %v1046_v5 = vsel %vm4087_vm9, %v1041_v1, %v1045_v60  ;;  %v1221_v17 = vrot.slane %v1207_v7, %v4105_v63  ;;  %v1883_v47 = vshrl.u32 %v3357_v45, 16  ;;  %v3346_v52 = vrot.slane %v4228_v33, 9  ;;  %v3359_v60 = vld.sshfl [vmem:[%s4043_s19 + $0x8] sm:$0x13 pattern:$0x76325410] }
  0x3d   : > { %3581 = vmatprep.subr.bf16.mxu0 %v3952_v2  ;;  %3596 = vmatpush3.bf16.msra.mxu1 %v3832_v38  ;;  %v1056_v12 = vcombine.low %v4111_v0, %v1046_v5  ;;  %v1063_v0 = vrot.slane %v1055_v11, %v4105_v63  ;;  %v1486_v25 = vor.u32 %v1485_v57, %v1482_v21  ;;  %v1491_v27 = vrot.slane %v1489_v22, 7  ;;  %v3904_v38 = vld.sshfl [vmem:[%s4038_s16 + $0x10] sm:$0xf pattern:$0x76325410]  ;;  %v3853_v1 = vld [vmem:[%s4028_s10 + $0x100] sm:$0xff]  }
  0x3e   : > { %3613 = vmatprep.subr.bf16.mxu1 %v3952_v2  ;;  %v1222_v24 = vcombine.low %v1214_v16, %v1221_v17  ;;  %v1642_v53 = vrot.slane %v1627_v42, 7  ;;  %v1885_v55 = vrot.slane %v1883_v47, 6  ;;  %v1900_v59 = vshll.u32 %v3358_v46, 16  ;;  %v3855_v13 = vld [vmem:[%s4028_s10 + $0x108] sm:$0xff]   ;;  %v3858_v19 = vld [vmem:[%s4033_s13 + $0x10] sm:$0xff]   ;;  %v3860_v33 = vld [vmem:[%s4033_s13 + $0x18] sm:$0xff]  }
  0x3f   : > { %v1070_v23 = vrot.slane %v1056_v12, %v4105_v63  ;;  %v1487_v28 = vrot.slane %v1486_v25, 2  ;;  %v4258_v6 = vshll.u32 %v1857_v54, 16  ;;  %v4262_v7 = vld.sshfl [vmem:[%s4043_s19] sm:$0xf pattern:$0x76325410] }
  0x40   : > { %3582 = vmatpush3.bf16.msra.mxu0 %v3829_v37  ;;  %3598 = vmatmul.mubr.msk.bf16.vlgmr.msra.gmra.mrb[4].mxu1 %vm555_vm13, %v880_v48  ;;  %v3903_v37 = vld.sshfl [vmem:[%s4038_s16 + $0x8] sm:$0xf pattern:$0x76325410]  ;;  %v1886_v48 = vshll.u32 %v3357_v45, 16  ;;  %v4266_v12 = vrot.slane %v1900_v59, 7 }
  0x41   : > { %3583 = vmatprep.subr.bf16.mxu0 %v3952_v2  ;;  %3614 = vmatpush3.bf16.msra.mxu1 %v3836_v49  ;;  %v1071_v29 = vcombine.low %v1063_v0, %v1070_v23  ;;  %v1492_v32 = vsel %vm4087_vm9, %v1487_v28, %v1491_v27  ;;  %v3849_v49 = vld [vmem:[%s4028_s10 + $0xd8] sm:$0xff]   ;;  %v4273_v14 = vld.sshfl [vmem:[%s4043_s19 + $0x8] sm:$0xf pattern:$0x76325410]  ;;  %v1914_v16 = vshll.u32 %v3359_v60, 16 }
  0x42   : > { %3615 = vmatprep.subr.bf16.mxu1 %v3952_v2  ;;  %3621 = vmatprep.mubr.msk.bf16.mxu1 %vm3953_vm1, %v3952_v2  ;;  %v1502_v35 = vcombine.low %v1046_v5, %v1492_v32  ;;  %v1865_v5 = vcombine.high %v3358_v46, %v3358_v46  ;;  %v4276_v17 = vld.sshfl [vmem:[%s4043_s19] sm:$0x12 pattern:$0x76325410]  ;;  %v1894_v0 = vrot.slane %v4258_v6, 7 }
  0x43   : > { %v2048_v25 = vcombine.high %v4276_v17, %v4276_v17  ;;  %v3369_v28 = vld.sshfl [vmem:[%s4043_s19 + $0xc] sm:$0x12 pattern:$0x76325410]  ;;  %v1916_v32 = vrot.slane %v1914_v16, 7 }
  0x44   : > { %3584 = vmatpush3.bf16.msra.mxu0 %v3831_v39  ;;  %v3847_v39 = vld [vmem:[%s4028_s10 + $0xd0] sm:$0xff]   ;;  %v1516_v41 = vrot.slane %v1502_v35, %v4105_v63  ;;  %v4286_v23 = vshll.u32 %v1865_v5, 16  ;;  %v2072_v42 = vcombine.high %v3369_v28, %v3369_v28  ;;  %v3373_v54 = vrot.slane %v3369_v28, 9 }
  0x45   : > { %3601 = vmatprep.subr.bf16.mxu0 %v3952_v2  ;;  %3616 = vmatpush3.bf16.msra.mxu1 %v3838_v62  ;;  %v1326_v62 = vcombine.low %v3903_v37, %v3904_v38 }
  0x46   : > { %3617 = vmatprep.subr.bf16.mxu1 %v3952_v2  ;;  %v1517_v50 = vcombine.low %v4121_v10, %v1516_v41  ;;  %v3360_v10 = vld.sshfl [vmem:[%s4043_s19 + $0xc] sm:$0x13 pattern:$0x76325410]  ;;  %v2075_v41 = vrot.slane %v2048_v25, 7 }
  0x47   : > { %3586 = vmatmul.mubr.msk.bf16.vlgmr.msra.gmra.mrb[4].mxu0 %vm555_vm13, %v776_v56  ;;  %v1888_v56 = vrot.slane %v1886_v48, 7  ;;  %v1881_v21 = vcombine.high %v3360_v10, %v3360_v10  ;;  %v1925_v22 = vshrl.u32 %v3360_v10, 16  ;;  %v1928_v57 = vshll.u32 %v3360_v10, 16  ;;  %v3866_v10 = vld [vmem:[%s4033_s13 + $0x48] sm:$0xff]  }
  0x48   : > { %3602 = vmatpush3.bf16.msra.mxu0 %v3835_v58  ;;  %3609 = vmatprep.mubr.msk.bf16.mxu0 %vm3953_vm1, %v3952_v2  ;;  %v1897_v58 = vshrl.u32 %v3358_v46, 16  ;;  %v3864_v46 = vld [vmem:[%s4033_s13 + $0x40] sm:$0xff]  }
  0x49   : > { %3603 = vmatprep.subr.bf16.mxu0 %v3952_v2  ;;  %3618 = vmatpush3.bf16.msra.mxu1 %v3840_v8  ;;  %v1873_v8 = vcombine.high %v3359_v60, %v3359_v60  ;;  %v1889_v9 = vor.u32 %v1888_v56, %v1885_v55  ;;  %v1930_v35 = vrot.slane %v1928_v57, 7  ;;  %v2087_v55 = vrot.slane %v2072_v42, 7  ;;  %v3395_v56 = vld.sshfl [vmem:[%s4043_s19 + $0x10] sm:$0x13 pattern:$0x76325410] }
  0x4a   : > { %3619 = vmatprep.subr.bf16.mxu1 %v3952_v2  ;;  %v4264_v11 = vrot.slane %v1897_v58, 6  ;;  %v3863_v58 = vld [vmem:[%s4033_s13 + $0x20] sm:$0xff]   ;;  %v3873_v42 = vld [vmem:[%s4033_s13 + $0x68] sm:$0xff]  }
  0x4b   : > { %v4294_v27 = vshll.u32 %v1873_v8, 16 }
  0x4c   : > { %3604 = vmatpush3.bf16.msra.mxu0 %v3837_v4  ;;  %v3856_v4 = vld [vmem:[%s4033_s13 + $0x8] sm:$0xff]  }
  0x4d   : > { %3605 = vmatprep.subr.bf16.mxu0 %v3952_v2  ;;  %3620 = vmatpush3.bf16.msra.mxu1 %v3842_v20  ;;  %v1643_v20 = vsel %vm4128_vm0, %v3346_v52, %v1642_v53 }
  0x4e   : > { %3637 = vmatprep.subr.bf16.mxu1 %v3952_v2 }
  0x50   : > { %3606 = vmatpush3.bf16.msra.mxu0 %v3839_v15  ;;  %3622 = vmatmul.mubr.msk.bf16.vlgmr.msra.gmra.mrb[8].mxu1 %vm555_vm13, %v1222_v24  ;;  %v1911_v15 = vshrl.u32 %v3359_v60, 16  ;;  %v3368_v24 = vld.sshfl [vmem:[%s4043_s19 + $0x8] sm:$0x12 pattern:$0x76325410]  ;;  %v1908_v60 = vrot.slane %v4286_v23, 7 }
  0x51   : > { %3607 = vmatprep.subr.bf16.mxu0 %v3952_v2  ;;  %3638 = vmatpush3.bf16.msra.mxu1 %v3844_v26  ;;  %v4292_v26 = vrot.slane %v1889_v9, 2  ;;  %v2064_v38 = vcombine.high %v3368_v24, %v3368_v24  ;;  %v3372_v52 = vrot.slane %v3368_v24, 9  ;;  %v3867_v24 = vld [vmem:[%s4033_s13 + $0x30] sm:$0xff]  }
  0x52   : > { %3639 = vmatprep.subr.bf16.mxu1 %v3952_v2  ;;  %3645 = vmatprep.mubr.msk.bf16.mxu1 %vm3953_vm1, %v3952_v2 }
  0x53   : > { %v2083_v53 = vrot.slane %v2064_v38, 7  ;;  %v3871_v38 = vld [vmem:[%s4033_s13 + $0x60] sm:$0xff]  }
  0x54   : > { %3608 = vmatpush3.bf16.msra.mxu0 %v3841_v61  ;;  %v3367_v61 = vld.sshfl [vmem:[%s4043_s19 + $0x4] sm:$0x12 pattern:$0x76325410] }
  0x55   : > { %3625 = vmatprep.subr.bf16.mxu0 %v3952_v2  ;;  %3640 = vmatpush3.bf16.msra.mxu1 %v3846_v31  ;;  %v1913_v31 = vrot.slane %v1911_v15, 6  ;;  %v2056_v37 = vcombine.high %v3367_v61, %v3367_v61  ;;  %v3371_v48 = vrot.slane %v3367_v61, 9  ;;  %v1895_v15 = vsel %vm4087_vm9, %v4292_v26, %v1894_v0 }
  0x56   : > { %3641 = vmatprep.subr.bf16.mxu1 %v3952_v2 }
  0x57   : > { %3610 = vmatmul.mubr.msk.bf16.vlgmr.msra.gmra.mrb[8].mxu0 %vm555_vm13, %v1071_v29  ;;  %v3857_v29 = vld [vmem:[%s4028_s10 + $0x110] sm:$0xff]   ;;  %v1917_v47 = vor.u32 %v1916_v32, %v1913_v31 }
  0x58   : > { %3626 = vmatpush3.bf16.msra.mxu0 %v3843_v30  ;;  %3633 = vmatprep.mubr.msk.bf16.mxu0 %vm3953_vm1, %v3952_v2  ;;  %v1653_v30 = vcombine.low %v4183_v3, %v1643_v20  ;;  %v3859_v3 = vld [vmem:[%s4028_s10 + $0x118] sm:$0xff]  }
  0x59   : > { %3627 = vmatprep.subr.bf16.mxu0 %v3952_v2  ;;  %3642 = vmatpush3.bf16.msra.mxu1 %v3848_v36  ;;  %v1934_v36 = vshll.u32 %v1881_v21, 16 }
  0x5a   : > { %3643 = vmatprep.subr.bf16.mxu1 %v3952_v2  ;;  %v1667_v45 = vrot.slane %v1653_v30, %v4105_v63  ;;  %v3869_v30 = vld [vmem:[%s4033_s13 + $0x38] sm:$0xff]  }
  0x5c   : > { %3628 = vmatpush3.bf16.msra.mxu0 %v3845_v34  ;;  %v1927_v34 = vrot.slane %v1925_v22, 6  ;;  %v2327_v22 = vcombine.high %v3395_v56, %v3395_v56 }
  0x5d   : > { %3629 = vmatprep.subr.bf16.mxu0 %v3952_v2  ;;  %3644 = vmatpush3.bf16.msra.mxu1 %v3850_v44  ;;  %v1903_v44 = vor.u32 %v4266_v12, %v4264_v11  ;;  %v4333_v11 = vsel %vm4128_vm0, %v3373_v54, %v2087_v55  ;;  %v2371_v12 = vshrl.u32 %v3395_v56, 16 }
  0x5e   : > { %3661 = vmatprep.subr.bf16.mxu1 %v3952_v2 }
  0x5f   : > { %v1904_v59 = vrot.slane %v1903_v44, 2  ;;  %v2373_v57 = vrot.slane %v2371_v12, 6 }
  0x60   : > { %3630 = vmatpush3.bf16.msra.mxu0 %v3847_v39  ;;  %3646 = vmatmul.mubr.msk.bf16.vlgmr.msra.gmra.mrb[12].mxu1 %vm555_vm13, %v1517_v50  ;;  %v3370_v39 = vrot.slane %v4276_v17, 9  ;;  %v1771_v50 = vcombine.low %v4262_v7, %v4273_v14  ;;  %v1936_v7 = vrot.slane %v1934_v36, 7  ;;  %v3865_v14 = vld [vmem:[%s4033_s13 + $0x28] sm:$0xff]  }
  0x61   : > { %3631 = vmatprep.subr.bf16.mxu0 %v3952_v2  ;;  %3662 = vmatpush3.bf16.msra.mxu1 %v3854_v51  ;;  %v1931_v51 = vor.u32 %v1930_v35, %v1927_v34  ;;  %v1909_v16 = vsel %vm4087_vm9, %v1904_v59, %v1908_v60  ;;  %v3872_v34 = vld [vmem:[%s4033_s13 + $0x80] sm:$0xff]  }
  0x62   : > { %3663 = vmatprep.subr.bf16.mxu1 %v3952_v2  ;;  %3669 = vmatprep.mubr.msk.bf16.mxu1 %vm3953_vm1, %v3952_v2  ;;  %v2076_v8 = vsel %vm4128_vm0, %v3370_v39, %v2075_v41  ;;  %v1946_v0 = vcombine.low %v1895_v15, %v1909_v16  ;;  %v3874_v39 = vld [vmem:[%s4033_s13 + $0x88] sm:$0xff]   ;;  %v3881_v59 = vld [vmem:[%s4033_s13 + $0xa0] sm:$0xff]   ;;  %v3447_v15 = vld.sshfl [vmem:[%s4043_s19 + $0x14] sm:$0x12 pattern:$0x76325410] }
  0x63   : > { %v1932_v5 = vrot.slane %v1931_v51, 2  ;;  %v3878_v51 = vld [vmem:[%s4033_s13 + $0x98] sm:$0xff]  }
  0x64   : > { %3632 = vmatpush3.bf16.msra.mxu0 %v3849_v49  ;;  %v2079_v49 = vrot.slane %v2056_v37, 7  ;;  %v1954_v31 = vrot.slane %v1946_v0, %v4105_v63 }
  0x65   : > { %3649 = vmatprep.subr.bf16.mxu0 %v3952_v2  ;;  %3664 = vmatpush3.bf16.msra.mxu1 %v3856_v4  ;;  %v1922_v4 = vrot.slane %v4294_v27, 7  ;;  %v1937_v20 = vsel %vm4087_vm9, %v1932_v5, %v1936_v7  ;;  %v3870_v27 = vld [vmem:[%s4033_s13 + $0x58] sm:$0xff]   ;;  %v3883_v5 = vld [vmem:[%s4033_s13 + $0xa8] sm:$0xff]  }
  0x66   : > { %3665 = vmatprep.subr.bf16.mxu1 %v3952_v2  ;;  %v4324_v9 = vsel %vm4128_vm0, %v3371_v48, %v2079_v49  ;;  %v3875_v48 = vld [vmem:[%s4033_s13 + $0x70] sm:$0xff]  }
  0x67   : > { %3634 = vmatmul.mubr.msk.bf16.vlgmr.msra.gmra.mrb[12].mxu0 %vm555_vm13, %v1326_v62  ;;  %v1668_v62 = vcombine.low %v4170_v43, %v1667_v45  ;;  %v4329_v43 = vsel %vm4128_vm0, %v3372_v52, %v2083_v53  ;;  %v2097_v6 = vcombine.low %v2076_v8, %v4324_v9  ;;  %v3876_v45 = vld [vmem:[%s4033_s13 + $0x90] sm:$0xff]   ;;  %v3877_v53 = vld [vmem:[%s4033_s13 + $0x78] sm:$0xff]  }
  0x68   : > { %3650 = vmatpush3.bf16.msra.mxu0 %v3853_v1  ;;  %3657 = vmatprep.mubr.msk.bf16.mxu0 %vm3953_vm1, %v3952_v2  ;;  %v1918_v1 = vrot.slane %v1917_v47, 2  ;;  %v2098_v21 = vcombine.low %v4329_v43, %v4333_v11  ;;  %v3908_v47 = vld.sshfl [vmem:[%s4043_s19 + $0xc] sm:$0xf pattern:$0x76325410] }
  0x69   : > { %3651 = vmatprep.subr.bf16.mxu0 %v3952_v2  ;;  %3666 = vmatpush3.bf16.msra.mxu1 %v3858_v19  ;;  %v3868_v19 = vld [vmem:[%s4033_s13 + $0x50] sm:$0xff]   ;;  %v2105_v25 = vrot.slane %v2097_v6, %v4105_v63 }
  0x6a   : > { %3667 = vmatprep.subr.bf16.mxu1 %v3952_v2  ;;  %v1923_v17 = vsel %vm4087_vm9, %v1918_v1, %v1922_v4  ;;  %v4362_v26 = vrot.slane %v2098_v21, %v4105_v63  ;;  %v3408_v52 = vld.sshfl [vmem:[%s4043_s19 + $0x10] sm:$0x12 pattern:$0x76325410] }
  0x6b   : > { %v1947_v23 = vcombine.low %v1923_v17, %v1937_v20  ;;  %v2518_v55 = vcombine.high %v3408_v52, %v3408_v52  ;;  %v3412_v60 = vrot.slane %v3408_v52, 9  ;;  %v3434_v1 = vld.sshfl [vmem:[%s4043_s19 + $0x14] sm:$0x13 pattern:$0x76325410] }
  0x6c   : > { %3652 = vmatpush3.bf16.msra.mxu0 %v3855_v13  ;;  %v2374_v13 = vshll.u32 %v3395_v56, 16  ;;  %v3882_v56 = vld [vmem:[%s4033_s13 + $0xc0] sm:$0xff]   ;;  %v3909_v4 = vld.sshfl [vmem:[%s4043_s19 + $0x8] sm:$0xf pattern:$0x76325410] }
  0x6d   : > { %3653 = vmatprep.subr.bf16.mxu0 %v3952_v2  ;;  %3668 = vmatpush3.bf16.msra.mxu1 %v3860_v33  ;;  %v4370_v32 = vrot.slane %v1947_v23, %v4105_v63  ;;  %v2113_v33 = vcombine.low %v2105_v25, %v4362_v26  ;;  %v3910_v8 = vld.sshfl [vmem:[%s4043_s19 + $0x10] sm:$0xf pattern:$0x76325410]  ;;  %v2817_v12 = vshrl.u32 %v3434_v1, 16  ;;  %v3451_v25 = vrot.slane %v3447_v15, 9 }
  0x6e   : > { %3685 = vmatprep.subr.bf16.mxu1 %v3952_v2  ;;  %v2376_v61 = vrot.slane %v2374_v13, 7  ;;  %v2820_v13 = vshll.u32 %v3434_v1, 16 }
  0x6f   : > { %v1962_v37 = vcombine.low %v1954_v31, %v4370_v32  ;;  %v2819_v6 = vrot.slane %v2817_v12, 6 }
  0x70   : > { %3654 = vmatpush3.bf16.msra.mxu0 %v3857_v29  ;;  %3670 = vmatmul.mubr.msk.bf16.vlgmr.msra.gmra.mrb[16].mxu1 %vm555_vm13, %v1771_v50  ;;  %v2377_v28 = vor.u32 %v2376_v61, %v2373_v57  ;;  %v2380_v29 = vshll.u32 %v2327_v22, 16  ;;  %v2822_v21 = vrot.slane %v2820_v13, 7  ;;  %v3888_v22 = vld [vmem:[%s4033_s13 + $0xd8] sm:$0xff]   ;;  %v2964_v57 = vcombine.high %v3447_v15, %v3447_v15 }
  0x71   : > { %3655 = vmatprep.subr.bf16.mxu0 %v3952_v2  ;;  %3686 = vmatpush3.bf16.msra.mxu1 %v3864_v46  ;;  %v3907_v46 = vld.sshfl [vmem:[%s4043_s19 + $0x4] sm:$0xf pattern:$0x76325410] }
  0x72   : > { %3687 = vmatprep.subr.bf16.mxu1 %v3952_v2  ;;  %3693 = vmatprep.mubr.msk.bf16.mxu1 %vm3953_vm1, %v3952_v2  ;;  %v2378_v35 = vrot.slane %v2377_v28, 2  ;;  %v2382_v36 = vrot.slane %v2380_v29, 7  ;;  %v2823_v0 = vor.u32 %v2822_v21, %v2819_v6  ;;  %v3891_v29 = vld [vmem:[%s4033_s13 + $0xe0] sm:$0xff]  }
  0x74   : > { %3656 = vmatpush3.bf16.msra.mxu0 %v3859_v3  ;;  %v4383_v41 = vsel %vm4087_vm9, %v2378_v35, %v2382_v36  ;;  %v2392_v3 = vcombine.low %v1909_v16, %v1923_v17  ;;  %v2543_v16 = vcombine.low %v4324_v9, %v4329_v43  ;;  %v3887_v43 = vld [vmem:[%s4033_s13 + $0xb8] sm:$0xff]   ;;  %v3893_v35 = vld [vmem:[%s4033_s13 + $0xe8] sm:$0xff]  }
  0x75   : > { %3673 = vmatprep.subr.bf16.mxu0 %v3952_v2  ;;  %3688 = vmatpush3.bf16.msra.mxu1 %v3866_v10  ;;  %v2393_v44 = vcombine.low %v1937_v20, %v4383_v41  ;;  %v3884_v10 = vld [vmem:[%s4033_s13 + $0xc8] sm:$0xff]   ;;  %v2773_v20 = vcombine.high %v3434_v1, %v3434_v1 }
  0x76   : > { %3689 = vmatprep.subr.bf16.mxu1 %v3952_v2  ;;  %v2400_v49 = vrot.slane %v2392_v3, %v4105_v63  ;;  %v2551_v61 = vrot.slane %v2543_v16, %v4105_v63  ;;  %v3898_v3 = vld [vmem:[%s4033_s13 + $0x118] sm:$0xff]  }
  0x77   : > { %3658 = vmatmul.mubr.msk.bf16.vlgmr.msra.gmra.mrb[16].mxu0 %vm555_vm13, %v1668_v62  ;;  %v2407_v50 = vrot.slane %v2393_v44, %v4105_v63  ;;  %v2533_v62 = vrot.slane %v2518_v55, 7  ;;  %v2826_v23 = vshll.u32 %v2773_v20, 16  ;;  %v3897_v44 = vld [vmem:[%s4033_s13 + $0xf8] sm:$0xff]  }
  0x78   : > { %3674 = vmatpush3.bf16.msra.mxu0 %v3863_v58  ;;  %3681 = vmatprep.mubr.msk.bf16.mxu0 %vm3953_vm1, %v3952_v2  ;;  %v2217_v58 = vcombine.low %v3907_v46, %v3908_v47 }
  0x79   : > { %3675 = vmatprep.subr.bf16.mxu0 %v3952_v2  ;;  %3690 = vmatpush3.bf16.msra.mxu1 %v3868_v19  ;;  %v2408_v54 = vcombine.low %v2400_v49, %v2407_v50  ;;  %v2534_v7 = vsel %vm4128_vm0, %v3412_v60, %v2533_v62  ;;  %v3885_v19 = vld [vmem:[%s4033_s13 + $0xb0] sm:$0xff]   ;;  %v2828_v31 = vrot.slane %v2826_v23, 7 }
  0x7a   : > { %3691 = vmatprep.subr.bf16.mxu1 %v3952_v2  ;;  %v2544_v17 = vcombine.low %v4333_v11, %v2534_v7  ;;  %v2663_v11 = vcombine.low %v3909_v4, %v3910_v8 }
  0x7c   : > { %3676 = vmatpush3.bf16.msra.mxu0 %v3865_v14  ;;  %v3886_v14 = vld [vmem:[%s4033_s13 + $0xd0] sm:$0xff]   ;;  %v2558_v9 = vrot.slane %v2544_v17, %v4105_v63 }
  0x7d   : > { %3677 = vmatprep.subr.bf16.mxu0 %v3952_v2  ;;  %3692 = vmatpush3.bf16.msra.mxu1 %v3870_v27  ;;  %v2979_v27 = vrot.slane %v2964_v57, 7 }
  0x7e   : > { %3709 = vmatprep.subr.bf16.mxu1 %v3952_v2  ;;  %v2559_v28 = vcombine.low %v2551_v61, %v2558_v9 }
  0x80   : > { %3678 = vmatpush3.bf16.msra.mxu0 %v3867_v24  ;;  %3694 = vmatmul.mubr.msk.bf16.vlgmr.msra.gmra.mrb[20].mxu1 %vm555_vm13, %v2113_v33  ;;  %v3892_v24 = vld [vmem:[%s4033_s13 + $0x100] sm:$0xff]   ;;  %v3894_v33 = vld [vmem:[%s4033_s13 + $0x108] sm:$0xff]  }
  0x81   : > { %3679 = vmatprep.subr.bf16.mxu0 %v3952_v2  ;;  %3710 = vmatpush3.bf16.msra.mxu1 %v3872_v34  ;;  %v2980_v34 = vsel %vm4128_vm0, %v3451_v25, %v2979_v27 }
  0x82   : > { %3711 = vmatprep.subr.bf16.mxu1 %v3952_v2  ;;  %3717 = vmatprep.mubr.msk.bf16.mxu1 %vm3953_vm1, %v3952_v2  ;;  %v2990_v18 = vcombine.low %v2534_v7, %v2980_v34 }
  0x84   : > { %3680 = vmatpush3.bf16.msra.mxu0 %v3869_v30  ;;  %v2824_v30 = vrot.slane %v2823_v0, 2 }
  0x85   : > { %3697 = vmatprep.subr.bf16.mxu0 %v3952_v2  ;;  %3712 = vmatpush3.bf16.msra.mxu1 %v3874_v39  ;;  %v3895_v39 = vld [vmem:[%s4033_s13 + $0xf0] sm:$0xff]  }
  0x86   : > { %3713 = vmatprep.subr.bf16.mxu1 %v3952_v2  ;;  %v2829_v36 = vsel %vm4087_vm9, %v2824_v30, %v2828_v31 }
  0x87   : > { %3682 = vmatmul.mubr.msk.bf16.vlgmr.msra.gmra.mrb[20].mxu0 %vm555_vm13, %v1962_v37  ;;  %v3896_v37 = vld [vmem:[%s4033_s13 + $0x110] sm:$0xff]  }
  0x88   : > { %3698 = vmatpush3.bf16.msra.mxu0 %v3871_v38  ;;  %3705 = vmatprep.mubr.msk.bf16.mxu0 %vm3953_vm1, %v3952_v2  ;;  %v2839_v38 = vcombine.low %v4383_v41, %v2829_v36 }
  0x89   : > { %3699 = vmatprep.subr.bf16.mxu0 %v3952_v2  ;;  %3714 = vmatpush3.bf16.msra.mxu1 %v3876_v45 }
  0x8a   : > { %3715 = vmatprep.subr.bf16.mxu1 %v3952_v2  ;;  %v2853_v40 = vrot.slane %v2839_v38, %v4105_v63 }
  0x8c   : > { %3700 = vmatpush3.bf16.msra.mxu0 %v3873_v42  ;;  %v3004_v42 = vrot.slane %v2990_v18, %v4105_v63  ;;  %v2854_v41 = vcombine.low %v4370_v32, %v2853_v40 }
  0x8d   : > { %3701 = vmatprep.subr.bf16.mxu0 %v3952_v2  ;;  %3716 = vmatpush3.bf16.msra.mxu1 %v3878_v51 }
  0x8e   : > { %3733 = vmatprep.subr.bf16.mxu1 %v3952_v2  ;;  %v3005_v45 = vcombine.low %v4362_v26, %v3004_v42 }
  0x90   : > { %3702 = vmatpush3.bf16.msra.mxu0 %v3875_v48  ;;  %3718 = vmatmul.mubr.msk.bf16.vlgmr.msra.gmra.mrb[24].mxu1 %vm555_vm13, %v2408_v54 }
  0x91   : > { %3703 = vmatprep.subr.bf16.mxu0 %v3952_v2  ;;  %3734 = vmatpush3.bf16.msra.mxu1 %v3882_v56 }
  0x92   : > { %3735 = vmatprep.subr.bf16.mxu1 %v3952_v2  ;;  %3741 = vmatprep.mubr.msk.bf16.mxu1 %vm3953_vm1, %v3952_v2 }
  0x94   : > { %3704 = vmatpush3.bf16.msra.mxu0 %v3877_v53 }
  0x95   : > { %3721 = vmatprep.subr.bf16.mxu0 %v3952_v2  ;;  %3736 = vmatpush3.bf16.msra.mxu1 %v3884_v10 }
  0x96   : > { %3737 = vmatprep.subr.bf16.mxu1 %v3952_v2 }
  0x97   : > { %3706 = vmatmul.mubr.msk.bf16.vlgmr.msra.gmra.mrb[24].mxu0 %vm555_vm13, %v2217_v58 }
  0x98   : > { %3722 = vmatpush3.bf16.msra.mxu0 %v3881_v59  ;;  %3729 = vmatprep.mubr.msk.bf16.mxu0 %vm3953_vm1, %v3952_v2 }
  0x99   : > { %3723 = vmatprep.subr.bf16.mxu0 %v3952_v2  ;;  %3738 = vmatpush3.bf16.msra.mxu1 %v3886_v14 }
  0x9a   : > { %3739 = vmatprep.subr.bf16.mxu1 %v3952_v2 }
  0x9c   : > { %3724 = vmatpush3.bf16.msra.mxu0 %v3883_v5 }
  0x9d   : > { %3725 = vmatprep.subr.bf16.mxu0 %v3952_v2  ;;  %3740 = vmatpush3.bf16.msra.mxu1 %v3888_v22 }
  0x9e   : > { %3757 = vmatprep.subr.bf16.mxu1 %v3952_v2 }
  0xa0   : > { %3726 = vmatpush3.bf16.msra.mxu0 %v3885_v19  ;;  %3742 = vmatmul.mubr.msk.bf16.vlgmr.msra.gmra.mrb[28].mxu1 %vm555_vm13, %v2663_v11 }
  0xa1   : > { %3727 = vmatprep.subr.bf16.mxu0 %v3952_v2  ;;  %3758 = vmatpush3.bf16.msra.mxu1 %v3892_v24 }
  0xa2   : > { %3759 = vmatprep.subr.bf16.mxu1 %v3952_v2  ;;  %3765 = vmatprep.mubr.msk.bf16.mxu1 %vm3953_vm1, %v3952_v2 }
  0xa4   : > { %3728 = vmatpush3.bf16.msra.mxu0 %v3887_v43 }
  0xa5   : > { %3745 = vmatprep.subr.bf16.mxu0 %v3952_v2  ;;  %3760 = vmatpush3.bf16.msra.mxu1 %v3894_v33 }
  0xa6   : > { %3761 = vmatprep.subr.bf16.mxu1 %v3952_v2 }
  0xa7   : > { %3730 = vmatmul.mubr.msk.bf16.vlgmr.msra.gmra.mrb[28].mxu0 %vm555_vm13, %v2559_v28 }
  0xa8   : > { %3746 = vmatpush3.bf16.msra.mxu0 %v3891_v29  ;;  %3753 = vmatprep.mubr.msk.bf16.mxu0 %vm3953_vm1, %v3952_v2  ;;  %vm3118_vm1 = vcmask (!%p3457_p9), 517120  }
  0xa9   : > { %3747 = vmatprep.subr.bf16.mxu0 %v3952_v2  ;;  %3762 = vmatpush3.bf16.msra.mxu1 %v3896_v37 }
  0xaa   : > { %3763 = vmatprep.subr.bf16.mxu1 %v3952_v2 }
  0xac   : > { %3748 = vmatpush3.bf16.msra.mxu0 %v3893_v35 }
  0xad   : > { %3749 = vmatprep.subr.bf16.mxu0 %v3952_v2  ;;  %3764 = vmatpush3.bf16.msra.mxu1 %v3898_v3 }
  0xb0   : > { %3750 = vmatpush3.bf16.msra.mxu0 %v3895_v39  ;;  %3766 = vmatmul.mubr.msk.bf16.vlgmr.msra.gmra.mrb[32].mxu1 %vm555_vm13, %v3005_v45 }
  0xb1   : > { %3751 = vmatprep.subr.bf16.mxu0 %v3952_v2 }
  0xb4   : > { %3752 = vmatpush3.bf16.msra.mxu0 %v3897_v44 }
  0xb7   : > { %3754 = vmatmul.mubr.msk.bf16.vlgmr.msra.gmra.mrb[32].mxu0 %vm555_vm13, %v2854_v41 }
 0x103   : > { %v682_v46 = vpop.f32.mrb[0].mxu1 }
 0x104   : > { %v3575_v47 = vpop.f32.mrb[1].mxu1 }
 0x105   : > { %v685_v48 = vpop.f32.mrb[2].mxu1 }
 0x106   : > { %v3576_v50 = vpop.f32.mrb[3].mxu1 }
 0x10a   : > { %v593_v49 = vpop.f32.mrb[0].mxu0 }
 0x10b   : > { %v683_v63 = vadd.f32 %v682_v46, %v593_v49  ;;  %v3563_v51 = vpop.f32.mrb[1].mxu0 }
 0x10c   : > { %v596_v52 = vpop.f32.mrb[2].mxu0 }
 0x10d   : > { %v686_v53 = vadd.f32 %v685_v48, %v596_v52  ;;  %v3564_v26 = vpop.f32.mrb[3].mxu0 }
 0x113   : > { %v942_v54 = vpop.f32.mrb[4].mxu1 }
 0x114   : > { %v3599_v2 = vpop.f32.mrb[5].mxu1 }
 0x115   : > { %v945_v55 = vpop.f32.mrb[6].mxu1 }
 0x116   : > { %v3600_v32 = vpop.f32.mrb[7].mxu1 }
 0x11a   : > { %v838_v56 = vpop.f32.mrb[4].mxu0 }
 0x11b   : > { %v845_v58 = vadd.f32 %v838_v56, %v683_v63  ;;  %v3587_v59 = vpop.f32.mrb[5].mxu0 }
 0x11c   : > { %v841_v60 = vpop.f32.mrb[6].mxu0 }
 0x11d   : > { %v949_v62 = vadd.f32 %v942_v54, %v845_v58  ;;  %v846_v10 = vadd.f32 %v841_v60, %v686_v53  ;;  %v3588_v1 = vpop.f32.mrb[7].mxu0 }
 0x11f   : > { %v950_v4 = vadd.f32 %v945_v55, %v846_v10 }
 0x123   : > { %v1284_v5 = vpop.f32.mrb[8].mxu1 }
 0x124   : > { %v3623_v7 = vpop.f32.mrb[9].mxu1 }
 0x125   : > { %v1287_v8 = vpop.f32.mrb[10].mxu1 }
 0x126   : > { %v3624_v13 = vpop.f32.mrb[11].mxu1 }
 0x12a   : > { %v1133_v12 = vpop.f32.mrb[8].mxu0 }
 0x12b   : > { %v1140_v14 = vadd.f32 %v1133_v12, %v949_v62  ;;  %v3611_v15 = vpop.f32.mrb[9].mxu0 }
 0x12c   : > { %v1136_v16 = vpop.f32.mrb[10].mxu0 }
 0x12d   : > { %v1291_v17 = vadd.f32 %v1284_v5, %v1140_v14  ;;  %v1141_v19 = vadd.f32 %v1136_v16, %v950_v4  ;;  %v3612_v20 = vpop.f32.mrb[11].mxu0 }
 0x12f   : > { %v1292_v6 = vadd.f32 %v1287_v8, %v1141_v19 }
 0x133   : > { %v1579_v21 = vpop.f32.mrb[12].mxu1 }
 0x134   : > { %v3647_v22 = vpop.f32.mrb[13].mxu1 }
 0x135   : > { %v1582_v57 = vpop.f32.mrb[14].mxu1 }
 0x136   : > { %v3648_v9 = vpop.f32.mrb[15].mxu1 }
 0x13a   : > { %v1388_v61 = vpop.f32.mrb[12].mxu0 }
 0x13b   : > { %v1395_v43 = vadd.f32 %v1388_v61, %v1291_v17  ;;  %v3635_v11 = vpop.f32.mrb[13].mxu0  ;;  %v3076_v61 = vld [vmem:[#allocation2] sm:$0xff] }
 0x13c   : > { %v1391_v0 = vpop.f32.mrb[14].mxu0 }
 0x13d   : > { %v1586_v23 = vadd.f32 %v1579_v21, %v1395_v43  ;;  %v1396_v24 = vadd.f32 %v1391_v0, %v1292_v6  ;;  %v3636_v25 = vpop.f32.mrb[15].mxu0 }
 0x13f   : > { %v1587_v27 = vadd.f32 %v1582_v57, %v1396_v24 }
 0x143   : > { %v1833_v28 = vpop.f32.mrb[16].mxu1 }
 0x144   : > { %v3671_v29 = vpop.f32.mrb[17].mxu1 }
 0x145   : > { %v1836_v30 = vpop.f32.mrb[18].mxu1  ;;  %v3458_v29 = vld [vmem:[%s4505_s4] ss:$0 sm:$0xff] (!%p3457_p9) }
 0x146   : > { %v3672_v33 = vpop.f32.mrb[19].mxu1 }
 0x14a   : > { %v1730_v31 = vpop.f32.mrb[16].mxu0 }
 0x14b   : > { %v1737_v34 = vadd.f32 %v1730_v31, %v1586_v23  ;;  %v3659_v35 = vpop.f32.mrb[17].mxu0  ;;  %v3077_v23 = vld [vmem:[#allocation2 + $0x8] sm:$0xff] }
 0x14c   : > { %v1733_v36 = vpop.f32.mrb[18].mxu0 }
 0x14d   : > { %v1840_v18 = vadd.f32 %v1833_v28, %v1737_v34  ;;  %v1738_v37 = vadd.f32 %v1733_v36, %v1587_v27  ;;  %v3660_v38 = vpop.f32.mrb[19].mxu0 }
 0x14f   : > { %v1841_v39 = vadd.f32 %v1836_v30, %v1738_v37  ;;  %v3459_v30 = vld [vmem:[%s4506_s5] ss:$0 sm:$0xff] (!%p3457_p9) }
 0x153   : > { %v2175_v42 = vpop.f32.mrb[20].mxu1 }
 0x154   : > { %v3695_v3 = vpop.f32.mrb[21].mxu1 }
 0x155   : > { %v2178_v40 = vpop.f32.mrb[22].mxu1 }
 0x156   : > { %v3696_v45 = vpop.f32.mrb[23].mxu1 }
 0x15a   : > { %v2024_v44 = vpop.f32.mrb[20].mxu0 }
 0x15b   : > { %v2031_v41 = vadd.f32 %v2024_v44, %v1840_v18  ;;  %v3683_v46 = vpop.f32.mrb[21].mxu0 }
 0x15c   : > { %v2027_v47 = vpop.f32.mrb[22].mxu0 }
 0x15d   : > { %v2182_v48 = vadd.f32 %v2175_v42, %v2031_v41  ;;  %v2032_v49 = vadd.f32 %v2027_v47, %v1841_v39  ;;  %v3684_v50 = vpop.f32.mrb[23].mxu0 }
 0x15f   : > { %v2183_v63 = vadd.f32 %v2178_v40, %v2032_v49 }
 0x163   : > { %v2470_v51 = vpop.f32.mrb[24].mxu1 }
 0x164   : > { %v3719_v52 = vpop.f32.mrb[25].mxu1 }
 0x165   : > { %v2473_v53 = vpop.f32.mrb[26].mxu1 }
 0x166   : > { %v3720_v54 = vpop.f32.mrb[27].mxu1 }
 0x16a   : > { %v2279_v26 = vpop.f32.mrb[24].mxu0 }
 0x16b   : > { %v2286_v2 = vadd.f32 %v2279_v26, %v2182_v48  ;;  %v3707_v55 = vpop.f32.mrb[25].mxu0 }
 0x16c   : > { %v2282_v56 = vpop.f32.mrb[26].mxu0 }
 0x16d   : > { %v2477_v32 = vadd.f32 %v2470_v51, %v2286_v2  ;;  %v2287_v58 = vadd.f32 %v2282_v56, %v2183_v63  ;;  %v3708_v59 = vpop.f32.mrb[27].mxu0 }
 0x16f   : > { %v2478_v60 = vadd.f32 %v2473_v53, %v2287_v58 }
 0x173   : > { %v2725_v62 = vpop.f32.mrb[28].mxu1 }
 0x174   : > { %v3743_v10 = vpop.f32.mrb[29].mxu1 }
 0x175   : > { %v2728_v1 = vpop.f32.mrb[30].mxu1 }
 0x176   : > { %v3744_v5 = vpop.f32.mrb[31].mxu1 }
 0x17a   : > { %v2621_v4 = vpop.f32.mrb[28].mxu0 }
 0x17b   : > { %v2628_v7 = vadd.f32 %v2621_v4, %v2477_v32  ;;  %v3731_v8 = vpop.f32.mrb[29].mxu0 }
 0x17c   : > { %v2624_v12 = vpop.f32.mrb[30].mxu0 }
 0x17d   : > { %v2732_v13 = vadd.f32 %v2725_v62, %v2628_v7  ;;  %v2629_v14 = vadd.f32 %v2624_v12, %v2478_v60  ;;  %v3732_v15 = vpop.f32.mrb[31].mxu0 }
 0x17f   : > { %v2733_v16 = vadd.f32 %v2728_v1, %v2629_v14 }
 0x183   : > { %v3067_v17 = vpop.f32.mrb[32].mxu1 }
 0x184   : > { %v3767_v19 = vpop.f32.mrb[33].mxu1 }
 0x185   : > { %v3070_v20 = vpop.f32.mrb[34].mxu1 }
 0x186   : > { %v3768_v21 = vpop.f32.mrb[35].mxu1 }
 0x18a   : > { %v2916_v6 = vpop.f32.mrb[32].mxu0 }
 0x18b   : > { %v2923_v22 = vadd.f32 %v2916_v6, %v2732_v13  ;;  %v3755_v57 = vpop.f32.mrb[33].mxu0 }
 0x18c   : > { %v2919_v9 = vpop.f32.mrb[34].mxu0 }
 0x18d   : > { %v3074_v43 = vadd.f32 %v3067_v17, %v2923_v22  ;;  %v2924_v11 = vadd.f32 %v2919_v9, %v2733_v16  ;;  %v3756_v0 = vpop.f32.mrb[35].mxu0  ;;  %3085 = sbr.rel (%p3457_p9) target bundleno = 422 (0x1a6), region = 52 }
 0x18f   : > { %v3078_v24 = vadd.f32 %v3076_v61, %v3074_v43  ;;  %v3075_v25 = vadd.f32 %v3070_v20, %v2924_v11 }
 0x191   : > { %3080 = vst.msk [vmem:[#allocation2] sm:$0xff] %vm555_vm13, %v3078_v24  ;;  %v3079_v27 = vadd.f32 %v3077_v23, %v3075_v25 }
 0x193   : > { %3081 = vst.msk [vmem:[#allocation2 + $0x8] sm:$0xff] %vm555_vm13, %v3079_v27 }
 0x198   : > { %v3086_v28 = vld [vmem:[#allocation2] sm:$0xff] }
 0x199   : > { %v3095_v31 = vmul.f32 %v3458_v29, %v3086_v28 }
 0x19a   : > { %v3087_v33 = vld [vmem:[#allocation2 + $0x8] sm:$0xff] }
 0x19b   : > { %v3096_v34 = vmul.f32 %v3458_v29, %v3087_v33  ;;  %v3104_v35 = vadd.f32 %v3459_v30, %v3095_v31 }
 0x19d   : > { %v3105_v36 = vadd.f32 %v3459_v30, %v3096_v34  ;;  %v3106_v18 = vmax.f32 %v3104_v35, 0.0 }
 0x19f   : > { %v3107_v37 = vmax.f32 %v3105_v36, 0.0  ;;  %v3114_v38 = vpack.c.bf16 %v3106_v18, %v3106_v18  ;;  %v3110_v39 = vcombine.high %v3106_v18, %v3106_v18 }
 0x1a1   : > { %v3116_v42 = vpack.c.bf16 %v3107_v37, %v3107_v37  ;;  %v3111_v3 = vcombine.high %v3107_v37, %v3107_v37  ;;  %3119 = vst.msk [vmem:[%s4048_s8] sm:$0x3] %vm3118_vm1, %v3114_v38  ;;  %v3115_v40 = vpack.c.bf16 %v3110_v39, %v3110_v39 }
 0x1a3   : > { %3121 = vst.msk [vmem:[%s4048_s8 + $0x4] sm:$0x3] %vm3118_vm1, %v3116_v42  ;;  %v3117_v44 = vpack.c.bf16 %v3111_v3, %v3111_v3  ;;  %3120 = vst.msk [vmem:[%s4048_s8 + $0x2] sm:$0x3] %vm3118_vm1, %v3115_v40 }
 0x1a5   : > { %3122 = vst.msk [vmem:[%s4048_s8 + $0x6] sm:$0x3] %vm3118_vm1, %v3117_v44 }
 0x1a6 PF: > { %s16_s25 = sadd.s32 1, %s3949_s25   ;;  %s4514_s21 = smov %s3941_s23 }
 0x1a7   : > { %p13_p10 = scmp.ge.s32.totalorder %s16_s25, 14   ;;  %s4515_s22 = smov %s3945_s24 }
 0x1a8   : > { %s4516_s23 = smov %s4519_s26  ;;  %s4517_s24 = smov %s4523_s27 }
 0x1a9   :  { %15 = sbr.rel (!%p13_p10) target bundleno = 3 (0x3), region = 95 }

// kernel: unet3d_forward.16
= control target key start
LH: loop header
LB: loop body
LE: loop exit
PB: predicated region body
PF: predicated region fallthrough
CT: control target
= control target key end

     0   :  { %s4834_s21 = smov 0   ;;  %s4836_s22 = smov 0   ;;  %s5721_s0 = inlined_call_operand.vmem [shape: bf16[10,1,10,10,32], index: 0, kind: input, shape index: {}]   ;;  %s5722_s1 = inlined_call_operand.vmem [shape: bf16[10,1,10,10,32], index: 1, kind: input, shape index: {}]   ;;  %s5723_s2 = inlined_call_operand.vmem [shape: bf16[3,288,32], index: 2, kind: input, shape index: {}]   ;;  %s5724_s3 = inlined_call_operand.vmem [shape: bf16[3,288,32], index: 3, kind: input, shape index: {}]   ;;  %s5725_s4 = inlined_call_operand.vmem [shape: f32[1,32], index: 4, kind: input, shape index: {}]   ;;  %s5726_s5 = inlined_call_operand.vmem [shape: f32[1,32], index: 5, kind: input, shape index: {}]   ;;  %s5727_s6 = inlined_call_operand.vmem [shape: bf16[8,8,8,32], index: 6, kind: output, shape index: {}]  }
   0x1   :  { %s4838_s23 = smov 0   ;;  %s4840_s24 = smov 0  }
   0x2   :  { %s4842_s25 = smov 0  }
   0x3 LB: > { %s28_s26 = sadd.s32 1, %s4788_s23  ;;  %s31_s27 = sadd.s32 1, %s4792_s24  ;;  %s4796_s25 = sphi %s4842_s25, %s16_s25   ;;  %s4792_s24 = sphi %s4840_s24, %s5735_s24   ;;  %s4788_s23 = sphi %s4838_s23, %s5734_s23   ;;  %s4784_s22 = sphi %s4836_s22, %s5733_s22   ;;  %s4780_s21 = sphi %s4834_s21, %s5732_s21  }
   0x4   : > { %p29_p0 = scmp.ge.s32.totalorder %s28_s26, 3  ;;  %p3825_p1 = scmp.ge.s32.totalorder %s4796_s25, 1 }
   0x5   : > { %p289_p2 = scmp.lt.s32.totalorder %s4796_s25, 25 }
   0x6   : > { %s5737_s26 = smov (%p29_p0, %s28_s26), 0  ;;  %s5739_s27 = smov (!%p29_p0, %s31_s27), %s4792_s24 }
   0x7   : > { %p290_p3 = pnand %p3825_p1, %p289_p2  ;;  %p33_p4 = scmp.ge.s32.totalorder %s5739_s27, 8 }
   0x8   : > { %s344_s28 = sadd.s32 (!%p290_p3), %s4780_s21, %s4784_s22  ;;  %p364_p5 = scmp.lt.s32.totalorder (!%p290_p3), %s4780_s21, 2 }
   0x9   : > { %s5741_s27 = smov (%p33_p4, %s5739_s27), 0  ;;  %293 = sbr.rel (%p290_p3) target bundleno = 438 (0x1b6), region = 44 }
   0xa   : > { %p345_p6 = scmp.lt.s32.totalorder (!%p290_p3), %s344_s28, 9  ;;  %p376_p7 = scmp.lt.s32.totalorder (!%p290_p3), %s4784_s22, 7 }
   0xb   : > { %p3832_p8 = scmp.ne.s32.totalorder (!%p290_p3), %s4780_s21, 0 }
  0x10   : > { %s365_s29 = scalar_select %p364_p5, %s4780_s21, 2 }
  0x11   : > { %s5743_s28 = smov (!%p345_p6, %s344_s28), 9  ;;  %s5745_s22 = smov (!%p376_p7, %s4784_s22), 7 }
  0x12   : > { %s4656_s30 = smul.u32 144, %s365_s29  ;;  %s4194_s20 = sshll.u32 %s5745_s22, 5  ;;  %vm388_vm0 = vcmask (!%p3832_p8), 261120   ;;  %v4798_v0 = vmov (!%p3832_p8), 0.0  }
  0x13   : > { %s4655_s7 = smul.u32 80, %s5743_s28  ;;  %s4892_s8 = scalar_lea.vmem %s5727_s6, %s4194_s20  ;;  %389 = vst.msk [vmem:[#allocation2] sm:$0xff] (!%p3832_p8), %vm388_vm0, %v4798_v0  ;;  %390 = vst.msk [vmem:[#allocation2 + $0x8] sm:$0xff] (!%p3832_p8), %vm388_vm0, %v4798_v0 }
  0x14   : > { %s4872_s10 = scalar_lea.vmem %s5723_s2, %s4656_s30  ;;  %s4877_s13 = scalar_lea.vmem %s5724_s3, %s4656_s30  ;;  %391 = vst.msk [vmem:[#allocation2 + $0x10] sm:$0xff] (!%p3832_p8), %vm388_vm0, %v4798_v0  ;;  %392 = vst.msk [vmem:[#allocation2 + $0x18] sm:$0xff] (!%p3832_p8), %vm388_vm0, %v4798_v0 }
  0x15   : > { %s4882_s16 = scalar_lea.vmem %s5721_s0, %s4655_s7  ;;  %s4887_s19 = scalar_lea.vmem %s5722_s1, %s4655_s7  ;;  %393 = vst.msk [vmem:[#allocation2 + $0x20] sm:$0xff] (!%p3832_p8), %vm388_vm0, %v4798_v0  ;;  %394 = vst.msk [vmem:[#allocation2 + $0x28] sm:$0xff] (!%p3832_p8), %vm388_vm0, %v4798_v0 }
  0x16   : > { %387 = sbr.rel (%p3832_p8) target bundleno = 29 (0x1d), region = 48  ;;  %395 = vst.msk [vmem:[#allocation2 + $0x30] sm:$0xff] (!%p3832_p8), %vm388_vm0, %v4798_v0  ;;  %396 = vst.msk [vmem:[#allocation2 + $0x38] sm:$0xff] (!%p3832_p8), %vm388_vm0, %v4798_v0 }
  0x1d PF: > { %v4698_v1 = vld [vmem:[%s4877_s13] sm:$0xff]   ;;  %v4699_v2 = vld [vmem:[%s4872_s10 + $0x10] sm:$0xff]   ;;  %v4700_v3 = vld [vmem:[%s4877_s13 + $0x8] sm:$0xff]   ;;  %vm560_vm1 = vcmask 261120   ;;  %vm417_vm2 = vsmask.f32 3328 }
  0x1e   : > { %4411 = vmatprep.subr.bf16.mxu0 %v4698_v1  ;;  %4303 = vmatprep.subr.bf16.mxu1 %v4699_v2  ;;  %v4701_v4 = vld [vmem:[%s4872_s10 + $0x18] sm:$0xff]   ;;  %v4702_v5 = vld [vmem:[%s4887_s19] ss:$8 sps:$4 sm:$0xff]   ;;  %v4909_v9 = vld [vmem:[%s4882_s16 + $0x4] sm:$0x1]  ;;  %vm771_vm5 = vcmask 1042432  }
  0x1f   : > { %4412 = vmatpush3.bf16.msra.mxu0 %v4698_v1  ;;  %4304 = vmatpush3.bf16.msra.mxu1 %v4699_v2  ;;  %v4703_v6 = vld [vmem:[%s4887_s19 + $0x10] ss:$8 sps:$4 sm:$0xff]   ;;  %v4903_v7 = vld [vmem:[%s4882_s16] sm:$0xf]  ;;  %v4906_v8 = vld [vmem:[%s4882_s16 + $0x8] sm:$0xf] }
  0x20   : > { %4413 = vmatprep.subr.bf16.mxu0 %v4700_v3  ;;  %4305 = vmatprep.subr.bf16.mxu1 %v4701_v4  ;;  %v4912_v10 = vld [vmem:[%s4882_s16 + $0xc] sm:$0x1]  ;;  %vm418_vm3 = vsmask.f32 7440  ;;  %v421_v11 = vshrl.u32 %v4903_v7, 16  ;;  %v424_v12 = vshll.u32 %v4903_v7, 16 }
  0x21   : > { %4415 = vmatprep.mubr.msk.bf16.mxu0 %vm560_vm1, %v4702_v5  ;;  %v430_v13 = vshll.u32 %v4909_v9, 16  ;;  %v435_v14 = vshrl.u32 %v4906_v8, 16  ;;  %v438_v15 = vshll.u32 %v4906_v8, 16  ;;  %v444_v16 = vshll.u32 %v4912_v10, 16  ;;  %v4924_v23 = vld [vmem:[%s4872_s10] sm:$0xff]   ;;  %v4705_v24 = vld [vmem:[%s4877_s13 + $0x10] sm:$0xff]   ;;  %vm4939_vm4 = vmor %vm417_vm2, %vm418_vm3 }
  0x22   : > { %v776_v17 = vrot.slane %v4909_v9, 5  ;;  %v780_v18 = vrot.slane %v4912_v10, 5  ;;  %v423_v19 = vrot.slane %v421_v11, 4  ;;  %v426_v20 = vrot.slane %v424_v12, 5  ;;  %v4929_v28 = vld [vmem:[%s4882_s16 + $0x10] sm:$0xf] }
  0x23   : > { %4414 = vmatpush3.bf16.msra.mxu0 %v4700_v3  ;;  %4306 = vmatpush3.bf16.msra.mxu1 %v4701_v4  ;;  %v432_v21 = vrot.slane %v430_v13, 5  ;;  %v437_v22 = vrot.slane %v435_v14, 4  ;;  %v440_v25 = vrot.slane %v438_v15, 5  ;;  %v446_v26 = vrot.slane %v444_v16, 5  ;;  %v4932_v29 = vld [vmem:[%s4882_s16 + $0x18] sm:$0xf] }
  0x24   : > { %v427_v27 = vor.u32 %v426_v20, %v423_v19  ;;  %4315 = vmatprep.subr.bf16.mxu1 %v4924_v23  ;;  %4423 = vmatprep.subr.bf16.mxu0 %v4705_v24  ;;  %v4935_v30 = vld [vmem:[%s4882_s16 + $0x14] sm:$0x1]  ;;  %v4944_v33 = vld [vmem:[%s4882_s16 + $0x1c] sm:$0x1]  ;;  %v449_v34 = vshrl.u32 %v4929_v28, 16  ;;  %v452_v35 = vshll.u32 %v4929_v28, 16 }
  0x25   : > { %v441_v32 = vor.u32 %v440_v25, %v437_v22  ;;  %v458_v36 = vshll.u32 %v4935_v30, 16  ;;  %v463_v38 = vshrl.u32 %v4932_v29, 16  ;;  %v466_v39 = vshll.u32 %v4932_v29, 16  ;;  %v4706_v49 = vld [vmem:[%s4887_s19 + $0x20] ss:$8 sps:$4 sm:$0xff]   ;;  %v4709_v50 = vld [vmem:[%s4877_s13 + $0x18] sm:$0xff]  }
  0x26   : > { %4416 = vmatmul.mubr.msk.bf16.vlgmr.msra.gmra.mrb[0].mxu0 %vm560_vm1, %v4703_v6  ;;  %v428_v37 = vrot.slane %v427_v27, 4  ;;  %v472_v40 = vshll.u32 %v4944_v33, 16  ;;  %v451_v42 = vrot.slane %v449_v34, 4  ;;  %v454_v43 = vrot.slane %v452_v35, 5  ;;  %v4707_v57 = vld [vmem:[%s4887_s19 + $0x30] ss:$8 sps:$4 sm:$0xff]  }
  0x27   : > { %4424 = vmatpush3.bf16.msra.mxu0 %v4705_v24  ;;  %v442_v41 = vrot.slane %v441_v32, 4  ;;  %v460_v44 = vrot.slane %v458_v36, 5  ;;  %v465_v46 = vrot.slane %v463_v38, 4  ;;  %v468_v47 = vrot.slane %v466_v39, 5  ;;  %4419 = vmatprep.mubr.msk.bf16.mxu0 %vm560_vm1, %v4706_v49  ;;  %v4963_v58 = vld [vmem:[%s4882_s16 + $0x20] sm:$0xf] }
  0x28   : > { %v433_v45 = vsel %vm4939_vm4, %v428_v37, %v432_v21  ;;  %v474_v48 = vrot.slane %v472_v40, 5  ;;  %v455_v52 = vor.u32 %v454_v43, %v451_v42  ;;  %v784_v53 = vrot.slane %v4935_v30, 5  ;;  %v4966_v59 = vld [vmem:[%s4882_s16 + $0x28] sm:$0xf]  ;;  %4425 = vmatprep.subr.bf16.mxu0 %v4709_v50  ;;  %v4969_v61 = vld [vmem:[%s4882_s16 + $0x24] sm:$0x1] }
  0x29   : > { %v447_v51 = vsel %vm4939_vm4, %v442_v41, %v446_v26  ;;  %v788_v54 = vrot.slane %v4944_v33, 5  ;;  %v469_v56 = vor.u32 %v468_v47, %v465_v46  ;;  %v4972_v62 = vld [vmem:[%s4882_s16 + $0x2c] sm:$0x1]  ;;  %v477_v63 = vshrl.u32 %v4963_v58, 16  ;;  %v4988_v19 = vld [vmem:[%s4877_s13 + $0x20] sm:$0xff]   ;;  %p4189_p9 = scmp.ne.s32.totalorder %s4780_s21, 2 }
  0x2a   : > { %v3833_v55 = vcombine.low %v433_v45, %v447_v51  ;;  %v456_v60 = vrot.slane %v455_v52, 4  ;;  %v480_v1 = vshll.u32 %v4963_v58, 16  ;;  %v486_v2 = vshll.u32 %v4969_v61, 16  ;;  %v4708_v12 = vld [vmem:[%s4872_s10 + $0x8] sm:$0xff]   ;;  %v4991_v24 = vld [vmem:[%s4882_s16 + $0x30] sm:$0xf] }
  0x2b   : > { %4426 = vmatpush3.bf16.msra.mxu0 %v4709_v50  ;;  %v470_v0 = vrot.slane %v469_v56, 4  ;;  %v491_v3 = vshrl.u32 %v4966_v59, 16  ;;  %v479_v5 = vrot.slane %v477_v63, 4  ;;  %v494_v6 = vshll.u32 %v4966_v59, 16  ;;  %v4994_v26 = vld [vmem:[%s4882_s16 + $0x38] sm:$0xf] }
  0x2c   : > { %4307 = vmatprep.mubr.msk.bf16.mxu1 %vm560_vm1, %v3833_v55  ;;  %v461_v4 = vsel %vm4939_vm4, %v456_v60, %v460_v44  ;;  %v500_v11 = vshll.u32 %v4972_v62, 16  ;;  %v482_v14 = vrot.slane %v480_v1, 5  ;;  %v488_v15 = vrot.slane %v486_v2, 5  ;;  %v4997_v27 = vld [vmem:[%s4882_s16 + $0x34] sm:$0x1]  ;;  %4435 = vmatprep.subr.bf16.mxu0 %v4988_v19  ;;  %v5015_v42 = vld [vmem:[%s4872_s10 + $0x20] sm:$0xff]  }
  0x2d   : > { %v475_v13 = vsel %vm4939_vm4, %v470_v0, %v474_v48  ;;  %v493_v16 = vrot.slane %v491_v3, 4  ;;  %v496_v21 = vrot.slane %v494_v6, 5  ;;  %v5000_v32 = vld [vmem:[%s4882_s16 + $0x3c] sm:$0x1]  ;;  %v3843_v34 = vcombine.low %v4903_v7, %v4906_v8  ;;  %v2128_v41 = vld [vmem:[%s4887_s19] sm:$0xf] }
  0x2e   : > { %4420 = vmatmul.mubr.msk.bf16.gmra.mrb[4].mxu0 %vm560_vm1, %v4707_v57  ;;  %v3834_v20 = vcombine.low %v461_v4, %v475_v13  ;;  %v502_v22 = vrot.slane %v500_v11, 5  ;;  %v483_v25 = vor.u32 %v482_v14, %v479_v5  ;;  %v3844_v35 = vcombine.low %v4929_v28, %v4932_v29  ;;  %v5022_v47 = vld [vmem:[%s4887_s19 + $0x4] sm:$0x1]  ;;  %v2130_v52 = vld [vmem:[%s4887_s19 + $0x8] sm:$0xf]  ;;  %v5102_v29 = vld [vmem:[%s4872_s10 + $0x30] sm:$0xff]  }
  0x2f   : > { %v3845_v36 = vcombine.low %v4963_v58, %v4966_v59  ;;  %v497_v37 = vor.u32 %v496_v21, %v493_v16  ;;  %v505_v38 = vshrl.u32 %v4991_v24, 16  ;;  %v508_v39 = vshll.u32 %v4991_v24, 16  ;;  %v5030_v0 = vld [vmem:[%s4887_s19 + $0xc] sm:$0x1]  ;;  %v2132_v11 = vld [vmem:[%s4887_s19 + $0x10] sm:$0xf] }
  0x30   : > { %4308 = vmatmul.mubr.msk.bf16.vlgmr.msra.gmra.mrb[0].mxu1 %vm560_vm1, %v3834_v20  ;;  %v514_v40 = vshll.u32 %v4997_v27, 16  ;;  %v484_v43 = vrot.slane %v483_v25, 4  ;;  %v519_v44 = vshrl.u32 %v4994_v26, 16  ;;  %v522_v45 = vshll.u32 %v4994_v26, 16  ;;  %v5035_v13 = vld [vmem:[%s4887_s19 + $0x14] sm:$0x1] }
  0x31   : > { %4316 = vmatpush3.bf16.msra.mxu1 %v4924_v23  ;;  %v528_v46 = vshll.u32 %v5000_v32, 16  ;;  %v498_v48 = vrot.slane %v497_v37, 4  ;;  %v507_v49 = vrot.slane %v505_v38, 4  ;;  %v510_v50 = vrot.slane %v508_v39, 5  ;;  %v2134_v21 = vld [vmem:[%s4887_s19 + $0x18] sm:$0xf] }
  0x32   : > { %4317 = vmatprep.subr.bf16.mxu1 %v4708_v12  ;;  %v516_v51 = vrot.slane %v514_v40, 5  ;;  %v489_v23 = vsel %vm4939_vm4, %v484_v43, %v488_v15  ;;  %v521_v55 = vrot.slane %v519_v44, 4  ;;  %v524_v56 = vrot.slane %v522_v45, 5  ;;  %v5042_v38 = vld [vmem:[%s4887_s19 + $0x1c] sm:$0x1] }
  0x33   : > { %v530_v57 = vrot.slane %v528_v46, 5  ;;  %v503_v60 = vsel %vm4939_vm4, %v498_v48, %v502_v22  ;;  %v511_v63 = vor.u32 %v510_v50, %v507_v49  ;;  %v2145_v1 = vshrl.u32 %v2128_v41, 16  ;;  %v2136_v49 = vld [vmem:[%s4887_s19 + $0x20] sm:$0xf]  ;;  %v2142_v7 = vld [vmem:[%s4887_s19 + $0x38] sm:$0xf] }
  0x34   : > { %v2148_v2 = vshll.u32 %v2128_v41, 16  ;;  %v3835_v3 = vcombine.low %v489_v23, %v503_v60  ;;  %v525_v4 = vor.u32 %v524_v56, %v521_v55  ;;  %v2154_v5 = vshll.u32 %v5022_v47, 16  ;;  %v5051_v56 = vld [vmem:[%s4887_s19 + $0x24] sm:$0x1]  ;;  %v2372_v28 = vld [vmem:[%s4887_s19 + $0x18] sm:$0xe] }
  0x35   : > { %4318 = vmatpush3.bf16.msra.mxu1 %v4708_v12  ;;  %v2159_v6 = vshrl.u32 %v2130_v52, 16  ;;  %v512_v14 = vrot.slane %v511_v63, 4  ;;  %v2147_v15 = vrot.slane %v2145_v1, 4  ;;  %v2162_v20 = vshll.u32 %v2130_v52, 16  ;;  %v747_v59 = vld [vmem:[%s4882_s16] sm:$0xe] }
  0x36   : > { %v2150_v16 = vrot.slane %v2148_v2, 5  ;;  %4327 = vmatprep.subr.bf16.mxu1 %v5015_v42  ;;  %4311 = vmatprep.mubr.msk.bf16.mxu1 %vm560_vm1, %v3835_v3  ;;  %v526_v22 = vrot.slane %v525_v4, 4  ;;  %v2156_v25 = vrot.slane %v2154_v5, 5  ;;  %v2168_v37 = vshll.u32 %v5030_v0, 16  ;;  %v2138_v2 = vld [vmem:[%s4887_s19 + $0x28] sm:$0xf] }
  0x37   : > { %v2161_v12 = vrot.slane %v2159_v6, 4  ;;  %v517_v39 = vsel %vm4939_vm4, %v512_v14, %v516_v51  ;;  %v2164_v41 = vrot.slane %v2162_v20, 5  ;;  %v2173_v43 = vshrl.u32 %v2132_v11, 16  ;;  %v5059_v5 = vld [vmem:[%s4887_s19 + $0x2c] sm:$0x1] }
  0x38   : > { %v2151_v40 = vor.u32 %v2150_v16, %v2147_v15  ;;  %v531_v44 = vsel %vm4939_vm4, %v526_v22, %v530_v57  ;;  %v2170_v45 = vrot.slane %v2168_v37, 5  ;;  %v2176_v46 = vshll.u32 %v2132_v11, 16  ;;  %v2140_v20 = vld [vmem:[%s4887_s19 + $0x30] sm:$0xf]  ;;  %v5070_v37 = vld [vmem:[%s4887_s19 + $0x34] sm:$0x1] }
  0x39   : > { %v2182_v48 = vshll.u32 %v5035_v13, 16  ;;  %v3836_v50 = vcombine.low %v517_v39, %v531_v44  ;;  %v2165_v23 = vor.u32 %v2164_v41, %v2161_v12  ;;  %v2175_v55 = vrot.slane %v2173_v43, 4  ;;  %v2376_v33 = vld [vmem:[%s4887_s19 + $0x38] sm:$0xe] }
  0x3a   : > { %v2152_v52 = vrot.slane %v2151_v40, 4  ;;  %v2178_v51 = vrot.slane %v2176_v46, 5  ;;  %v2187_v63 = vshrl.u32 %v2134_v21, 16  ;;  %v2190_v1 = vshll.u32 %v2134_v21, 16 }
  0x3b   : > { %v2184_v60 = vrot.slane %v2182_v48, 5  ;;  %vm772_vm6 = vcmask 1046532   ;;  %4312 = vmatmul.mubr.msk.bf16.gmra.mrb[4].mxu1 %vm560_vm1, %v3836_v50  ;;  %v2166_v3 = vrot.slane %v2165_v23, 4  ;;  %v2196_v4 = vshll.u32 %v5042_v38, 16  ;;  %v4715_v48 = vld [vmem:[%s4872_s10 + $0x28] sm:$0xff]  }
  0x3c   : > { %v2157_v57 = vsel %vm4939_vm4, %v2152_v52, %v2156_v25  ;;  %v2201_v6 = vshrl.u32 %v2136_v49, 16  ;;  %v2179_v11 = vor.u32 %v2178_v51, %v2175_v55  ;;  %v2189_v14 = vrot.slane %v2187_v63, 4  ;;  %4319 = vmatprep.mubr.msk.bf16.mxu1 %vm560_vm1, %v3843_v34  ;;  %v5079_v63 = vld [vmem:[%s4887_s19 + $0x3c] sm:$0x1]  ;;  %vm5109_vm7 = vmor %vm771_vm5, %vm772_vm6 }
  0x3d   : > { %v2192_v15 = vrot.slane %v2190_v1, 5  ;;  %v2204_v16 = vshll.u32 %v2136_v49, 16  ;;  %v2171_v21 = vsel %vm4939_vm4, %v2166_v3, %v2170_v45  ;;  %v2198_v22 = vrot.slane %v2196_v4, 5 }
  0x3e   : > { %v2203_v25 = vrot.slane %v2201_v6, 4  ;;  %v2210_v12 = vshll.u32 %v5051_v56, 16  ;;  %v4021_v39 = vcombine.low %v2157_v57, %v2171_v21  ;;  %v2180_v40 = vrot.slane %v2179_v11, 4  ;;  %v2369_v6 = vld [vmem:[%s4887_s19] sm:$0xe] }
  0x3f   : > { %v2193_v41 = vor.u32 %v2192_v15, %v2189_v14  ;;  %v2206_v43 = vrot.slane %v2204_v16, 5  ;;  %v2215_v34 = vshrl.u32 %v2138_v2, 16  ;;  %v2218_v44 = vshll.u32 %v2138_v2, 16  ;;  %v2371_v21 = vld [vmem:[%s4887_s19 + $0x10] sm:$0xe] }
  0x40   : > { %v2212_v8 = vrot.slane %v2210_v12, 5  ;;  %v2224_v46 = vshll.u32 %v5059_v5, 16  ;;  %4427 = vmatprep.mubr.msk.bf16.mxu0 %vm560_vm1, %v4021_v39  ;;  %v2185_v45 = vsel %vm4939_vm4, %v2180_v40, %v2184_v60  ;;  %v2229_v52 = vshrl.u32 %v2140_v20, 16  ;;  %v4716_v60 = vld [vmem:[%s4877_s13 + $0x28] sm:$0xff]  }
  0x41   : > { %v2194_v49 = vrot.slane %v2193_v41, 4  ;;  %v2207_v50 = vor.u32 %v2206_v43, %v2203_v25  ;;  %v2217_v23 = vrot.slane %v2215_v34, 4  ;;  %v2220_v55 = vrot.slane %v2218_v44, 5  ;;  %v748_v34 = vld [vmem:[%s4882_s16 + $0x8] sm:$0xe] }
  0x42   : > { %v2226_v51 = vrot.slane %v2224_v46, 5  ;;  %v2232_v1 = vshll.u32 %v2140_v20, 16  ;;  %v2231_v3 = vrot.slane %v2229_v52, 4  ;;  %v2238_v4 = vshll.u32 %v5070_v37, 16  ;;  %v2370_v20 = vld [vmem:[%s4887_s19 + $0x8] sm:$0xe] }
  0x43   : > { %v2199_v2 = vsel %vm4939_vm4, %v2194_v49, %v2198_v22  ;;  %v2208_v57 = vrot.slane %v2207_v50, 4  ;;  %4320 = vmatmul.mubr.msk.bf16.vlgmr.msra.gmra.mrb[0].mxu1 %vm560_vm1, %v3844_v35  ;;  %v2221_v14 = vor.u32 %v2220_v55, %v2217_v23  ;;  %v2243_v16 = vshrl.u32 %v2142_v7, 16  ;;  %v749_v52 = vld [vmem:[%s4882_s16 + $0x10] sm:$0xe] }
  0x44   : > { %v4022_v11 = vcombine.low %v2185_v45, %v2199_v2  ;;  %v2234_v15 = vrot.slane %v2232_v1, 5  ;;  %4328 = vmatpush3.bf16.msra.mxu1 %v5015_v42  ;;  %v2240_v25 = vrot.slane %v2238_v4, 5  ;;  %v2246_v12 = vshll.u32 %v2142_v7, 16  ;;  %4323 = vmatprep.mubr.msk.bf16.mxu1 %vm560_vm1, %v3845_v36  ;;  %v5121_v45 = vld [vmem:[%s4877_s13 + $0x30] sm:$0xff]   ;;  %v2373_v1 = vld [vmem:[%s4887_s19 + $0x20] sm:$0xe] }
  0x45   : > { %v2213_v22 = vsel %vm4939_vm4, %v2208_v57, %v2212_v8  ;;  %v2252_v39 = vshll.u32 %v5079_v63, 16  ;;  %v2222_v35 = vrot.slane %v2221_v14, 4  ;;  %v2245_v40 = vrot.slane %v2243_v16, 4  ;;  %4329 = vmatprep.subr.bf16.mxu1 %v4715_v48  ;;  %v2374_v14 = vld [vmem:[%s4887_s19 + $0x28] sm:$0xe] }
  0x46   : > { %4428 = vmatmul.mubr.msk.bf16.vlgmr.msra.gmra.mrb[0].mxu0 %vm560_vm1, %v4022_v11  ;;  %v2235_v42 = vor.u32 %v2234_v15, %v2231_v3  ;;  %v3846_v41 = vcombine.low %v4991_v24, %v4994_v26  ;;  %v2248_v36 = vrot.slane %v2246_v12, 5  ;;  %v4031_v7 = vrot.slane %v2369_v6, 9 }
  0x47   : > { %4436 = vmatpush3.bf16.msra.mxu0 %v4988_v19  ;;  %v2254_v43 = vrot.slane %v2252_v39, 5  ;;  %v2395_v8 = vrot.slane %v5022_v47, 5  ;;  %v2227_v44 = vsel %vm4939_vm4, %v2222_v35, %v2226_v51  ;;  %v4032_v26 = vrot.slane %v2370_v20, 9  ;;  %v751_v20 = vld [vmem:[%s4882_s16 + $0x20] sm:$0xe] }
  0x48   : > { %v2236_v24 = vrot.slane %v2235_v42, 4  ;;  %4437 = vmatprep.subr.bf16.mxu0 %v4716_v60  ;;  %v2399_v46 = vrot.slane %v5030_v0, 5  ;;  %v4023_v19 = vcombine.low %v2213_v22, %v2227_v44  ;;  %v2249_v49 = vor.u32 %v2248_v36, %v2245_v40  ;;  %4330 = vmatpush3.bf16.msra.mxu1 %v4715_v48  ;;  %v750_v0 = vld [vmem:[%s4882_s16 + $0x18] sm:$0xe]  ;;  %v2375_v35 = vld [vmem:[%s4887_s19 + $0x30] sm:$0xe] }
  0x49   : > { %v2396_v50 = vsel %vm5109_vm7, %v4031_v7, %v2395_v8  ;;  %v4033_v47 = vrot.slane %v2371_v21, 9  ;;  %v2403_v55 = vrot.slane %v5035_v13, 5  ;;  %v4034_v51 = vrot.slane %v2372_v28, 9  ;;  %4339 = vmatprep.subr.bf16.mxu1 %v5102_v29  ;;  %v753_v42 = vld [vmem:[%s4882_s16 + $0x30] sm:$0xe] }
  0x4a   : > { %v2400_v23 = vsel %vm5109_vm7, %v4032_v26, %v2399_v46  ;;  %4431 = vmatprep.mubr.msk.bf16.mxu0 %vm560_vm1, %v4023_v19  ;;  %v2241_v48 = vsel %vm4939_vm4, %v2236_v24, %v2240_v25  ;;  %v2250_v2 = vrot.slane %v2249_v49, 4  ;;  %v2407_v57 = vrot.slane %v5042_v38, 5  ;;  %v4721_v26 = vld [vmem:[%s4877_s13 + $0x38] sm:$0xff]  }
  0x4b   : > { %4438 = vmatpush3.bf16.msra.mxu0 %v4716_v60  ;;  %v3853_v3 = vrot.slane %v747_v59, 9  ;;  %4324 = vmatmul.mubr.msk.bf16.gmra.mrb[4].mxu1 %vm560_vm1, %v3846_v41  ;;  %v4039_v13 = vcombine.low %v2396_v50, %v2400_v23  ;;  %v3854_v4 = vrot.slane %v748_v34, 9  ;;  %v3855_v6 = vrot.slane %v749_v52, 9  ;;  %v4720_v41 = vld [vmem:[%s4872_s10 + $0x38] sm:$0xff]   ;;  %v4725_v52 = vld [vmem:[%s4872_s10 + $0x40] sm:$0xff]  }
  0x4c   : > { %4447 = vmatprep.subr.bf16.mxu0 %v5121_v45  ;;  %v3856_v11 = vrot.slane %v750_v0, 9  ;;  %v2255_v15 = vsel %vm4939_vm4, %v2250_v2, %v2254_v43  ;;  %v2404_v16 = vsel %vm5109_vm7, %v4033_v47, %v2403_v55  ;;  %v4035_v60 = vrot.slane %v2373_v1, 9  ;;  %v4724_v23 = vld [vmem:[%s4882_s16 + $0x8] ss:$8 sps:$4 sm:$0xff]   ;;  %v5205_v55 = vld [vmem:[%s4877_s13 + $0x40] sm:$0xff]  }
  0x4d   : > { %v777_v38 = vsel %vm5109_vm7, %v3853_v3, %v776_v17  ;;  %v4024_v21 = vcombine.low %v2241_v48, %v2255_v15  ;;  %v2408_v22 = vsel %vm5109_vm7, %v4034_v51, %v2407_v57  ;;  %v781_v25 = vsel %vm5109_vm7, %v3854_v4, %v780_v18  ;;  %v752_v17 = vld [vmem:[%s4882_s16 + $0x28] sm:$0xe]  ;;  %v4727_v0 = vld [vmem:[%s4882_s16 + $0x18] ss:$8 sps:$4 sm:$0xff]   ;;  %v5214_v48 = vld [vmem:[%s4887_s19 + $0xc] sm:$0x1] }
  0x4e   : > { %v785_v9 = vsel %vm5109_vm7, %v3855_v6, %v784_v53  ;;  %v3861_v12 = vcombine.low %v777_v38, %v781_v25  ;;  %v789_v39 = vsel %vm5109_vm7, %v3856_v11, %v788_v54  ;;  %v2411_v10 = vrot.slane %v5051_v56, 5  ;;  %v754_v54 = vld [vmem:[%s4882_s16 + $0x38] sm:$0xe]  ;;  %v4722_v51 = vld [vmem:[%s4887_s19 + $0x8] ss:$8 sps:$4 sm:$0xff]  }
  0x4f   : > { %v4036_v28 = vrot.slane %v2374_v14, 9  ;;  %4432 = vmatmul.mubr.msk.bf16.gmra.mrb[4].mxu0 %vm560_vm1, %v4024_v21  ;;  %v3862_v18 = vcombine.low %v785_v9, %v789_v39  ;;  %v2415_v30 = vrot.slane %v5059_v5, 5  ;;  %v4040_v53 = vcombine.low %v2404_v16, %v2408_v22  ;;  %v4067_v1 = vld [vmem:[%s4887_s19 + $0x8] sm:$0xf]  ;;  %v4069_v2 = vld [vmem:[%s4887_s19 + $0x10] sm:$0xf] }
  0x50   : > { %4439 = vmatprep.mubr.msk.bf16.mxu0 %vm560_vm1, %v4039_v13  ;;  %4331 = vmatprep.mubr.msk.bf16.mxu1 %vm560_vm1, %v3861_v12  ;;  %v3857_v40 = vrot.slane %v751_v20, 9  ;;  %v2412_v56 = vsel %vm5109_vm7, %v4035_v60, %v2411_v10  ;;  %v792_v5 = vrot.slane %v4969_v61, 5  ;;  %v3858_v36 = vrot.slane %v752_v17, 9  ;;  %v4730_v57 = vld [vmem:[%s4882_s16 + $0x28] ss:$8 sps:$4 sm:$0xff]  }
  0x51   : > { %v2416_v59 = vsel %vm5109_vm7, %v4036_v28, %v2415_v30  ;;  %v4037_v43 = vrot.slane %v2375_v35, 9  ;;  %v2419_v7 = vrot.slane %v5070_v37, 5  ;;  %v796_v8 = vrot.slane %v4972_v62, 5  ;;  %v5219_v3 = vld [vmem:[%s4887_s19 + $0x14] sm:$0x1]  ;;  %v4731_v14 = vld [vmem:[%s4872_s10 + $0x48] sm:$0xff]  }
  0x52   : > { %v3859_v34 = vrot.slane %v753_v42, 9  ;;  %v4038_v44 = vrot.slane %v2376_v33, 9  ;;  %v793_v24 = vsel %vm5109_vm7, %v3857_v40, %v792_v5  ;;  %v800_v46 = vrot.slane %v4997_v27, 5  ;;  %v4071_v38 = vld [vmem:[%s4887_s19 + $0x18] sm:$0xf] }
  0x53   : > { %4332 = vmatmul.mubr.msk.bf16.vlgmr.msra.gmra.mrb[0].mxu1 %vm560_vm1, %v3862_v18  ;;  %v3860_v19 = vrot.slane %v754_v54, 9  ;;  %v4041_v61 = vcombine.low %v2412_v56, %v2416_v59  ;;  %v2423_v37 = vrot.slane %v5079_v63, 5  ;;  %v797_v62 = vsel %vm5109_vm7, %v3858_v36, %v796_v8  ;;  %v5227_v60 = vld [vmem:[%s4887_s19 + $0x1c] sm:$0x1]  ;;  %v4073_v9 = vld [vmem:[%s4887_s19 + $0x20] sm:$0xf] }
  0x54   : > { %4340 = vmatpush3.bf16.msra.mxu1 %v5102_v29  ;;  %v804_v49 = vrot.slane %v5000_v32, 5  ;;  %v3863_v50 = vcombine.low %v793_v24, %v797_v62  ;;  %v801_v47 = vsel %vm5109_vm7, %v3859_v34, %v800_v46  ;;  %v2420_v32 = vsel %vm5109_vm7, %v4037_v43, %v2419_v7  ;;  %v4723_v17 = vld [vmem:[%s4887_s19 + $0x18] ss:$8 sps:$4 sm:$0xff]   ;;  %v5233_v10 = vld [vmem:[%s4887_s19 + $0x24] sm:$0x1]  ;;  %v5251_v62 = vld [vmem:[%s4872_s10 + $0x50] sm:$0xff]  }
  0x55   : > { %4341 = vmatprep.subr.bf16.mxu1 %v4720_v41  ;;  %v2424_v29 = vsel %vm5109_vm7, %v4038_v44, %v2423_v37  ;;  %v2685_v13 = vshrl.u32 %v4067_v1, 16  ;;  %v2688_v4 = vshll.u32 %v4067_v1, 16  ;;  %v2694_v6 = vshll.u32 %v5214_v48, 16  ;;  %v4728_v30 = vld [vmem:[%s4887_s19 + $0x28] ss:$8 sps:$4 sm:$0xff]  }
  0x56   : > { %v805_v27 = vsel %vm5109_vm7, %v3860_v19, %v804_v49  ;;  %4335 = vmatprep.mubr.msk.bf16.mxu1 %vm560_vm1, %v3863_v50  ;;  %v2699_v11 = vshrl.u32 %v4069_v2, 16  ;;  %v2702_v15 = vshll.u32 %v4069_v2, 16  ;;  %v2708_v16 = vshll.u32 %v5219_v3, 16  ;;  %v3889_v40 = vld [vmem:[%s4882_s16 + $0x8] sm:$0xf] }
  0x57   : > { %4440 = vmatmul.mubr.msk.bf16.vlgmr.msra.gmra.mrb[0].mxu0 %vm560_vm1, %v4040_v53  ;;  %v3864_v63 = vcombine.low %v801_v47, %v805_v27  ;;  %v2687_v20 = vrot.slane %v2685_v13, 4  ;;  %v2690_v21 = vrot.slane %v2688_v4, 5  ;;  %v2696_v22 = vrot.slane %v2694_v6, 5  ;;  %v5242_v36 = vld [vmem:[%s4882_s16 + $0xc] sm:$0x1] }
  0x58   : > { %4448 = vmatpush3.bf16.msra.mxu0 %v5121_v45  ;;  %4443 = vmatprep.mubr.msk.bf16.mxu0 %vm560_vm1, %v4041_v61  ;;  %v4042_v45 = vcombine.low %v2420_v32, %v2424_v29  ;;  %v2701_v25 = vrot.slane %v2699_v11, 4  ;;  %v2704_v12 = vrot.slane %v2702_v15, 5  ;;  %v2710_v39 = vrot.slane %v2708_v16, 5  ;;  %v3891_v44 = vld [vmem:[%s4882_s16 + $0x10] sm:$0xf] }
  0x59   : > { %4449 = vmatprep.subr.bf16.mxu0 %v4721_v26  ;;  %4342 = vmatpush3.bf16.msra.mxu1 %v4720_v41  ;;  %v2713_v28 = vshrl.u32 %v4071_v38, 16  ;;  %v2716_v18 = vshll.u32 %v4071_v38, 16  ;;  %v2691_v35 = vor.u32 %v2690_v21, %v2687_v20  ;;  %v2722_v42 = vshll.u32 %v5227_v60, 16  ;;  %v4732_v41 = vld [vmem:[%s4877_s13 + $0x48] sm:$0xff]   ;;  %v4733_v24 = vld [vmem:[%s4882_s16 + $0x38] ss:$8 sps:$4 sm:$0xff]  }
  0x5a   : > { %4351 = vmatprep.subr.bf16.mxu1 %v4725_v52  ;;  %v2727_v53 = vshrl.u32 %v4073_v9, 16  ;;  %v2730_v33 = vshll.u32 %v4073_v9, 16  ;;  %v2705_v54 = vor.u32 %v2704_v12, %v2701_v25  ;;  %v2736_v5 = vshll.u32 %v5233_v10, 16  ;;  %v5248_v61 = vld [vmem:[%s4882_s16 + $0x14] sm:$0x1] }
  0x5b   : > { %4336 = vmatmul.mubr.msk.bf16.gmra.mrb[4].mxu1 %vm560_vm1, %v3864_v63  ;;  %v2715_v56 = vrot.slane %v2713_v28, 4  ;;  %v2718_v59 = vrot.slane %v2716_v18, 5  ;;  %v2692_v43 = vrot.slane %v2691_v35, 4  ;;  %v2724_v7 = vrot.slane %v2722_v42, 5  ;;  %v3893_v4 = vld [vmem:[%s4882_s16 + $0x18] sm:$0xf] }
  0x5c   : > { %4450 = vmatpush3.bf16.msra.mxu0 %v4721_v26  ;;  %4343 = vmatprep.mubr.msk.bf16.mxu1 %vm560_vm1, %v4724_v23  ;;  %v2729_v8 = vrot.slane %v2727_v53, 4  ;;  %v2732_v34 = vrot.slane %v2730_v33, 5  ;;  %v2706_v26 = vrot.slane %v2705_v54, 4  ;;  %v2738_v19 = vrot.slane %v2736_v5, 5  ;;  %v3895_v16 = vld [vmem:[%s4882_s16 + $0x20] sm:$0xf] }
  0x5d   : > { %4459 = vmatprep.subr.bf16.mxu0 %v5205_v55  ;;  %v2719_v46 = vor.u32 %v2718_v59, %v2715_v56  ;;  %v1066_v37 = vshrl.u32 %v3889_v40, 16  ;;  %v2697_v49 = vsel %vm4939_vm4, %v2692_v43, %v2696_v22  ;;  %v1069_v47 = vshll.u32 %v3889_v40, 16  ;;  %v5277_v38 = vld [vmem:[%s4882_s16 + $0x24] sm:$0x1]  ;;  %v4075_v9 = vld [vmem:[%s4887_s19 + $0x28] sm:$0xf] }
  0x5e   : > { %v2733_v50 = vor.u32 %v2732_v34, %v2729_v8  ;;  %v2711_v27 = vsel %vm4939_vm4, %v2706_v26, %v2710_v39  ;;  %v1080_v29 = vshrl.u32 %v3891_v44, 16  ;;  %v1089_v13 = vshll.u32 %v5248_v61, 16  ;;  %v5285_v18 = vld [vmem:[%s4887_s19 + $0x2c] sm:$0x1]  ;;  %v4077_v33 = vld [vmem:[%s4887_s19 + $0x30] sm:$0xf] }
  0x5f   : > { %4444 = vmatmul.mubr.msk.bf16.gmra.mrb[4].mxu0 %vm560_vm1, %v4042_v45  ;;  %v2720_v63 = vrot.slane %v2719_v46, 4  ;;  %v1068_v32 = vrot.slane %v1066_v37, 4  ;;  %v1071_v45 = vrot.slane %v1069_v47, 5  ;;  %v4083_v6 = vcombine.low %v2697_v49, %v2711_v27  ;;  %v5295_v34 = vld [vmem:[%s4887_s19 + $0x34] sm:$0x1] }
  0x60   : > { %4451 = vmatprep.mubr.msk.bf16.mxu0 %vm560_vm1, %v4722_v51  ;;  %v2734_v23 = vrot.slane %v2733_v50, 4  ;;  %v1082_v2 = vrot.slane %v1080_v29, 4  ;;  %v1091_v22 = vrot.slane %v1089_v13, 5  ;;  %v1094_v25 = vshrl.u32 %v3893_v4, 16  ;;  %v4079_v50 = vld [vmem:[%s4887_s19 + $0x38] sm:$0xf] }
  0x61   : > { %v2725_v1 = vsel %vm4939_vm4, %v2720_v63, %v2724_v7  ;;  %v1072_v15 = vor.u32 %v1071_v45, %v1068_v32  ;;  %v1097_v12 = vshll.u32 %v3893_v4, 16  ;;  %v1108_v28 = vshrl.u32 %v3895_v16, 16  ;;  %v5302_v32 = vld [vmem:[%s4887_s19 + $0x3c] sm:$0x1]  ;;  %v5311_v13 = vld [vmem:[%s4887_s19 + $0x44] sm:$0x1] }
  0x62   : > { %v2739_v11 = vsel %vm4939_vm4, %v2734_v23, %v2738_v19  ;;  %v1096_v35 = vrot.slane %v1094_v25, 4  ;;  %v1111_v42 = vshll.u32 %v3895_v16, 16  ;;  %v1117_v53 = vshll.u32 %v5277_v38, 16 }
  0x63   : > { %4344 = vmatmul.mubr.msk.bf16.vlgmr.msra.gmra.mrb[0].mxu1 %vm560_vm1, %v4727_v0  ;;  %v4729_v0 = vld [vmem:[%s4887_s19 + $0x38] ss:$8 sps:$4 sm:$0xff]   ;;  %v5280_v20 = vcombine.low %v2725_v1, %v2739_v11  ;;  %v1110_v56 = vrot.slane %v1108_v28, 4  ;;  %v2741_v7 = vshrl.u32 %v4075_v9, 16  ;;  %v2755_v26 = vshrl.u32 %v4077_v33, 16 }
  0x64   : > { %4352 = vmatpush3.bf16.msra.mxu1 %v4725_v52  ;;  %4347 = vmatprep.mubr.msk.bf16.mxu1 %vm560_vm1, %v4730_v57  ;;  %v1075_v52 = vshll.u32 %v5242_v36, 16  ;;  %v1083_v57 = vshll.u32 %v3891_v44, 16  ;;  %v1113_v5 = vrot.slane %v1111_v42, 5  ;;  %v1119_v43 = vrot.slane %v1117_v53, 5  ;;  %v4737_v1 = vld [vmem:[%s4877_s13 + $0x58] sm:$0xff]  }
  0x65   : > { %4353 = vmatprep.subr.bf16.mxu1 %v4731_v14  ;;  %v2744_v44 = vshll.u32 %v4075_v9, 16  ;;  %v2743_v37 = vrot.slane %v2741_v7, 4  ;;  %v2758_v49 = vshll.u32 %v4077_v33, 16  ;;  %v2757_v23 = vrot.slane %v2755_v26, 4  ;;  %v3897_v11 = vld [vmem:[%s4882_s16 + $0x28] sm:$0xf] }
  0x66   : > { %v1077_v51 = vrot.slane %v1075_v52, 5  ;;  %v1085_v21 = vrot.slane %v1083_v57, 5  ;;  %v1114_v19 = vor.u32 %v1113_v5, %v1110_v56  ;;  %v2769_v4 = vshrl.u32 %v4079_v50, 16  ;;  %v4736_v28 = vld [vmem:[%s4872_s10 + $0x58] sm:$0xff]   ;;  %v5330_v56 = vld [vmem:[%s4882_s16 + $0x34] sm:$0x1] }
  0x67   : > { %4452 = vmatmul.mubr.msk.bf16.vlgmr.msra.gmra.mrb[0].mxu0 %vm560_vm1, %v4723_v17  ;;  %v1073_v17 = vrot.slane %v1072_v15, 4  ;;  %v2746_v27 = vrot.slane %v2744_v44, 5  ;;  %v2760_v45 = vrot.slane %v2758_v49, 5  ;;  %v3901_v7 = vld [vmem:[%s4882_s16 + $0x38] sm:$0xf]  ;;  %vm3700_vm8 = vcmask (!%p4189_p9), 257024  }
  0x68   : > { %4460 = vmatpush3.bf16.msra.mxu0 %v5205_v55  ;;  %4455 = vmatprep.mubr.msk.bf16.mxu0 %vm560_vm1, %v4728_v30  ;;  %v5266_v55 = vld [vmem:[%s4877_s13 + $0x50] sm:$0xff]   ;;  %v1086_v30 = vor.u32 %v1085_v21, %v1082_v2  ;;  %v1115_v29 = vrot.slane %v1114_v19, 4  ;;  %v5340_v19 = vld [vmem:[%s4872_s10 + $0x60] sm:$0xff]  }
  0x69   : > { %4461 = vmatprep.subr.bf16.mxu0 %v4732_v41  ;;  %4354 = vmatpush3.bf16.msra.mxu1 %v4731_v14  ;;  %v5273_v14 = vld [vmem:[%s4882_s16 + $0x1c] sm:$0x1]  ;;  %v1078_v40 = vsel %vm4939_vm4, %v1073_v17, %v1077_v51  ;;  %v2764_v51 = vshll.u32 %v5295_v34, 16  ;;  %v2747_v57 = vor.u32 %v2746_v27, %v2743_v37  ;;  %v2761_v16 = vor.u32 %v2760_v45, %v2757_v23 }
  0x6a   : > { %4363 = vmatprep.subr.bf16.mxu1 %v5251_v62  ;;  %v1103_v39 = vshll.u32 %v5273_v14, 16  ;;  %v1087_v59 = vrot.slane %v1086_v30, 4  ;;  %v1120_v15 = vsel %vm4939_vm4, %v1115_v29, %v1119_v43  ;;  %v2771_v17 = vrot.slane %v2769_v4, 4  ;;  %v3903_v29 = vld [vmem:[%s4882_s16 + $0x40] sm:$0xf] }
  0x6b   : > { %4348 = vmatmul.mubr.msk.bf16.gmra.mrb[4].mxu1 %vm560_vm1, %v4733_v24  ;;  %v2750_v24 = vshll.u32 %v5285_v18, 16  ;;  %v2766_v21 = vrot.slane %v2764_v51, 5  ;;  %v2748_v9 = vrot.slane %v2747_v57, 4  ;;  %v2762_v30 = vrot.slane %v2761_v16, 4  ;;  %v5352_v57 = vld [vmem:[%s4882_s16 + $0x44] sm:$0x1] }
  0x6c   : > { %4462 = vmatpush3.bf16.msra.mxu0 %v4732_v41  ;;  %v1099_v41 = vrot.slane %v1097_v12, 5  ;;  %v1105_v54 = vrot.slane %v1103_v39, 5  ;;  %v1092_v46 = vsel %vm4939_vm4, %v1087_v59, %v1091_v22  ;;  %v2778_v22 = vshll.u32 %v5302_v32, 16  ;;  %v5318_v39 = vld [vmem:[%s4882_s16 + $0x2c] sm:$0x1] }
  0x6d   : > { %4471 = vmatprep.subr.bf16.mxu0 %v5266_v55  ;;  %v3905_v47 = vcombine.low %v1078_v40, %v1092_v46  ;;  %v2752_v63 = vrot.slane %v2750_v24, 5  ;;  %v2767_v59 = vsel %vm4939_vm4, %v2762_v30, %v2766_v21  ;;  %v1131_v49 = vshll.u32 %v5318_v39, 16  ;;  %v4093_v16 = vld [vmem:[%s4887_s19 + $0x8] sm:$0xe] }
  0x6e   : > { %v1100_v8 = vor.u32 %v1099_v41, %v1096_v35  ;;  %v2780_v35 = vrot.slane %v2778_v22, 5  ;;  %v2792_v41 = vshll.u32 %v5311_v13, 16  ;;  %v1150_v23 = vshrl.u32 %v3901_v7, 16 }
  0x6f   : > { %4456 = vmatmul.mubr.msk.bf16.gmra.mrb[4].mxu0 %vm560_vm1, %v4729_v0  ;;  %v4081_v0 = vld [vmem:[%s4887_s19 + $0x40] sm:$0xf]  ;;  %4355 = vmatprep.mubr.msk.bf16.mxu1 %vm560_vm1, %v3905_v47  ;;  %v2753_v33 = vsel %vm4939_vm4, %v2748_v9, %v2752_v63  ;;  %v5344_v47 = vld [vmem:[%s4882_s16 + $0x3c] sm:$0x1]  ;;  %v1145_v63 = vshll.u32 %v5330_v56, 16  ;;  %v1167_v30 = vshll.u32 %v3903_v29, 16 }
  0x70   : > { %4463 = vmatprep.mubr.msk.bf16.mxu0 %vm560_vm1, %v4083_v6  ;;  %v1101_v52 = vrot.slane %v1100_v8, 4  ;;  %v2772_v6 = vshll.u32 %v4079_v50, 16  ;;  %v2783_v42 = vshrl.u32 %v4081_v0, 16  ;;  %v2786_v53 = vshll.u32 %v4081_v0, 16  ;;  %v5337_v8 = vld [vmem:[%s4877_s13 + $0x60] sm:$0xff]  }
  0x71   : > { %v4085_v44 = vcombine.low %v2753_v33, %v2767_v59  ;;  %v2794_v26 = vrot.slane %v2792_v41, 5  ;;  %v1133_v0 = vrot.slane %v1131_v49, 5  ;;  %v1159_v22 = vshll.u32 %v5344_v47, 16  ;;  %v4094_v9 = vld [vmem:[%s4887_s19 + $0x10] sm:$0xe] }
  0x72   : > { %v1106_v2 = vsel %vm4939_vm4, %v1101_v52, %v1105_v54  ;;  %v2774_v12 = vrot.slane %v2772_v6, 5  ;;  %v3899_v54 = vld [vmem:[%s4882_s16 + $0x30] sm:$0xf]  ;;  %v2785_v5 = vrot.slane %v2783_v42, 4  ;;  %v2788_v43 = vrot.slane %v2786_v53, 5 }
  0x73   : > { %v3906_v25 = vcombine.low %v1106_v2, %v1120_v15  ;;  %v1136_v50 = vshrl.u32 %v3899_v54, 16  ;;  %v1139_v27 = vshll.u32 %v3899_v54, 16  ;;  %v1147_v6 = vrot.slane %v1145_v63, 5  ;;  %v4096_v41 = vld [vmem:[%s4887_s19 + $0x20] sm:$0xe] }
  0x74   : > { %v2775_v40 = vor.u32 %v2774_v12, %v2771_v17  ;;  %v1153_v15 = vshll.u32 %v3901_v7, 16  ;;  %v1161_v53 = vrot.slane %v1159_v22, 5  ;;  %v1169_v59 = vrot.slane %v1167_v30, 5 }
  0x75   : > { %4356 = vmatmul.mubr.msk.bf16.vlgmr.msra.gmra.mrb[0].mxu1 %vm560_vm1, %v3906_v25  ;;  %v1138_v2 = vrot.slane %v1136_v50, 4  ;;  %v1141_v4 = vrot.slane %v1139_v27, 5  ;;  %v1164_v25 = vshrl.u32 %v3903_v29, 16  ;;  %v4102_v7 = vrot.slane %v4094_v9, 9  ;;  %v3917_v27 = vld [vmem:[%s4882_s16 + $0x18] sm:$0xe] }
  0x76   : > { %4364 = vmatpush3.bf16.msra.mxu1 %v5251_v62  ;;  %v2776_v24 = vrot.slane %v2775_v40, 4  ;;  %v2789_v62 = vor.u32 %v2788_v43, %v2785_v5  ;;  %v1173_v40 = vshll.u32 %v5352_v57, 16  ;;  %v4101_v5 = vrot.slane %v4093_v16, 9 }
  0x77   : > { %4464 = vmatmul.mubr.msk.bf16.vlgmr.msra.gmra.mrb[0].mxu0 %vm560_vm1, %v5280_v20  ;;  %v1122_v20 = vshrl.u32 %v3897_v11, 16  ;;  %4365 = vmatprep.subr.bf16.mxu1 %v4736_v28  ;;  %v1142_v12 = vor.u32 %v1141_v4, %v1138_v2  ;;  %v1166_v33 = vrot.slane %v1164_v25, 4  ;;  %v2947_v4 = vrot.slane %v5233_v10, 5  ;;  %v4100_v25 = vld [vmem:[%s4887_s19 + $0x40] sm:$0xe] }
  0x78   : > { %4472 = vmatpush3.bf16.msra.mxu0 %v5266_v55  ;;  %v1125_v55 = vshll.u32 %v3897_v11, 16  ;;  %4467 = vmatprep.mubr.msk.bf16.mxu0 %vm560_vm1, %v4085_v44  ;;  %v2781_v52 = vsel %vm4939_vm4, %v2776_v24, %v2780_v35  ;;  %v2790_v45 = vrot.slane %v2789_v62, 4  ;;  %v1152_v11 = vrot.slane %v1150_v23, 4  ;;  %v4095_v35 = vld [vmem:[%s4887_s19 + $0x18] sm:$0xe] }
  0x79   : > { %4473 = vmatprep.subr.bf16.mxu0 %v4737_v1  ;;  %v1124_v46 = vrot.slane %v1122_v20, 4  ;;  %v1143_v54 = vrot.slane %v1142_v12, 4  ;;  %v1175_v43 = vrot.slane %v1173_v40, 5  ;;  %v2939_v44 = vrot.slane %v5219_v3, 5  ;;  %v3919_v12 = vld [vmem:[%s4882_s16 + $0x28] sm:$0xe] }
  0x7a   : > { %v1127_v37 = vrot.slane %v1125_v55, 5  ;;  %4366 = vmatpush3.bf16.msra.mxu1 %v4736_v28  ;;  %v1155_v28 = vrot.slane %v1153_v15, 5  ;;  %v2935_v55 = vrot.slane %v5214_v48, 5  ;;  %v4103_v62 = vrot.slane %v4095_v35, 9  ;;  %v4099_v15 = vld [vmem:[%s4887_s19 + $0x38] sm:$0xe] }
  0x7b   : > { %4375 = vmatprep.subr.bf16.mxu1 %v5340_v19  ;;  %v1148_v24 = vsel %vm4939_vm4, %v1143_v54, %v1147_v6  ;;  %v2940_v48 = vsel %vm5109_vm7, %v4102_v7, %v2939_v44  ;;  %v2943_v3 = vrot.slane %v5227_v60, 5  ;;  %v1316_v6 = vrot.slane %v5242_v36, 5  ;;  %v3921_v54 = vld [vmem:[%s4882_s16 + $0x38] sm:$0xe]  ;;  %v3922_v44 = vld [vmem:[%s4882_s16 + $0x40] sm:$0xe] }
  0x7c   : > { %4474 = vmatpush3.bf16.msra.mxu0 %v4737_v1  ;;  %v1128_v51 = vor.u32 %v1127_v37, %v1124_v46  ;;  %v2795_v1 = vsel %vm4939_vm4, %v2790_v45, %v2794_v26  ;;  %v1156_v20 = vor.u32 %v1155_v28, %v1152_v11  ;;  %v1170_v46 = vor.u32 %v1169_v59, %v1166_v33  ;;  %v3915_v37 = vld [vmem:[%s4882_s16 + $0x8] sm:$0xe]  ;;  %v4098_v11 = vld [vmem:[%s4887_s19 + $0x30] sm:$0xe] }
  0x7d   : > { %4483 = vmatprep.subr.bf16.mxu0 %v5337_v8  ;;  %v4086_v17 = vcombine.low %v2781_v52, %v2795_v1  ;;  %v2936_v50 = vsel %vm5109_vm7, %v4101_v5, %v2935_v55  ;;  %v3916_v52 = vld [vmem:[%s4882_s16 + $0x10] sm:$0xe]  ;;  %v4104_v45 = vrot.slane %v4096_v41, 9  ;;  %v2944_v2 = vsel %vm5109_vm7, %v4103_v62, %v2943_v3  ;;  %v4741_v28 = vld [vmem:[%s4877_s13 + $0x68] sm:$0xff]  }
  0x7e   : > { %v1129_v21 = vrot.slane %v1128_v51, 4  ;;  %v1157_v26 = vrot.slane %v1156_v20, 4  ;;  %v1171_v29 = vrot.slane %v1170_v46, 4  ;;  %v4109_v23 = vcombine.low %v2936_v50, %v2940_v48  ;;  %v3918_v51 = vld [vmem:[%s4882_s16 + $0x20] sm:$0xe]  ;;  %v4746_v62 = vld [vmem:[%s4877_s13 + $0x70] sm:$0xff]  }
  0x7f   : > { %4468 = vmatmul.mubr.msk.bf16.gmra.mrb[4].mxu0 %vm560_vm1, %v4086_v17  ;;  %v3923_v60 = vrot.slane %v3915_v37, 9  ;;  %v3924_v1 = vrot.slane %v3916_v52, 9  ;;  %v3925_v22 = vrot.slane %v3917_v27, 9  ;;  %v2948_v10 = vsel %vm5109_vm7, %v4104_v45, %v2947_v4  ;;  %v4740_v50 = vld [vmem:[%s4872_s10 + $0x68] sm:$0xff]   ;;  %v5449_v45 = vld [vmem:[%s4872_s10 + $0x70] sm:$0xff]  }
  0x80   : > { %v1134_v42 = vsel %vm4939_vm4, %v1129_v21, %v1133_v0  ;;  %v1162_v63 = vsel %vm4939_vm4, %v1157_v26, %v1161_v53  ;;  %v4097_v0 = vld [vmem:[%s4887_s19 + $0x28] sm:$0xe]  ;;  %v1176_v16 = vsel %vm4939_vm4, %v1171_v29, %v1175_v43  ;;  %4475 = vmatprep.mubr.msk.bf16.mxu0 %vm560_vm1, %v4109_v23  ;;  %v1320_v21 = vrot.slane %v5248_v61, 5  ;;  %v4742_v29 = vld [vmem:[%s4887_s19 + $0x10] ss:$8 sps:$4 sm:$0xff]  }
  0x81   : > { %v3907_v49 = vcombine.low %v1134_v42, %v1148_v24  ;;  %v3908_v9 = vcombine.low %v1162_v63, %v1176_v16  ;;  %v1317_v36 = vsel %vm5109_vm7, %v3923_v60, %v1316_v6  ;;  %v1324_v17 = vrot.slane %v5273_v14, 5  ;;  %v3920_v14 = vld [vmem:[%s4882_s16 + $0x30] sm:$0xe]  ;;  %v5459_v6 = vld [vmem:[%s4887_s19 + $0x14] sm:$0x1] }
  0x82   : > { %v4110_v30 = vcombine.low %v2944_v2, %v2948_v10  ;;  %v1321_v35 = vsel %vm5109_vm7, %v3924_v1, %v1320_v21  ;;  %v3926_v61 = vrot.slane %v3918_v51, 9  ;;  %v1328_v42 = vrot.slane %v5277_v38, 5  ;;  %v4743_v51 = vld [vmem:[%s4887_s19 + $0x20] ss:$8 sps:$4 sm:$0xff]   ;;  %v4752_v2 = vld [vmem:[%s4877_s13 + $0x78] sm:$0xff]  }
  0x83   : > { %4359 = vmatprep.mubr.msk.bf16.mxu1 %vm560_vm1, %v3907_v49  ;;  %v3931_v53 = vcombine.low %v1317_v36, %v1321_v35  ;;  %v1325_v33 = vsel %vm5109_vm7, %v3925_v22, %v1324_v17  ;;  %v4105_v40 = vrot.slane %v4097_v0, 9  ;;  %v2951_v41 = vrot.slane %v5285_v18, 5  ;;  %v4748_v4 = vld [vmem:[%s4887_s19 + $0x30] ss:$8 sps:$4 sm:$0xff]   ;;  %v4141_v10 = vld [vmem:[%s4887_s19 + $0x20] sm:$0xf] }
  0x84   : > { %4360 = vmatmul.mubr.msk.bf16.gmra.mrb[4].mxu1 %vm560_vm1, %v3908_v9  ;;  %v1329_v20 = vsel %vm5109_vm7, %v3926_v61, %v1328_v42  ;;  %v4106_v59 = vrot.slane %v4098_v11, 9  ;;  %v2955_v38 = vrot.slane %v5295_v34, 5  ;;  %v4107_v5 = vrot.slane %v4099_v15, 9  ;;  %v4137_v60 = vld [vmem:[%s4887_s19 + $0x10] sm:$0xf] }
  0x85   : > { %4367 = vmatprep.mubr.msk.bf16.mxu1 %vm560_vm1, %v3931_v53  ;;  %v3932_v43 = vcombine.low %v1325_v33, %v1329_v20  ;;  %v2952_v18 = vsel %vm5109_vm7, %v4105_v40, %v2951_v41  ;;  %v2959_v55 = vrot.slane %v5302_v32, 5  ;;  %v4108_v7 = vrot.slane %v4100_v25, 9  ;;  %v4139_v11 = vld [vmem:[%s4887_s19 + $0x18] sm:$0xf]  ;;  %v5463_v15 = vld [vmem:[%s4887_s19 + $0x1c] sm:$0x1] }
  0x86   : > { %v2956_v24 = vsel %vm5109_vm7, %v4106_v59, %v2955_v38  ;;  %v2963_v26 = vrot.slane %v5311_v13, 5  ;;  %v3927_v34 = vrot.slane %v3919_v12, 9  ;;  %v1332_v46 = vrot.slane %v5318_v39, 5  ;;  %v5472_v12 = vld [vmem:[%s4887_s19 + $0x24] sm:$0x1] }
  0x87   : > { %4476 = vmatmul.mubr.msk.bf16.vlgmr.msra.gmra.mrb[0].mxu0 %vm560_vm1, %v4110_v30  ;;  %v4111_v37 = vcombine.low %v2952_v18, %v2956_v24  ;;  %v3928_v49 = vrot.slane %v3920_v14, 9  ;;  %v1336_v32 = vrot.slane %v5330_v56, 5  ;;  %v3929_v3 = vrot.slane %v3921_v54, 9  ;;  %v4747_v30 = vld [vmem:[%s4882_s16 + $0x20] ss:$8 sps:$4 sm:$0xff]  }
  0x88   : > { %4484 = vmatpush3.bf16.msra.mxu0 %v5337_v8  ;;  %v2960_v8 = vsel %vm5109_vm7, %v4107_v5, %v2959_v55  ;;  %v2964_v48 = vsel %vm5109_vm7, %v4108_v7, %v2963_v26  ;;  %v1333_v13 = vsel %vm5109_vm7, %v3927_v34, %v1332_v46  ;;  %v1340_v39 = vrot.slane %v5344_v47, 5  ;;  %v5478_v33 = vld [vmem:[%s4887_s19 + $0x2c] sm:$0x1]  ;;  %v4749_v40 = vld [vmem:[%s4887_s19 + $0x40] ss:$8 sps:$4 sm:$0xff]  }
  0x89   : > { %4485 = vmatprep.subr.bf16.mxu0 %v4741_v28  ;;  %4479 = vmatprep.mubr.msk.bf16.mxu0 %vm560_vm1, %v4111_v37  ;;  %v4112_v52 = vcombine.low %v2960_v8, %v2964_v48  ;;  %v1337_v27 = vsel %vm5109_vm7, %v3928_v49, %v1336_v32  ;;  %v3930_v63 = vrot.slane %v3922_v44, 9  ;;  %v1344_v56 = vrot.slane %v5352_v57, 5  ;;  %v3959_v59 = vld [vmem:[%s4882_s16 + $0x10] sm:$0xf]  ;;  %v5484_v38 = vld [vmem:[%s4877_s13 + $0x80] sm:$0xff]  }
  0x8a   : > { %v3933_v23 = vcombine.low %v1333_v13, %v1337_v27  ;;  %v1341_v47 = vsel %vm5109_vm7, %v3929_v3, %v1340_v39  ;;  %v3225_v16 = vshrl.u32 %v4137_v60, 16  ;;  %v3228_v1 = vshll.u32 %v4137_v60, 16  ;;  %v4750_v5 = vld [vmem:[%s4882_s16 + $0x30] ss:$8 sps:$4 sm:$0xff]   ;;  %v5490_v24 = vld [vmem:[%s4882_s16 + $0x14] sm:$0x1] }
  0x8b   : > { %v1345_v57 = vsel %vm5109_vm7, %v3930_v63, %v1344_v56  ;;  %v3234_v21 = vshll.u32 %v5459_v6, 16  ;;  %v3239_v22 = vshrl.u32 %v4139_v11, 16  ;;  %v3242_v25 = vshll.u32 %v4139_v11, 16  ;;  %v3961_v37 = vld [vmem:[%s4882_s16 + $0x18] sm:$0xf] }
  0x8c   : > { %4486 = vmatpush3.bf16.msra.mxu0 %v4741_v28  ;;  %4368 = vmatmul.mubr.msk.bf16.vlgmr.msra.gmra.mrb[0].mxu1 %vm560_vm1, %v3932_v43  ;;  %v3934_v0 = vcombine.low %v1341_v47, %v1345_v57  ;;  %v3248_v9 = vshll.u32 %v5463_v15, 16  ;;  %v3227_v36 = vrot.slane %v3225_v16, 4  ;;  %v3230_v17 = vrot.slane %v3228_v1, 5  ;;  %v4143_v28 = vld [vmem:[%s4887_s19 + $0x28] sm:$0xf]  ;;  %v4751_v43 = vld [vmem:[%s4872_s10 + $0x78] sm:$0xff]  }
  0x8d   : > { %4495 = vmatprep.subr.bf16.mxu0 %v4746_v62  ;;  %4376 = vmatpush3.bf16.msra.mxu1 %v5340_v19  ;;  %v4744_v19 = vld [vmem:[%s4882_s16 + $0x10] ss:$8 sps:$4 sm:$0xff]   ;;  %v3236_v35 = vrot.slane %v3234_v21, 5  ;;  %v3241_v61 = vrot.slane %v3239_v22, 4  ;;  %v3244_v42 = vrot.slane %v3242_v25, 5  ;;  %v3253_v14 = vshrl.u32 %v4141_v10, 16 }
  0x8e   : > { %4371 = vmatprep.mubr.msk.bf16.mxu1 %vm560_vm1, %v3933_v23  ;;  %4377 = vmatprep.subr.bf16.mxu1 %v4740_v50  ;;  %v3250_v53 = vrot.slane %v3248_v9, 5  ;;  %v3231_v41 = vor.u32 %v3230_v17, %v3227_v36  ;;  %v3256_v54 = vshll.u32 %v4141_v10, 16  ;;  %v3262_v20 = vshll.u32 %v5472_v12, 16  ;;  %v5494_v48 = vld [vmem:[%s4882_s16 + $0x1c] sm:$0x1] }
  0x8f   : > { %4480 = vmatmul.mubr.msk.bf16.gmra.mrb[4].mxu0 %vm560_vm1, %v4112_v52  ;;  %v3245_v18 = vor.u32 %v3244_v42, %v3241_v61  ;;  %v3267_v55 = vshrl.u32 %v4143_v28, 16  ;;  %v3270_v7 = vshll.u32 %v4143_v28, 16  ;;  %v3276_v44 = vshll.u32 %v5478_v33, 16  ;;  %v5512_v16 = vld [vmem:[%s4882_s16 + $0x24] sm:$0x1] }
  0x90   : > { %4487 = vmatprep.mubr.msk.bf16.mxu0 %vm560_vm1, %v4742_v29  ;;  %v3232_v26 = vrot.slane %v3231_v41, 4  ;;  %v3255_v34 = vrot.slane %v3253_v14, 4  ;;  %v3258_v46 = vrot.slane %v3256_v54, 5  ;;  %v1606_v39 = vshrl.u32 %v3959_v59, 16  ;;  %v3965_v25 = vld [vmem:[%s4882_s16 + $0x28] sm:$0xf] }
  0x91   : > { %4378 = vmatpush3.bf16.msra.mxu1 %v4740_v50  ;;  %v3246_v8 = vrot.slane %v3245_v18, 4  ;;  %v3269_v49 = vrot.slane %v3267_v55, 4  ;;  %v3272_v32 = vrot.slane %v3270_v7, 5  ;;  %v3278_v50 = vrot.slane %v3276_v44, 5  ;;  %v5520_v9 = vld [vmem:[%s4882_s16 + $0x2c] sm:$0x1] }
  0x92   : > { %4387 = vmatprep.subr.bf16.mxu1 %v5449_v45  ;;  %v3237_v13 = vsel %vm4939_vm4, %v3232_v26, %v3236_v35  ;;  %v3259_v3 = vor.u32 %v3258_v46, %v3255_v34  ;;  %v1609_v52 = vshll.u32 %v3959_v59, 16  ;;  %v1615_v56 = vshll.u32 %v5490_v24, 16  ;;  %v4145_v35 = vld [vmem:[%s4887_s19 + $0x30] sm:$0xf]  ;;  %v5528_v59 = vld [vmem:[%s4887_s19 + $0x34] sm:$0x1] }
  0x93   : > { %v3251_v27 = vsel %vm4939_vm4, %v3246_v8, %v3250_v53  ;;  %v3273_v63 = vor.u32 %v3272_v32, %v3269_v49  ;;  %v1620_v29 = vshrl.u32 %v3961_v37, 16  ;;  %v1608_v57 = vrot.slane %v1606_v39, 4  ;;  %v4147_v55 = vld [vmem:[%s4887_s19 + $0x38] sm:$0xf]  ;;  %v4757_v44 = vld [vmem:[%s4877_s13 + $0x88] sm:$0xff]  }
  0x94   : > { %4372 = vmatmul.mubr.msk.bf16.gmra.mrb[4].mxu1 %vm560_vm1, %v3934_v0  ;;  %v4153_v23 = vcombine.low %v3237_v13, %v3251_v27  ;;  %v3260_v47 = vrot.slane %v3259_v3, 4  ;;  %v3963_v0 = vld [vmem:[%s4882_s16 + $0x20] sm:$0xf]  ;;  %v1617_v60 = vrot.slane %v1615_v56, 5  ;;  %v1629_v22 = vshll.u32 %v5494_v48, 16 }
  0x95   : > { %4379 = vmatprep.mubr.msk.bf16.mxu1 %vm560_vm1, %v4744_v19  ;;  %v5506_v19 = vld [vmem:[%s4872_s10 + $0x80] sm:$0xff]   ;;  %v1622_v11 = vrot.slane %v1620_v29, 4  ;;  %v1634_v10 = vshrl.u32 %v3963_v0, 16  ;;  %v1637_v28 = vshll.u32 %v3963_v0, 16  ;;  %v1651_v18 = vshll.u32 %v3965_v25, 16 }
  0x96   : > { %v1631_v53 = vrot.slane %v1629_v22, 5  ;;  %v3281_v7 = vshrl.u32 %v4145_v35, 16  ;;  %v5538_v49 = vld [vmem:[%s4887_s19 + $0x3c] sm:$0x1]  ;;  %v4149_v27 = vld [vmem:[%s4887_s19 + $0x40] sm:$0xf] }
  0x97   : > { %4488 = vmatmul.mubr.msk.bf16.vlgmr.msra.gmra.mrb[0].mxu0 %vm560_vm1, %v4743_v51  ;;  %v1611_v51 = vrot.slane %v1609_v52, 5  ;;  %v1639_v14 = vrot.slane %v1637_v28, 5  ;;  %v3295_v52 = vshrl.u32 %v4147_v55, 16  ;;  %v5558_v22 = vld [vmem:[%s4882_s16 + $0x34] sm:$0x1] }
  0x98   : > { %4496 = vmatpush3.bf16.msra.mxu0 %v4746_v62  ;;  %4491 = vmatprep.mubr.msk.bf16.mxu0 %vm560_vm1, %v4748_v4  ;;  %v3264_v62 = vrot.slane %v3262_v20, 5  ;;  %v3274_v4 = vrot.slane %v3273_v63, 4  ;;  %v1648_v20 = vshrl.u32 %v3965_v25, 16  ;;  %v3283_v32 = vrot.slane %v3281_v7, 4  ;;  %v3969_v25 = vld [vmem:[%s4882_s16 + $0x38] sm:$0xf] }
  0x99   : > { %4497 = vmatprep.subr.bf16.mxu0 %v4752_v2  ;;  %v1612_v21 = vor.u32 %v1611_v51, %v1608_v57  ;;  %v4151_v57 = vld [vmem:[%s4887_s19 + $0x48] sm:$0xf] }
  0x9a   : > { %v3265_v1 = vsel %vm4939_vm4, %v3260_v47, %v3264_v62  ;;  %v3279_v36 = vsel %vm4939_vm4, %v3274_v4, %v3278_v50  ;;  %v1650_v46 = vrot.slane %v1648_v20, 4  ;;  %v3284_v62 = vshll.u32 %v4145_v35, 16  ;;  %v5546_v47 = vld [vmem:[%s4887_s19 + $0x44] sm:$0x1]  ;;  %v5553_v4 = vld [vmem:[%s4887_s19 + $0x4c] sm:$0x1] }
  0x9b   : > { %v4154_v61 = vcombine.low %v3265_v1, %v3279_v36  ;;  %v1613_v42 = vrot.slane %v1612_v21, 4  ;;  %v3290_v50 = vshll.u32 %v5528_v59, 16  ;;  %v3312_v1 = vshll.u32 %v4149_v27, 16  ;;  %v3967_v21 = vld [vmem:[%s4882_s16 + $0x30] sm:$0xf] }
  0x9c   : > { %4498 = vmatpush3.bf16.msra.mxu0 %v4752_v2  ;;  %4380 = vmatmul.mubr.msk.bf16.vlgmr.msra.gmra.mrb[0].mxu1 %vm560_vm1, %v4747_v30  ;;  %v4753_v2 = vld [vmem:[%s4882_s16 + $0x40] ss:$8 sps:$4 sm:$0xff]   ;;  %v1643_v30 = vshll.u32 %v5512_v16, 16  ;;  %v3286_v39 = vrot.slane %v3284_v62, 5  ;;  %v3323_v28 = vshrl.u32 %v4151_v57, 16  ;;  %v1662_v7 = vshrl.u32 %v3967_v21, 16 }
  0x9d   : > { %4507 = vmatprep.subr.bf16.mxu0 %v5484_v38  ;;  %4388 = vmatpush3.bf16.msra.mxu1 %v5449_v45  ;;  %v1623_v45 = vshll.u32 %v3961_v37, 16  ;;  %v1653_v37 = vrot.slane %v1651_v18, 5  ;;  %v3292_v29 = vrot.slane %v3290_v50, 5  ;;  %v3326_v18 = vshll.u32 %v4151_v57, 16  ;;  %v5578_v50 = vld [vmem:[%s4882_s16 + $0x44] sm:$0x1] }
  0x9e   : > { %4383 = vmatprep.mubr.msk.bf16.mxu1 %vm560_vm1, %v4750_v5  ;;  %4389 = vmatprep.subr.bf16.mxu1 %v4751_v43  ;;  %v1645_v54 = vrot.slane %v1643_v30, 5  ;;  %v1618_v5 = vsel %vm4939_vm4, %v1613_v42, %v1617_v60  ;;  %v3287_v0 = vor.u32 %v3286_v39, %v3283_v32  ;;  %v3314_v42 = vrot.slane %v3312_v1, 5 }
  0x9f   : > { %4492 = vmatmul.mubr.msk.bf16.gmra.mrb[4].mxu0 %vm560_vm1, %v4749_v40  ;;  %v1625_v17 = vrot.slane %v1623_v45, 5  ;;  %v1636_v40 = vrot.slane %v1634_v10, 4  ;;  %v1654_v56 = vor.u32 %v1653_v37, %v1650_v46  ;;  %v3309_v45 = vshrl.u32 %v4149_v27, 16  ;;  %v3971_v46 = vld [vmem:[%s4882_s16 + $0x40] sm:$0xf] }
  0xa0   : > { %4499 = vmatprep.mubr.msk.bf16.mxu0 %vm560_vm1, %v4153_v23  ;;  %v3298_v23 = vshll.u32 %v4147_v55, 16  ;;  %v3288_v10 = vrot.slane %v3287_v0, 4  ;;  %v5569_v55 = vld [vmem:[%s4882_s16 + $0x3c] sm:$0x1]  ;;  %v3973_v27 = vld [vmem:[%s4882_s16 + $0x48] sm:$0xf] }
  0xa1   : > { %4390 = vmatpush3.bf16.msra.mxu1 %v4751_v43  ;;  %v1626_v41 = vor.u32 %v1625_v17, %v1622_v11  ;;  %v1657_v43 = vshll.u32 %v5520_v9, 16  ;;  %v1640_v34 = vor.u32 %v1639_v14, %v1636_v40  ;;  %v1655_v60 = vrot.slane %v1654_v56, 4 }
  0xa2   : > { %4399 = vmatprep.subr.bf16.mxu1 %v5506_v19  ;;  %v3300_v11 = vrot.slane %v3298_v23, 5  ;;  %v3318_v17 = vshll.u32 %v5546_v47, 16  ;;  %v3293_v40 = vsel %vm4939_vm4, %v3288_v10, %v3292_v29  ;;  %v3325_v14 = vrot.slane %v3323_v28, 4 }
  0xa3   : > { %v1627_v26 = vrot.slane %v1626_v41, 4  ;;  %v1659_v8 = vrot.slane %v1657_v43, 5  ;;  %v1641_v3 = vrot.slane %v1640_v34, 4  ;;  %v3332_v43 = vshll.u32 %v5553_v4, 16 }
  0xa4   : > { %4384 = vmatmul.mubr.msk.bf16.gmra.mrb[4].mxu1 %vm560_vm1, %v4753_v2  ;;  %v3297_v2 = vrot.slane %v3295_v52, 4  ;;  %v3320_v41 = vrot.slane %v3318_v17, 5  ;;  %v1676_v34 = vshrl.u32 %v3969_v25, 16  ;;  %v1679_v29 = vshll.u32 %v3969_v25, 16 }
  0xa5   : > { %v1632_v13 = vsel %vm4939_vm4, %v1627_v26, %v1631_v53  ;;  %v1646_v51 = vsel %vm4939_vm4, %v1641_v3, %v1645_v54  ;;  %v1660_v30 = vsel %vm4939_vm4, %v1655_v60, %v1659_v8  ;;  %v4756_v54 = vld [vmem:[%s4872_s10 + $0x88] sm:$0xff]   ;;  %v1671_v26 = vshll.u32 %v5558_v22, 16 }
  0xa6   : > { %v3975_v63 = vcombine.low %v1618_v5, %v1632_v13  ;;  %v3301_v35 = vor.u32 %v3300_v11, %v3297_v2  ;;  %v3976_v53 = vcombine.low %v1646_v51, %v1660_v30  ;;  %v3328_v8 = vrot.slane %v3326_v18, 5  ;;  %v5586_v60 = vld [vmem:[%s4882_s16 + $0x4c] sm:$0x1] }
  0xa7   : > { %4500 = vmatmul.mubr.msk.bf16.vlgmr.msra.gmra.mrb[0].mxu0 %vm560_vm1, %v4154_v61  ;;  %v3311_v61 = vrot.slane %v3309_v45, 4  ;;  %v3334_v32 = vrot.slane %v3332_v43, 5  ;;  %v1664_v3 = vrot.slane %v1662_v7, 4  ;;  %v1673_v52 = vrot.slane %v1671_v26, 5 }
  0xa8   : > { %4508 = vmatpush3.bf16.msra.mxu0 %v5484_v38  ;;  %v3304_v38 = vshll.u32 %v5538_v49, 16  ;;  %4391 = vmatprep.mubr.msk.bf16.mxu1 %vm560_vm1, %v3975_v63  ;;  %v3302_v20 = vrot.slane %v3301_v35, 4  ;;  %v3329_v56 = vor.u32 %v3328_v8, %v3325_v14  ;;  %v1685_v57 = vshll.u32 %v5569_v55, 16  ;;  %v4165_v14 = vld [vmem:[%s4887_s19 + $0x20] sm:$0xe] }
  0xa9   : > { %4509 = vmatprep.subr.bf16.mxu0 %v4757_v44  ;;  %v3315_v5 = vor.u32 %v3314_v42, %v3311_v61  ;;  %v1690_v51 = vshrl.u32 %v3971_v46, 16  ;;  %v1693_v0 = vshll.u32 %v3971_v46, 16  ;;  %v1699_v11 = vshll.u32 %v5578_v50, 16  ;;  %v4164_v61 = vld [vmem:[%s4887_s19 + $0x18] sm:$0xe] }
  0xaa   : > { %v3306_v36 = vrot.slane %v3304_v38, 5  ;;  %v3330_v2 = vrot.slane %v3329_v56, 4  ;;  %v1681_v38 = vrot.slane %v1679_v29, 5  ;;  %v1704_v45 = vshrl.u32 %v3973_v27, 16 }
  0xab   : > { %v3316_v37 = vrot.slane %v3315_v5, 4  ;;  %v1692_v25 = vrot.slane %v1690_v51, 4  ;;  %v1695_v10 = vrot.slane %v1693_v0, 5  ;;  %v1701_v30 = vrot.slane %v1699_v11, 5  ;;  %v3988_v0 = vld [vmem:[%s4882_s16 + $0x28] sm:$0xe] }
  0xac   : > { %4510 = vmatpush3.bf16.msra.mxu0 %v4757_v44  ;;  %4392 = vmatmul.mubr.msk.bf16.vlgmr.msra.gmra.mrb[0].mxu1 %vm560_vm1, %v3976_v53  ;;  %v1665_v44 = vshll.u32 %v3967_v21, 16  ;;  %v3307_v62 = vsel %vm4939_vm4, %v3302_v20, %v3306_v36  ;;  %v1687_v21 = vrot.slane %v1685_v57, 5  ;;  %v4163_v36 = vld [vmem:[%s4887_s19 + $0x10] sm:$0xe]  ;;  %v3335_v17 = vsel %vm4939_vm4, %v3330_v2, %v3334_v32 }
  0xad   : > { %4400 = vmatpush3.bf16.msra.mxu1 %v5506_v19  ;;  %v4155_v13 = vcombine.low %v3293_v40, %v3307_v62  ;;  %v3321_v63 = vsel %vm4939_vm4, %v3316_v37, %v3320_v41  ;;  %v1678_v19 = vrot.slane %v1676_v34, 4  ;;  %v1706_v35 = vrot.slane %v1704_v45, 4  ;;  %v4166_v34 = vld [vmem:[%s4887_s19 + $0x28] sm:$0xe]  ;;  %v3985_v32 = vld [vmem:[%s4882_s16 + $0x10] sm:$0xe] }
  0xae   : > { %v1667_v39 = vrot.slane %v1665_v44, 5  ;;  %4401 = vmatprep.subr.bf16.mxu1 %v4756_v54  ;;  %v4156_v42 = vcombine.low %v3321_v63, %v3335_v17  ;;  %v1696_v40 = vor.u32 %v1695_v10, %v1692_v25  ;;  %v1707_v41 = vshll.u32 %v3973_v27, 16  ;;  %v4167_v11 = vld [vmem:[%s4887_s19 + $0x30] sm:$0xe]  ;;  %v4168_v25 = vld [vmem:[%s4887_s19 + $0x38] sm:$0xe] }
  0xaf   : > { %4503 = vmatprep.mubr.msk.bf16.mxu0 %vm560_vm1, %v4155_v13  ;;  %v1682_v28 = vor.u32 %v1681_v38, %v1678_v19  ;;  %v1713_v20 = vshll.u32 %v5586_v60, 16  ;;  %v4171_v5 = vrot.slane %v4163_v36, 9  ;;  %v3475_v18 = vrot.slane %v5459_v6, 5  ;;  %v3986_v6 = vld [vmem:[%s4882_s16 + $0x18] sm:$0xe] }
  0xb0   : > { %v1668_v23 = vor.u32 %v1667_v39, %v1664_v3  ;;  %4504 = vmatmul.mubr.msk.bf16.gmra.mrb[4].mxu0 %vm560_vm1, %v4156_v42  ;;  %v1697_v43 = vrot.slane %v1696_v40, 4  ;;  %v1709_v7 = vrot.slane %v1707_v41, 5  ;;  %v4172_v44 = vrot.slane %v4164_v61, 9  ;;  %v4169_v10 = vld [vmem:[%s4887_s19 + $0x40] sm:$0xe] }
  0xb1   : > { %4402 = vmatpush3.bf16.msra.mxu1 %v4756_v54  ;;  %v1683_v54 = vrot.slane %v1682_v28, 4  ;;  %v3479_v26 = vrot.slane %v5463_v15, 5  ;;  %v1715_v62 = vrot.slane %v1713_v20, 5  ;;  %v3476_v37 = vsel %vm5109_vm7, %v4171_v5, %v3475_v18  ;;  %v3989_v42 = vld [vmem:[%s4882_s16 + $0x30] sm:$0xe] }
  0xb2   : > { %v1669_v1 = vrot.slane %v1668_v23, 4  ;;  %v4173_v8 = vrot.slane %v4165_v14, 9  ;;  %v1702_v3 = vsel %vm4939_vm4, %v1697_v43, %v1701_v30  ;;  %v1710_v39 = vor.u32 %v1709_v7, %v1706_v35  ;;  %v4170_v30 = vld [vmem:[%s4887_s19 + $0x48] sm:$0xe]  ;;  %v3990_v14 = vld [vmem:[%s4882_s16 + $0x38] sm:$0xe] }
  0xb3   : > { %v1688_v46 = vsel %vm4939_vm4, %v1683_v54, %v1687_v21  ;;  %v3480_v15 = vsel %vm5109_vm7, %v4172_v44, %v3479_v26  ;;  %v3483_v63 = vrot.slane %v5472_v12, 5  ;;  %v4174_v56 = vrot.slane %v4166_v34, 9  ;;  %v3991_v18 = vld [vmem:[%s4882_s16 + $0x40] sm:$0xe]  ;;  %v3992_v26 = vld [vmem:[%s4882_s16 + $0x48] sm:$0xe] }
  0xb4   : > { %v1674_v53 = vsel %vm4939_vm4, %v1669_v1, %v1673_v52  ;;  %v3987_v52 = vld [vmem:[%s4882_s16 + $0x20] sm:$0xe]  ;;  %v4179_v27 = vcombine.low %v3476_v37, %v3480_v15  ;;  %v3487_v19 = vrot.slane %v5478_v33, 5  ;;  %v1711_v29 = vrot.slane %v1710_v39, 4 }
  0xb5   : > { %v3977_v13 = vcombine.low %v1674_v53, %v1688_v46  ;;  %v3993_v23 = vrot.slane %v3985_v32, 9  ;;  %v1856_v57 = vrot.slane %v5490_v24, 5  ;;  %v3994_v51 = vrot.slane %v3986_v6, 9 }
  0xb6   : > { %4511 = vmatprep.mubr.msk.bf16.mxu0 %vm560_vm1, %v4179_v27  ;;  %v3484_v2 = vsel %vm5109_vm7, %v4173_v8, %v3483_v63  ;;  %v3488_v12 = vsel %vm5109_vm7, %v4174_v56, %v3487_v19  ;;  %v1860_v33 = vrot.slane %v5494_v48, 5  ;;  %v3995_v38 = vrot.slane %v3987_v52, 9 }
  0xb7   : > { %4395 = vmatprep.mubr.msk.bf16.mxu1 %vm560_vm1, %v3977_v13  ;;  %v1716_v45 = vsel %vm4939_vm4, %v1711_v29, %v1715_v62  ;;  %v4180_v24 = vcombine.low %v3484_v2, %v3488_v12  ;;  %v1857_v1 = vsel %vm5109_vm7, %v3993_v23, %v1856_v57  ;;  %v1864_v21 = vrot.slane %v5512_v16, 5  ;;  %v3620_v29 = vld [vmem:[#allocation2 + $0x10] sm:$0xff] }
  0xb8   : > { %v3978_v36 = vcombine.low %v1702_v3, %v1716_v45  ;;  %v1861_v17 = vsel %vm5109_vm7, %v3994_v51, %v1860_v33  ;;  %v3996_v48 = vrot.slane %v3988_v0, 9  ;;  %v1868_v28 = vrot.slane %v5520_v9, 5  ;;  %v3618_v0 = vld [vmem:[#allocation2] sm:$0xff] }
  0xb9   : > { %4512 = vmatmul.mubr.msk.bf16.vlgmr.msra.gmra.mrb[0].mxu0 %vm560_vm1, %v4180_v24  ;;  %v4001_v31 = vcombine.low %v1857_v1, %v1861_v17  ;;  %v1865_v35 = vsel %vm5109_vm7, %v3995_v38, %v1864_v21  ;;  %v4175_v61 = vrot.slane %v4167_v11, 9  ;;  %v3491_v16 = vrot.slane %v5528_v59, 5  ;;  %v3621_v38 = vld [vmem:[#allocation2 + $0x18] sm:$0xff]  ;;  %v3619_v1 = vld [vmem:[#allocation2 + $0x8] sm:$0xff] }
  0xba   : > { %4396 = vmatmul.mubr.msk.bf16.gmra.mrb[4].mxu1 %vm560_vm1, %v3978_v36  ;;  %v1869_v53 = vsel %vm5109_vm7, %v3996_v48, %v1868_v28  ;;  %v4176_v40 = vrot.slane %v4168_v25, 9  ;;  %v3495_v9 = vrot.slane %v5538_v49, 5  ;;  %v4177_v41 = vrot.slane %v4169_v10, 9  ;;  %v3624_v48 = vld [vmem:[#allocation2 + $0x30] sm:$0xff] }
  0xbb   : > { %4403 = vmatprep.mubr.msk.bf16.mxu1 %vm560_vm1, %v4001_v31  ;;  %v4002_v54 = vcombine.low %v1865_v35, %v1869_v53  ;;  %v3492_v20 = vsel %vm5109_vm7, %v4175_v61, %v3491_v16  ;;  %v3499_v59 = vrot.slane %v5546_v47, 5  ;;  %v4178_v5 = vrot.slane %v4170_v30, 9  ;;  %v3622_v31 = vld [vmem:[#allocation2 + $0x20] sm:$0xff]  ;;  %v3625_v16 = vld [vmem:[#allocation2 + $0x38] sm:$0xff] }
  0xbc   : > { %v3496_v43 = vsel %vm5109_vm7, %v4176_v40, %v3495_v9  ;;  %v3503_v7 = vrot.slane %v5553_v4, 5  ;;  %v3997_v44 = vrot.slane %v3989_v42, 9  ;;  %v1872_v49 = vrot.slane %v5558_v22, 5  ;;  %v3623_v9 = vld [vmem:[#allocation2 + $0x28] sm:$0xff] }
  0xbd   : > { %v4181_v34 = vcombine.low %v3492_v20, %v3496_v43  ;;  %v3500_v46 = vsel %vm5109_vm7, %v4177_v41, %v3499_v59  ;;  %v3998_v62 = vrot.slane %v3990_v14, 9  ;;  %v1876_v37 = vrot.slane %v5569_v55, 5 }
  0xbe   : > { %v3504_v47 = vsel %vm5109_vm7, %v4178_v5, %v3503_v7  ;;  %v1873_v8 = vsel %vm5109_vm7, %v3997_v44, %v1872_v49  ;;  %v3999_v32 = vrot.slane %v3991_v18, 9  ;;  %v1880_v4 = vrot.slane %v5578_v50, 5  ;;  %v4190_v5 = vld [vmem:[%s5725_s4] ss:$0 sm:$0xff] (!%p4189_p9) }
  0xbf   : > { %4515 = vmatprep.mubr.msk.bf16.mxu0 %vm560_vm1, %v4181_v34  ;;  %v4182_v22 = vcombine.low %v3500_v46, %v3504_v47  ;;  %v1877_v6 = vsel %vm5109_vm7, %v3998_v62, %v1876_v37  ;;  %v4000_v13 = vrot.slane %v3992_v26, 9  ;;  %v1884_v3 = vrot.slane %v5586_v60, 5  ;;  %v4191_v18 = vld [vmem:[%s5726_s5] ss:$0 sm:$0xff] (!%p4189_p9) }
  0xc0   : > { %v4003_v39 = vcombine.low %v1873_v8, %v1877_v6  ;;  %v1881_v55 = vsel %vm5109_vm7, %v3999_v32, %v1880_v4 }
  0xc1   : > { %4516 = vmatmul.mubr.msk.bf16.gmra.mrb[4].mxu0 %vm560_vm1, %v4182_v22  ;;  %v1885_v50 = vsel %vm5109_vm7, %v4000_v13, %v1884_v3 }
  0xc2   : > { %4404 = vmatmul.mubr.msk.bf16.vlgmr.msra.gmra.mrb[0].mxu1 %vm560_vm1, %v4002_v54  ;;  %v4004_v15 = vcombine.low %v1881_v55, %v1885_v50 }
  0xc3   : > { %4407 = vmatprep.mubr.msk.bf16.mxu1 %vm560_vm1, %v4003_v39 }
  0xca   : > { %4408 = vmatmul.mubr.msk.bf16.gmra.mrb[4].mxu1 %vm560_vm1, %v4004_v15 }
 0x18c   : > { %v4513_v52 = vpop.f32.mrb[0].mxu0 }
 0x18d   : > { %v3579_v27 = vpop.f32.mrb[1].mxu0 }
 0x18e   : > { %v4514_v63 = vpop.f32.mrb[2].mxu0 }
 0x18f   : > { %v3582_v60 = vpop.f32.mrb[3].mxu0 }
 0x194   : > { %v4517_v56 = vpop.f32.mrb[4].mxu0 }
 0x195   : > { %v4405_v19 = vpop.f32.mrb[0].mxu1  ;;  %v3595_v23 = vpop.f32.mrb[5].mxu0 }
 0x196   : > { %v4519_v57 = vadd.f32 %v4513_v52, %v4405_v19  ;;  %v1960_v51 = vpop.f32.mrb[1].mxu1  ;;  %v4518_v2 = vpop.f32.mrb[6].mxu0 }
 0x197   : > { %v4520_v12 = vadd.f32 %v3579_v27, %v1960_v51  ;;  %v4406_v33 = vpop.f32.mrb[2].mxu1  ;;  %v3598_v58 = vpop.f32.mrb[7].mxu0 }
 0x198   : > { %v3628_v11 = vadd.f32 %v4519_v57, %v3620_v29  ;;  %v4521_v45 = vadd.f32 %v4514_v63, %v4406_v33  ;;  %v1963_v24 = vpop.f32.mrb[3].mxu1 }
 0x199   : > { %v3626_v21 = vadd.f32 %v4520_v12, %v3618_v0  ;;  %v4522_v25 = vadd.f32 %v3582_v60, %v1963_v24 }
 0x19a   : > { %3636 = vst.msk [vmem:[#allocation2 + $0x10] sm:$0xff] %vm560_vm1, %v3628_v11  ;;  %v3629_v10 = vadd.f32 %v4521_v45, %v3621_v38 }
 0x19b   : > { %3634 = vst.msk [vmem:[#allocation2] sm:$0xff] %vm560_vm1, %v3626_v21  ;;  %v3627_v36 = vadd.f32 %v4522_v25, %v3619_v1 }
 0x19c   : > { %3637 = vst.msk [vmem:[#allocation2 + $0x18] sm:$0xff] %vm560_vm1, %v3629_v10 }
 0x19d   : > { %3635 = vst.msk [vmem:[#allocation2 + $0x8] sm:$0xff] %vm560_vm1, %v3627_v36  ;;  %v4409_v17 = vpop.f32.mrb[4].mxu1 }
 0x19e   : > { %v4523_v28 = vadd.f32 %v4517_v56, %v4409_v17  ;;  %v1976_v30 = vpop.f32.mrb[5].mxu1 }
 0x19f   : > { %v4524_v35 = vadd.f32 %v3595_v23, %v1976_v30  ;;  %v4410_v61 = vpop.f32.mrb[6].mxu1  ;;  %3645 = sbr.rel (%p4189_p9) target bundleno = 438 (0x1b6), region = 52 }
 0x1a0   : > { %v3632_v42 = vadd.f32 %v4523_v28, %v3624_v48  ;;  %v4525_v53 = vadd.f32 %v4518_v2, %v4410_v61  ;;  %v1979_v40 = vpop.f32.mrb[7].mxu1 }
 0x1a1   : > { %v3630_v41 = vadd.f32 %v4524_v35, %v3622_v31  ;;  %v4526_v14 = vadd.f32 %v3598_v58, %v1979_v40  ;;  %v3648_v44 = vld [vmem:[#allocation2 + $0x10] sm:$0xff] (!%p4189_p9) }
 0x1a2   : > { %3640 = vst.msk [vmem:[#allocation2 + $0x30] sm:$0xff] %vm560_vm1, %v3632_v42  ;;  %v3633_v54 = vadd.f32 %v4525_v53, %v3625_v16  ;;  %v3646_v59 = vld [vmem:[#allocation2] sm:$0xff] (!%p4189_p9)  ;;  %v3663_v34 = vmul.f32 (!%p4189_p9), %v4190_v5, %v3648_v44 }
 0x1a3   : > { %3638 = vst.msk [vmem:[#allocation2 + $0x20] sm:$0xff] %vm560_vm1, %v3630_v41  ;;  %v3631_v20 = vadd.f32 %v4526_v14, %v3623_v9  ;;  %v3661_v43 = vmul.f32 (!%p4189_p9), %v4190_v5, %v3646_v59  ;;  %v3649_v49 = vld [vmem:[#allocation2 + $0x18] sm:$0xff] (!%p4189_p9) }
 0x1a4   : > { %3641 = vst.msk [vmem:[#allocation2 + $0x38] sm:$0xff] %vm560_vm1, %v3633_v54  ;;  %v3647_v7 = vld [vmem:[#allocation2 + $0x8] sm:$0xff] (!%p4189_p9)  ;;  %v3664_v46 = vmul.f32 (!%p4189_p9), %v4190_v5, %v3649_v49  ;;  %v3678_v3 = vadd.f32 (!%p4189_p9), %v4191_v18, %v3663_v34 }
 0x1a5   : > { %3639 = vst.msk [vmem:[#allocation2 + $0x28] sm:$0xff] %vm560_vm1, %v3631_v20  ;;  %v3662_v26 = vmul.f32 (!%p4189_p9), %v4190_v5, %v3647_v7  ;;  %v3676_v8 = vadd.f32 (!%p4189_p9), %v4191_v18, %v3661_v43 }
 0x1a6   : > { %v3679_v39 = vadd.f32 %v4191_v18, %v3664_v46  ;;  %v3686_v60 = vmax.f32 %v3678_v3, 0.0 }
 0x1a7   : > { %v3677_v13 = vadd.f32 %v4191_v18, %v3662_v26  ;;  %v3684_v50 = vmax.f32 %v3676_v8, 0.0 }
 0x1a8   : > { %v3687_v56 = vmax.f32 %v3679_v39, 0.0  ;;  %v3694_v2 = vpack.c.bf16 %v3686_v60, %v3686_v60 }
 0x1a9   : > { %v3652_v47 = vld [vmem:[#allocation2 + $0x30] sm:$0xff]  ;;  %v3685_v63 = vmax.f32 %v3677_v13, 0.0  ;;  %v3692_v29 = vpack.c.bf16 %v3684_v50, %v3684_v50 }
 0x1aa   : > { %v3650_v62 = vld [vmem:[#allocation2 + $0x20] sm:$0xff]  ;;  %v3667_v22 = vmul.f32 %v4190_v5, %v3652_v47  ;;  %v3695_v12 = vpack.c.bf16 %v3687_v56, %v3687_v56  ;;  %3703 = vst.msk [vmem:[%s4892_s8 + $0x8] sm:$0xf] %vm3700_vm8, %v3694_v2 }
 0x1ab   : > { %v3665_v32 = vmul.f32 %v4190_v5, %v3650_v62  ;;  %v3653_v6 = vld [vmem:[#allocation2 + $0x38] sm:$0xff]  ;;  %v3693_v0 = vpack.c.bf16 %v3685_v63, %v3685_v63  ;;  %3701 = vst.msk [vmem:[%s4892_s8] sm:$0xf] %vm3700_vm8, %v3692_v29 }
 0x1ac   : > { %v3651_v37 = vld [vmem:[#allocation2 + $0x28] sm:$0xff]  ;;  %v3668_v55 = vmul.f32 %v4190_v5, %v3653_v6  ;;  %v3682_v27 = vadd.f32 %v4191_v18, %v3667_v22  ;;  %3704 = vst.msk [vmem:[%s4892_s8 + $0xc] sm:$0xf] %vm3700_vm8, %v3695_v12 }
 0x1ad   : > { %v3666_v4 = vmul.f32 %v4190_v5, %v3651_v37  ;;  %v3680_v15 = vadd.f32 %v4191_v18, %v3665_v32  ;;  %3702 = vst.msk [vmem:[%s4892_s8 + $0x4] sm:$0xf] %vm3700_vm8, %v3693_v0 }
 0x1ae   : > { %v3683_v19 = vadd.f32 %v4191_v18, %v3668_v55  ;;  %v3690_v51 = vmax.f32 %v3682_v27, 0.0 }
 0x1af   : > { %v3681_v52 = vadd.f32 %v4191_v18, %v3666_v4  ;;  %v3688_v23 = vmax.f32 %v3680_v15, 0.0 }
 0x1b0   : > { %v3691_v33 = vmax.f32 %v3683_v19, 0.0  ;;  %v3698_v11 = vpack.c.bf16 %v3690_v51, %v3690_v51 }
 0x1b1   : > { %v3689_v57 = vmax.f32 %v3681_v52, 0.0  ;;  %v3696_v38 = vpack.c.bf16 %v3688_v23, %v3688_v23 }
 0x1b2   : > { %v3699_v45 = vpack.c.bf16 %v3691_v33, %v3691_v33  ;;  %3707 = vst.msk [vmem:[%s4892_s8 + $0x18] sm:$0xf] %vm3700_vm8, %v3698_v11 }
 0x1b3   : > { %v3697_v58 = vpack.c.bf16 %v3689_v57, %v3689_v57  ;;  %3705 = vst.msk [vmem:[%s4892_s8 + $0x10] sm:$0xf] %vm3700_vm8, %v3696_v38 }
 0x1b4   : > { %3708 = vst.msk [vmem:[%s4892_s8 + $0x1c] sm:$0xf] %vm3700_vm8, %v3699_v45 }
 0x1b5   : > { %3706 = vst.msk [vmem:[%s4892_s8 + $0x14] sm:$0xf] %vm3700_vm8, %v3697_v58 }
 0x1b6 PF: > { %s16_s25 = sadd.s32 1, %s4796_s25   ;;  %s5732_s21 = smov %s4788_s23 }
 0x1b7   : > { %p13_p10 = scmp.ge.s32.totalorder %s16_s25, 26   ;;  %s5733_s22 = smov %s4792_s24 }
 0x1b8   : > { %s5734_s23 = smov %s5737_s26  ;;  %s5735_s24 = smov %s5741_s27 }
 0x1b9   :  { %15 = sbr.rel (!%p13_p10) target bundleno = 3 (0x3), region = 95 }

</bundles_post_ra>
